<compile_context>
chip_gen: v7x
topology: tpu7x:2x2x1
jax: 0.10.0
libtpu: 0.0.40
codegen_flags: <defaults>
</compile_context>

<pallas_src>
import functools

import jax
import jax.numpy as jnp
import numpy as np
from jax import lax
from jax.experimental import pallas as pl
from jax.experimental.pallas import tpu as pltpu


def _pick_block(b):
    for c in (8, 4, 2, 1):
        if b % c == 0:
            return c


# ---------------- fused conv1 + relu + pool + conv2 + relu + pool ----------------
def _convs_kernel(x_ref, w1_ref, b1_ref, w2_ref, b2_ref, o_ref,
                  g_ref, acc1_ref, acc2_ref, *, bblk):
    """One batch block per grid step.

    x_ref : (bblk, 34, 9, 32) bf16   padded 32x32x8 input, 4 cols x 8 ch folded in lanes
    w1_ref: (3, 48, 64)       bf16   conv1 per-kh weights; K=(6 cols x 8 ci), N=(4 cols x 16 co)
    b1_ref: (1, 32)           f32    conv1 bias, tiled twice (both pooled column pairs)
    w2_ref: (3, 64, 64)       bf16   conv2 per-kh weights; K=(4 cols x 16 ci), N=(2 cols x 32 co)
    b2_ref: (1, 32)           f32    conv2 bias
    o_ref : (bblk, 8, 8, 32)  bf16   pooled conv2 activation (real channels only)
    g_ref : (bblk, 18, 24, 32) bf16  halo-padded conv1 activation, column pairs in lanes
    acc*  : f32 MXU accumulators
    """
    # ----- conv1: 3 dots (one per kh), M = bblk*32*8, K = 48, N = 64 -----
    for kh in range(3):
        lhs = jnp.concatenate(
            [x_ref[:, kh:kh + 32, 0:8, :],          # padded cols 4q .. 4q+3
             x_ref[:, kh:kh + 32, 1:9, 0:16]],      # padded cols 4q+4, 4q+5
            axis=-1).reshape(bblk * 256, 48)
        contrib = jnp.dot(lhs, w1_ref[kh], preferred_element_type=jnp.float32)
        if kh == 0:
            acc1_ref[...] = contrib
        else:
            acc1_ref[...] += contrib

    y1 = acc1_ref[...]                               # (bblk*256, 64) rows = (b, h, q)
    pw = jnp.maximum(y1[:, :32], y1[:, 32:])         # 2x1 pool over width (lane-aligned max)
    pw = pw.reshape(bblk * 16, 2, 8, 32)             # free reshape: split row pairs
    a1 = jnp.maximum(pw[:, 0], pw[:, 1])             # 1x2 pool over height
    a1 = jnp.maximum(a1 + b1_ref[...], 0.0).astype(jnp.bfloat16)   # bias + relu (post-pool)

    # ----- conv1 activation stays in VMEM: halo-padded, column-pair grouped -----
    g_ref[...] = jnp.zeros_like(g_ref)               # zero borders every step (megacore safe)
    g_ref[:, 1:17, 8:16, :] = a1.reshape(bblk, 16, 8, 32)

    # ----- conv2: 3 dots, M = bblk*16*8, K = 64, N = 64 -----
    for kh in range(3):
        lhs = jnp.concatenate(
            [g_ref[:, kh:kh + 16, 7:15, 16:32],      # a1 col 2*w2 - 1
             g_ref[:, kh:kh + 16, 8:16, :],          # a1 cols 2*w2, 2*w2 + 1
             g_ref[:, kh:kh + 16, 9:17, 0:16]],      # a1 col 2*w2 + 2
            axis=-1).reshape(bblk * 128, 64)
        contrib = jnp.dot(lhs, w2_ref[kh], preferred_element_type=jnp.float32)
        if kh == 0:
            acc2_ref[...] = contrib
        else:
            acc2_ref[...] += contrib

    y2 = acc2_ref[...]                               # (bblk*128, 64) rows = (b, h, w2)
    qw = jnp.maximum(y2[:, :32], y2[:, 32:])         # pool over width
    qw = qw.reshape(bblk * 8, 2, 8, 32)
    a2 = jnp.maximum(qw[:, 0], qw[:, 1])             # pool over height
    a2 = jnp.maximum(a2 + b2_ref[...], 0.0)
    o_ref[...] = a2.reshape(bblk, 8, 8, 32).astype(jnp.bfloat16)


def conv_layers(xfold, w1, b1, w2, b2):
    """xfold: (B, 34, 9, 32) bf16.  Returns (B, 8, 8, 32) bf16 pooled conv2 activation."""
    B = xfold.shape[0]
    bblk = _pick_block(B)
    kernel = functools.partial(_convs_kernel, bblk=bblk)
    return pl.pallas_call(
        kernel,
        grid=(B // bblk,),
        out_shape=jax.ShapeDtypeStruct((B, 8, 8, 32), jnp.bfloat16),
        in_specs=[
            pl.BlockSpec((bblk, 34, 9, 32), lambda i: (i, 0, 0, 0)),
            pl.BlockSpec((3, 48, 64), lambda i: (0, 0, 0)),
            pl.BlockSpec((1, 32), lambda i: (0, 0)),
            pl.BlockSpec((3, 64, 64), lambda i: (0, 0, 0)),
            pl.BlockSpec((1, 32), lambda i: (0, 0)),
        ],
        out_specs=pl.BlockSpec((bblk, 8, 8, 32), lambda i: (i, 0, 0, 0)),
        scratch_shapes=[
            pltpu.VMEM((bblk, 18, 24, 32), jnp.bfloat16),   # padded conv1 activation
            pltpu.VMEM((bblk * 256, 64), jnp.float32),       # conv1 accumulator
            pltpu.VMEM((bblk * 128, 64), jnp.float32),       # conv2 accumulator
        ],
        compiler_params=pltpu.CompilerParams(dimension_semantics=("parallel",)),
    )(xfold, w1, b1, w2, b2)


# ------------------------- fused fc1(+ReLU) + fc2 kernel -------------------------
def _fc_kernel(x_ref, w1_ref, b1_ref, w2_ref, b2_ref, o_ref):
    h = jnp.dot(x_ref[...], w1_ref[...], preferred_element_type=jnp.float32)
    h = jnp.maximum(h + b1_ref[...], 0.0).astype(jnp.bfloat16)
    o_ref[...] = jnp.dot(h, w2_ref[...], preferred_element_type=jnp.float32) + b2_ref[...]


def fc1_fc2(x, w1, b1, w2, b2):
    B, K = x.shape
    tm = B if B <= 256 else 256
    bp = pl.cdiv(B, tm) * tm
    if bp != B:
        x = jnp.pad(x, ((0, bp - B), (0, 0)))
    out = pl.pallas_call(
        _fc_kernel,
        grid=(bp // tm,),
        out_shape=jax.ShapeDtypeStruct((bp, 128), jnp.float32),
        in_specs=[
            pl.BlockSpec((tm, K), lambda i: (i, 0)),
            pl.BlockSpec((K, 128), lambda i: (0, 0)),
            pl.BlockSpec((1, 128), lambda i: (0, 0)),
            pl.BlockSpec((128, 128), lambda i: (0, 0)),
            pl.BlockSpec((1, 128), lambda i: (0, 0)),
        ],
        out_specs=pl.BlockSpec((tm, 128), lambda i: (i, 0)),
        compiler_params=pltpu.CompilerParams(dimension_semantics=("parallel",)),
    )(x, w1, b1, w2, b2)
    return out[:B]


# -------------------------------- parameters --------------------------------
def _conv1_weight(w):
    # torch (co=16, ci=3, kh, kw) -> (3, 48, 64): K = (6 col offsets x 8 ci),
    # N = (4 output cols ordered [0,2,1,3] x 16 co) so the 2x pool is a 32-lane max.
    wt = jnp.transpose(w, (2, 3, 1, 0))                            # (kh, kw, ci, co)
    wt = jnp.pad(wt, ((0, 0), (0, 0), (0, 5), (0, 0)))             # ci 3 -> 8
    parts = [jnp.pad(wt, ((0, 0), (r, 3 - r), (0, 0), (0, 0))) for r in (0, 2, 1, 3)]
    t = jnp.stack(parts, axis=3)                                   # (3, 6, 8, 4, 16)
    return t.reshape(3, 48, 64).astype(jnp.bfloat16)


def _conv2_weight(w):
    # torch (co=32, ci=16, kh, kw) -> (3, 64, 64): K = (4 col offsets x 16 ci),
    # N = (2 column phases x 32 co).
    wt = jnp.transpose(w, (2, 3, 1, 0))                            # (kh, kw, ci, co)
    parts = [jnp.pad(wt, ((0, 0), (dw, 1 - dw), (0, 0), (0, 0))) for dw in (0, 1)]
    t = jnp.stack(parts, axis=3)                                   # (3, 4, 16, 2, 32)
    return t.reshape(3, 64, 64).astype(jnp.bfloat16)


def prepare_params(tp):
    # fc1: torch rows index the NCHW flatten (c*64 + h*8 + w); permute rows once to
    # the kernel's (h*8 + w)*32 + c layout so the flatten is a free HBM reshape.
    wf1 = tp["fc1_w"].reshape(128, 32, 8, 8).transpose(2, 3, 1, 0).reshape(2048, 128)
    wf2 = jnp.pad(tp["fc2_w"].T, ((0, 0), (0, 128 - 43)))
    return {
        "w1": _conv1_weight(tp["conv1_w"]),
        "b1": jnp.concatenate([tp["conv1_b"], tp["conv1_b"]]).reshape(1, 32).astype(jnp.float32),
        "w2": _conv2_weight(tp["conv2_w"]),
        "b2": tp["conv2_b"].reshape(1, 32).astype(jnp.float32),
        "wf1": wf1.astype(jnp.bfloat16),
        "bf1": tp["fc1_b"].reshape(1, 128).astype(jnp.float32),
        "wf2": wf2.astype(jnp.bfloat16),
        "bf2": jnp.pad(tp["fc2_b"], (0, 128 - 43)).reshape(1, 128).astype(jnp.float32),
    }


def init_torch_params(key):
    ks = jax.random.split(key, 8)

    def u(k, shape, fan_in):
        bound = 1.0 / jnp.sqrt(float(fan_in))
        return jax.random.uniform(k, shape, jnp.float32, -bound, bound)

    return {
        "conv1_w": u(ks[0], (16, 3, 3, 3), 3 * 9),
        "conv1_b": u(ks[1], (16,), 3 * 9),
        "conv2_w": u(ks[2], (32, 16, 3, 3), 16 * 9),
        "conv2_b": u(ks[3], (32,), 16 * 9),
        "fc1_w": u(ks[4], (128, 8 * 8 * 32), 8 * 8 * 32),
        "fc1_b": u(ks[5], (128,), 8 * 8 * 32),
        "fc2_w": u(ks[6], (43, 128), 128),
        "fc2_b": u(ks[7], (43,), 128),
    }


# ---------------------------------- forward ----------------------------------
def cnn_forward(params, x_nchw):
    B = x_nchw.shape[0]
    x = jnp.transpose(x_nchw, (0, 2, 3, 1)).astype(jnp.bfloat16)   # NHWC (B,32,32,3)
    # 'same' zero pad for 3x3 conv, width padded to 36 and channels 3->8 so four
    # padded columns x 8 channels fold into 32 lanes with a FREE row-major reshape.
    x = jnp.pad(x, ((0, 0), (1, 1), (1, 3), (0, 5)))                # (B,34,36,8)
    x = x.reshape(B, 34, 9, 32)
    feat = conv_layers(x, params["w1"], params["b1"],
                       params["w2"], params["b2"])                  # (B,8,8,32) bf16
    feat = feat.reshape(B, 8 * 8 * 32)                              # (B,2048), free reshape
    logits = fc1_fc2(feat, params["wf1"], params["bf1"],
                     params["wf2"], params["bf2"])                  # (B,128) f32
    return logits[:, :43]                                           # drop padded classes


# ------------------------------ pure-JAX reference ------------------------------
def cnn_reference(tp, x):
    dn = ("NCHW", "OIHW", "NCHW")
    y = lax.conv_general_dilated(x, tp["conv1_w"], (1, 1), "SAME",
                                 dimension_numbers=dn, precision=lax.Precision.HIGHEST)
    y = jax.nn.relu(y + tp["conv1_b"][None, :, None, None])
    y = lax.reduce_window(y, -jnp.inf, lax.max, (1, 1, 2, 2), (1, 1, 2, 2), "VALID")
    y = lax.conv_general_dilated(y, tp["conv2_w"], (1, 1), "SAME",
                                 dimension_numbers=dn, precision=lax.Precision.HIGHEST)
    y = jax.nn.relu(y + tp["conv2_b"][None, :, None, None])
    y = lax.reduce_window(y, -jnp.inf, lax.max, (1, 1, 2, 2), (1, 1, 2, 2), "VALID")
    feat = y.reshape(y.shape[0], -1)
    h = jax.nn.relu(jnp.dot(feat, tp["fc1_w"].T, precision=lax.Precision.HIGHEST)
                    + tp["fc1_b"])
    return jnp.dot(h, tp["fc2_w"].T, precision=lax.Precision.HIGHEST) + tp["fc2_b"]


if __name__ == "__main__":
    key = jax.random.PRNGKey(0)
    kp, kx = jax.random.split(key)
    torch_params = init_torch_params(kp)
    params = prepare_params(torch_params)
    x = jax.random.normal(kx, (2, 3, 32, 32), jnp.float32)

    out = jax.jit(cnn_forward)(params, x)
    jax.block_until_ready(out)
    assert out.shape == (2, 43), out.shape

    ref = cnn_reference(torch_params, x)
    np.testing.assert_allclose(np.asarray(out), np.asarray(ref), rtol=0.1, atol=0.1)
    print("KERNEL_OK")
</pallas_src>

<mosaic_0001>
module attributes {stable_mosaic.version = 11 : i64} {
  func.func @_fc_kernel(%arg0: i32, %arg1: memref<2x2048xbf16, #tpu.memory_space<vmem>>, %arg2: memref<2048x128xbf16, #tpu.memory_space<vmem>>, %arg3: memref<1x128xf32, #tpu.memory_space<vmem>>, %arg4: memref<128x128xbf16, #tpu.memory_space<vmem>>, %arg5: memref<1x128xf32, #tpu.memory_space<vmem>>, %arg6: memref<2x128xf32, #tpu.memory_space<vmem>>) attributes {dimension_semantics = [#tpu.dimension_semantics<parallel>], iteration_bounds = array<i64: 1>, scalar_prefetch = 0 : i64, scratch_operands = 0 : i64, tpu.core_type = #tpu.core_type<tc>, window_params = [{transform_indices = @transform_0, window_bounds = array<i64: 2, 2048>}, {pipeline_mode = #tpu.pipeline_mode<synchronous>, transform_indices = @transform_1, window_bounds = array<i64: 2048, 128>}, {pipeline_mode = #tpu.pipeline_mode<synchronous>, transform_indices = @transform_2, window_bounds = array<i64: 1, 128>}, {pipeline_mode = #tpu.pipeline_mode<synchronous>, transform_indices = @transform_3, window_bounds = array<i64: 128, 128>}, {pipeline_mode = #tpu.pipeline_mode<synchronous>, transform_indices = @transform_4, window_bounds = array<i64: 1, 128>}, {transform_indices = @transform_5, window_bounds = array<i64: 2, 128>}]} {
    %c0 = arith.constant 0 : index
    %c0_0 = arith.constant 0 : index
    %0 = vector.load %arg1[%c0, %c0_0] : memref<2x2048xbf16, #tpu.memory_space<vmem>>, vector<2x2048xbf16>
    %c0_1 = arith.constant 0 : index
    %c0_2 = arith.constant 0 : index
    %1 = vector.load %arg2[%c0_1, %c0_2] : memref<2048x128xbf16, #tpu.memory_space<vmem>>, vector<2048x128xbf16>
    %cst = arith.constant dense<0.000000e+00> : vector<2x128xf32>
    %2 = tpu.matmul %0, %1, %cst {dimension_numbers = #tpu.dot_dimension_numbers<[1], [0], [0], [1], [0, 0, 1, 1], [], []>} : vector<2x2048xbf16>, vector<2048x128xbf16>, vector<2x128xf32> -> vector<2x128xf32>
    %c0_3 = arith.constant 0 : index
    %c0_4 = arith.constant 0 : index
    %3 = vector.load %arg3[%c0_3, %c0_4] : memref<1x128xf32, #tpu.memory_space<vmem>>, vector<1x128xf32>
    %4 = vector.broadcast %3 : vector<1x128xf32> to vector<2x128xf32>
    %5 = arith.addf %2, %4 : vector<2x128xf32>
    %cst_5 = arith.constant 0.000000e+00 : f32
    %6 = vector.broadcast %cst_5 : f32 to vector<2x128xf32>
    %7 = arith.maximumf %5, %6 : vector<2x128xf32>
    %8 = arith.truncf %7 : vector<2x128xf32> to vector<2x128xbf16>
    %c0_6 = arith.constant 0 : index
    %c0_7 = arith.constant 0 : index
    %9 = vector.load %arg4[%c0_6, %c0_7] : memref<128x128xbf16, #tpu.memory_space<vmem>>, vector<128x128xbf16>
    %cst_8 = arith.constant dense<0.000000e+00> : vector<2x128xf32>
    %10 = tpu.matmul %8, %9, %cst_8 {dimension_numbers = #tpu.dot_dimension_numbers<[1], [0], [0], [1], [0, 0, 1, 1], [], []>} : vector<2x128xbf16>, vector<128x128xbf16>, vector<2x128xf32> -> vector<2x128xf32>
    %c0_9 = arith.constant 0 : index
    %c0_10 = arith.constant 0 : index
    %11 = vector.load %arg5[%c0_9, %c0_10] : memref<1x128xf32, #tpu.memory_space<vmem>>, vector<1x128xf32>
    %12 = vector.broadcast %11 : vector<1x128xf32> to vector<2x128xf32>
    %13 = arith.addf %10, %12 : vector<2x128xf32>
    %c0_11 = arith.constant 0 : index
    %c0_12 = arith.constant 0 : index
    %14 = vector.load %arg6[%c0_11, %c0_12] : memref<2x128xf32, #tpu.memory_space<vmem>>, vector<2x128xf32>
    tpu.vector_store %arg6[%c0_11, %c0_12], %13 {strides = array<i32>} : memref<2x128xf32, #tpu.memory_space<vmem>>, vector<2x128xf32>,
    return
  }
  func.func @transform_0(%arg0: i32) -> (i32, i32) {
    %c0_i32 = arith.constant 0 : i32
    %c0_i32_0 = arith.constant 0 : i32
    return %arg0, %c0_i32 : i32, i32
  }
  func.func @transform_1(%arg0: i32) -> (i32, i32) {
    %c0_i32 = arith.constant 0 : i32
    %c0_i32_0 = arith.constant 0 : i32
    %c0_i32_1 = arith.constant 0 : i32
    return %c0_i32, %c0_i32_0 : i32, i32
  }
  func.func @transform_2(%arg0: i32) -> (i32, i32) {
    %c0_i32 = arith.constant 0 : i32
    %c0_i32_0 = arith.constant 0 : i32
    %c0_i32_1 = arith.constant 0 : i32
    return %c0_i32, %c0_i32_0 : i32, i32
  }
  func.func @transform_3(%arg0: i32) -> (i32, i32) {
    %c0_i32 = arith.constant 0 : i32
    %c0_i32_0 = arith.constant 0 : i32
    %c0_i32_1 = arith.constant 0 : i32
    return %c0_i32, %c0_i32_0 : i32, i32
  }
  func.func @transform_4(%arg0: i32) -> (i32, i32) {
    %c0_i32 = arith.constant 0 : i32
    %c0_i32_0 = arith.constant 0 : i32
    %c0_i32_1 = arith.constant 0 : i32
    return %c0_i32, %c0_i32_0 : i32, i32
  }
  func.func @transform_5(%arg0: i32) -> (i32, i32) {
    %c0_i32 = arith.constant 0 : i32
    %c0_i32_0 = arith.constant 0 : i32
    return %arg0, %c0_i32 : i32, i32
  }
}

module attributes {stable_mosaic.version = 11 : i64} {
  func.func @_convs_kernel(%arg0: i32, %arg1: memref<2x34x9x32xbf16, #tpu.memory_space<vmem>>, %arg2: memref<3x48x64xbf16, #tpu.memory_space<vmem>>, %arg3: memref<1x32xf32, #tpu.memory_space<vmem>>, %arg4: memref<3x64x64xbf16, #tpu.memory_space<vmem>>, %arg5: memref<1x32xf32, #tpu.memory_space<vmem>>, %arg6: memref<2x8x8x32xbf16, #tpu.memory_space<vmem>>, %arg7: memref<2x18x24x32xbf16, #tpu.memory_space<vmem>>, %arg8: memref<512x64xf32, #tpu.memory_space<vmem>>, %arg9: memref<256x64xf32, #tpu.memory_space<vmem>>) attributes {dimension_semantics = [#tpu.dimension_semantics<parallel>], iteration_bounds = array<i64: 1>, scalar_prefetch = 0 : i64, scratch_operands = 3 : i64, tpu.core_type = #tpu.core_type<tc>, window_params = [{transform_indices = @transform_0, window_bounds = array<i64: 2, 34, 9, 32>}, {pipeline_mode = #tpu.pipeline_mode<synchronous>, transform_indices = @transform_1, window_bounds = array<i64: 3, 48, 64>}, {pipeline_mode = #tpu.pipeline_mode<synchronous>, transform_indices = @transform_2, window_bounds = array<i64: 1, 32>}, {pipeline_mode = #tpu.pipeline_mode<synchronous>, transform_indices = @transform_3, window_bounds = array<i64: 3, 64, 64>}, {pipeline_mode = #tpu.pipeline_mode<synchronous>, transform_indices = @transform_4, window_bounds = array<i64: 1, 32>}, {transform_indices = @transform_5, window_bounds = array<i64: 2, 8, 8, 32>}]} {
    %c0 = arith.constant 0 : index
    %c0_0 = arith.constant 0 : index
    %c0_1 = arith.constant 0 : index
    %c0_2 = arith.constant 0 : index
    %0 = vector.load %arg1[%c0, %c0_0, %c0_1, %c0_2] : memref<2x34x9x32xbf16, #tpu.memory_space<vmem>>, vector<2x32x8x32xbf16>
    %c0_3 = arith.constant 0 : index
    %c0_4 = arith.constant 0 : index
    %c1 = arith.constant 1 : index
    %c0_5 = arith.constant 0 : index
    %1 = vector.load %arg1[%c0_3, %c0_4, %c1, %c0_5] : memref<2x34x9x32xbf16, #tpu.memory_space<vmem>>, vector<2x32x8x16xbf16>
    %2 = tpu.concatenate %0, %1 in 3 : vector<2x32x8x32xbf16>, vector<2x32x8x16xbf16> -> vector<2x32x8x48xbf16>
    %3 = vector.shape_cast %2 : vector<2x32x8x48xbf16> to vector<512x48xbf16>
    %c0_6 = arith.constant 0 : index
    %c0_7 = arith.constant 0 : index
    %c0_8 = arith.constant 0 : index
    %4 = vector.load %arg2[%c0_6, %c0_7, %c0_8] : memref<3x48x64xbf16, #tpu.memory_space<vmem>>, vector<1x48x64xbf16>
    %5 = vector.shape_cast %4 : vector<1x48x64xbf16> to vector<48x64xbf16>
    %cst = arith.constant dense<0.000000e+00> : vector<512x64xf32>
    %6 = tpu.matmul %3, %5, %cst {dimension_numbers = #tpu.dot_dimension_numbers<[1], [0], [0], [1], [0, 0, 1, 1], [], []>} : vector<512x48xbf16>, vector<48x64xbf16>, vector<512x64xf32> -> vector<512x64xf32>
    %c0_9 = arith.constant 0 : index
    %c0_10 = arith.constant 0 : index
    %7 = vector.load %arg8[%c0_9, %c0_10] : memref<512x64xf32, #tpu.memory_space<vmem>>, vector<512x64xf32>
    tpu.vector_store %arg8[%c0_9, %c0_10], %6 {strides = array<i32>} : memref<512x64xf32, #tpu.memory_space<vmem>>, vector<512x64xf32>,
    %c0_11 = arith.constant 0 : index
    %c1_12 = arith.constant 1 : index
    %c0_13 = arith.constant 0 : index
    %c0_14 = arith.constant 0 : index
    %8 = vector.load %arg1[%c0_11, %c1_12, %c0_13, %c0_14] : memref<2x34x9x32xbf16, #tpu.memory_space<vmem>>, vector<2x32x8x32xbf16>
    %c0_15 = arith.constant 0 : index
    %c1_16 = arith.constant 1 : index
    %c1_17 = arith.constant 1 : index
    %c0_18 = arith.constant 0 : index
    %9 = vector.load %arg1[%c0_15, %c1_16, %c1_17, %c0_18] : memref<2x34x9x32xbf16, #tpu.memory_space<vmem>>, vector<2x32x8x16xbf16>
    %10 = tpu.concatenate %8, %9 in 3 : vector<2x32x8x32xbf16>, vector<2x32x8x16xbf16> -> vector<2x32x8x48xbf16>
    %11 = vector.shape_cast %10 : vector<2x32x8x48xbf16> to vector<512x48xbf16>
    %c1_19 = arith.constant 1 : index
    %c0_20 = arith.constant 0 : index
    %c0_21 = arith.constant 0 : index
    %12 = vector.load %arg2[%c1_19, %c0_20, %c0_21] : memref<3x48x64xbf16, #tpu.memory_space<vmem>>, vector<1x48x64xbf16>
    %13 = vector.shape_cast %12 : vector<1x48x64xbf16> to vector<48x64xbf16>
    %cst_22 = arith.constant dense<0.000000e+00> : vector<512x64xf32>
    %14 = tpu.matmul %11, %13, %cst_22 {dimension_numbers = #tpu.dot_dimension_numbers<[1], [0], [0], [1], [0, 0, 1, 1], [], []>} : vector<512x48xbf16>, vector<48x64xbf16>, vector<512x64xf32> -> vector<512x64xf32>
    %c0_23 = arith.constant 0 : index
    %c0_24 = arith.constant 0 : index
    %15 = vector.load %arg8[%c0_23, %c0_24] : memref<512x64xf32, #tpu.memory_space<vmem>>, vector<512x64xf32>
    %16 = arith.addf %15, %14 : vector<512x64xf32>
    %c0_25 = arith.constant 0 : index
    %c0_26 = arith.constant 0 : index
    %17 = vector.load %arg8[%c0_25, %c0_26] : memref<512x64xf32, #tpu.memory_space<vmem>>, vector<512x64xf32>
    tpu.vector_store %arg8[%c0_25, %c0_26], %16 {strides = array<i32>} : memref<512x64xf32, #tpu.memory_space<vmem>>, vector<512x64xf32>,
    %c0_27 = arith.constant 0 : index
    %c2 = arith.constant 2 : index
    %c0_28 = arith.constant 0 : index
    %c0_29 = arith.constant 0 : index
    %18 = vector.load %arg1[%c0_27, %c2, %c0_28, %c0_29] : memref<2x34x9x32xbf16, #tpu.memory_space<vmem>>, vector<2x32x8x32xbf16>
    %c0_30 = arith.constant 0 : index
    %c2_31 = arith.constant 2 : index
    %c1_32 = arith.constant 1 : index
    %c0_33 = arith.constant 0 : index
    %19 = vector.load %arg1[%c0_30, %c2_31, %c1_32, %c0_33] : memref<2x34x9x32xbf16, #tpu.memory_space<vmem>>, vector<2x32x8x16xbf16>
    %20 = tpu.concatenate %18, %19 in 3 : vector<2x32x8x32xbf16>, vector<2x32x8x16xbf16> -> vector<2x32x8x48xbf16>
    %21 = vector.shape_cast %20 : vector<2x32x8x48xbf16> to vector<512x48xbf16>
    %c2_34 = arith.constant 2 : index
    %c0_35 = arith.constant 0 : index
    %c0_36 = arith.constant 0 : index
    %22 = vector.load %arg2[%c2_34, %c0_35, %c0_36] : memref<3x48x64xbf16, #tpu.memory_space<vmem>>, vector<1x48x64xbf16>
    %23 = vector.shape_cast %22 : vector<1x48x64xbf16> to vector<48x64xbf16>
    %cst_37 = arith.constant dense<0.000000e+00> : vector<512x64xf32>
    %24 = tpu.matmul %21, %23, %cst_37 {dimension_numbers = #tpu.dot_dimension_numbers<[1], [0], [0], [1], [0, 0, 1, 1], [], []>} : vector<512x48xbf16>, vector<48x64xbf16>, vector<512x64xf32> -> vector<512x64xf32>
    %c0_38 = arith.constant 0 : index
    %c0_39 = arith.constant 0 : index
    %25 = vector.load %arg8[%c0_38, %c0_39] : memref<512x64xf32, #tpu.memory_space<vmem>>, vector<512x64xf32>
    %26 = arith.addf %25, %24 : vector<512x64xf32>
    %c0_40 = arith.constant 0 : index
    %c0_41 = arith.constant 0 : index
    %27 = vector.load %arg8[%c0_40, %c0_41] : memref<512x64xf32, #tpu.memory_space<vmem>>, vector<512x64xf32>
    tpu.vector_store %arg8[%c0_40, %c0_41], %26 {strides = array<i32>} : memref<512x64xf32, #tpu.memory_space<vmem>>, vector<512x64xf32>,
    %c0_42 = arith.constant 0 : index
    %c0_43 = arith.constant 0 : index
    %28 = vector.load %arg8[%c0_42, %c0_43] : memref<512x64xf32, #tpu.memory_space<vmem>>, vector<512x64xf32>
    %29 = vector.extract_strided_slice %28 {offsets = [0, 0], sizes = [512, 32], strides = [1, 1]} : vector<512x64xf32> to vector<512x32xf32>
    %30 = vector.extract_strided_slice %28 {offsets = [0, 32], sizes = [512, 32], strides = [1, 1]} : vector<512x64xf32> to vector<512x32xf32>
    %31 = arith.maximumf %29, %30 : vector<512x32xf32>
    %32 = vector.shape_cast %31 : vector<512x32xf32> to vector<32x2x8x32xf32>
    %33 = vector.extract_strided_slice %32 {offsets = [0, 0, 0, 0], sizes = [32, 1, 8, 32], strides = [1, 1, 1, 1]} : vector<32x2x8x32xf32> to vector<32x1x8x32xf32>
    %34 = vector.shape_cast %33 : vector<32x1x8x32xf32> to vector<32x8x32xf32>
    %35 = vector.extract_strided_slice %32 {offsets = [0, 1, 0, 0], sizes = [32, 1, 8, 32], strides = [1, 1, 1, 1]} : vector<32x2x8x32xf32> to vector<32x1x8x32xf32>
    %36 = vector.shape_cast %35 : vector<32x1x8x32xf32> to vector<32x8x32xf32>
    %37 = arith.maximumf %34, %36 : vector<32x8x32xf32>
    %c0_44 = arith.constant 0 : index
    %c0_45 = arith.constant 0 : index
    %38 = vector.load %arg3[%c0_44, %c0_45] : memref<1x32xf32, #tpu.memory_space<vmem>>, vector<1x32xf32>
    %39 = vector.shape_cast %38 : vector<1x32xf32> to vector<1x1x32xf32>
    %40 = vector.broadcast %39 : vector<1x1x32xf32> to vector<32x8x32xf32>
    %41 = arith.addf %37, %40 : vector<32x8x32xf32>
    %cst_46 = arith.constant 0.000000e+00 : f32
    %42 = vector.broadcast %cst_46 : f32 to vector<32x8x32xf32>
    %43 = arith.maximumf %41, %42 : vector<32x8x32xf32>
    %44 = arith.truncf %43 : vector<32x8x32xf32> to vector<32x8x32xbf16>
    %cst_47 = arith.constant 0.000000e+00 : bf16
    %45 = vector.broadcast %cst_47 : bf16 to vector<2x18x24x32xbf16>
    %c0_48 = arith.constant 0 : index
    %c0_49 = arith.constant 0 : index
    %c0_50 = arith.constant 0 : index
    %c0_51 = arith.constant 0 : index
    %46 = vector.load %arg7[%c0_48, %c0_49, %c0_50, %c0_51] : memref<2x18x24x32xbf16, #tpu.memory_space<vmem>>, vector<2x18x24x32xbf16>
    tpu.vector_store %arg7[%c0_48, %c0_49, %c0_50, %c0_51], %45 {strides = array<i32>} : memref<2x18x24x32xbf16, #tpu.memory_space<vmem>>, vector<2x18x24x32xbf16>,
    %47 = vector.shape_cast %44 : vector<32x8x32xbf16> to vector<2x16x8x32xbf16>
    %c0_52 = arith.constant 0 : index
    %c1_53 = arith.constant 1 : index
    %c8 = arith.constant 8 : index
    %c0_54 = arith.constant 0 : index
    %48 = vector.load %arg7[%c0_52, %c1_53, %c8, %c0_54] : memref<2x18x24x32xbf16, #tpu.memory_space<vmem>>, vector<2x16x8x32xbf16>
    tpu.vector_store %arg7[%c0_52, %c1_53, %c8, %c0_54], %47 {strides = array<i32>} : memref<2x18x24x32xbf16, #tpu.memory_space<vmem>>, vector<2x16x8x32xbf16>,
    %c0_55 = arith.constant 0 : index
    %c0_56 = arith.constant 0 : index
    %c7 = arith.constant 7 : index
    %c16 = arith.constant 16 : index
    %49 = vector.load %arg7[%c0_55, %c0_56, %c7, %c16] : memref<2x18x24x32xbf16, #tpu.memory_space<vmem>>, vector<2x16x8x16xbf16>
    %c0_57 = arith.constant 0 : index
    %c0_58 = arith.constant 0 : index
    %c8_59 = arith.constant 8 : index
    %c0_60 = arith.constant 0 : index
    %50 = vector.load %arg7[%c0_57, %c0_58, %c8_59, %c0_60] : memref<2x18x24x32xbf16, #tpu.memory_space<vmem>>, vector<2x16x8x32xbf16>
    %c0_61 = arith.constant 0 : index
    %c0_62 = arith.constant 0 : index
    %c9 = arith.constant 9 : index
    %c0_63 = arith.constant 0 : index
    %51 = vector.load %arg7[%c0_61, %c0_62, %c9, %c0_63] : memref<2x18x24x32xbf16, #tpu.memory_space<vmem>>, vector<2x16x8x16xbf16>
    %52 = tpu.concatenate %49, %50, %51 in 3 : vector<2x16x8x16xbf16>, vector<2x16x8x32xbf16>, vector<2x16x8x16xbf16> -> vector<2x16x8x64xbf16>
    %53 = vector.shape_cast %52 : vector<2x16x8x64xbf16> to vector<256x64xbf16>
    %c0_64 = arith.constant 0 : index
    %c0_65 = arith.constant 0 : index
    %c0_66 = arith.constant 0 : index
    %54 = vector.load %arg4[%c0_64, %c0_65, %c0_66] : memref<3x64x64xbf16, #tpu.memory_space<vmem>>, vector<1x64x64xbf16>
    %55 = vector.shape_cast %54 : vector<1x64x64xbf16> to vector<64x64xbf16>
    %cst_67 = arith.constant dense<0.000000e+00> : vector<256x64xf32>
    %56 = tpu.matmul %53, %55, %cst_67 {dimension_numbers = #tpu.dot_dimension_numbers<[1], [0], [0], [1], [0, 0, 1, 1], [], []>} : vector<256x64xbf16>, vector<64x64xbf16>, vector<256x64xf32> -> vector<256x64xf32>
    %c0_68 = arith.constant 0 : index
    %c0_69 = arith.constant 0 : index
    %57 = vector.load %arg9[%c0_68, %c0_69] : memref<256x64xf32, #tpu.memory_space<vmem>>, vector<256x64xf32>
    tpu.vector_store %arg9[%c0_68, %c0_69], %56 {strides = array<i32>} : memref<256x64xf32, #tpu.memory_space<vmem>>, vector<256x64xf32>,
    %c0_70 = arith.constant 0 : index
    %c1_71 = arith.constant 1 : index
    %c7_72 = arith.constant 7 : index
    %c16_73 = arith.constant 16 : index
    %58 = vector.load %arg7[%c0_70, %c1_71, %c7_72, %c16_73] : memref<2x18x24x32xbf16, #tpu.memory_space<vmem>>, vector<2x16x8x16xbf16>
    %c0_74 = arith.constant 0 : index
    %c1_75 = arith.constant 1 : index
    %c8_76 = arith.constant 8 : index
    %c0_77 = arith.constant 0 : index
    %59 = vector.load %arg7[%c0_74, %c1_75, %c8_76, %c0_77] : memref<2x18x24x32xbf16, #tpu.memory_space<vmem>>, vector<2x16x8x32xbf16>
    %c0_78 = arith.constant 0 : index
    %c1_79 = arith.constant 1 : index
    %c9_80 = arith.constant 9 : index
    %c0_81 = arith.constant 0 : index
    %60 = vector.load %arg7[%c0_78, %c1_79, %c9_80, %c0_81] : memref<2x18x24x32xbf16, #tpu.memory_space<vmem>>, vector<2x16x8x16xbf16>
    %61 = tpu.concatenate %58, %59, %60 in 3 : vector<2x16x8x16xbf16>, vector<2x16x8x32xbf16>, vector<2x16x8x16xbf16> -> vector<2x16x8x64xbf16>
    %62 = vector.shape_cast %61 : vector<2x16x8x64xbf16> to vector<256x64xbf16>
    %c1_82 = arith.constant 1 : index
    %c0_83 = arith.constant 0 : index
    %c0_84 = arith.constant 0 : index
    %63 = vector.load %arg4[%c1_82, %c0_83, %c0_84] : memref<3x64x64xbf16, #tpu.memory_space<vmem>>, vector<1x64x64xbf16>
    %64 = vector.shape_cast %63 : vector<1x64x64xbf16> to vector<64x64xbf16>
    %cst_85 = arith.constant dense<0.000000e+00> : vector<256x64xf32>
    %65 = tpu.matmul %62, %64, %cst_85 {dimension_numbers = #tpu.dot_dimension_numbers<[1], [0], [0], [1], [0, 0, 1, 1], [], []>} : vector<256x64xbf16>, vector<64x64xbf16>, vector<256x64xf32> -> vector<256x64xf32>
    %c0_86 = arith.constant 0 : index
    %c0_87 = arith.constant 0 : index
    %66 = vector.load %arg9[%c0_86, %c0_87] : memref<256x64xf32, #tpu.memory_space<vmem>>, vector<256x64xf32>
    %67 = arith.addf %66, %65 : vector<256x64xf32>
    %c0_88 = arith.constant 0 : index
    %c0_89 = arith.constant 0 : index
    %68 = vector.load %arg9[%c0_88, %c0_89] : memref<256x64xf32, #tpu.memory_space<vmem>>, vector<256x64xf32>
    tpu.vector_store %arg9[%c0_88, %c0_89], %67 {strides = array<i32>} : memref<256x64xf32, #tpu.memory_space<vmem>>, vector<256x64xf32>,
    %c0_90 = arith.constant 0 : index
    %c2_91 = arith.constant 2 : index
    %c7_92 = arith.constant 7 : index
    %c16_93 = arith.constant 16 : index
    %69 = vector.load %arg7[%c0_90, %c2_91, %c7_92, %c16_93] : memref<2x18x24x32xbf16, #tpu.memory_space<vmem>>, vector<2x16x8x16xbf16>
    %c0_94 = arith.constant 0 : index
    %c2_95 = arith.constant 2 : index
    %c8_96 = arith.constant 8 : index
    %c0_97 = arith.constant 0 : index
    %70 = vector.load %arg7[%c0_94, %c2_95, %c8_96, %c0_97] : memref<2x18x24x32xbf16, #tpu.memory_space<vmem>>, vector<2x16x8x32xbf16>
    %c0_98 = arith.constant 0 : index
    %c2_99 = arith.constant 2 : index
    %c9_100 = arith.constant 9 : index
    %c0_101 = arith.constant 0 : index
    %71 = vector.load %arg7[%c0_98, %c2_99, %c9_100, %c0_101] : memref<2x18x24x32xbf16, #tpu.memory_space<vmem>>, vector<2x16x8x16xbf16>
    %72 = tpu.concatenate %69, %70, %71 in 3 : vector<2x16x8x16xbf16>, vector<2x16x8x32xbf16>, vector<2x16x8x16xbf16> -> vector<2x16x8x64xbf16>
    %73 = vector.shape_cast %72 : vector<2x16x8x64xbf16> to vector<256x64xbf16>
    %c2_102 = arith.constant 2 : index
    %c0_103 = arith.constant 0 : index
    %c0_104 = arith.constant 0 : index
    %74 = vector.load %arg4[%c2_102, %c0_103, %c0_104] : memref<3x64x64xbf16, #tpu.memory_space<vmem>>, vector<1x64x64xbf16>
    %75 = vector.shape_cast %74 : vector<1x64x64xbf16> to vector<64x64xbf16>
    %cst_105 = arith.constant dense<0.000000e+00> : vector<256x64xf32>
    %76 = tpu.matmul %73, %75, %cst_105 {dimension_numbers = #tpu.dot_dimension_numbers<[1], [0], [0], [1], [0, 0, 1, 1], [], []>} : vector<256x64xbf16>, vector<64x64xbf16>, vector<256x64xf32> -> vector<256x64xf32>
    %c0_106 = arith.constant 0 : index
    %c0_107 = arith.constant 0 : index
    %77 = vector.load %arg9[%c0_106, %c0_107] : memref<256x64xf32, #tpu.memory_space<vmem>>, vector<256x64xf32>
    %78 = arith.addf %77, %76 : vector<256x64xf32>
    %c0_108 = arith.constant 0 : index
    %c0_109 = arith.constant 0 : index
    %79 = vector.load %arg9[%c0_108, %c0_109] : memref<256x64xf32, #tpu.memory_space<vmem>>, vector<256x64xf32>
    tpu.vector_store %arg9[%c0_108, %c0_109], %78 {strides = array<i32>} : memref<256x64xf32, #tpu.memory_space<vmem>>, vector<256x64xf32>,
    %c0_110 = arith.constant 0 : index
    %c0_111 = arith.constant 0 : index
    %80 = vector.load %arg9[%c0_110, %c0_111] : memref<256x64xf32, #tpu.memory_space<vmem>>, vector<256x64xf32>
    %81 = vector.extract_strided_slice %80 {offsets = [0, 0], sizes = [256, 32], strides = [1, 1]} : vector<256x64xf32> to vector<256x32xf32>
    %82 = vector.extract_strided_slice %80 {offsets = [0, 32], sizes = [256, 32], strides = [1, 1]} : vector<256x64xf32> to vector<256x32xf32>
    %83 = arith.maximumf %81, %82 : vector<256x32xf32>
    %84 = vector.shape_cast %83 : vector<256x32xf32> to vector<16x2x8x32xf32>
    %85 = vector.extract_strided_slice %84 {offsets = [0, 0, 0, 0], sizes = [16, 1, 8, 32], strides = [1, 1, 1, 1]} : vector<16x2x8x32xf32> to vector<16x1x8x32xf32>
    %86 = vector.shape_cast %85 : vector<16x1x8x32xf32> to vector<16x8x32xf32>
    %87 = vector.extract_strided_slice %84 {offsets = [0, 1, 0, 0], sizes = [16, 1, 8, 32], strides = [1, 1, 1, 1]} : vector<16x2x8x32xf32> to vector<16x1x8x32xf32>
    %88 = vector.shape_cast %87 : vector<16x1x8x32xf32> to vector<16x8x32xf32>
    %89 = arith.maximumf %86, %88 : vector<16x8x32xf32>
    %c0_112 = arith.constant 0 : index
    %c0_113 = arith.constant 0 : index
    %90 = vector.load %arg5[%c0_112, %c0_113] : memref<1x32xf32, #tpu.memory_space<vmem>>, vector<1x32xf32>
    %91 = vector.shape_cast %90 : vector<1x32xf32> to vector<1x1x32xf32>
    %92 = vector.broadcast %91 : vector<1x1x32xf32> to vector<16x8x32xf32>
    %93 = arith.addf %89, %92 : vector<16x8x32xf32>
    %cst_114 = arith.constant 0.000000e+00 : f32
    %94 = vector.broadcast %cst_114 : f32 to vector<16x8x32xf32>
    %95 = arith.maximumf %93, %94 : vector<16x8x32xf32>
    %96 = vector.shape_cast %95 : vector<16x8x32xf32> to vector<2x8x8x32xf32>
    %97 = arith.truncf %96 : vector<2x8x8x32xf32> to vector<2x8x8x32xbf16>
    %c0_115 = arith.constant 0 : index
    %c0_116 = arith.constant 0 : index
    %c0_117 = arith.constant 0 : index
    %c0_118 = arith.constant 0 : index
    %98 = vector.load %arg6[%c0_115, %c0_116, %c0_117, %c0_118] : memref<2x8x8x32xbf16, #tpu.memory_space<vmem>>, vector<2x8x8x32xbf16>
    tpu.vector_store %arg6[%c0_115, %c0_116, %c0_117, %c0_118], %97 {strides = array<i32>} : memref<2x8x8x32xbf16, #tpu.memory_space<vmem>>, vector<2x8x8x32xbf16>,
    return
  }
  func.func @transform_0(%arg0: i32) -> (i32, i32, i32, i32) {
    %c0_i32 = arith.constant 0 : i32
    %c0_i32_0 = arith.constant 0 : i32
    %c0_i32_1 = arith.constant 0 : i32
    %c0_i32_2 = arith.constant 0 : i32
    return %arg0, %c0_i32, %c0_i32_0, %c0_i32_1 : i32, i32, i32, i32
  }
  func.func @transform_1(%arg0: i32) -> (i32, i32, i32) {
    %c0_i32 = arith.constant 0 : i32
    %c0_i32_0 = arith.constant 0 : i32
    %c0_i32_1 = arith.constant 0 : i32
    %c0_i32_2 = arith.constant 0 : i32
    return %c0_i32, %c0_i32_0, %c0_i32_1 : i32, i32, i32
  }
  func.func @transform_2(%arg0: i32) -> (i32, i32) {
    %c0_i32 = arith.constant 0 : i32
    %c0_i32_0 = arith.constant 0 : i32
    %c0_i32_1 = arith.constant 0 : i32
    return %c0_i32, %c0_i32_0 : i32, i32
  }
  func.func @transform_3(%arg0: i32) -> (i32, i32, i32) {
    %c0_i32 = arith.constant 0 : i32
    %c0_i32_0 = arith.constant 0 : i32
    %c0_i32_1 = arith.constant 0 : i32
    %c0_i32_2 = arith.constant 0 : i32
    return %c0_i32, %c0_i32_0, %c0_i32_1 : i32, i32, i32
  }
  func.func @transform_4(%arg0: i32) -> (i32, i32) {
    %c0_i32 = arith.constant 0 : i32
    %c0_i32_0 = arith.constant 0 : i32
    %c0_i32_1 = arith.constant 0 : i32
    return %c0_i32, %c0_i32_0 : i32, i32
  }
  func.func @transform_5(%arg0: i32) -> (i32, i32, i32, i32) {
    %c0_i32 = arith.constant 0 : i32
    %c0_i32_0 = arith.constant 0 : i32
    %c0_i32_1 = arith.constant 0 : i32
    %c0_i32_2 = arith.constant 0 : i32
    return %arg0, %c0_i32, %c0_i32_0, %c0_i32_1 : i32, i32, i32, i32
  }
}

</mosaic_0001>

<bundles_post_ra>
// kernel: cnn_forward.3
= control target key start
LH: loop header
LB: loop body
LE: loop exit
PB: predicated region body
PF: predicated region fallthrough
CT: control target
= control target key end

     0   :  { %v293_v28 = vlaneseq  ;;  %v2128_v36 = vmov 1966171168   ;;  %s2618_s0 = inlined_call_operand.vmem [shape: bf16[2,2048], index: 0, kind: input, shape index: {}]   ;;  %s2619_s1 = inlined_call_operand.vmem [shape: bf16[2048,128], index: 1, kind: input, shape index: {}]   ;;  %s2620_s2 = inlined_call_operand.vmem [shape: f32[1,128], index: 2, kind: input, shape index: {}]   ;;  %s2621_s3 = inlined_call_operand.vmem [shape: bf16[128,128], index: 3, kind: input, shape index: {}]   ;;  %s2622_s4 = inlined_call_operand.vmem [shape: f32[1,128], index: 4, kind: input, shape index: {}]   ;;  %s2623_s5 = inlined_call_operand.hbm [shape: f32[2,128], index: 5, kind: output, shape index: {}]  }
   0x1   :  { %v1966_v0 = vld [vmem:[%s2619_s1 + $0x40] sm:$0xff]   ;;  %v1970_v4 = vld [vmem:[%s2619_s1 + $0x48] sm:$0xff]   ;;  %v1974_v8 = vld [vmem:[%s2619_s1 + $0x50] sm:$0xff]   ;;  %v291_v37 = vunpack.c.l.s4 %v2128_v36 }
   0x2   :  { %v1967_v1 = vld [vmem:[%s2619_s1 + $0xc0] sm:$0xff]   ;;  %1757 = vmatprep.subr.bf16.mxu0 %v1966_v0  ;;  %v1971_v5 = vld [vmem:[%s2619_s1 + $0xc8] sm:$0xff]   ;;  %v1975_v9 = vld [vmem:[%s2619_s1 + $0xd0] sm:$0xff]   ;;  %v294_v33 = vshrl.u32 %v293_v28, 7 }
   0x3   :  { %v1968_v2 = vld [vmem:[%s2619_s1] sm:$0xff]   ;;  %1779 = vmatprep.subr.bf16.mxu1 %v1967_v1  ;;  %v1972_v6 = vld [vmem:[%s2619_s1 + $0x8] sm:$0xff]   ;;  %v1976_v10 = vld [vmem:[%s2619_s1 + $0x10] sm:$0xff]   ;;  %v292_v40 = vunpack.c.0.s8 %v291_v37 }
   0x4   :  { %v1969_v3 = vld [vmem:[%s2619_s1 + $0x80] sm:$0xff]   ;;  %1758 = vmatpush3.bf16.msra.mxu0 %v1968_v2  ;;  %v1973_v7 = vld [vmem:[%s2619_s1 + $0x88] sm:$0xff]   ;;  %v1977_v11 = vld [vmem:[%s2619_s1 + $0x90] sm:$0xff]  }
   0x5   :  { %1780 = vmatpush3.bf16.msra.mxu1 %v1969_v3  ;;  %1759 = vmatprep.subr.bf16.mxu0 %v1970_v4  ;;  %v1978_v12 = vld [vmem:[%s2619_s1 + $0x58] sm:$0xff]   ;;  %v1982_v16 = vld [vmem:[%s2619_s1 + $0x60] sm:$0xff]   ;;  %v1986_v20 = vld [vmem:[%s2619_s1 + $0x68] sm:$0xff]   ;;  %v2267_v41 = vsub.s32 %v292_v40, %v294_v33 }
   0x6   :  { %1781 = vmatprep.subr.bf16.mxu1 %v1971_v5  ;;  %v1979_v13 = vld [vmem:[%s2619_s1 + $0xd8] sm:$0xff]   ;;  %v1983_v17 = vld [vmem:[%s2619_s1 + $0xe0] sm:$0xff]   ;;  %v1987_v21 = vld [vmem:[%s2619_s1 + $0xe8] sm:$0xff]  }
   0x7   :  { %v1980_v14 = vld [vmem:[%s2619_s1 + $0x18] sm:$0xff]   ;;  %v1984_v18 = vld [vmem:[%s2619_s1 + $0x20] sm:$0xff]   ;;  %v1988_v22 = vld [vmem:[%s2619_s1 + $0x28] sm:$0xff]  }
   0x8   :  { %1760 = vmatpush3.bf16.msra.mxu0 %v1972_v6  ;;  %v1981_v15 = vld [vmem:[%s2619_s1 + $0x98] sm:$0xff]   ;;  %v1985_v19 = vld [vmem:[%s2619_s1 + $0xa0] sm:$0xff]   ;;  %v1989_v23 = vld [vmem:[%s2619_s1 + $0xa8] sm:$0xff]  }
   0x9   :  { %1782 = vmatpush3.bf16.msra.mxu1 %v1973_v7  ;;  %1761 = vmatprep.subr.bf16.mxu0 %v1974_v8  ;;  %v1990_v24 = vld [vmem:[%s2619_s1 + $0x70] sm:$0xff]   ;;  %v1994_v29 = vld [vmem:[%s2619_s1 + $0x78] sm:$0xff]   ;;  %v22_v34 = vld [vmem:[%s2618_s0] sm:$0xff] }
   0xa   :  { %1783 = vmatprep.subr.bf16.mxu1 %v1975_v9  ;;  %v1991_v25 = vld [vmem:[%s2619_s1 + $0xf0] sm:$0xff]   ;;  %v1995_v30 = vld [vmem:[%s2619_s1 + $0xf8] sm:$0xff]   ;;  %v1999_v35 = vld [vmem:[%s2619_s1 + $0x140] sm:$0xff]   ;;  %v289_v39 = vcombine.high %v22_v34, %v22_v34  ;;  %v296_v42 = vrot.slane %v22_v34, %v2267_v41 }
   0xb   :  { %v1992_v26 = vld [vmem:[%s2619_s1 + $0x30] sm:$0xff]   ;;  %v1996_v31 = vld [vmem:[%s2619_s1 + $0x38] sm:$0xff]   ;;  %v2000_v38 = vld [vmem:[%s2619_s1 + $0x1c0] sm:$0xff]  }
   0xc   :  { %1762 = vmatpush3.bf16.msra.mxu0 %v1976_v10  ;;  %v1993_v27 = vld [vmem:[%s2619_s1 + $0xb0] sm:$0xff]   ;;  %v1997_v32 = vld [vmem:[%s2619_s1 + $0xb8] sm:$0xff]   ;;  %v2271_v43 = vrot.slane %v289_v39, %v2267_v41  ;;  %v304_v44 = vcombine.high %v296_v42, %v296_v42  ;;  %v312_v45 = vrot.slane %v296_v42, %v2267_v41  ;;  %v2001_v47 = vld [vmem:[%s2619_s1 + $0x100] sm:$0xff]  }
   0xd   :  { %1784 = vmatpush3.bf16.msra.mxu1 %v1977_v11  ;;  %1763 = vmatprep.subr.bf16.mxu0 %v1978_v12  ;;  %v2002_v49 = vld [vmem:[%s2619_s1 + $0x180] sm:$0xff]   ;;  %v2003_v52 = vld [vmem:[%s2619_s1 + $0x148] sm:$0xff]   ;;  %v2007_v58 = vld [vmem:[%s2619_s1 + $0x150] sm:$0xff]  }
   0xe   :  { %1785 = vmatprep.subr.bf16.mxu1 %v1979_v13  ;;  %v305_v46 = vcombine.high %v2271_v43, %v2271_v43  ;;  %v326_v48 = vrot.slane %v304_v44, %v2267_v41  ;;  %v334_v51 = vcombine.high %v312_v45, %v312_v45  ;;  %v2004_v54 = vld [vmem:[%s2619_s1 + $0x1c8] sm:$0xff]   ;;  %v2008_v59 = vld [vmem:[%s2619_s1 + $0x1d0] sm:$0xff]   ;;  %v2011_v62 = vld [vmem:[%s2619_s1 + $0x158] sm:$0xff]  }
   0xf   :  { %v2005_v55 = vld [vmem:[%s2619_s1 + $0x108] sm:$0xff]   ;;  %v2009_v60 = vld [vmem:[%s2619_s1 + $0x110] sm:$0xff]   ;;  %v2012_v63 = vld [vmem:[%s2619_s1 + $0x1d8] sm:$0xff]  }
  0x10   :  { %1764 = vmatpush3.bf16.msra.mxu0 %v1980_v14  ;;  %v333_v50 = vrot.slane %v305_v46, %v2267_v41  ;;  %1203 = vmatprep.mubr.bf16.mxu0 %v326_v48  ;;  %v336_v53 = vcombine.high %v326_v48, %v326_v48  ;;  %v2006_v57 = vld [vmem:[%s2619_s1 + $0x188] sm:$0xff]   ;;  %v2010_v61 = vld [vmem:[%s2619_s1 + $0x190] sm:$0xff]   ;;  %v2013_v0 = vld [vmem:[%s2619_s1 + $0x118] sm:$0xff]  }
  0x11   :  { %1786 = vmatpush3.bf16.msra.mxu1 %v1981_v15  ;;  %1765 = vmatprep.subr.bf16.mxu0 %v1982_v16  ;;  %v2014_v1 = vld [vmem:[%s2619_s1 + $0x198] sm:$0xff]   ;;  %v2015_v2 = vld [vmem:[%s2619_s1 + $0x160] sm:$0xff]   ;;  %v2019_v6 = vld [vmem:[%s2619_s1 + $0x168] sm:$0xff]  }
  0x12   :  { %1787 = vmatprep.subr.bf16.mxu1 %v1983_v17  ;;  %v337_v56 = vcombine.high %v333_v50, %v333_v50  ;;  %1243 = vmatprep.mubr.bf16.mxu1 %v336_v53  ;;  %v2016_v3 = vld [vmem:[%s2619_s1 + $0x1e0] sm:$0xff]   ;;  %v2020_v7 = vld [vmem:[%s2619_s1 + $0x1e8] sm:$0xff]   ;;  %v2023_v10 = vld [vmem:[%s2619_s1 + $0x170] sm:$0xff]  }
  0x13   :  { %v2017_v4 = vld [vmem:[%s2619_s1 + $0x120] sm:$0xff]   ;;  %v2021_v8 = vld [vmem:[%s2619_s1 + $0x128] sm:$0xff]   ;;  %v2024_v11 = vld [vmem:[%s2619_s1 + $0x1f0] sm:$0xff]  }
  0x14   :  { %1766 = vmatpush3.bf16.msra.mxu0 %v1984_v18  ;;  %v2018_v5 = vld [vmem:[%s2619_s1 + $0x1a0] sm:$0xff]   ;;  %v2022_v9 = vld [vmem:[%s2619_s1 + $0x1a8] sm:$0xff]   ;;  %v2025_v12 = vld [vmem:[%s2619_s1 + $0x130] sm:$0xff]   ;;  %v319_v18 = vrot.slane %v2271_v43, %v2267_v41 }
  0x15   :  { %1788 = vmatpush3.bf16.msra.mxu1 %v1985_v19  ;;  %1767 = vmatprep.subr.bf16.mxu0 %v1986_v20  ;;  %v2026_v13 = vld [vmem:[%s2619_s1 + $0x1b0] sm:$0xff]   ;;  %v2027_v14 = vld [vmem:[%s2619_s1 + $0x178] sm:$0xff]   ;;  %v2031_v19 = vld [vmem:[%s2619_s1 + $0x240] sm:$0xff]  }
  0x16   :  { %1789 = vmatprep.subr.bf16.mxu1 %v1987_v21  ;;  %v2028_v15 = vld [vmem:[%s2619_s1 + $0x1f8] sm:$0xff]   ;;  %v2032_v20 = vld [vmem:[%s2619_s1 + $0x2c0] sm:$0xff]   ;;  %v2039_v28 = vld [vmem:[%s2619_s1 + $0x250] sm:$0xff]  }
  0x17   :  { %v2029_v16 = vld [vmem:[%s2619_s1 + $0x138] sm:$0xff]   ;;  %v2033_v21 = vld [vmem:[%s2619_s1 + $0x200] sm:$0xff]   ;;  %v2051_v40 = vld [vmem:[%s2619_s1 + $0x268] sm:$0xff]  }
  0x18   :  { %1768 = vmatpush3.bf16.msra.mxu0 %v1988_v22  ;;  %v2030_v17 = vld [vmem:[%s2619_s1 + $0x1b8] sm:$0xff]   ;;  %v2034_v22 = vld [vmem:[%s2619_s1 + $0x280] sm:$0xff]   ;;  %v2052_v42 = vld [vmem:[%s2619_s1 + $0x2e8] sm:$0xff]  }
  0x19   :  { %1790 = vmatpush3.bf16.msra.mxu1 %v1989_v23  ;;  %1769 = vmatprep.subr.bf16.mxu0 %v1990_v24  ;;  %v335_v23 = vcombine.high %v319_v18, %v319_v18  ;;  %v2035_v24 = vld [vmem:[%s2619_s1 + $0x248] sm:$0xff]   ;;  %v2044_v33 = vld [vmem:[%s2619_s1 + $0x2d8] sm:$0xff]   ;;  %v2047_v36 = vld [vmem:[%s2619_s1 + $0x260] sm:$0xff]  }
  0x1a   :  { %1791 = vmatprep.subr.bf16.mxu1 %v1991_v25  ;;  %v2036_v25 = vld [vmem:[%s2619_s1 + $0x2c8] sm:$0xff]   ;;  %v2045_v34 = vld [vmem:[%s2619_s1 + $0x218] sm:$0xff]   ;;  %v2048_v37 = vld [vmem:[%s2619_s1 + $0x2e0] sm:$0xff]  }
  0x1b   :  { %v2050_v39 = vld [vmem:[%s2619_s1 + $0x2a0] sm:$0xff]   ;;  %v2053_v43 = vld [vmem:[%s2619_s1 + $0x228] sm:$0xff]  }
  0x1c   :  { %1770 = vmatpush3.bf16.msra.mxu0 %v1992_v26  ;;  %v2037_v26 = vld [vmem:[%s2619_s1 + $0x208] sm:$0xff]  }
  0x1d   :  { %1792 = vmatpush3.bf16.msra.mxu1 %v1993_v27  ;;  %1771 = vmatprep.subr.bf16.mxu0 %v1994_v29  ;;  %v2038_v27 = vld [vmem:[%s2619_s1 + $0x288] sm:$0xff]   ;;  %v2040_v29 = vld [vmem:[%s2619_s1 + $0x2d0] sm:$0xff]  }
  0x1e   :  { %1793 = vmatprep.subr.bf16.mxu1 %v1995_v30  ;;  %v2041_v30 = vld [vmem:[%s2619_s1 + $0x210] sm:$0xff]   ;;  %v2054_v44 = vld [vmem:[%s2619_s1 + $0x2a8] sm:$0xff]  }
  0x1f   :  { %v23_v46 = vld [vmem:[%s2618_s0 + $0x8] sm:$0xff] }
  0x20   :  { %1772 = vmatpush3.bf16.msra.mxu0 %v1996_v31  ;;  %v2042_v31 = vld [vmem:[%s2619_s1 + $0x290] sm:$0xff]   ;;  %v345_v48 = vrot.slane %v23_v46, %v2267_v41 }
  0x21   :  { %1794 = vmatpush3.bf16.msra.mxu1 %v1997_v32  ;;  %1801 = vmatprep.subr.bf16.mxu0 %v1999_v35  ;;  %v2043_v32 = vld [vmem:[%s2619_s1 + $0x258] sm:$0xff]  }
  0x22   :  { %1823 = vmatprep.subr.bf16.mxu1 %v2000_v38  ;;  %v2046_v35 = vld [vmem:[%s2619_s1 + $0x298] sm:$0xff]   ;;  %v2049_v38 = vld [vmem:[%s2619_s1 + $0x220] sm:$0xff]  }
  0x23   :  { %1204 = vmatmul.mubr.bf16.vlgmr.msra.gmra.mrb[0].mxu0 %v312_v45  ;;  %v2055_v45 = vld [vmem:[%s2619_s1 + $0x270] sm:$0xff]  }
  0x24   :  { %1802 = vmatpush3.bf16.msra.mxu0 %v2001_v47  ;;  %1244 = vmatmul.mubr.bf16.vlgmr.msra.gmra.mrb[0].mxu1 %v334_v51  ;;  %v2056_v47 = vld [vmem:[%s2619_s1 + $0x2f0] sm:$0xff]  }
  0x25   :  { %1803 = vmatprep.subr.bf16.mxu0 %v2003_v52  ;;  %1824 = vmatpush3.bf16.msra.mxu1 %v2002_v49  ;;  %v338_v49 = vcombine.high %v23_v46, %v23_v46  ;;  %v2058_v51 = vld [vmem:[%s2619_s1 + $0x2b0] sm:$0xff]   ;;  %v353_v52 = vcombine.high %v345_v48, %v345_v48 }
  0x26   :  { %1283 = vmatprep.mubr.bf16.mxu0 %v333_v50  ;;  %1825 = vmatprep.subr.bf16.mxu1 %v2004_v54  ;;  %v2057_v50 = vld [vmem:[%s2619_s1 + $0x230] sm:$0xff]   ;;  %v2059_v54 = vld [vmem:[%s2619_s1 + $0x278] sm:$0xff]  }
  0x27   :  { %1323 = vmatprep.mubr.bf16.mxu1 %v337_v56  ;;  %v2459_v53 = vrot.slane %v338_v49, %v2267_v41  ;;  %v375_v56 = vrot.slane %v353_v52, %v2267_v41 }
  0x28   :  { %1804 = vmatpush3.bf16.msra.mxu0 %v2005_v55  ;;  %v2060_v55 = vld [vmem:[%s2619_s1 + $0x2f8] sm:$0xff]  }
  0x29   :  { %1805 = vmatprep.subr.bf16.mxu0 %v2007_v58  ;;  %1826 = vmatpush3.bf16.msra.mxu1 %v2006_v57  ;;  %v354_v57 = vcombine.high %v2459_v53, %v2459_v53  ;;  %v2061_v58 = vld [vmem:[%s2619_s1 + $0x238] sm:$0xff]  }
  0x2a   :  { %1827 = vmatprep.subr.bf16.mxu1 %v2008_v59  ;;  %v2062_v59 = vld [vmem:[%s2619_s1 + $0x2b8] sm:$0xff]  }
  0x2c   :  { %1806 = vmatpush3.bf16.msra.mxu0 %v2009_v60  ;;  %v385_v60 = vcombine.high %v375_v56, %v375_v56 }
  0x2d   :  { %1807 = vmatprep.subr.bf16.mxu0 %v2011_v62  ;;  %1828 = vmatpush3.bf16.msra.mxu1 %v2010_v61  ;;  %v361_v61 = vrot.slane %v345_v48, %v2267_v41  ;;  %v2063_v62 = vld [vmem:[%s2619_s1 + $0x340] sm:$0xff]  }
  0x2e   :  { %1829 = vmatprep.subr.bf16.mxu1 %v2012_v63  ;;  %v2064_v63 = vld [vmem:[%s2619_s1 + $0x3c0] sm:$0xff]  }
  0x30   :  { %1808 = vmatpush3.bf16.msra.mxu0 %v2013_v0  ;;  %v382_v0 = vrot.slane %v354_v57, %v2267_v41 }
  0x31   :  { %1809 = vmatprep.subr.bf16.mxu0 %v2015_v2  ;;  %1830 = vmatpush3.bf16.msra.mxu1 %v2014_v1  ;;  %v2065_v1 = vld [vmem:[%s2619_s1 + $0x300] sm:$0xff]  }
  0x32   :  { %1831 = vmatprep.subr.bf16.mxu1 %v2016_v3  ;;  %v2066_v2 = vld [vmem:[%s2619_s1 + $0x380] sm:$0xff]   ;;  %v383_v3 = vcombine.high %v361_v61, %v361_v61 }
  0x34   :  { %1810 = vmatpush3.bf16.msra.mxu0 %v2017_v4  ;;  %v2067_v4 = vld [vmem:[%s2619_s1 + $0x348] sm:$0xff]  }
  0x35   :  { %1811 = vmatprep.subr.bf16.mxu0 %v2019_v6  ;;  %1832 = vmatpush3.bf16.msra.mxu1 %v2018_v5  ;;  %v2068_v5 = vld [vmem:[%s2619_s1 + $0x3c8] sm:$0xff]   ;;  %v386_v6 = vcombine.high %v382_v0, %v382_v0 }
  0x36   :  { %1833 = vmatprep.subr.bf16.mxu1 %v2020_v7  ;;  %v2069_v7 = vld [vmem:[%s2619_s1 + $0x308] sm:$0xff]  }
  0x38   :  { %1812 = vmatpush3.bf16.msra.mxu0 %v2021_v8  ;;  %v2070_v8 = vld [vmem:[%s2619_s1 + $0x388] sm:$0xff]  }
  0x39   :  { %1813 = vmatprep.subr.bf16.mxu0 %v2023_v10  ;;  %1834 = vmatpush3.bf16.msra.mxu1 %v2022_v9  ;;  %v2071_v9 = vld [vmem:[%s2619_s1 + $0x350] sm:$0xff]  }
  0x3a   :  { %1835 = vmatprep.subr.bf16.mxu1 %v2024_v11  ;;  %v2072_v10 = vld [vmem:[%s2619_s1 + $0x3d0] sm:$0xff]  }
  0x3b   :  { %v2073_v11 = vld [vmem:[%s2619_s1 + $0x310] sm:$0xff]  }
  0x3c   :  { %1814 = vmatpush3.bf16.msra.mxu0 %v2025_v12  ;;  %v2074_v12 = vld [vmem:[%s2619_s1 + $0x390] sm:$0xff]  }
  0x3d   :  { %1815 = vmatprep.subr.bf16.mxu0 %v2027_v14  ;;  %1836 = vmatpush3.bf16.msra.mxu1 %v2026_v13  ;;  %v2075_v13 = vld [vmem:[%s2619_s1 + $0x358] sm:$0xff]  }
  0x3e   :  { %1837 = vmatprep.subr.bf16.mxu1 %v2028_v15  ;;  %v2076_v14 = vld [vmem:[%s2619_s1 + $0x3d8] sm:$0xff]  }
  0x3f   :  { %v2077_v15 = vld [vmem:[%s2619_s1 + $0x318] sm:$0xff]  }
  0x40   :  { %1816 = vmatpush3.bf16.msra.mxu0 %v2029_v16  ;;  %v2078_v16 = vld [vmem:[%s2619_s1 + $0x398] sm:$0xff]  }
  0x41   :  { %1845 = vmatprep.subr.bf16.mxu0 %v2031_v19  ;;  %1838 = vmatpush3.bf16.msra.mxu1 %v2030_v17  ;;  %v2079_v17 = vld [vmem:[%s2619_s1 + $0x360] sm:$0xff]  }
  0x42   :  { %1867 = vmatprep.subr.bf16.mxu1 %v2032_v20  ;;  %v2081_v19 = vld [vmem:[%s2619_s1 + $0x320] sm:$0xff]  }
  0x43   :  { %1284 = vmatmul.mubr.bf16.vlgmr.msra.gmra.mrb[4].mxu0 %v319_v18  ;;  %v2080_v18 = vld [vmem:[%s2619_s1 + $0x3e0] sm:$0xff]  }
  0x44   :  { %1846 = vmatpush3.bf16.msra.mxu0 %v2033_v21  ;;  %1324 = vmatmul.mubr.bf16.vlgmr.msra.gmra.mrb[4].mxu1 %v335_v23  ;;  %v2082_v20 = vld [vmem:[%s2619_s1 + $0x3a0] sm:$0xff]   ;;  %v2083_v21 = vld [vmem:[%s2619_s1 + $0x368] sm:$0xff]  }
  0x45   :  { %1847 = vmatprep.subr.bf16.mxu0 %v2035_v24  ;;  %1868 = vmatpush3.bf16.msra.mxu1 %v2034_v22  ;;  %v2084_v22 = vld [vmem:[%s2619_s1 + $0x3e8] sm:$0xff]  }
  0x46   :  { %1869 = vmatprep.subr.bf16.mxu1 %v2036_v25  ;;  %1363 = vmatprep.mubr.bf16.mxu0 %v375_v56  ;;  %v2085_v23 = vld [vmem:[%s2619_s1 + $0x328] sm:$0xff]   ;;  %v2087_v25 = vld [vmem:[%s2619_s1 + $0x370] sm:$0xff]  }
  0x47   :  { %1403 = vmatprep.mubr.bf16.mxu1 %v385_v60  ;;  %v2086_v24 = vld [vmem:[%s2619_s1 + $0x3a8] sm:$0xff]  }
  0x48   :  { %1848 = vmatpush3.bf16.msra.mxu0 %v2037_v26  ;;  %v2088_v26 = vld [vmem:[%s2619_s1 + $0x3f0] sm:$0xff]  }
  0x49   :  { %1849 = vmatprep.subr.bf16.mxu0 %v2039_v28  ;;  %1870 = vmatpush3.bf16.msra.mxu1 %v2038_v27  ;;  %v2089_v27 = vld [vmem:[%s2619_s1 + $0x330] sm:$0xff]  }
  0x4a   :  { %1871 = vmatprep.subr.bf16.mxu1 %v2040_v29  ;;  %v2090_v28 = vld [vmem:[%s2619_s1 + $0x3b0] sm:$0xff]   ;;  %v2091_v29 = vld [vmem:[%s2619_s1 + $0x378] sm:$0xff]  }
  0x4c   :  { %1850 = vmatpush3.bf16.msra.mxu0 %v2041_v30  ;;  %v2092_v30 = vld [vmem:[%s2619_s1 + $0x3f8] sm:$0xff]  }
  0x4d   :  { %1851 = vmatprep.subr.bf16.mxu0 %v2043_v32  ;;  %1872 = vmatpush3.bf16.msra.mxu1 %v2042_v31 }
  0x4e   :  { %1873 = vmatprep.subr.bf16.mxu1 %v2044_v33 }
  0x50   :  { %1852 = vmatpush3.bf16.msra.mxu0 %v2045_v34 }
  0x51   :  { %1853 = vmatprep.subr.bf16.mxu0 %v2047_v36  ;;  %1874 = vmatpush3.bf16.msra.mxu1 %v2046_v35 }
  0x52   :  { %1875 = vmatprep.subr.bf16.mxu1 %v2048_v37 }
  0x54   :  { %1854 = vmatpush3.bf16.msra.mxu0 %v2049_v38 }
  0x55   :  { %1855 = vmatprep.subr.bf16.mxu0 %v2051_v40  ;;  %1876 = vmatpush3.bf16.msra.mxu1 %v2050_v39 }
  0x56   :  { %1877 = vmatprep.subr.bf16.mxu1 %v2052_v42 }
  0x58   :  { %1856 = vmatpush3.bf16.msra.mxu0 %v2053_v43 }
  0x59   :  { %1857 = vmatprep.subr.bf16.mxu0 %v2055_v45  ;;  %1878 = vmatpush3.bf16.msra.mxu1 %v2054_v44 }
  0x5a   :  { %1879 = vmatprep.subr.bf16.mxu1 %v2056_v47 }
  0x5c   :  { %1858 = vmatpush3.bf16.msra.mxu0 %v2057_v50 }
  0x5d   :  { %1859 = vmatprep.subr.bf16.mxu0 %v2059_v54  ;;  %1880 = vmatpush3.bf16.msra.mxu1 %v2058_v51 }
  0x5e   :  { %1881 = vmatprep.subr.bf16.mxu1 %v2060_v55 }
  0x60   :  { %1860 = vmatpush3.bf16.msra.mxu0 %v2061_v58 }
  0x61   :  { %1889 = vmatprep.subr.bf16.mxu0 %v2063_v62  ;;  %1882 = vmatpush3.bf16.msra.mxu1 %v2062_v59 }
  0x62   :  { %1911 = vmatprep.subr.bf16.mxu1 %v2064_v63 }
  0x63   :  { %1364 = vmatmul.mubr.bf16.vlgmr.msra.gmra.mrb[8].mxu0 %v361_v61 }
  0x64   :  { %1890 = vmatpush3.bf16.msra.mxu0 %v2065_v1  ;;  %1443 = vmatprep.mubr.bf16.mxu0 %v382_v0 }
  0x65   :  { %1404 = vmatmul.mubr.bf16.vlgmr.msra.gmra.mrb[8].mxu1 %v383_v3  ;;  %1891 = vmatprep.subr.bf16.mxu0 %v2067_v4 }
  0x66   :  { %1912 = vmatpush3.bf16.msra.mxu1 %v2066_v2  ;;  %1483 = vmatprep.mubr.bf16.mxu1 %v386_v6 }
  0x67   :  { %1913 = vmatprep.subr.bf16.mxu1 %v2068_v5 }
  0x68   :  { %1892 = vmatpush3.bf16.msra.mxu0 %v2069_v7 }
  0x69   :  { %1893 = vmatprep.subr.bf16.mxu0 %v2071_v9 }
  0x6a   :  { %1914 = vmatpush3.bf16.msra.mxu1 %v2070_v8 }
  0x6b   :  { %1915 = vmatprep.subr.bf16.mxu1 %v2072_v10 }
  0x6c   :  { %1894 = vmatpush3.bf16.msra.mxu0 %v2073_v11 }
  0x6d   :  { %1895 = vmatprep.subr.bf16.mxu0 %v2075_v13 }
  0x6e   :  { %1916 = vmatpush3.bf16.msra.mxu1 %v2074_v12 }
  0x6f   :  { %1917 = vmatprep.subr.bf16.mxu1 %v2076_v14 }
  0x70   :  { %1896 = vmatpush3.bf16.msra.mxu0 %v2077_v15 }
  0x71   :  { %1897 = vmatprep.subr.bf16.mxu0 %v2079_v17 }
  0x72   :  { %1918 = vmatpush3.bf16.msra.mxu1 %v2078_v16 }
  0x73   :  { %1919 = vmatprep.subr.bf16.mxu1 %v2080_v18 }
  0x74   :  { %1898 = vmatpush3.bf16.msra.mxu0 %v2081_v19 }
  0x75   :  { %1899 = vmatprep.subr.bf16.mxu0 %v2083_v21 }
  0x76   :  { %1920 = vmatpush3.bf16.msra.mxu1 %v2082_v20 }
  0x77   :  { %1921 = vmatprep.subr.bf16.mxu1 %v2084_v22 }
  0x78   :  { %1900 = vmatpush3.bf16.msra.mxu0 %v2085_v23 }
  0x79   :  { %1901 = vmatprep.subr.bf16.mxu0 %v2087_v25 }
  0x7a   :  { %1922 = vmatpush3.bf16.msra.mxu1 %v2086_v24 }
  0x7b   :  { %1923 = vmatprep.subr.bf16.mxu1 %v2088_v26 }
  0x7c   :  { %10 = vsyncpa [#allocation3], 0  ;;  %1902 = vmatpush3.bf16.msra.mxu0 %v2089_v27  ;;  %v2093_v31 = vld [vmem:[%s2619_s1 + $0x338] sm:$0xff]   ;;  %v368_v32 = vrot.slane %v2459_v53, %v2267_v41  ;;  %v2096_v35 = vld [vmem:[%s2621_s3] sm:$0xff]   ;;  %v2129_v36 = vmov 0.0   ;;  %vm2130_vm0 = vmmov 0  }
  0x7d   :  { %1903 = vmatprep.subr.bf16.mxu0 %v2091_v29  ;;  %v2094_v33 = vld [vmem:[%s2619_s1 + $0x3b8] sm:$0xff]   ;;  %v2097_v41 = vld [vmem:[%s2621_s3 + $0x8] sm:$0xff]   ;;  %v2098_v37 = vld [vmem:[%s2621_s3 + $0x10] sm:$0xff]   ;;  %s2131_s16 = smov [#allocation2]  }
  0x7e   :  { %1924 = vmatpush3.bf16.msra.mxu1 %v2090_v28  ;;  %v384_v34 = vcombine.high %v368_v32, %v368_v32  ;;  %v2099_v38 = vld [vmem:[%s2621_s3 + $0x18] sm:$0xff]   ;;  %v2100_v39 = vld [vmem:[%s2621_s3 + $0x20] sm:$0xff]   ;;  %v2101_v40 = vld [vmem:[%s2621_s3 + $0x28] sm:$0xff]   ;;  %s1611_s17 = sshll.u32 %s2131_s16, 4  ;;  %s1612_s17 = int_to_ptr.vmem [resolvable:$true] %s1611_s17 }
  0x7f   :  { %1925 = vmatprep.subr.bf16.mxu1 %v2092_v30  ;;  %v2102_v42 = vld [vmem:[%s2621_s3 + $0x30] sm:$0xff]   ;;  %v2103_v43 = vld [vmem:[%s2621_s3 + $0x38] sm:$0xff]   ;;  %v1619_v45 = vld [vmem:[%s2620_s2] ss:$0 sm:$0xff]  ;;  %s2104_s18 = scalar_lea.vmem %s1612_s17, 32  ;;  %p2109_p1 = scmp.lt.s32.totalorder %s1612_s17, %s1612_s17 }
  0x80   :  { %1904 = vmatpush3.bf16.msra.mxu0 %v2093_v31  ;;  %v1748_v31 = vld [vmem:[%s2622_s4] ss:$0 sm:$0xff]  ;;  %p2105_p0 = scmp.ne.s32.totalorder %s1612_s17, %s2104_s18  ;;  %p2110_p2 = scmp.lt.s32.totalorder %s2104_s18, %s2104_s18 }
  0x81   :  { %1942 = vmatprep.subr.bf16.mxu0 %v2129_v36 }
  0x82   :  { %1926 = vmatpush3.bf16.msra.mxu1 %v2094_v33  ;;  %p2111_p3 = por %p2110_p2, %p2109_p1 }
  0x83   :  { %1444 = vmatmul.mubr.bf16.vlgmr.msra.gmra.mrb[12].mxu0 %v368_v32 }
  0x84   :  { %1943 = vmatpush3.bf16.msra.mxu0 %v2096_v35  ;;  %1958 = vmatprep.mubr.msk.bf16.mxu0 %vm2130_vm0, %v2129_v36  ;;  %p2112_p4 = pnand %p2111_p3, %p2105_p0 }
  0x85   :  { %1484 = vmatmul.mubr.bf16.vlgmr.msra.gmra.mrb[12].mxu1 %v384_v34  ;;  %1944 = vmatprep.subr.bf16.mxu0 %v2129_v36 }
  0x88   :  { %1945 = vmatpush3.bf16.msra.mxu0 %v2097_v41 }
  0x89   :  { %1946 = vmatprep.subr.bf16.mxu0 %v2129_v36 }
  0x8c   :  { %1947 = vmatpush3.bf16.msra.mxu0 %v2098_v37 }
  0x8d   :  { %1948 = vmatprep.subr.bf16.mxu0 %v2129_v36 }
  0x90   :  { %1949 = vmatpush3.bf16.msra.mxu0 %v2099_v38 }
  0x91   :  { %1950 = vmatprep.subr.bf16.mxu0 %v2129_v36 }
  0x94   :  { %1951 = vmatpush3.bf16.msra.mxu0 %v2100_v39 }
  0x95   :  { %1952 = vmatprep.subr.bf16.mxu0 %v2129_v36 }
  0x98   :  { %1953 = vmatpush3.bf16.msra.mxu0 %v2101_v40 }
  0x99   :  { %1954 = vmatprep.subr.bf16.mxu0 %v2129_v36 }
  0x9c   :  { %1955 = vmatpush3.bf16.msra.mxu0 %v2102_v42 }
  0x9d   :  { %1956 = vmatprep.subr.bf16.mxu0 %v2129_v36 }
  0xa0   :  { %1957 = vmatpush3.bf16.msra.mxu0 %v2103_v43 }
  0xf6   :  { %v1773_v44 = vpop.f32.mrb[0].mxu0 }
  0xf7   :  { %v1774_v46 = vpop.f32.mrb[1].mxu0  ;;  %v1795_v47 = vpop.f32.mrb[0].mxu1 }
  0xf8   :  { %v1775_v48 = vadd.f32 %v1774_v46, %v1773_v44  ;;  %v1776_v49 = vpop.f32.mrb[2].mxu0  ;;  %v1796_v50 = vpop.f32.mrb[1].mxu1 }
  0xf9   :  { %v1777_v51 = vpop.f32.mrb[3].mxu0  ;;  %v1797_v53 = vadd.f32 %v1796_v50, %v1795_v47  ;;  %v1798_v54 = vpop.f32.mrb[2].mxu1 }
  0xfa   :  { %v1206_v52 = vadd.f32 %v1775_v48, %v1619_v45  ;;  %v1799_v55 = vpop.f32.mrb[3].mxu1 }
  0xfc   :  { %v1246_v56 = vadd.f32 %v1797_v53, %v1206_v52 }
 0x116   :  { %v1817_v57 = vpop.f32.mrb[4].mxu0 }
 0x117   :  { %v1818_v58 = vpop.f32.mrb[5].mxu0  ;;  %v1839_v59 = vpop.f32.mrb[4].mxu1 }
 0x118   :  { %v1819_v60 = vadd.f32 %v1818_v58, %v1817_v57  ;;  %v1820_v61 = vpop.f32.mrb[6].mxu0  ;;  %v1840_v62 = vpop.f32.mrb[5].mxu1 }
 0x119   :  { %v1821_v63 = vpop.f32.mrb[7].mxu0  ;;  %v1841_v1 = vadd.f32 %v1840_v62, %v1839_v59  ;;  %v1842_v2 = vpop.f32.mrb[6].mxu1 }
 0x11a   :  { %v1286_v0 = vadd.f32 %v1819_v60, %v1246_v56  ;;  %v1843_v3 = vpop.f32.mrb[7].mxu1 }
 0x11c   :  { %v1326_v4 = vadd.f32 %v1841_v1, %v1286_v0 }
 0x136   :  { %v1861_v5 = vpop.f32.mrb[8].mxu0 }
 0x137   :  { %v1862_v6 = vpop.f32.mrb[9].mxu0 }
 0x138   :  { %v1883_v7 = vpop.f32.mrb[8].mxu1  ;;  %v1863_v8 = vadd.f32 %v1862_v6, %v1861_v5  ;;  %v1864_v9 = vpop.f32.mrb[10].mxu0 }
 0x139   :  { %v1884_v10 = vpop.f32.mrb[9].mxu1  ;;  %v1865_v11 = vpop.f32.mrb[11].mxu0 }
 0x13a   :  { %v1366_v12 = vadd.f32 %v1863_v8, %v1326_v4  ;;  %v1885_v13 = vadd.f32 %v1884_v10, %v1883_v7  ;;  %v1886_v14 = vpop.f32.mrb[10].mxu1 }
 0x13b   :  { %v1887_v15 = vpop.f32.mrb[11].mxu1 }
 0x13c   :  { %v1406_v16 = vadd.f32 %v1885_v13, %v1366_v12 }
 0x156   :  { %v1905_v17 = vpop.f32.mrb[12].mxu0 }
 0x157   :  { %v1906_v18 = vpop.f32.mrb[13].mxu0 }
 0x158   :  { %v1927_v19 = vpop.f32.mrb[12].mxu1  ;;  %v1907_v20 = vadd.f32 %v1906_v18, %v1905_v17  ;;  %v1908_v21 = vpop.f32.mrb[14].mxu0 }
 0x159   :  { %v1928_v22 = vpop.f32.mrb[13].mxu1  ;;  %v1909_v23 = vpop.f32.mrb[15].mxu0 }
 0x15a   :  { %v1446_v24 = vadd.f32 %v1907_v20, %v1406_v16  ;;  %v1929_v25 = vadd.f32 %v1928_v22, %v1927_v19  ;;  %v1930_v26 = vpop.f32.mrb[14].mxu1 }
 0x15b   :  { %v1931_v27 = vpop.f32.mrb[15].mxu1 }
 0x15c   :  { %v1486_v28 = vadd.f32 %v1929_v25, %v1446_v24 }
 0x15e   :  { %v1491_v29 = vmax.f32 %v1486_v28, 0.0 }
 0x160   :  { %v1492_v30 = vpack.c.bf16 %v1491_v29, %v1491_v29 }
 0x162   :  { %1959 = vmatmul.mubr.bf16.vlgmr.msra.gmra.mrb[16].mxu0 %v1492_v30 }
 0x235   :  { %v1598_v32 = vpop.f32.mrb[16].mxu0 }
 0x236   :  { %v1599_v33 = vadd.f32 %v1748_v31, %v1598_v32  ;;  %v1960_v34 = vpop.f32.mrb[17].mxu0 }
 0x237   :  { %v1601_v35 = vpop.f32.mrb[18].mxu0 }
 0x238   :  { %1604 = vst [vmem:[#allocation2] sm:$0x3] %v1599_v33  ;;  %v1961_v36 = vpop.f32.mrb[19].mxu0 }
 0x239   :  { %2115 = shalt.err (!%p2112_p4)
}
 0x23a   :  { %s2116_s4 = scalar_lea.hbm %s2623_s5, 32 }
 0x23b   :  { %p2117_p5 = scmp.ne.s32.totalorder %s2623_s5, %s2116_s4  ;;  %p2120_p6 = scmp.lt.u32.totalorder %s2116_s4, %s2623_s5 }
 0x23d   :  { %p2122_p7 = pnand %p2120_p6, %p2117_p5 }
 0x23f   :  { %2125 = shalt.err (!%p2122_p7)
}
 0x240   :  { %1614 = dma.vmem_to_hbm [thread:$0]  %s1612_s17, 32, %s2623_s5, [#allocation3]  }
 0x241   :  { %2126 = dma.done.wait [#allocation3], 32  }
 0x242   :  { %2127 = vsyncadd [#allocation3], 4294967264 }
 0x243   :  { %1618 = vsyncpa [#allocation3], 1 }

// kernel: cnn_forward.2
= control target key start
LH: loop header
LB: loop body
LE: loop exit
PB: predicated region body
PF: predicated region fallthrough
CT: control target
= control target key end

     0   :  { %s15184_s8 = smov 32   ;;  %vm1045_vm0 = vcmask 261120   ;;  %vm1422_vm1 = vcmask 392192   ;;  %vm1808_vm2 = vcmask 523264   ;;  %vm6350_vm3 = vcmask 257024   ;;  %s15186_s7 = smov 112   ;;  %s20885_s0 = inlined_call_operand.vmem [shape: bf16[2,34,9,32], index: 0, kind: input, shape index: {}]   ;;  %s20886_s1 = inlined_call_operand.vmem [shape: bf16[3,48,64], index: 1, kind: input, shape index: {}]   ;;  %s20887_s2 = inlined_call_operand.vmem [shape: f32[1,32], index: 2, kind: input, shape index: {}]   ;;  %s20888_s3 = inlined_call_operand.vmem [shape: bf16[3,64,64], index: 3, kind: input, shape index: {}]   ;;  %s20889_s4 = inlined_call_operand.vmem [shape: f32[1,32], index: 4, kind: input, shape index: {}]   ;;  %s20890_s5 = inlined_call_operand.vmem [shape: bf16[2,8,8,32], index: 5, kind: output, shape index: {}]  }
   0x1   :  { %v23_v0 = vld [vmem:[%s20885_s0 + $0x10] sm:$0xf]  ;;  %v87_v1 = vld [vmem:[%s20885_s0 + $0x14] sm:$0x1]  ;;  %v21_v2 = vld [vmem:[%s20885_s0] sm:$0xf] }
   0x2   :  { %v12675_v3 = vcombine.low %v23_v0, %v87_v1  ;;  %v85_v4 = vld [vmem:[%s20885_s0 + $0x4] sm:$0x1]  ;;  %v24_v5 = vld [vmem:[%s20885_s0 + $0x18] sm:$0xf]  ;;  %v88_v6 = vld [vmem:[%s20885_s0 + $0x1c] sm:$0x1] }
   0x3   :  { %v12673_v7 = vcombine.low %v21_v2, %v85_v4  ;;  %v12676_v8 = vcombine.low %v24_v5, %v88_v6  ;;  %v22_v9 = vld [vmem:[%s20885_s0 + $0x8] sm:$0xf]  ;;  %v86_v10 = vld [vmem:[%s20885_s0 + $0xc] sm:$0x1]  ;;  %v25_v16 = vld [vmem:[%s20885_s0 + $0x20] sm:$0xf] }
   0x4   :  { %v26_v11 = vld [vmem:[%s20885_s0 + $0x28] sm:$0xf]  ;;  %v484_v12 = vshrl.u32 %v12675_v3, 16  ;;  %v486_v13 = vshll.u32 %v12675_v3, 16  ;;  %v12674_v14 = vcombine.low %v22_v9, %v86_v10  ;;  %v90_v15 = vld [vmem:[%s20885_s0 + $0x2c] sm:$0x1] }
   0x5   :  { %v470_v17 = vshrl.u32 %v12673_v7, 16  ;;  %v472_v18 = vshll.u32 %v12673_v7, 16  ;;  %v491_v19 = vshrl.u32 %v12676_v8, 16  ;;  %v493_v20 = vshll.u32 %v12676_v8, 16  ;;  %v89_v21 = vld [vmem:[%s20885_s0 + $0x24] sm:$0x1] }
   0x6   :  { %v488_v22 = vrot.slane %v486_v13, 1  ;;  %v477_v23 = vshrl.u32 %v12674_v14, 16  ;;  %v479_v24 = vshll.u32 %v12674_v14, 16  ;;  %v12678_v25 = vcombine.low %v26_v11, %v90_v15  ;;  %v28_v26 = vld [vmem:[%s20885_s0 + $0x38] sm:$0xf]  ;;  %v14599_v27 = vld [vmem:[%s20886_s1] sm:$0xff]  }
   0x7   :  { %v474_v28 = vrot.slane %v472_v18, 1  ;;  %v495_v29 = vrot.slane %v493_v20, 1  ;;  %v12677_v30 = vcombine.low %v25_v16, %v89_v21  ;;  %v92_v31 = vld [vmem:[%s20885_s0 + $0x3c] sm:$0x1]  ;;  %v27_v32 = vld [vmem:[%s20885_s0 + $0x30] sm:$0xf]  ;;  %14201 = vmatprep.subr.bf16.mxu0 %v14599_v27  ;;  %14531 = vmatprep.subr.bf16.mxu1 %v14599_v27 }
   0x8   :  { %v489_v33 = vor.u32 %v488_v22, %v484_v12  ;;  %v481_v34 = vrot.slane %v479_v24, 1  ;;  %v505_v35 = vshrl.u32 %v12678_v25, 16  ;;  %v507_v36 = vshll.u32 %v12678_v25, 16  ;;  %v91_v37 = vld [vmem:[%s20885_s0 + $0x34] sm:$0x1]  ;;  %v14602_v38 = vld [vmem:[%s20886_s1 + $0x8] sm:$0xff]   ;;  %14202 = vmatpush3.bf16.msra.mxu0 %v14599_v27  ;;  %14534 = vmatpush3.bf16.msra.mxu1 %v14599_v27 }
   0x9   :  { %v475_v39 = vor.u32 %v474_v28, %v470_v17  ;;  %v498_v40 = vshrl.u32 %v12677_v30, 16  ;;  %v500_v41 = vshll.u32 %v12677_v30, 16  ;;  %v30_v42 = vld [vmem:[%s20885_s0 + $0x48] sm:$0xf]  ;;  %v94_v43 = vld [vmem:[%s20885_s0 + $0x4c] sm:$0x1]  ;;  %v496_v44 = vor.u32 %v495_v29, %v491_v19  ;;  %14203 = vmatprep.subr.bf16.mxu0 %v14602_v38  ;;  %14532 = vmatprep.subr.bf16.mxu1 %v14602_v38 }
   0xa   :  { %921 = vrot.lane.b32.xlu1 %v489_v33, %s15184_s8  ;;  %v509_v45 = vrot.slane %v507_v36, 1  ;;  %v12680_v46 = vcombine.low %v28_v26, %v92_v31  ;;  %v12679_v47 = vcombine.low %v27_v32, %v91_v37  ;;  %v29_v48 = vld [vmem:[%s20885_s0 + $0x40] sm:$0xf]  ;;  %v93_v49 = vld [vmem:[%s20885_s0 + $0x44] sm:$0x1]  ;;  %v14605_v50 = vld [vmem:[%s20886_s1 + $0x10] sm:$0xff]   ;;  %v482_v51 = vor.u32 %v481_v34, %v477_v23 }
   0xb   :  { %917 = vrot.lane.b32.xlu0 %v475_v39, %s15184_s8  ;;  %v502_v52 = vrot.slane %v500_v41, 1  ;;  %v12682_v53 = vcombine.low %v30_v42, %v94_v43  ;;  %v12681_v54 = vcombine.low %v29_v48, %v93_v49  ;;  %v32_v55 = vld [vmem:[%s20885_s0 + $0x58] sm:$0xf]  ;;  %v96_v56 = vld [vmem:[%s20885_s0 + $0x5c] sm:$0x1]  ;;  %s15187_s16 = smov 16  }
   0xc   :  { %v521_v57 = vshll.u32 %v12680_v46, 16  ;;  %v31_v58 = vld [vmem:[%s20885_s0 + $0x50] sm:$0xf]  ;;  %v510_v59 = vor.u32 %v509_v45, %v505_v35  ;;  %v519_v60 = vshrl.u32 %v12680_v46, 16  ;;  %v514_v61 = vshll.u32 %v12679_v47, 16  ;;  %14204 = vmatpush3.bf16.msra.mxu0 %v14602_v38  ;;  %14535 = vmatpush3.bf16.msra.mxu1 %v14602_v38  ;;  %s15188_s25 = smov 48  }
   0xd   :  { %v95_v62 = vld [vmem:[%s20885_s0 + $0x54] sm:$0x1]  ;;  %v512_v0 = vshrl.u32 %v12679_v47, 16  ;;  %v535_v1 = vshll.u32 %v12682_v53, 16  ;;  %v12684_v2 = vcombine.low %v32_v55, %v96_v56  ;;  %14205 = vmatprep.subr.bf16.mxu0 %v14605_v50  ;;  %v503_v3 = vor.u32 %v502_v52, %v498_v40  ;;  %v34_v7 = vld [vmem:[%s20885_s0 + $0x68] sm:$0xf]  ;;  %14533 = vmatprep.subr.bf16.mxu1 %v14605_v50 }
   0xe   :  { %923 = vrot.lane.b32.xlu1 %v496_v44, %s15184_s8  ;;  %v523_v63 = vrot.slane %v521_v57, 1  ;;  %v516_v4 = vrot.slane %v514_v61, 1  ;;  %v528_v5 = vshll.u32 %v12681_v54, 16  ;;  %v12683_v6 = vcombine.low %v31_v58, %v95_v62  ;;  %v98_v8 = vld [vmem:[%s20885_s0 + $0x6c] sm:$0x1] }
   0xf   :  { %919 = vrot.lane.b32.xlu0 %v482_v51, %s15184_s8  ;;  %v33_v9 = vld [vmem:[%s20885_s0 + $0x60] sm:$0xf]  ;;  %v97_v10 = vld [vmem:[%s20885_s0 + $0x64] sm:$0x1]  ;;  %v533_v11 = vshrl.u32 %v12682_v53, 16  ;;  %v549_v12 = vshll.u32 %v12684_v2, 16  ;;  %v12686_v16 = vcombine.low %v34_v7, %v98_v8 }
  0x10   :  { %14206 = vmatpush3.bf16.msra.mxu0 %v14605_v50  ;;  %14536 = vmatpush3.bf16.msra.mxu1 %v14605_v50  ;;  %v524_v13 = vor.u32 %v523_v63, %v519_v60  ;;  %v537_v14 = vrot.slane %v535_v1, 1  ;;  %v526_v15 = vshrl.u32 %v12681_v54, 16  ;;  %v517_v17 = vor.u32 %v516_v4, %v512_v0  ;;  %v36_v21 = vld [vmem:[%s20885_s0 + $0x78] sm:$0xf]  ;;  %v100_v22 = vld [vmem:[%s20885_s0 + $0x7c] sm:$0x1] }
  0x11   :  { %v530_v18 = vrot.slane %v528_v5, 1  ;;  %v542_v19 = vshll.u32 %v12683_v6, 16  ;;  %v12685_v20 = vcombine.low %v33_v9, %v97_v10  ;;  %v35_v23 = vld [vmem:[%s20885_s0 + $0x70] sm:$0xf]  ;;  %v99_v24 = vld [vmem:[%s20885_s0 + $0x74] sm:$0x1]  ;;  %v12688_v30 = vcombine.low %v36_v21, %v100_v22 }
  0x12   :  { %927 = vrot.lane.b32.xlu1 %v510_v59, %s15184_s8  ;;  %v547_v25 = vshrl.u32 %v12684_v2, 16  ;;  %v551_v26 = vrot.slane %v549_v12, 1  ;;  %v538_v27 = vor.u32 %v537_v14, %v533_v11  ;;  %v540_v28 = vshrl.u32 %v12683_v6, 16  ;;  %v38_v31 = vld [vmem:[%s20885_s0 + $0x88] sm:$0xf] }
  0x13   :  { %925 = vrot.lane.b32.xlu0 %v503_v3, %s15184_s8  ;;  %v563_v29 = vshll.u32 %v12686_v16, 16  ;;  %v102_v32 = vld [vmem:[%s20885_s0 + $0x8c] sm:$0x1]  ;;  %v531_v33 = vor.u32 %v530_v18, %v526_v15  ;;  %v544_v34 = vrot.slane %v542_v19, 1  ;;  %v556_v35 = vshll.u32 %v12685_v20, 16 }
  0x14   :  { %v12687_v36 = vcombine.low %v35_v23, %v99_v24  ;;  %v37_v37 = vld [vmem:[%s20885_s0 + $0x80] sm:$0xf]  ;;  %v101_v38 = vld [vmem:[%s20885_s0 + $0x84] sm:$0x1]  ;;  %v552_v39 = vor.u32 %v551_v26, %v547_v25  ;;  %v12690_v40 = vcombine.low %v38_v31, %v102_v32  ;;  %v561_v41 = vshrl.u32 %v12686_v16, 16 }
  0x15   :  { %v565_v42 = vrot.slane %v563_v29, 1  ;;  %v554_v43 = vshrl.u32 %v12685_v20, 16  ;;  %v577_v44 = vshll.u32 %v12688_v30, 16  ;;  %v545_v45 = vor.u32 %v544_v34, %v540_v28  ;;  %v40_v49 = vld [vmem:[%s20885_s0 + $0x98] sm:$0xf] }
  0x16   :  { %931 = vrot.lane.b32.xlu1 %v524_v13, %s15184_s8  ;;  %v558_v46 = vrot.slane %v556_v35, 1  ;;  %v570_v47 = vshll.u32 %v12687_v36, 16  ;;  %v12689_v48 = vcombine.low %v37_v37, %v101_v38  ;;  %v104_v50 = vld [vmem:[%s20885_s0 + $0x9c] sm:$0x1]  ;;  %v39_v51 = vld [vmem:[%s20885_s0 + $0x90] sm:$0xf] }
  0x17   :  { %929 = vrot.lane.b32.xlu0 %v517_v17, %s15184_s8  ;;  %v103_v52 = vld [vmem:[%s20885_s0 + $0x94] sm:$0x1]  ;;  %v575_v53 = vshrl.u32 %v12688_v30, 16  ;;  %v591_v54 = vshll.u32 %v12690_v40, 16  ;;  %v566_v55 = vor.u32 %v565_v42, %v561_v41  ;;  %v579_v56 = vrot.slane %v577_v44, 1 }
  0x18   :  { %v568_v57 = vshrl.u32 %v12687_v36, 16  ;;  %v12692_v58 = vcombine.low %v40_v49, %v104_v50  ;;  %v559_v59 = vor.u32 %v558_v46, %v554_v43  ;;  %v572_v60 = vrot.slane %v570_v47, 1  ;;  %v42_v63 = vld [vmem:[%s20885_s0 + $0xa8] sm:$0xf]  ;;  %v106_v0 = vld [vmem:[%s20885_s0 + $0xac] sm:$0x1] }
  0x19   :  { %v584_v61 = vshll.u32 %v12689_v48, 16  ;;  %v12691_v62 = vcombine.low %v39_v51, %v103_v52  ;;  %v41_v1 = vld [vmem:[%s20885_s0 + $0xa0] sm:$0xf]  ;;  %v105_v2 = vld [vmem:[%s20885_s0 + $0xa4] sm:$0x1]  ;;  %v589_v3 = vshrl.u32 %v12690_v40, 16  ;;  %v580_v5 = vor.u32 %v579_v56, %v575_v53 }
  0x1a   :  { %935 = vrot.lane.b32.xlu1 %v538_v27, %s15184_s8  ;;  %v593_v4 = vrot.slane %v591_v54, 1  ;;  %v582_v6 = vshrl.u32 %v12689_v48, 16  ;;  %v605_v7 = vshll.u32 %v12692_v58, 16  ;;  %v12694_v8 = vcombine.low %v42_v63, %v106_v0  ;;  %v44_v9 = vld [vmem:[%s20885_s0 + $0xb8] sm:$0xf] }
  0x1b   :  { %933 = vrot.lane.b32.xlu0 %v531_v33, %s15184_s8  ;;  %v108_v10 = vld [vmem:[%s20885_s0 + $0xbc] sm:$0x1]  ;;  %v573_v11 = vor.u32 %v572_v60, %v568_v57  ;;  %v586_v12 = vrot.slane %v584_v61, 1  ;;  %v598_v13 = vshll.u32 %v12691_v62, 16  ;;  %v12693_v14 = vcombine.low %v41_v1, %v105_v2  ;;  %v43_v15 = vld [vmem:[%s20885_s0 + $0xb0] sm:$0xf] }
  0x1c   :  { %v107_v16 = vld [vmem:[%s20885_s0 + $0xb4] sm:$0x1]  ;;  %v594_v17 = vor.u32 %v593_v4, %v589_v3  ;;  %v12696_v18 = vcombine.low %v44_v9, %v108_v10  ;;  %v603_v19 = vshrl.u32 %v12692_v58, 16  ;;  %v607_v20 = vrot.slane %v605_v7, 1  ;;  %v46_v27 = vld [vmem:[%s20885_s0 + $0xc8] sm:$0xf] }
  0x1d   :  { %v596_v21 = vshrl.u32 %v12691_v62, 16  ;;  %v619_v22 = vshll.u32 %v12694_v8, 16  ;;  %v587_v23 = vor.u32 %v586_v12, %v582_v6  ;;  %v600_v24 = vrot.slane %v598_v13, 1  ;;  %v110_v28 = vld [vmem:[%s20885_s0 + $0xcc] sm:$0x1] }
  0x1e   :  { %939 = vrot.lane.b32.xlu1 %v552_v39, %s15184_s8  ;;  %v612_v25 = vshll.u32 %v12693_v14, 16  ;;  %v12695_v26 = vcombine.low %v43_v15, %v107_v16  ;;  %v45_v29 = vld [vmem:[%s20885_s0 + $0xc0] sm:$0xf]  ;;  %v109_v30 = vld [vmem:[%s20885_s0 + $0xc4] sm:$0x1]  ;;  %v617_v31 = vshrl.u32 %v12694_v8, 16  ;;  %v608_v33 = vor.u32 %v607_v20, %v603_v19 }
  0x1f   :  { %937 = vrot.lane.b32.xlu0 %v545_v45, %s15184_s8  ;;  %v633_v32 = vshll.u32 %v12696_v18, 16  ;;  %v621_v34 = vrot.slane %v619_v22, 1  ;;  %v610_v35 = vshrl.u32 %v12693_v14, 16  ;;  %v12698_v36 = vcombine.low %v46_v27, %v110_v28  ;;  %v48_v41 = vld [vmem:[%s20885_s0 + $0xd8] sm:$0xf] }
  0x20   :  { %v601_v37 = vor.u32 %v600_v24, %v596_v21  ;;  %v614_v38 = vrot.slane %v612_v25, 1  ;;  %v626_v39 = vshll.u32 %v12695_v26, 16  ;;  %v12697_v40 = vcombine.low %v45_v29, %v109_v30  ;;  %v112_v42 = vld [vmem:[%s20885_s0 + $0xdc] sm:$0x1]  ;;  %v47_v43 = vld [vmem:[%s20885_s0 + $0xd0] sm:$0xf] }
  0x21   :  { %v111_v44 = vld [vmem:[%s20885_s0 + $0xd4] sm:$0x1]  ;;  %v631_v45 = vshrl.u32 %v12696_v18, 16  ;;  %v635_v46 = vrot.slane %v633_v32, 1  ;;  %v622_v47 = vor.u32 %v621_v34, %v617_v31  ;;  %v624_v48 = vshrl.u32 %v12695_v26, 16 }
  0x22   :  { %943 = vrot.lane.b32.xlu1 %v566_v55, %s15184_s8  ;;  %v647_v49 = vshll.u32 %v12698_v36, 16  ;;  %v12700_v50 = vcombine.low %v48_v41, %v112_v42  ;;  %v615_v51 = vor.u32 %v614_v38, %v610_v35  ;;  %v628_v52 = vrot.slane %v626_v39, 1  ;;  %v50_v55 = vld [vmem:[%s20885_s0 + $0xe8] sm:$0xf]  ;;  %v114_v56 = vld [vmem:[%s20885_s0 + $0xec] sm:$0x1] }
  0x23   :  { %941 = vrot.lane.b32.xlu0 %v559_v59, %s15184_s8  ;;  %v640_v53 = vshll.u32 %v12697_v40, 16  ;;  %v12699_v54 = vcombine.low %v47_v43, %v111_v44  ;;  %v49_v57 = vld [vmem:[%s20885_s0 + $0xe0] sm:$0xf]  ;;  %v113_v58 = vld [vmem:[%s20885_s0 + $0xe4] sm:$0x1]  ;;  %v636_v59 = vor.u32 %v635_v46, %v631_v45  ;;  %v645_v60 = vshrl.u32 %v12698_v36, 16 }
  0x24   :  { %v649_v61 = vrot.slane %v647_v49, 1  ;;  %v638_v62 = vshrl.u32 %v12697_v40, 16  ;;  %v661_v63 = vshll.u32 %v12700_v50, 16  ;;  %v12702_v0 = vcombine.low %v50_v55, %v114_v56  ;;  %v116_v6 = vld [vmem:[%s20885_s0 + $0xfc] sm:$0x1] }
  0x25   :  { %v629_v1 = vor.u32 %v628_v52, %v624_v48  ;;  %v642_v2 = vrot.slane %v640_v53, 1  ;;  %v654_v3 = vshll.u32 %v12699_v54, 16  ;;  %v12701_v4 = vcombine.low %v49_v57, %v113_v58  ;;  %v51_v7 = vld [vmem:[%s20885_s0 + $0xf0] sm:$0xf]  ;;  %v115_v8 = vld [vmem:[%s20885_s0 + $0xf4] sm:$0x1] }
  0x26   :  { %947 = vrot.lane.b32.xlu1 %v580_v5, %s15184_s8  ;;  %v52_v5 = vld [vmem:[%s20885_s0 + $0xf8] sm:$0xf]  ;;  %v659_v9 = vshrl.u32 %v12700_v50, 16  ;;  %v652_v10 = vshrl.u32 %v12699_v54, 16  ;;  %v663_v12 = vrot.slane %v661_v63, 1  ;;  %v675_v13 = vshll.u32 %v12702_v0, 16 }
  0x27   :  { %945 = vrot.lane.b32.xlu0 %v573_v11, %s15184_s8  ;;  %v650_v11 = vor.u32 %v649_v61, %v645_v60  ;;  %v12704_v14 = vcombine.low %v52_v5, %v116_v6  ;;  %v643_v15 = vor.u32 %v642_v2, %v638_v62  ;;  %v656_v16 = vrot.slane %v654_v3, 1  ;;  %v54_v19 = vld [vmem:[%s20885_s0 + $0x118] sm:$0xf]  ;;  %v118_v20 = vld [vmem:[%s20885_s0 + $0x11c] sm:$0x1] }
  0x28   :  { %v12703_v18 = vcombine.low %v51_v7, %v115_v8  ;;  %v53_v21 = vld [vmem:[%s20885_s0 + $0x110] sm:$0xf]  ;;  %v117_v22 = vld [vmem:[%s20885_s0 + $0x114] sm:$0x1]  ;;  %v666_v24 = vshrl.u32 %v12701_v4, 16  ;;  %v664_v25 = vor.u32 %v663_v12, %v659_v9  ;;  %v677_v26 = vrot.slane %v675_v13, 1 }
  0x29   :  { %v689_v27 = vshll.u32 %v12704_v14, 16  ;;  %v12706_v28 = vcombine.low %v54_v19, %v118_v20  ;;  %v56_v29 = vld [vmem:[%s20885_s0 + $0x128] sm:$0xf]  ;;  %v120_v30 = vld [vmem:[%s20885_s0 + $0x12c] sm:$0x1]  ;;  %v657_v31 = vor.u32 %v656_v16, %v652_v10  ;;  %v12705_v34 = vcombine.low %v53_v21, %v117_v22 }
  0x2a   :  { %951 = vrot.lane.b32.xlu1 %v594_v17, %s15184_s8  ;;  %v668_v17 = vshll.u32 %v12701_v4, 16  ;;  %v55_v35 = vld [vmem:[%s20885_s0 + $0x120] sm:$0xf]  ;;  %v119_v36 = vld [vmem:[%s20885_s0 + $0x124] sm:$0x1]  ;;  %v680_v38 = vshrl.u32 %v12703_v18, 16  ;;  %v12708_v39 = vcombine.low %v56_v29, %v120_v30 }
  0x2b   :  { %949 = vrot.lane.b32.xlu0 %v587_v23, %s15184_s8  ;;  %v673_v23 = vshrl.u32 %v12702_v0, 16  ;;  %v691_v41 = vrot.slane %v689_v27, 1  ;;  %v703_v42 = vshll.u32 %v12706_v28, 16  ;;  %v58_v43 = vld [vmem:[%s20885_s0 + $0x138] sm:$0xf]  ;;  %v12707_v48 = vcombine.low %v55_v35, %v119_v36 }
  0x2c   :  { %v670_v32 = vrot.slane %v668_v17, 1  ;;  %v122_v44 = vld [vmem:[%s20885_s0 + $0x13c] sm:$0x1]  ;;  %v57_v49 = vld [vmem:[%s20885_s0 + $0x130] sm:$0xf]  ;;  %v717_v52 = vshll.u32 %v12708_v39, 16 }
  0x2d   :  { %v678_v40 = vor.u32 %v677_v26, %v673_v23  ;;  %v121_v50 = vld [vmem:[%s20885_s0 + $0x134] sm:$0x1]  ;;  %v12710_v53 = vcombine.low %v58_v43, %v122_v44  ;;  %v705_v55 = vrot.slane %v703_v42, 1  ;;  %v694_v56 = vshrl.u32 %v12705_v34, 16  ;;  %v60_v58 = vld [vmem:[%s20885_s0 + $0x148] sm:$0xf] }
  0x2e   :  { %955 = vrot.lane.b32.xlu1 %v608_v33, %s15184_s8  ;;  %v682_v33 = vshll.u32 %v12703_v18, 16  ;;  %v671_v45 = vor.u32 %v670_v32, %v666_v24  ;;  %v12709_v57 = vcombine.low %v57_v49, %v121_v50  ;;  %v710_v62 = vshll.u32 %v12707_v48, 16  ;;  %v59_v63 = vld [vmem:[%s20885_s0 + $0x140] sm:$0xf]  ;;  %v123_v0 = vld [vmem:[%s20885_s0 + $0x144] sm:$0x1] }
  0x2f   :  { %953 = vrot.lane.b32.xlu0 %v601_v37, %s15184_s8  ;;  %v687_v37 = vshrl.u32 %v12704_v14, 16  ;;  %v719_v2 = vrot.slane %v717_v52, 1  ;;  %v731_v3 = vshll.u32 %v12710_v53, 16  ;;  %v12711_v7 = vcombine.low %v59_v63, %v123_v0  ;;  %v62_v8 = vld [vmem:[%s20885_s0 + $0x158] sm:$0xf] }
  0x30   :  { %v684_v46 = vrot.slane %v682_v33, 1  ;;  %v724_v6 = vshll.u32 %v12709_v57, 16  ;;  %v126_v9 = vld [vmem:[%s20885_s0 + $0x15c] sm:$0x1]  ;;  %v712_v12 = vrot.slane %v710_v62, 1  ;;  %v722_v20 = vshrl.u32 %v12709_v57, 16 }
  0x31   :  { %v692_v54 = vor.u32 %v691_v41, %v687_v37  ;;  %v61_v13 = vld [vmem:[%s20885_s0 + $0x150] sm:$0xf]  ;;  %v125_v14 = vld [vmem:[%s20885_s0 + $0x154] sm:$0x1]  ;;  %v733_v17 = vrot.slane %v731_v3, 1  ;;  %v12714_v19 = vcombine.low %v62_v8, %v126_v9  ;;  %v738_v22 = vshll.u32 %v12711_v7, 16 }
  0x32   :  { %959 = vrot.lane.b32.xlu1 %v622_v47, %s15184_s8  ;;  %v696_v47 = vshll.u32 %v12705_v34, 16  ;;  %v685_v60 = vor.u32 %v684_v46, %v680_v38  ;;  %v726_v21 = vrot.slane %v724_v6, 1  ;;  %v12713_v23 = vcombine.low %v61_v13, %v125_v14  ;;  %v64_v24 = vld [vmem:[%s20885_s0 + $0x168] sm:$0xf]  ;;  %v128_v26 = vld [vmem:[%s20885_s0 + $0x16c] sm:$0x1] }
  0x33   :  { %957 = vrot.lane.b32.xlu0 %v615_v51, %s15184_s8  ;;  %v701_v51 = vshrl.u32 %v12706_v28, 16  ;;  %v63_v27 = vld [vmem:[%s20885_s0 + $0x160] sm:$0xf]  ;;  %v127_v28 = vld [vmem:[%s20885_s0 + $0x164] sm:$0x1]  ;;  %v736_v32 = vshrl.u32 %v12711_v7, 16  ;;  %v12716_v36 = vcombine.low %v64_v24, %v128_v26 }
  0x34   :  { %v698_v61 = vrot.slane %v696_v47, 1  ;;  %v759_v33 = vshll.u32 %v12714_v19, 16  ;;  %v740_v34 = vrot.slane %v738_v22, 1  ;;  %v752_v35 = vshll.u32 %v12713_v23, 16  ;;  %v66_v38 = vld [vmem:[%s20885_s0 + $0x178] sm:$0xf] }
  0x35   :  { %v706_v5 = vor.u32 %v705_v55, %v701_v51  ;;  %v12715_v37 = vcombine.low %v63_v27, %v127_v28  ;;  %v65_v41 = vld [vmem:[%s20885_s0 + $0x170] sm:$0xf]  ;;  %v129_v42 = vld [vmem:[%s20885_s0 + $0x174] sm:$0x1]  ;;  %v757_v44 = vshrl.u32 %v12714_v19, 16  ;;  %vm7356_vm4 = vcmask 130048  }
  0x36   :  { %963 = vrot.lane.b32.xlu1 %v636_v59, %s15184_s8  ;;  %v124_v59 = vld [vmem:[%s20885_s0 + $0x14c] sm:$0x1]  ;;  %v699_v10 = vor.u32 %v698_v61, %v694_v56  ;;  %v68_v46 = vld [vmem:[%s20885_s0 + $0x188] sm:$0xf]  ;;  %v12717_v51 = vcombine.low %v65_v41, %v129_v42  ;;  %v741_v52 = vor.u32 %v740_v34, %v736_v32  ;;  %v67_v56 = vld [vmem:[%s20885_s0 + $0x180] sm:$0xf] }
  0x37   :  { %961 = vrot.lane.b32.xlu0 %v629_v1, %s15184_s8  ;;  %v715_v1 = vshrl.u32 %v12708_v39, 16  ;;  %v12712_v4 = vcombine.low %v60_v58, %v124_v59  ;;  %v727_v39 = vor.u32 %v726_v21, %v722_v20  ;;  %v132_v47 = vld [vmem:[%s20885_s0 + $0x18c] sm:$0x1]  ;;  %v766_v49 = vshll.u32 %v12715_v37, 16  ;;  %v131_v57 = vld [vmem:[%s20885_s0 + $0x184] sm:$0x1] }
  0x38   :  { %v12720_v55 = vcombine.low %v68_v46, %v132_v47  ;;  %v771_v59 = vshrl.u32 %v12716_v36, 16  ;;  %v780_v0 = vshll.u32 %v12717_v51, 16  ;;  %v12719_v3 = vcombine.low %v67_v56, %v131_v57  ;;  %v133_v6 = vld [vmem:[%s20885_s0 + $0x194] sm:$0x1]  ;;  %v72_v14 = vld [vmem:[%s20885_s0 + $0x1a8] sm:$0xf] }
  0x39   :  { %v720_v16 = vor.u32 %v719_v2, %v715_v1  ;;  %v745_v18 = vshll.u32 %v12712_v4, 16  ;;  %v743_v29 = vshrl.u32 %v12712_v4, 16  ;;  %v768_v62 = vrot.slane %v766_v49, 1  ;;  %v70_v1 = vld [vmem:[%s20885_s0 + $0x198] sm:$0xf] }
  0x3a   :  { %967 = vrot.lane.b32.xlu1 %v650_v11, %s15184_s8  ;;  %v708_v11 = vshrl.u32 %v12707_v48, 16  ;;  %v773_v48 = vshll.u32 %v12716_v36, 16  ;;  %v134_v4 = vld [vmem:[%s20885_s0 + $0x19c] sm:$0x1]  ;;  %v801_v7 = vshll.u32 %v12720_v55, 16  ;;  %v778_v9 = vshrl.u32 %v12717_v51, 16 }
  0x3b   :  { %965 = vrot.lane.b32.xlu0 %v643_v15, %s15184_s8  ;;  %v729_v15 = vshrl.u32 %v12710_v53, 16  ;;  %v750_v53 = vshrl.u32 %v12713_v23, 16  ;;  %v71_v19 = vld [vmem:[%s20885_s0 + $0x1a0] sm:$0xf]  ;;  %v135_v20 = vld [vmem:[%s20885_s0 + $0x1a4] sm:$0x1] }
  0x3c   :  { %v775_v61 = vrot.slane %v773_v48, 1  ;;  %v799_v21 = vshrl.u32 %v12720_v55, 16  ;;  %v803_v22 = vrot.slane %v801_v7, 1  ;;  %v12723_v27 = vcombine.low %v71_v19, %v135_v20  ;;  %v74_v28 = vld [vmem:[%s20885_s0 + $0x1b8] sm:$0xf] }
  0x3d   :  { %v734_v30 = vor.u32 %v733_v17, %v729_v15  ;;  %v136_v15 = vld [vmem:[%s20885_s0 + $0x1ac] sm:$0x1]  ;;  %v782_v17 = vrot.slane %v780_v0, 1  ;;  %v137_v34 = vld [vmem:[%s20885_s0 + $0x1b4] sm:$0x1] }
  0x3e   :  { %971 = vrot.lane.b32.xlu1 %v664_v25, %s15184_s8  ;;  %v713_v25 = vor.u32 %v712_v12, %v708_v11  ;;  %v12722_v12 = vcombine.low %v70_v1, %v134_v4  ;;  %v12724_v23 = vcombine.low %v72_v14, %v136_v15  ;;  %v822_v42 = vshll.u32 %v12723_v27, 16  ;;  %v140_v46 = vld [vmem:[%s20885_s0 + $0x1cc] sm:$0x1]  ;;  %v75_v47 = vld [vmem:[%s20885_s0 + $0x1c0] sm:$0xf] }
  0x3f   :  { %969 = vrot.lane.b32.xlu0 %v657_v31, %s15184_s8  ;;  %v747_v31 = vrot.slane %v745_v18, 1  ;;  %v794_v18 = vshll.u32 %v12719_v3, 16  ;;  %v139_v48 = vld [vmem:[%s20885_s0 + $0x1c4] sm:$0x1]  ;;  %v78_v56 = vld [vmem:[%s20885_s0 + $0x1d8] sm:$0xf] }
  0x40   :  { %v813_v36 = vshrl.u32 %v12722_v12, 16  ;;  %v827_v49 = vshrl.u32 %v12724_v23, 16  ;;  %v12727_v55 = vcombine.low %v75_v47, %v139_v48  ;;  %v142_v57 = vld [vmem:[%s20885_s0 + $0x1dc] sm:$0x1]  ;;  %v80_v7 = vld [vmem:[%s20885_s0 + $0x1e8] sm:$0xf] }
  0x41   :  { %v748_v43 = vor.u32 %v747_v31, %v743_v29  ;;  %v138_v29 = vld [vmem:[%s20885_s0 + $0x1bc] sm:$0x1]  ;;  %v792_v31 = vshrl.u32 %v12719_v3, 16  ;;  %v796_v32 = vrot.slane %v794_v18, 1  ;;  %vm7677_vm5 = vsmask.f32 256 }
  0x42   :  { %975 = vrot.lane.b32.xlu1 %v678_v40, %s15184_s8  ;;  %v130_v40 = vld [vmem:[%s20885_s0 + $0x17c] sm:$0x1]  ;;  %vm7678_vm6 = vsmask.f32 4368 }
  0x43   :  { %973 = vrot.lane.b32.xlu0 %v671_v45, %s15184_s8  ;;  %v761_v45 = vrot.slane %v759_v33, 1  ;;  %v12718_v50 = vcombine.low %v66_v38, %v130_v40  ;;  %v73_v33 = vld [vmem:[%s20885_s0 + $0x1b0] sm:$0xf]  ;;  %v829_v38 = vshll.u32 %v12724_v23, 16  ;;  %v82_v23 = vld [vmem:[%s20885_s0 + $0x1f8] sm:$0xf]  ;;  %vm18814_vm7 = vmor %vm7677_vm5, %vm7678_vm6 }
  0x45   :  { %v762_v58 = vor.u32 %v761_v45, %v757_v44  ;;  %v787_v63 = vshll.u32 %v12718_v50, 16  ;;  %v785_v8 = vshrl.u32 %v12718_v50, 16  ;;  %v76_v44 = vld [vmem:[%s20885_s0 + $0x1c8] sm:$0xf]  ;;  %v797_v45 = vor.u32 %v796_v32, %v792_v31 }
  0x46   :  { %979 = vrot.lane.b32.xlu1 %v692_v54, %s15184_s8  ;;  %v754_v54 = vrot.slane %v752_v35, 1  ;;  %v804_v35 = vor.u32 %v803_v22, %v799_v21  ;;  %v831_v50 = vrot.slane %v829_v38, 1 }
  0x47   :  { %977 = vrot.lane.b32.xlu0 %v685_v60, %s15184_s8  ;;  %v764_v60 = vshrl.u32 %v12715_v37, 16  ;;  %v789_v11 = vrot.slane %v787_v63, 1 }
  0x48   :  { %v755_v2 = vor.u32 %v754_v54, %v750_v53  ;;  %v12728_v54 = vcombine.low %v76_v44, %v140_v46  ;;  %v832_v63 = vor.u32 %v831_v50, %v827_v49  ;;  %v12805_v44 = vld [vmem:[%s20885_s0 + $0x10] sm:$0xf] }
  0x49   :  { %v790_v24 = vor.u32 %v789_v11, %v785_v8  ;;  %v79_v11 = vld [vmem:[%s20885_s0 + $0x1e0] sm:$0xf] }
  0x4a   :  { %983 = vrot.lane.b32.xlu1 %v706_v5, %s15184_s8  ;;  %v69_v5 = vld [vmem:[%s20885_s0 + $0x190] sm:$0xf]  ;;  %v855_v14 = vshrl.u32 %v12728_v54, 16 }
  0x4b   :  { %981 = vrot.lane.b32.xlu0 %v699_v10, %s15184_s8  ;;  %v776_v10 = vor.u32 %v775_v61, %v771_v59  ;;  %v12721_v13 = vcombine.low %v69_v5, %v133_v6  ;;  %v820_v59 = vshrl.u32 %v12723_v27, 16  ;;  %v77_v61 = vld [vmem:[%s20885_s0 + $0x1d0] sm:$0xf]  ;;  %v857_v5 = vshll.u32 %v12728_v54, 16 }
  0x4c   :  { %v850_v6 = vshll.u32 %v12727_v55, 16 }
  0x4d   :  { %v808_v26 = vshll.u32 %v12721_v13, 16  ;;  %v806_v37 = vshrl.u32 %v12721_v13, 16 }
  0x4e   :  { %987 = vrot.lane.b32.xlu1 %v720_v16, %s15184_s8  ;;  %v769_v16 = vor.u32 %v768_v62, %v764_v60  ;;  %v824_v60 = vrot.slane %v822_v42, 1  ;;  %v141_v62 = vld [vmem:[%s20885_s0 + $0x1d4] sm:$0x1]  ;;  %v852_v21 = vrot.slane %v850_v6, 1 }
  0x4f   :  { %985 = vrot.lane.b32.xlu0 %v713_v25, %s15184_s8  ;;  %v815_v25 = vshll.u32 %v12722_v12, 16  ;;  %v810_v41 = vrot.slane %v808_v26, 1  ;;  %v143_v12 = vld [vmem:[%s20885_s0 + $0x1e4] sm:$0x1]  ;;  %v145_v26 = vld [vmem:[%s20885_s0 + $0x1f4] sm:$0x1] }
  0x50   :  { %v825_v8 = vor.u32 %v824_v60, %v820_v59  ;;  %v12731_v19 = vcombine.low %v79_v11, %v143_v12 }
  0x51   :  { %v817_v40 = vrot.slane %v815_v25, 1  ;;  %v81_v25 = vld [vmem:[%s20885_s0 + $0x1f0] sm:$0xf] }
  0x52   :  { %991 = vrot.lane.b32.xlu1 %v734_v30, %s15184_s8  ;;  %v783_v30 = vor.u32 %v782_v17, %v778_v9  ;;  %v12729_v9 = vcombine.low %v77_v61, %v141_v62  ;;  %v848_v17 = vshrl.u32 %v12727_v55, 16  ;;  %v12733_v38 = vcombine.low %v81_v25, %v145_v26 }
  0x53   :  { %989 = vrot.lane.b32.xlu0 %v727_v39, %s15184_s8  ;;  %v12726_v39 = vcombine.low %v74_v28, %v138_v29  ;;  %v84_v29 = vld [vmem:[%s20885_s0 + $0x208] sm:$0xf]  ;;  %v876_v47 = vshrl.u32 %v12731_v19, 16 }
  0x54   :  { %v864_v22 = vshll.u32 %v12729_v9, 16  ;;  %v890_v62 = vshrl.u32 %v12733_v38, 16 }
  0x55   :  { %v843_v51 = vshll.u32 %v12726_v39, 16  ;;  %v841_v0 = vshrl.u32 %v12726_v39, 16 }
  0x56   :  { %995 = vrot.lane.b32.xlu1 %v748_v43, %s15184_s8  ;;  %v12725_v43 = vcombine.low %v73_v33, %v137_v34  ;;  %v878_v33 = vshll.u32 %v12731_v19, 16 }
  0x57   :  { %993 = vrot.lane.b32.xlu0 %v741_v52, %s15184_s8  ;;  %v818_v52 = vor.u32 %v817_v40, %v813_v36  ;;  %v845_v1 = vrot.slane %v843_v51, 1  ;;  %v862_v36 = vshrl.u32 %v12729_v9, 16  ;;  %v83_v40 = vld [vmem:[%s20885_s0 + $0x200] sm:$0xf]  ;;  %v892_v51 = vshll.u32 %v12733_v38, 16 }
  0x58   :  { %v836_v53 = vshll.u32 %v12725_v43, 16  ;;  %v834_v3 = vshrl.u32 %v12725_v43, 16  ;;  %v880_v48 = vrot.slane %v878_v33, 1  ;;  %v12870_v9 = vld [vmem:[%s20885_s0 + $0x1c] sm:$0x1] }
  0x59   :  { %v846_v13 = vor.u32 %v845_v1, %v841_v0  ;;  %v12871_v0 = vld [vmem:[%s20885_s0 + $0x24] sm:$0x1]  ;;  %v894_v1 = vrot.slane %v892_v51, 1 }
  0x5a   :  { %999 = vrot.lane.b32.xlu1 %v762_v58, %s15184_s8  ;;  %v811_v58 = vor.u32 %v810_v41, %v806_v37  ;;  %v838_v4 = vrot.slane %v836_v53, 1  ;;  %v866_v37 = vrot.slane %v864_v22, 1  ;;  %v147_v41 = vld [vmem:[%s20885_s0 + $0x204] sm:$0x1]  ;;  %v14666_v53 = vld [vmem:[%s20886_s1 + $0x18] sm:$0xff]   ;;  %v881_v60 = vor.u32 %v880_v48, %v876_v47 }
  0x5b   :  { %997 = vrot.lane.b32.xlu0 %v755_v2, %s15184_s8  ;;  %v12730_v2 = vcombine.low %v78_v56, %v142_v57  ;;  %v12804_v56 = vld [vmem:[%s20885_s0 + $0x8] sm:$0xf]  ;;  %v12868_v57 = vld [vmem:[%s20885_s0 + $0xc] sm:$0x1]  ;;  %14271 = vmatprep.subr.bf16.mxu1 %v14666_v53  ;;  %v12810_v48 = vld [vmem:[%s20885_s0 + $0x38] sm:$0xf] }
  0x5c   :  { %v839_v20 = vor.u32 %v838_v4, %v834_v3  ;;  %v867_v50 = vor.u32 %v866_v37, %v862_v36  ;;  %v15697_v4 = vcombine.low %v12804_v56, %v12868_v57  ;;  %v14972_v37 = vld [vmem:[%s20885_s0 + $0x8] sm:$0xf]  ;;  %v14974_v56 = vld [vmem:[%s20885_s0 + $0x20] sm:$0xf] }
  0x5d   :  { %v871_v15 = vshll.u32 %v12730_v2, 16  ;;  %v869_v27 = vshrl.u32 %v12730_v2, 16 }
  0x5e   :  { %1003 = vrot.lane.b32.xlu1 %v776_v10, %s15184_s8  ;;  %v144_v10 = vld [vmem:[%s20885_s0 + $0x1ec] sm:$0x1]  ;;  %v2323_v26 = vshrl.u32 %v15697_v4, 16 }
  0x5f   :  { %1001 = vrot.lane.b32.xlu0 %v769_v16, %s15184_s8  ;;  %v859_v16 = vrot.slane %v857_v5, 1  ;;  %v12732_v18 = vcombine.low %v80_v7, %v144_v10  ;;  %v873_v28 = vrot.slane %v871_v15, 1  ;;  %v12873_v15 = vld [vmem:[%s20885_s0 + $0x34] sm:$0x1] }
  0x61   :  { %v860_v31 = vor.u32 %v859_v16, %v855_v14  ;;  %v885_v32 = vshll.u32 %v12732_v18, 16  ;;  %v874_v42 = vor.u32 %v873_v28, %v869_v27  ;;  %v883_v43 = vshrl.u32 %v12732_v18, 16  ;;  %v12809_v14 = vld [vmem:[%s20885_s0 + $0x30] sm:$0xf] }
  0x62   :  { %1007 = vrot.lane.b32.xlu1 %v790_v24, %s15184_s8  ;;  %v146_v24 = vld [vmem:[%s20885_s0 + $0x1fc] sm:$0x1]  ;;  %v895_v16 = vor.u32 %v894_v1, %v890_v62  ;;  %v2325_v18 = vshll.u32 %v15697_v4, 16  ;;  %v14969_v27 = vld [vmem:[%s20885_s0 + $0x10] sm:$0xf]  ;;  %v15737_v33 = vcombine.low %v12809_v14, %v12873_v15 }
  0x63   :  { %1005 = vrot.lane.b32.xlu0 %v783_v30, %s15184_s8  ;;  %v148_v30 = vld [vmem:[%s20885_s0 + $0x20c] sm:$0x1]  ;;  %v12734_v34 = vcombine.low %v82_v23, %v146_v24  ;;  %v887_v46 = vrot.slane %v885_v32, 1  ;;  %v12813_v1 = vld [vmem:[%s20885_s0 + $0x50] sm:$0xf] }
  0x64   :  { %v12736_v39 = vcombine.low %v84_v29, %v148_v30  ;;  %v14970_v29 = vld [vmem:[%s20885_s0 + $0x18] sm:$0xf]  ;;  %v2358_v4 = vshrl.u32 %v15737_v33, 16  ;;  %v12879_v14 = vld [vmem:[%s20885_s0 + $0x64] sm:$0x1] }
  0x65   :  { %v899_v49 = vshll.u32 %v12734_v34, 16  ;;  %v888_v59 = vor.u32 %v887_v46, %v883_v43  ;;  %v14976_v15 = vld [vmem:[%s20885_s0 + $0x30] sm:$0xf] }
  0x66   :  { %1011 = vrot.lane.b32.xlu1 %v804_v35, %s15184_s8  ;;  %v853_v35 = vor.u32 %v852_v21, %v848_v17  ;;  %v913_v54 = vshll.u32 %v12736_v39, 16  ;;  %v911_v2 = vshrl.u32 %v12736_v39, 16  ;;  %v12872_v21 = vld [vmem:[%s20885_s0 + $0x2c] sm:$0x1] }
  0x67   :  { %1009 = vrot.lane.b32.xlu0 %v797_v45, %s15184_s8  ;;  %v12869_v45 = vld [vmem:[%s20885_s0 + $0x14] sm:$0x1]  ;;  %v901_v61 = vrot.slane %v899_v49, 1  ;;  %v12874_v49 = vld [vmem:[%s20885_s0 + $0x3c] sm:$0x1] }
  0x68   :  { %v15680_v55 = vcombine.low %v12805_v44, %v12869_v45  ;;  %v915_v6 = vrot.slane %v913_v54, 1  ;;  %v12811_v44 = vld [vmem:[%s20885_s0 + $0x40] sm:$0xf]  ;;  %v12875_v45 = vld [vmem:[%s20885_s0 + $0x44] sm:$0x1] }
  0x6a   :  { %1015 = vrot.lane.b32.xlu1 %v818_v52, %s15184_s8  ;;  %v15675_v52 = vcombine.low %v83_v40, %v147_v41  ;;  %v2332_v7 = vshll.u32 %v15680_v55, 16  ;;  %v916_v23 = vor.u32 %v915_v6, %v911_v2  ;;  %v2330_v24 = vshrl.u32 %v15680_v55, 16  ;;  %v12877_v2 = vld [vmem:[%s20885_s0 + $0x54] sm:$0x1]  ;;  %v12876_v6 = vld [vmem:[%s20885_s0 + $0x4c] sm:$0x1] }
  0x6b   :  { %1013 = vrot.lane.b32.xlu0 %v811_v58, %s15184_s8  ;;  %v897_v58 = vshrl.u32 %v12734_v34, 16  ;;  %v14971_v34 = vld [vmem:[%s20885_s0] sm:$0xf]  ;;  %v2360_v55 = vshll.u32 %v15737_v33, 16 }
  0x6c   :  { %v906_v3 = vshll.u32 %v15675_v52, 16  ;;  %v2334_v25 = vrot.slane %v2332_v7, 1  ;;  %v14975_v7 = vld [vmem:[%s20885_s0 + $0x38] sm:$0xf] }
  0x6d   :  { %v902_v12 = vor.u32 %v901_v61, %v897_v58 }
  0x6e   :  { %1019 = vrot.lane.b32.xlu1 %v832_v63, %s15184_s8  ;;  %v12807_v63 = vld [vmem:[%s20885_s0 + $0x20] sm:$0xf]  ;;  %v908_v17 = vrot.slane %v906_v3, 1  ;;  %v2335_v58 = vor.u32 %v2334_v25, %v2330_v24 }
  0x6f   :  { %1017 = vrot.lane.b32.xlu0 %v825_v8, %s15184_s8  ;;  %v12806_v8 = vld [vmem:[%s20885_s0 + $0x18] sm:$0xf]  ;;  %v15706_v11 = vcombine.low %v12807_v63, %v12871_v0  ;;  %v15782_v0 = vcombine.low %v12810_v48, %v12874_v49 }
  0x70   :  { %v15718_v19 = vcombine.low %v12806_v8, %v12870_v9  ;;  %v14979_v49 = vld [vmem:[%s20885_s0 + $0x58] sm:$0xf] }
  0x71   :  { %v2346_v32 = vshll.u32 %v15706_v11, 16  ;;  %v2344_v47 = vshrl.u32 %v15706_v11, 16  ;;  %v2362_v11 = vrot.slane %v2360_v55, 1  ;;  %v2365_v33 = vshrl.u32 %v15782_v0, 16  ;;  %v14980_v55 = vld [vmem:[%s20885_s0 + $0x50] sm:$0xf] }
  0x72   :  { %1023 = vrot.lane.b32.xlu1 %v846_v13, %s15184_s8  ;;  %v904_v13 = vshrl.u32 %v15675_v52, 16  ;;  %v2339_v43 = vshll.u32 %v15718_v19, 16  ;;  %v2337_v54 = vshrl.u32 %v15718_v19, 16  ;;  %v15815_v19 = vcombine.low %v12813_v1, %v12877_v2  ;;  %v12818_v2 = vld [vmem:[%s20885_s0 + $0x78] sm:$0xf] }
  0x73   :  { %1021 = vrot.lane.b32.xlu0 %v839_v20, %s15184_s8  ;;  %v12808_v20 = vld [vmem:[%s20885_s0 + $0x28] sm:$0xf]  ;;  %v2348_v53 = vrot.slane %v2346_v32, 1 }
  0x74   :  { %v15748_v39 = vcombine.low %v12808_v20, %v12872_v21  ;;  %v909_v41 = vor.u32 %v908_v17, %v904_v13  ;;  %v2341_v63 = vrot.slane %v2339_v43, 1  ;;  %v12815_v13 = vld [vmem:[%s20885_s0 + $0x60] sm:$0xf] }
  0x75   :  { %v15821_v25 = vcombine.low %v12815_v13, %v12879_v14 }
  0x76   :  { %1027 = vrot.lane.b32.xlu1 %v860_v31, %s15184_s8  ;;  %v2342_v21 = vor.u32 %v2341_v63, %v2337_v54 }
  0x77   :  { %1025 = vrot.lane.b32.xlu0 %v853_v35, %s15184_s8  ;;  %v2402_v48 = vshll.u32 %v15821_v25, 16 }
  0x7a   :  { %1031 = vrot.lane.b32.xlu1 %v874_v42, %s15184_s8  ;;  %v2327_v42 = vrot.slane %v2325_v18, 1 }
  0x7b   :  { %1029 = vrot.lane.b32.xlu0 %v867_v50, %s15184_s8  ;;  %v14973_v50 = vld [vmem:[%s20885_s0 + $0x28] sm:$0xf] }
  0x7c   :  { %v922_v5 = vpop.permute.xlu1 %921  ;;  %v2328_v62 = vor.u32 %v2327_v42, %v2323_v26  ;;  %v12814_v26 = vld [vmem:[%s20885_s0 + $0x58] sm:$0xf] }
  0x7d   :  { %v918_v10 = vpop.permute.xlu0 %917  ;;  %v1054_v28 = vsel %vm1045_vm0, %v14969_v27, %v922_v5  ;;  %v12812_v5 = vld [vmem:[%s20885_s0 + $0x48] sm:$0xf]  ;;  %v12878_v27 = vld [vmem:[%s20885_s0 + $0x5c] sm:$0x1] }
  0x7e   :  { %1035 = vrot.lane.b32.xlu1 %v888_v59, %s15184_s8  ;;  %v1048_v35 = vsel %vm1045_vm0, %v14971_v34, %v918_v10  ;;  %v2353_v59 = vshll.u32 %v15748_v39, 16  ;;  %v2349_v10 = vor.u32 %v2348_v53, %v2344_v47  ;;  %v14978_v34 = vld [vmem:[%s20885_s0 + $0x40] sm:$0xf] }
  0x7f   :  { %1033 = vrot.lane.b32.xlu0 %v881_v60, %s15184_s8  ;;  %v15779_v60 = vcombine.low %v12811_v44, %v12875_v45  ;;  %v15850_v44 = vcombine.low %v12814_v26, %v12878_v27  ;;  %v12816_v45 = vld [vmem:[%s20885_s0 + $0x68] sm:$0xf] }
  0x80   :  { %v924_v22 = vpop.permute.xlu1 %923  ;;  %v2355_v17 = vrot.slane %v2353_v59, 1 }
  0x81   :  { %v1057_v30 = vsel %vm1045_vm0, %v14970_v29, %v924_v22  ;;  %v920_v31 = vpop.permute.xlu0 %919  ;;  %v2374_v18 = vshll.u32 %v15779_v60, 16  ;;  %v2367_v22 = vshll.u32 %v15782_v0, 16  ;;  %v2372_v32 = vshrl.u32 %v15779_v60, 16  ;;  %v12819_v60 = vld [vmem:[%s20885_s0 + $0x80] sm:$0xf] }
  0x82   :  { %v12738_v36 = vcombine.low %v1054_v28, %v1057_v30  ;;  %v1051_v38 = vsel %vm1045_vm0, %v14972_v37, %v920_v31  ;;  %1039 = vrot.lane.b32.xlu1 %v902_v12, %s15184_s8  ;;  %v2351_v12 = vshrl.u32 %v15748_v39, 16  ;;  %v14977_v28 = vld [vmem:[%s20885_s0 + $0x48] sm:$0xf]  ;;  %v2363_v31 = vor.u32 %v2362_v11, %v2358_v4  ;;  %v12817_v39 = vld [vmem:[%s20885_s0 + $0x70] sm:$0xf] }
  0x83   :  { %1037 = vrot.lane.b32.xlu0 %v895_v16, %s15184_s8  ;;  %v12737_v40 = vcombine.low %v1048_v35, %v1051_v38  ;;  %v2376_v37 = vrot.slane %v2374_v18, 1  ;;  %v2388_v38 = vshll.u32 %v15815_v19, 16  ;;  %v2369_v42 = vrot.slane %v2367_v22, 1  ;;  %v12885_v18 = vld [vmem:[%s20885_s0 + $0x94] sm:$0x1] }
  0x84   :  { %v928_v46 = vpop.permute.xlu1 %927  ;;  %v2395_v1 = vshll.u32 %v15850_v44, 16 }
  0x85   :  { %v1063_v51 = vsel %vm1045_vm0, %v14973_v50, %v928_v46  ;;  %14207 = vmatprep.mubr.msk.bf16.mxu0 %vm1422_vm1, %v12737_v40  ;;  %v926_v52 = vpop.permute.xlu0 %925  ;;  %v12881_v40 = vld [vmem:[%s20885_s0 + $0x74] sm:$0x1]  ;;  %v12880_v46 = vld [vmem:[%s20885_s0 + $0x6c] sm:$0x1]  ;;  %v2370_v63 = vor.u32 %v2369_v42, %v2365_v33  ;;  %v12887_v42 = vld [vmem:[%s20885_s0 + $0xa4] sm:$0x1] }
  0x86   :  { %v1060_v57 = vsel %vm1045_vm0, %v14974_v56, %v926_v52  ;;  %14208 = vmatmul.mubr.msk.bf16.vlgmr.msra.gmra.mrb[0].mxu0 %vm1422_vm1, %v12738_v36  ;;  %1043 = vrot.lane.b32.xlu1 %v916_v23, %s15184_s8  ;;  %v15819_v23 = vcombine.low %v12812_v5, %v12876_v6  ;;  %v2356_v36 = vor.u32 %v2355_v17, %v2351_v12  ;;  %v2386_v52 = vshrl.u32 %v15815_v19, 16  ;;  %v14982_v12 = vld [vmem:[%s20885_s0 + $0x60] sm:$0xf]  ;;  %v12821_v17 = vld [vmem:[%s20885_s0 + $0x90] sm:$0xf] }
  0x87   :  { %v12739_v61 = vcombine.low %v1060_v57, %v1063_v51  ;;  %1041 = vrot.lane.b32.xlu0 %v909_v41, %s15184_s8  ;;  %v15866_v54 = vcombine.low %v12817_v39, %v12881_v40  ;;  %v2377_v57 = vor.u32 %v2376_v37, %v2372_v32  ;;  %v15873_v59 = vcombine.low %v12816_v45, %v12880_v46  ;;  %v12822_v45 = vld [vmem:[%s20885_s0 + $0x98] sm:$0xf]  ;;  %v12886_v46 = vld [vmem:[%s20885_s0 + $0x9c] sm:$0x1] }
  0x88   :  { %v932_v3 = vpop.permute.xlu1 %931  ;;  %v2381_v43 = vshll.u32 %v15819_v23, 16  ;;  %v2379_v53 = vshrl.u32 %v15819_v23, 16  ;;  %v2400_v5 = vshrl.u32 %v15821_v25, 16  ;;  %v2404_v6 = vrot.slane %v2402_v48, 1  ;;  %v12820_v23 = vld [vmem:[%s20885_s0 + $0x88] sm:$0xf] }
  0x89   :  { %v1069_v8 = vsel %vm1045_vm0, %v14975_v7, %v932_v3  ;;  %14211 = vmatprep.mubr.msk.bf16.mxu0 %vm1422_vm1, %v12739_v61  ;;  %v930_v9 = vpop.permute.xlu0 %929  ;;  %v12883_v61 = vld [vmem:[%s20885_s0 + $0x84] sm:$0x1]  ;;  %v12882_v3 = vld [vmem:[%s20885_s0 + $0x7c] sm:$0x1]  ;;  %v14981_v7 = vld [vmem:[%s20885_s0 + $0x68] sm:$0xf] }
  0x8a   :  { %v1066_v16 = vsel %vm1045_vm0, %v14976_v15, %v930_v9  ;;  %2772 = vrot.lane.b32.xlu1 %v2335_v58, %s15184_s8  ;;  %v2390_v58 = vrot.slane %v2388_v38, 1  ;;  %v2383_v0 = vrot.slane %v2381_v43, 1  ;;  %v15895_v11 = vcombine.low %v12819_v60, %v12883_v61 }
  0x8b   :  { %v12740_v20 = vcombine.low %v1066_v16, %v1069_v8  ;;  %2770 = vrot.lane.b32.xlu0 %v2328_v62, %s15184_s8  ;;  %v2409_v15 = vshll.u32 %v15873_v59, 16  ;;  %v15904_v16 = vcombine.low %v12818_v2, %v12882_v3  ;;  %v2397_v22 = vrot.slane %v2395_v1, 1 }
  0x8c   :  { %v936_v24 = vpop.permute.xlu1 %935  ;;  %v2391_v14 = vor.u32 %v2390_v58, %v2386_v52  ;;  %v2405_v26 = vor.u32 %v2404_v6, %v2400_v5  ;;  %v2414_v27 = vshrl.u32 %v15866_v54, 16  ;;  %v2428_v48 = vshrl.u32 %v15895_v11, 16  ;;  %v14986_v58 = vld [vmem:[%s20885_s0 + $0x80] sm:$0xf]  ;;  %v12824_v5 = vld [vmem:[%s20885_s0 + $0xa8] sm:$0xf] }
  0x8d   :  { %v1075_v29 = vsel %vm1045_vm0, %v14977_v28, %v936_v24  ;;  %v934_v30 = vpop.permute.xlu0 %933  ;;  %v12884_v24 = vld [vmem:[%s20885_s0 + $0x8c] sm:$0x1]  ;;  %v2407_v28 = vshrl.u32 %v15873_v59, 16  ;;  %v2411_v38 = vrot.slane %v2409_v15, 1  ;;  %v2423_v39 = vshll.u32 %v15904_v16, 16 }
  0x8e   :  { %v1072_v35 = vsel %vm1045_vm0, %v14978_v34, %v934_v30  ;;  %14212 = vmatmul.mubr.msk.bf16.gmra.mrb[4].mxu0 %vm1422_vm1, %v12740_v20  ;;  %2776 = vrot.lane.b32.xlu1 %v2349_v10, %s15184_s8  ;;  %v2416_v10 = vshll.u32 %v15866_v54, 16  ;;  %v2384_v20 = vor.u32 %v2383_v0, %v2379_v53  ;;  %v14983_v30 = vld [vmem:[%s20885_s0 + $0x78] sm:$0xf]  ;;  %v2430_v34 = vshll.u32 %v15895_v11, 16  ;;  %v12888_v6 = vld [vmem:[%s20885_s0 + $0xac] sm:$0x1] }
  0x8f   :  { %v12741_v41 = vcombine.low %v1072_v35, %v1075_v29  ;;  %2774 = vrot.lane.b32.xlu0 %v2342_v21, %s15184_s8  ;;  %v2393_v21 = vshrl.u32 %v15850_v44, 16  ;;  %v14685_v29 = vld [vmem:[%s20886_s1 + $0x30] sm:$0xff]   ;;  %v15931_v35 = vcombine.low %v12821_v17, %v12885_v18  ;;  %v15939_v40 = vcombine.low %v12820_v23, %v12884_v24  ;;  %v12890_v24 = vld [vmem:[%s20885_s0 + $0xbc] sm:$0x1] }
  0x90   :  { %v940_v47 = vpop.permute.xlu1 %939  ;;  %v2418_v33 = vrot.slane %v2416_v10, 1  ;;  %14341 = vmatprep.subr.bf16.mxu0 %v14685_v29  ;;  %v2432_v60 = vrot.slane %v2430_v34, 1  ;;  %v2412_v0 = vor.u32 %v2411_v38, %v2407_v28  ;;  %v2425_v1 = vrot.slane %v2423_v39, 1  ;;  %v12829_v38 = vld [vmem:[%s20885_s0 + $0xd0] sm:$0xf] }
  0x91   :  { %v1081_v50 = vsel %vm1045_vm0, %v14979_v49, %v940_v47  ;;  %14215 = vmatprep.mubr.msk.bf16.mxu0 %vm1422_vm1, %v12741_v41  ;;  %v938_v51 = vpop.permute.xlu0 %937  ;;  %v12823_v41 = vld [vmem:[%s20885_s0 + $0xa0] sm:$0xf]  ;;  %v2398_v44 = vor.u32 %v2397_v22, %v2393_v21  ;;  %14342 = vmatpush3.bf16.msra.mxu0 %v14685_v29  ;;  %v2421_v49 = vshrl.u32 %v15904_v16, 16  ;;  %v2444_v54 = vshll.u32 %v15931_v35, 16  ;;  %v12893_v39 = vld [vmem:[%s20885_s0 + $0xd4] sm:$0x1] }
  0x92   :  { %v1078_v56 = vsel %vm1045_vm0, %v14980_v55, %v938_v51  ;;  %2780 = vrot.lane.b32.xlu1 %v2363_v31, %s15184_s8  ;;  %v2419_v53 = vor.u32 %v2418_v33, %v2414_v27  ;;  %v15961_v55 = vcombine.low %v12823_v41, %v12887_v42  ;;  %v2437_v61 = vshll.u32 %v15939_v40, 16  ;;  %v14989_v27 = vld [vmem:[%s20885_s0 + $0xa8] sm:$0xf]  ;;  %v14990_v33 = vld [vmem:[%s20885_s0 + $0xa0] sm:$0xf] }
  0x93   :  { %v12742_v62 = vcombine.low %v1078_v56, %v1081_v50  ;;  %2778 = vrot.lane.b32.xlu0 %v2356_v36, %s15184_s8  ;;  %v14984_v36 = vld [vmem:[%s20885_s0 + $0x70] sm:$0xf]  ;;  %v14985_v50 = vld [vmem:[%s20885_s0 + $0x88] sm:$0xf]  ;;  %v2442_v2 = vshrl.u32 %v15931_v35, 16  ;;  %v2446_v10 = vrot.slane %v2444_v54, 1  ;;  %v2433_v16 = vor.u32 %v2432_v60, %v2428_v48 }
  0x94   :  { %v944_v4 = vpop.permute.xlu1 %943  ;;  %v12825_v56 = vld [vmem:[%s20885_s0 + $0xb0] sm:$0xf]  ;;  %v2435_v11 = vshrl.u32 %v15939_v40, 16  ;;  %v2439_v17 = vrot.slane %v2437_v61, 1  ;;  %v2426_v22 = vor.u32 %v2425_v1, %v2421_v49  ;;  %v16011_v23 = vcombine.low %v12824_v5, %v12888_v6  ;;  %v14991_v49 = vld [vmem:[%s20885_s0 + $0xb8] sm:$0xf] }
  0x95   :  { %v1087_v8 = vsel %vm1045_vm0, %v14981_v7, %v944_v4  ;;  %v942_v9 = vpop.permute.xlu0 %941  ;;  %v14987_v7 = vld [vmem:[%s20885_s0 + $0x98] sm:$0xf]  ;;  %v14992_v54 = vld [vmem:[%s20885_s0 + $0xb0] sm:$0xf]  ;;  %v12895_v60 = vld [vmem:[%s20885_s0 + $0xe4] sm:$0x1] }
  0x96   :  { %v1084_v13 = vsel %vm1045_vm0, %v14982_v12, %v942_v9  ;;  %14216 = vmatmul.mubr.msk.bf16.gmra.mrb[8].mxu0 %vm1422_vm1, %v12742_v62  ;;  %2784 = vrot.lane.b32.xlu1 %v2377_v57, %s15184_s8  ;;  %v12889_v57 = vld [vmem:[%s20885_s0 + $0xb4] sm:$0x1]  ;;  %v15976_v62 = vcombine.low %v12822_v45, %v12886_v46  ;;  %v2458_v12 = vshll.u32 %v15961_v55, 16  ;;  %v2440_v41 = vor.u32 %v2439_v17, %v2435_v11  ;;  %v12892_v45 = vld [vmem:[%s20885_s0 + $0xcc] sm:$0x1] }
  0x97   :  { %v12743_v19 = vcombine.low %v1084_v13, %v1087_v8  ;;  %2782 = vrot.lane.b32.xlu0 %v2370_v63, %s15184_s8  ;;  %v15980_v4 = vcombine.low %v12825_v56, %v12889_v57  ;;  %v12827_v13 = vld [vmem:[%s20885_s0 + $0xc0] sm:$0xf]  ;;  %v12894_v5 = vld [vmem:[%s20885_s0 + $0xdc] sm:$0x1]  ;;  %v14993_v6 = vld [vmem:[%s20885_s0 + $0xc8] sm:$0xf] }
  0x98   :  { %v948_v25 = vpop.permute.xlu1 %947  ;;  %v2451_v18 = vshll.u32 %v15976_v62, 16  ;;  %v2449_v35 = vshrl.u32 %v15976_v62, 16  ;;  %v12833_v17 = vld [vmem:[%s20885_s0 + $0xf0] sm:$0xf] }
  0x99   :  { %v1093_v31 = vsel %vm1045_vm0, %v14983_v30, %v948_v25  ;;  %14219 = vmatprep.mubr.msk.bf16.mxu0 %vm1422_vm1, %v12743_v19  ;;  %v946_v32 = vpop.permute.xlu0 %945  ;;  %v12891_v19 = vld [vmem:[%s20885_s0 + $0xc4] sm:$0x1]  ;;  %v2447_v30 = vor.u32 %v2446_v10, %v2442_v2 }
  0x9a   :  { %v1090_v37 = vsel %vm1045_vm0, %v14984_v36, %v946_v32  ;;  %2788 = vrot.lane.b32.xlu1 %v2391_v14, %s15184_s8  ;;  %v14988_v14 = vld [vmem:[%s20885_s0 + $0x90] sm:$0xf]  ;;  %v2460_v32 = vrot.slane %v2458_v12, 1  ;;  %v16029_v36 = vcombine.low %v12827_v13, %v12891_v19  ;;  %v2453_v42 = vrot.slane %v2451_v18, 1  ;;  %v14994_v12 = vld [vmem:[%s20885_s0 + $0xc0] sm:$0xf] }
  0x9b   :  { %v12744_v43 = vcombine.low %v1090_v37, %v1093_v31  ;;  %2786 = vrot.lane.b32.xlu0 %v2384_v20, %s15184_s8  ;;  %v12826_v20 = vld [vmem:[%s20885_s0 + $0xb8] sm:$0xf]  ;;  %v2456_v31 = vshrl.u32 %v15961_v55, 16 }
  0x9c   :  { %v952_v47 = vpop.permute.xlu1 %951  ;;  %v16031_v37 = vcombine.low %v12826_v20, %v12890_v24  ;;  %v2486_v56 = vshll.u32 %v16029_v36, 16  ;;  %v2454_v62 = vor.u32 %v2453_v42, %v2449_v35 }
  0x9d   :  { %v1099_v51 = vsel %vm1045_vm0, %v14985_v50, %v952_v47  ;;  %v950_v52 = vpop.permute.xlu0 %949  ;;  %v2470_v47 = vshrl.u32 %v15980_v4, 16 }
  0x9e   :  { %v1096_v59 = vsel %vm1045_vm0, %v14986_v58, %v950_v52  ;;  %14220 = vmatmul.mubr.msk.bf16.gmra.mrb[12].mxu0 %vm1422_vm1, %v12744_v43  ;;  %2792 = vrot.lane.b32.xlu1 %v2405_v26, %s15184_s8  ;;  %v2472_v26 = vshll.u32 %v15980_v4, 16  ;;  %v2465_v43 = vshll.u32 %v16011_v23, 16  ;;  %v2461_v52 = vor.u32 %v2460_v32, %v2456_v31  ;;  %v12830_v4 = vld [vmem:[%s20885_s0 + $0xd8] sm:$0xf]  ;;  %v14996_v32 = vld [vmem:[%s20885_s0 + $0xd0] sm:$0xf] }
  0x9f   :  { %v12745_v63 = vcombine.low %v1096_v59, %v1099_v51  ;;  %2790 = vrot.lane.b32.xlu0 %v2398_v44, %s15184_s8  ;;  %v12828_v44 = vld [vmem:[%s20885_s0 + $0xc8] sm:$0xf]  ;;  %v2479_v57 = vshll.u32 %v16031_v37, 16  ;;  %v12831_v59 = vld [vmem:[%s20885_s0 + $0xe0] sm:$0xf]  ;;  %v16098_v20 = vcombine.low %v12830_v4, %v12894_v5 }
  0xa0   :  { %v956_v3 = vpop.permute.xlu1 %955  ;;  %v2474_v48 = vrot.slane %v2472_v26, 1  ;;  %v16062_v58 = vcombine.low %v12828_v44, %v12892_v45  ;;  %v16085_v11 = vcombine.low %v12831_v59, %v12895_v60  ;;  %v14995_v26 = vld [vmem:[%s20885_s0 + $0xd8] sm:$0xf]  ;;  %v12901_v59 = vld [vmem:[%s20885_s0 + $0x124] sm:$0x1] }
  0xa1   :  { %v1105_v8 = vsel %vm1045_vm0, %v14987_v7, %v956_v3  ;;  %14223 = vmatprep.mubr.msk.bf16.mxu0 %vm1422_vm1, %v12745_v63  ;;  %v954_v9 = vpop.permute.xlu0 %953  ;;  %v2463_v63 = vshrl.u32 %v16011_v23, 16  ;;  %v2484_v3 = vshrl.u32 %v16029_v36, 16  ;;  %v12896_v23 = vld [vmem:[%s20885_s0 + $0xec] sm:$0x1]  ;;  %v2507_v42 = vshll.u32 %v16098_v20, 16 }
  0xa2   :  { %v1102_v15 = vsel %vm1045_vm0, %v14988_v14, %v954_v9  ;;  %2796 = vrot.lane.b32.xlu1 %v2419_v53, %s15184_s8  ;;  %v16053_v53 = vcombine.low %v12829_v38, %v12893_v39  ;;  %v2475_v2 = vor.u32 %v2474_v48, %v2470_v47  ;;  %v2477_v9 = vshrl.u32 %v16031_v37, 16  ;;  %v12835_v37 = vld [vmem:[%s20885_s0 + $0x100] sm:$0xf]  ;;  %v12899_v38 = vld [vmem:[%s20885_s0 + $0x104] sm:$0x1] }
  0xa3   :  { %v12746_v21 = vcombine.low %v1102_v15, %v1105_v8  ;;  %2794 = vrot.lane.b32.xlu0 %v2412_v0, %s15184_s8  ;;  %v2467_v0 = vrot.slane %v2465_v43, 1  ;;  %v2488_v14 = vrot.slane %v2486_v56, 1  ;;  %v2481_v15 = vrot.slane %v2479_v57, 1  ;;  %v12834_v45 = vld [vmem:[%s20885_s0 + $0xf8] sm:$0xf] }
  0xa4   :  { %v960_v25 = vpop.permute.xlu1 %959  ;;  %v2500_v10 = vshll.u32 %v16053_v53, 16  ;;  %v2514_v31 = vshll.u32 %v16085_v11, 16  ;;  %v2512_v44 = vshrl.u32 %v16085_v11, 16  ;;  %v14997_v47 = vld [vmem:[%s20885_s0 + $0xe8] sm:$0xf] }
  0xa5   :  { %v1111_v28 = vsel %vm1045_vm0, %v14989_v27, %v960_v25  ;;  %v958_v29 = vpop.permute.xlu0 %957  ;;  %v2468_v19 = vor.u32 %v2467_v0, %v2463_v63  ;;  %v2498_v25 = vshrl.u32 %v16053_v53, 16  ;;  %v14998_v53 = vld [vmem:[%s20885_s0 + $0xe0] sm:$0xf]  ;;  %v14999_v4 = vld [vmem:[%s20885_s0 + $0xf8] sm:$0xf] }
  0xa6   :  { %v1108_v34 = vsel %vm1045_vm0, %v14990_v33, %v958_v29  ;;  %14224 = vmatmul.mubr.msk.bf16.gmra.mrb[16].mxu0 %vm1422_vm1, %v12746_v21  ;;  %2800 = vrot.lane.b32.xlu1 %v2433_v16, %s15184_s8  ;;  %v2493_v16 = vshll.u32 %v16062_v58, 16  ;;  %v12897_v21 = vld [vmem:[%s20885_s0 + $0xf4] sm:$0x1]  ;;  %v2502_v29 = vrot.slane %v2500_v10, 1  ;;  %v15000_v10 = vld [vmem:[%s20885_s0 + $0xf0] sm:$0xf] }
  0xa7   :  { %v12747_v40 = vcombine.low %v1108_v34, %v1111_v28  ;;  %2798 = vrot.lane.b32.xlu0 %v2426_v22, %s15184_s8  ;;  %v12832_v22 = vld [vmem:[%s20885_s0 + $0xe8] sm:$0xf]  ;;  %v2489_v34 = vor.u32 %v2488_v14, %v2484_v3  ;;  %v16122_v35 = vcombine.low %v12833_v17, %v12897_v21  ;;  %v12900_v3 = vld [vmem:[%s20885_s0 + $0x11c] sm:$0x1] }
  0xa8   :  { %v964_v46 = vpop.permute.xlu1 %963  ;;  %v16124_v36 = vcombine.low %v12832_v22, %v12896_v23  ;;  %v12838_v21 = vld [vmem:[%s20885_s0 + $0x128] sm:$0xf]  ;;  %v12902_v22 = vld [vmem:[%s20885_s0 + $0x12c] sm:$0x1]  ;;  %v14702_v23 = vld [vmem:[%s20886_s1 + $0x38] sm:$0xff]  }
  0xa9   :  { %v1117_v50 = vsel %vm1045_vm0, %v14991_v49, %v964_v46  ;;  %14227 = vmatprep.mubr.msk.bf16.mxu0 %vm1422_vm1, %v12747_v40  ;;  %v962_v51 = vpop.permute.xlu0 %961  ;;  %v2482_v40 = vor.u32 %v2481_v15, %v2477_v9  ;;  %v12898_v46 = vld [vmem:[%s20885_s0 + $0xfc] sm:$0x1]  ;;  %v2528_v56 = vshll.u32 %v16122_v35, 16  ;;  %v12839_v15 = vld [vmem:[%s20885_s0 + $0x130] sm:$0xf]  ;;  %14343 = vmatprep.subr.bf16.mxu0 %v14702_v23 }
  0xaa   :  { %v1114_v55 = vsel %vm1045_vm0, %v14992_v54, %v962_v51  ;;  %2804 = vrot.lane.b32.xlu1 %v2447_v30, %s15184_s8  ;;  %v2491_v30 = vshrl.u32 %v16062_v58, 16  ;;  %v2505_v51 = vshrl.u32 %v16098_v20, 16  ;;  %v2521_v57 = vshll.u32 %v16124_v36, 16  ;;  %v12837_v58 = vld [vmem:[%s20885_s0 + $0x120] sm:$0xf]  ;;  %14344 = vmatpush3.bf16.msra.mxu0 %v14702_v23 }
  0xab   :  { %v12748_v61 = vcombine.low %v1114_v55, %v1117_v50  ;;  %2802 = vrot.lane.b32.xlu0 %v2440_v41, %s15184_s8  ;;  %v2495_v41 = vrot.slane %v2493_v16, 1  ;;  %v2516_v50 = vrot.slane %v2514_v31, 1  ;;  %v2503_v55 = vor.u32 %v2502_v29, %v2498_v25  ;;  %v12903_v16 = vld [vmem:[%s20885_s0 + $0x134] sm:$0x1]  ;;  %v12844_v23 = vld [vmem:[%s20885_s0 + $0x158] sm:$0xf] }
  0xac   :  { %v968_v1 = vpop.permute.xlu1 %967  ;;  %v16163_v63 = vcombine.low %v12834_v45, %v12898_v46  ;;  %v16179_v9 = vcombine.low %v12837_v58, %v12901_v59  ;;  %v2523_v14 = vrot.slane %v2521_v57, 1  ;;  %v16211_v31 = vcombine.low %v12839_v15, %v12903_v16  ;;  %v12840_v45 = vld [vmem:[%s20885_s0 + $0x138] sm:$0xf]  ;;  %v12904_v46 = vld [vmem:[%s20885_s0 + $0x13c] sm:$0x1] }
  0xad   :  { %v1123_v7 = vsel %vm1045_vm0, %v14993_v6, %v968_v1  ;;  %v966_v8 = vpop.permute.xlu0 %965  ;;  %v2526_v1 = vshrl.u32 %v16122_v35, 16 }
  0xae   :  { %v1120_v13 = vsel %vm1045_vm0, %v14994_v12, %v966_v8  ;;  %14228 = vmatmul.mubr.msk.bf16.gmra.mrb[20].mxu0 %vm1422_vm1, %v12748_v61  ;;  %2808 = vrot.lane.b32.xlu1 %v2461_v52, %s15184_s8  ;;  %v16146_v52 = vcombine.low %v12835_v37, %v12899_v38  ;;  %v2496_v61 = vor.u32 %v2495_v41, %v2491_v30  ;;  %v2556_v30 = vshll.u32 %v16179_v9, 16  ;;  %v12841_v41 = vld [vmem:[%s20885_s0 + $0x140] sm:$0xf] }
  0xaf   :  { %v12749_v18 = vcombine.low %v1120_v13, %v1123_v7  ;;  %2806 = vrot.lane.b32.xlu0 %v2454_v62, %s15184_s8  ;;  %v2509_v62 = vrot.slane %v2507_v42, 1  ;;  %v2519_v7 = vshrl.u32 %v16124_v36, 16  ;;  %v2517_v12 = vor.u32 %v2516_v50, %v2512_v44  ;;  %v12905_v42 = vld [vmem:[%s20885_s0 + $0x144] sm:$0x1] }
  0xb0   :  { %v972_v24 = vpop.permute.xlu1 %971  ;;  %v2542_v8 = vshll.u32 %v16146_v52, 16  ;;  %v2530_v13 = vrot.slane %v2528_v56, 1  ;;  %v2540_v25 = vshrl.u32 %v16146_v52, 16  ;;  %v2533_v35 = vshrl.u32 %v16163_v63, 16 }
  0xb1   :  { %v1129_v27 = vsel %vm1045_vm0, %v14995_v26, %v972_v24  ;;  %14231 = vmatprep.mubr.msk.bf16.mxu0 %vm1422_vm1, %v12749_v18  ;;  %v970_v28 = vpop.permute.xlu0 %969  ;;  %v2510_v18 = vor.u32 %v2509_v62, %v2505_v51  ;;  %v15001_v26 = vld [vmem:[%s20885_s0 + $0x118] sm:$0xf]  ;;  %v16220_v36 = vcombine.low %v12838_v21, %v12902_v22  ;;  %v2524_v38 = vor.u32 %v2523_v14, %v2519_v7 }
  0xb2   :  { %v1126_v33 = vsel %vm1045_vm0, %v14996_v32, %v970_v28  ;;  %2812 = vrot.lane.b32.xlu1 %v2475_v2, %s15184_s8  ;;  %v12836_v2 = vld [vmem:[%s20885_s0 + $0x118] sm:$0xf]  ;;  %v2544_v29 = vrot.slane %v2542_v8, 1  ;;  %v15002_v32 = vld [vmem:[%s20885_s0 + $0x110] sm:$0xf]  ;;  %v2554_v44 = vshrl.u32 %v16179_v9, 16  ;;  %v16256_v59 = vcombine.low %v12841_v41, %v12905_v42 }
  0xb3   :  { %v12750_v39 = vcombine.low %v1126_v33, %v1129_v27  ;;  %2810 = vrot.lane.b32.xlu0 %v2468_v19, %s15184_s8  ;;  %v2535_v19 = vshll.u32 %v16163_v63, 16  ;;  %v16194_v20 = vcombine.low %v12836_v2, %v12900_v3  ;;  %v2558_v51 = vrot.slane %v2556_v30, 1 }
  0xb4   :  { %v976_v43 = vpop.permute.xlu1 %975  ;;  %v2545_v50 = vor.u32 %v2544_v29, %v2540_v25  ;;  %v2570_v52 = vshll.u32 %v16211_v31, 16  ;;  %v2563_v58 = vshll.u32 %v16220_v36, 16  ;;  %v16259_v63 = vcombine.low %v12840_v45, %v12904_v46  ;;  %v15007_v25 = vld [vmem:[%s20885_s0 + $0x148] sm:$0xf]  ;;  %v12910_v46 = vld [vmem:[%s20885_s0 + $0x16c] sm:$0x1] }
  0xb5   :  { %v1135_v48 = vsel %vm1045_vm0, %v14997_v47, %v976_v43  ;;  %v974_v49 = vpop.permute.xlu0 %973  ;;  %v15003_v47 = vld [vmem:[%s20885_s0 + $0x128] sm:$0xf]  ;;  %v2547_v57 = vshrl.u32 %v16194_v20, 16  ;;  %v2568_v3 = vshrl.u32 %v16211_v31, 16  ;;  %v2559_v8 = vor.u32 %v2558_v51, %v2554_v44  ;;  %v15008_v31 = vld [vmem:[%s20885_s0 + $0x140] sm:$0xf] }
  0xb6   :  { %v1132_v54 = vsel %vm1045_vm0, %v14998_v53, %v974_v49  ;;  %14232 = vmatmul.mubr.msk.bf16.gmra.mrb[24].mxu0 %vm1422_vm1, %v12750_v39  ;;  %2816 = vrot.lane.b32.xlu1 %v2489_v34, %s15184_s8  ;;  %v2531_v34 = vor.u32 %v2530_v13, %v2526_v1  ;;  %v2537_v39 = vrot.slane %v2535_v19, 1  ;;  %v12843_v53 = vld [vmem:[%s20885_s0 + $0x150] sm:$0xf]  ;;  %v12906_v1 = vld [vmem:[%s20885_s0 + $0x14c] sm:$0x1]  ;;  %v2572_v9 = vrot.slane %v2570_v52, 1 }
  0xb7   :  { %v12751_v60 = vcombine.low %v1132_v54, %v1135_v48  ;;  %2814 = vrot.lane.b32.xlu0 %v2482_v40, %s15184_s8  ;;  %v2549_v40 = vshll.u32 %v16194_v20, 16  ;;  %v12907_v54 = vld [vmem:[%s20885_s0 + $0x154] sm:$0x1]  ;;  %v2565_v14 = vrot.slane %v2563_v58, 1  ;;  %v2584_v15 = vshll.u32 %v16256_v59, 16 }
  0xb8   :  { %v980_v0 = vpop.permute.xlu1 %979  ;;  %v2577_v20 = vshll.u32 %v16259_v63, 16  ;;  %v2582_v29 = vshrl.u32 %v16256_v59, 16  ;;  %v12846_v45 = vld [vmem:[%s20885_s0 + $0x168] sm:$0xf]  ;;  %v15010_v52 = vld [vmem:[%s20885_s0 + $0x150] sm:$0xf] }
  0xb9   :  { %v1141_v5 = vsel %vm1045_vm0, %v14999_v4, %v980_v0  ;;  %14235 = vmatprep.mubr.msk.bf16.mxu0 %vm1422_vm1, %v12751_v60  ;;  %v978_v6 = vpop.permute.xlu0 %977  ;;  %v2551_v62 = vrot.slane %v2549_v40, 1  ;;  %v12842_v0 = vld [vmem:[%s20885_s0 + $0x148] sm:$0xf]  ;;  %v16268_v4 = vcombine.low %v12843_v53, %v12907_v54 }
  0xba   :  { %v1138_v11 = vsel %vm1045_vm0, %v15000_v10, %v978_v6  ;;  %2820 = vrot.lane.b32.xlu1 %v2503_v55, %s15184_s8  ;;  %v15004_v55 = vld [vmem:[%s20885_s0 + $0x120] sm:$0xf]  ;;  %v2561_v10 = vshrl.u32 %v16220_v36, 16  ;;  %v16285_v16 = vcombine.low %v12842_v0, %v12906_v1  ;;  %v12847_v36 = vld [vmem:[%s20885_s0 + $0x170] sm:$0xf]  ;;  %v2579_v40 = vrot.slane %v2577_v20, 1 }
  0xbb   :  { %v12752_v17 = vcombine.low %v1138_v11, %v1141_v5  ;;  %2818 = vrot.lane.b32.xlu0 %v2496_v61, %s15184_s8  ;;  %v2538_v61 = vor.u32 %v2537_v39, %v2533_v35  ;;  %v15005_v5 = vld [vmem:[%s20885_s0 + $0x138] sm:$0xf]  ;;  %v12845_v11 = vld [vmem:[%s20885_s0 + $0x160] sm:$0xf]  ;;  %v2552_v19 = vor.u32 %v2551_v62, %v2547_v57  ;;  %v2598_v22 = vshll.u32 %v16268_v4, 16 }
  0xbc   :  { %v984_v24 = vpop.permute.xlu1 %983  ;;  %v2591_v35 = vshll.u32 %v16285_v16, 16  ;;  %v2575_v39 = vshrl.u32 %v16259_v63, 16  ;;  %v12913_v62 = vld [vmem:[%s20885_s0 + $0x184] sm:$0x1]  ;;  %v12848_v1 = vld [vmem:[%s20885_s0 + $0x178] sm:$0xf] }
  0xbd   :  { %v1147_v27 = vsel %vm1045_vm0, %v15001_v26, %v984_v24  ;;  %v982_v28 = vpop.permute.xlu0 %981  ;;  %v12908_v24 = vld [vmem:[%s20885_s0 + $0x15c] sm:$0x1]  ;;  %v2600_v44 = vrot.slane %v2598_v22, 1  ;;  %v12850_v20 = vld [vmem:[%s20885_s0 + $0x188] sm:$0xf] }
  0xbe   :  { %v1144_v33 = vsel %vm1045_vm0, %v15002_v32, %v982_v28  ;;  %14236 = vmatmul.mubr.msk.bf16.gmra.mrb[28].mxu0 %vm1422_vm1, %v12752_v17  ;;  %2824 = vrot.lane.b32.xlu1 %v2517_v12, %s15184_s8  ;;  %v15006_v12 = vld [vmem:[%s20885_s0 + $0x130] sm:$0xf]  ;;  %v12909_v17 = vld [vmem:[%s20885_s0 + $0x164] sm:$0x1]  ;;  %v2573_v28 = vor.u32 %v2572_v9, %v2568_v3  ;;  %v16321_v41 = vcombine.low %v12844_v23, %v12908_v24  ;;  %v15011_v3 = vld [vmem:[%s20885_s0 + $0x168] sm:$0xf] }
  0xbf   :  { %v12753_v37 = vcombine.low %v1144_v33, %v1147_v27  ;;  %2822 = vrot.lane.b32.xlu0 %v2510_v18, %s15184_s8  ;;  %v16305_v30 = vcombine.low %v12845_v11, %v12909_v17  ;;  %v2566_v33 = vor.u32 %v2565_v14, %v2561_v10  ;;  %v2580_v58 = vor.u32 %v2579_v40, %v2575_v39  ;;  %v15012_v9 = vld [vmem:[%s20885_s0 + $0x160] sm:$0xf]  ;;  %v12851_v14 = vld [vmem:[%s20885_s0 + $0x190] sm:$0xf]  ;;  %v15013_v24 = vld [vmem:[%s20885_s0 + $0x178] sm:$0xf] }
  0xc0   :  { %v988_v43 = vpop.permute.xlu1 %987  ;;  %v2605_v59 = vshll.u32 %v16321_v41, 16 }
  0xc1   :  { %v1153_v48 = vsel %vm1045_vm0, %v15003_v47, %v988_v43  ;;  %14239 = vmatprep.mubr.msk.bf16.mxu0 %vm1422_vm1, %v12753_v37  ;;  %v986_v49 = vpop.permute.xlu0 %985  ;;  %v12911_v37 = vld [vmem:[%s20885_s0 + $0x174] sm:$0x1]  ;;  %v2596_v43 = vshrl.u32 %v16268_v4, 16  ;;  %v15009_v47 = vld [vmem:[%s20885_s0 + $0x158] sm:$0xf] }
  0xc2   :  { %v1150_v56 = vsel %vm1045_vm0, %v15004_v55, %v986_v49  ;;  %2828 = vrot.lane.b32.xlu1 %v2531_v34, %s15184_s8  ;;  %v2586_v34 = vrot.slane %v2584_v15, 1  ;;  %v16335_v51 = vcombine.low %v12847_v36, %v12911_v37  ;;  %v2589_v55 = vshrl.u32 %v16285_v16, 16  ;;  %v12915_v15 = vld [vmem:[%s20885_s0 + $0x194] sm:$0x1]  ;;  %v13134_v36 = vld [vmem:[%s20885_s0 + $0x1c] sm:$0x1] }
  0xc3   :  { %v12754_v60 = vcombine.low %v1150_v56, %v1153_v48  ;;  %2826 = vrot.lane.b32.xlu0 %v2524_v38, %s15184_s8  ;;  %v2593_v56 = vrot.slane %v2591_v35, 1  ;;  %v2601_v0 = vor.u32 %v2600_v44, %v2596_v43  ;;  %v2607_v17 = vrot.slane %v2605_v59, 1  ;;  %v13070_v35 = vld [vmem:[%s20885_s0 + $0x18] sm:$0xf]  ;;  %v13069_v43 = vld [vmem:[%s20885_s0 + $0x10] sm:$0xf] }
  0xc4   :  { %v992_v2 = vpop.permute.xlu1 %991  ;;  %v2587_v54 = vor.u32 %v2586_v34, %v2582_v29  ;;  %v2624_v23 = vshrl.u32 %v16335_v51, 16  ;;  %v16396_v29 = vcombine.low %v12851_v14, %v12915_v15  ;;  %v13133_v44 = vld [vmem:[%s20885_s0 + $0x14] sm:$0x1]  ;;  %v13074_v14 = vld [vmem:[%s20885_s0 + $0x38] sm:$0xf] }
  0xc5   :  { %v1159_v6 = vsel %vm1045_vm0, %v15005_v5, %v992_v2  ;;  %v990_v7 = vpop.permute.xlu0 %989  ;;  %v12912_v2 = vld [vmem:[%s20885_s0 + $0x17c] sm:$0x1]  ;;  %v2594_v11 = vor.u32 %v2593_v56, %v2589_v55 }
  0xc6   :  { %v1156_v13 = vsel %vm1045_vm0, %v15006_v12, %v990_v7  ;;  %14240 = vmatmul.mubr.msk.bf16.gmra.mrb[32].mxu0 %vm1422_vm1, %v12754_v60  ;;  %2832 = vrot.lane.b32.xlu1 %v2545_v50, %s15184_s8  ;;  %v2612_v50 = vshll.u32 %v16305_v30, 16  ;;  %v16346_v60 = vcombine.low %v12846_v45, %v12910_v46  ;;  %v2603_v12 = vshrl.u32 %v16321_v41, 16  ;;  %v15015_v45 = vld [vmem:[%s20885_s0 + $0x188] sm:$0xf]  ;;  %v13138_v15 = vld [vmem:[%s20885_s0 + $0x3c] sm:$0x1] }
  0xc7   :  { %v12755_v18 = vcombine.low %v1156_v13, %v1159_v6  ;;  %2830 = vrot.lane.b32.xlu0 %v2538_v61, %s15184_s8  ;;  %v12849_v61 = vld [vmem:[%s20885_s0 + $0x180] sm:$0xf]  ;;  %v2610_v6 = vshrl.u32 %v16305_v30, 16  ;;  %v15014_v30 = vld [vmem:[%s20885_s0 + $0x170] sm:$0xf] }
  0xc8   :  { %v996_v21 = vpop.permute.xlu1 %995  ;;  %v2614_v7 = vrot.slane %v2612_v50, 1  ;;  %v16373_v13 = vcombine.low %v12849_v61, %v12913_v62  ;;  %v16429_v50 = vcombine.low %v13070_v35, %v13134_v36  ;;  %v16448_v62 = vcombine.low %v13069_v43, %v13133_v44  ;;  %v13076_v35 = vld [vmem:[%s20885_s0 + $0x48] sm:$0xf] }
  0xc9   :  { %v1165_v26 = vsel %vm1045_vm0, %v15007_v25, %v996_v21  ;;  %14243 = vmatprep.mubr.msk.bf16.mxu0 %vm1422_vm1, %v12755_v18  ;;  %v994_v27 = vpop.permute.xlu0 %993  ;;  %v2619_v18 = vshll.u32 %v16346_v60, 16  ;;  %v12914_v21 = vld [vmem:[%s20885_s0 + $0x18c] sm:$0x1] }
  0xca   :  { %v1162_v32 = vsel %vm1045_vm0, %v15008_v31, %v994_v27  ;;  %2836 = vrot.lane.b32.xlu1 %v2559_v8, %s15184_s8  ;;  %v2626_v8 = vshll.u32 %v16335_v51, 16  ;;  %v2615_v27 = vor.u32 %v2614_v7, %v2610_v6  ;;  %v16406_v34 = vcombine.low %v12850_v20, %v12914_v21  ;;  %v13072_v51 = vld [vmem:[%s20885_s0 + $0x28] sm:$0xf]  ;;  %v13073_v20 = vld [vmem:[%s20885_s0 + $0x30] sm:$0xf] }
  0xcb   :  { %v12756_v38 = vcombine.low %v1162_v32, %v1165_v26  ;;  %2834 = vrot.lane.b32.xlu0 %v2552_v19, %s15184_s8  ;;  %v16383_v19 = vcombine.low %v12848_v1, %v12912_v2  ;;  %v2617_v32 = vshrl.u32 %v16346_v60, 16  ;;  %v2621_v39 = vrot.slane %v2619_v18, 1  ;;  %v13071_v1 = vld [vmem:[%s20885_s0 + $0x20] sm:$0xf]  ;;  %v13135_v2 = vld [vmem:[%s20885_s0 + $0x24] sm:$0x1] }
  0xcc   :  { %v1000_v42 = vpop.permute.xlu1 %999  ;;  %v2652_v6 = vshrl.u32 %v16396_v29, 16  ;;  %v4304_v18 = vshll.u32 %v16448_v62, 16  ;;  %v13137_v21 = vld [vmem:[%s20885_s0 + $0x34] sm:$0x1] }
  0xcd   :  { %v1171_v48 = vsel %vm1045_vm0, %v15009_v47, %v1000_v42  ;;  %v998_v49 = vpop.permute.xlu0 %997  ;;  %v2633_v40 = vshll.u32 %v16383_v19, 16  ;;  %v2638_v42 = vshrl.u32 %v16373_v13, 16  ;;  %v2631_v56 = vshrl.u32 %v16383_v19, 16 }
  0xce   :  { %v1168_v53 = vsel %vm1045_vm0, %v15010_v52, %v998_v49  ;;  %14244 = vmatmul.mubr.msk.bf16.gmra.mrb[36].mxu0 %vm1422_vm1, %v12756_v38  ;;  %2840 = vrot.lane.b32.xlu1 %v2573_v28, %s15184_s8  ;;  %v2628_v28 = vrot.slane %v2626_v8, 1  ;;  %v2608_v38 = vor.u32 %v2607_v17, %v2603_v12  ;;  %v2654_v49 = vshll.u32 %v16396_v29, 16  ;;  %v13136_v52 = vld [vmem:[%s20885_s0 + $0x2c] sm:$0x1] }
  0xcf   :  { %v12757_v57 = vcombine.low %v1168_v53, %v1171_v48  ;;  %2838 = vrot.lane.b32.xlu0 %v2566_v33, %s15184_s8  ;;  %v2640_v33 = vshll.u32 %v16373_v13, 16  ;;  %v15016_v53 = vld [vmem:[%s20885_s0 + $0x180] sm:$0xf]  ;;  %v2622_v60 = vor.u32 %v2621_v39, %v2617_v32  ;;  %v2635_v61 = vrot.slane %v2633_v40, 1  ;;  %v13140_v40 = vld [vmem:[%s20885_s0 + $0x4c] sm:$0x1] }
  0xd0   :  { %v1004_v63 = vpop.permute.xlu1 %1003  ;;  %v2629_v48 = vor.u32 %v2628_v28, %v2624_v23  ;;  %v2656_v7 = vrot.slane %v2654_v49, 1  ;;  %v4311_v8 = vshll.u32 %v16429_v50, 16  ;;  %v2645_v12 = vshrl.u32 %v16406_v34, 16 }
  0xd1   :  { %v1177_v4 = vsel %vm1045_vm0, %v15011_v3, %v1004_v63  ;;  %14247 = vmatprep.mubr.msk.bf16.mxu0 %vm1422_vm1, %v12757_v57  ;;  %v1002_v5 = vpop.permute.xlu0 %1001  ;;  %v2642_v55 = vrot.slane %v2640_v33, 1  ;;  %v2647_v57 = vshll.u32 %v16406_v34, 16  ;;  %v15017_v3 = vld [vmem:[%s20885_s0 + $0x198] sm:$0xf]  ;;  %v2636_v17 = vor.u32 %v2635_v61, %v2631_v56 }
  0xd2   :  { %v1174_v10 = vsel %vm1045_vm0, %v15012_v9, %v1002_v5  ;;  %2844 = vrot.lane.b32.xlu1 %v2587_v54, %s15184_s8  ;;  %v15018_v9 = vld [vmem:[%s20885_s0 + $0x190] sm:$0xf]  ;;  %v16479_v19 = vcombine.low %v13071_v1, %v13135_v2  ;;  %v4309_v28 = vshrl.u32 %v16429_v50, 16  ;;  %v4313_v29 = vrot.slane %v4311_v8, 1 }
  0xd3   :  { %v12758_v16 = vcombine.low %v1174_v10, %v1177_v4  ;;  %2842 = vrot.lane.b32.xlu0 %v2580_v58, %s15184_s8  ;;  %v14719_v58 = vld [vmem:[%s20886_s1 + $0x40] sm:$0xff]   ;;  %v2649_v13 = vrot.slane %v2647_v57, 1  ;;  %v16499_v33 = vcombine.low %v13074_v14, %v13138_v15  ;;  %v16501_v34 = vcombine.low %v13073_v20, %v13137_v21  ;;  %v15023_v57 = vld [vmem:[%s20886_s1 + $0x18] sm:$0xff]  }
  0xd4   :  { %v1008_v22 = vpop.permute.xlu1 %1007  ;;  %14345 = vmatprep.subr.bf16.mxu0 %v14719_v58  ;;  %v4318_v39 = vshll.u32 %v16479_v19, 16  ;;  %v4314_v50 = vor.u32 %v4313_v29, %v4309_v28  ;;  %v16535_v56 = vcombine.low %v13076_v35, %v13140_v40 }
  0xd5   :  { %v1183_v25 = vsel %vm1045_vm0, %v15013_v24, %v1008_v22  ;;  %v1006_v26 = vpop.permute.xlu0 %1005  ;;  %14346 = vmatpush3.bf16.msra.mxu0 %v14719_v58  ;;  %v15019_v24 = vld [vmem:[%s20885_s0 + $0x1a8] sm:$0xf]  ;;  %v2650_v32 = vor.u32 %v2649_v13, %v2645_v12  ;;  %v13078_v58 = vld [vmem:[%s20885_s0 + $0x58] sm:$0xf]  ;;  %v4337_v8 = vshrl.u32 %v16499_v33, 16 }
  0xd6   :  { %v1180_v31 = vsel %vm1045_vm0, %v15014_v30, %v1006_v26  ;;  %14248 = vmatmul.mubr.msk.bf16.gmra.mrb[40].mxu0 %vm1422_vm1, %v12758_v16  ;;  %2848 = vrot.lane.b32.xlu1 %v2601_v0, %s15184_s8  ;;  %v16450_v0 = vcombine.low %v13072_v51, %v13136_v52  ;;  %v15020_v30 = vld [vmem:[%s20885_s0 + $0x1a0] sm:$0xf]  ;;  %v4316_v51 = vshrl.u32 %v16479_v19, 16  ;;  %v15022_v52 = vld [vmem:[%s20885_s0 + $0x1b0] sm:$0xf] }
  0xd7   :  { %v12759_v37 = vcombine.low %v1180_v31, %v1183_v25  ;;  %2846 = vrot.lane.b32.xlu0 %v2594_v11, %s15184_s8  ;;  %v2643_v11 = vor.u32 %v2642_v55, %v2638_v42  ;;  %v4332_v55 = vshll.u32 %v16501_v34, 16  ;;  %v15025_v12 = vld [vmem:[%s20885_s0 + $0x1c0] sm:$0xf] }
  0xd8   :  { %v1012_v41 = vpop.permute.xlu1 %1011  ;;  %v4325_v23 = vshll.u32 %v16450_v0, 16  ;;  %v4323_v43 = vshrl.u32 %v16450_v0, 16  ;;  %v14672_v0 = vld [vmem:[%s20886_s1 + $0x28] sm:$0xff]  }
  0xd9   :  { %v1189_v46 = vsel %vm1045_vm0, %v15015_v45, %v1012_v41  ;;  %14251 = vmatprep.mubr.msk.bf16.mxu0 %vm1422_vm1, %v12759_v37  ;;  %v1010_v47 = vpop.permute.xlu0 %1009  ;;  %v4302_v37 = vshrl.u32 %v16448_v62, 16  ;;  %v14669_v41 = vld [vmem:[%s20886_s1 + $0x20] sm:$0xff]   ;;  %v4320_v62 = vrot.slane %v4318_v39, 1  ;;  %v4334_v15 = vrot.slane %v4332_v55, 1 }
  0xda   :  { %v1186_v54 = vsel %vm1045_vm0, %v15016_v53, %v1010_v47  ;;  %2852 = vrot.lane.b32.xlu1 %v2615_v27, %s15184_s8  ;;  %v2657_v27 = vor.u32 %v2656_v7, %v2652_v6  ;;  %v4327_v44 = vrot.slane %v4325_v23, 1  ;;  %v13075_v45 = vld [vmem:[%s20885_s0 + $0x40] sm:$0xf]  ;;  %v15021_v47 = vld [vmem:[%s20885_s0 + $0x1b8] sm:$0xf]  ;;  %v4351_v23 = vshrl.u32 %v16535_v56, 16 }
  0xdb   :  { %v12760_v59 = vcombine.low %v1186_v54, %v1189_v46  ;;  %2850 = vrot.lane.b32.xlu0 %v2608_v38, %s15184_s8  ;;  %v4306_v38 = vrot.slane %v4304_v18, 1  ;;  %v13139_v46 = vld [vmem:[%s20885_s0 + $0x44] sm:$0x1]  ;;  %v4339_v54 = vshll.u32 %v16499_v33, 16  ;;  %v4321_v19 = vor.u32 %v4320_v62, %v4316_v51  ;;  %v13084_v62 = vld [vmem:[%s20885_s0 + $0x88] sm:$0xf] }
  0xdc   :  { %v1016_v63 = vpop.permute.xlu1 %1015  ;;  %v4328_v2 = vor.u32 %v4327_v44, %v4323_v43  ;;  %v13081_v43 = vld [vmem:[%s20885_s0 + $0x70] sm:$0xf]  ;;  %v13145_v44 = vld [vmem:[%s20885_s0 + $0x74] sm:$0x1] }
  0xdd   :  { %v1195_v4 = vsel %vm1045_vm0, %v15017_v3, %v1016_v63  ;;  %v1014_v5 = vpop.permute.xlu0 %1013  ;;  %v4307_v61 = vor.u32 %v4306_v38, %v4302_v37  ;;  %v16547_v63 = vcombine.low %v13075_v45, %v13139_v46  ;;  %v13077_v3 = vld [vmem:[%s20885_s0 + $0x50] sm:$0xf]  ;;  %v4341_v14 = vrot.slane %v4339_v54, 1  ;;  %v13082_v37 = vld [vmem:[%s20885_s0 + $0x78] sm:$0xf] }
  0xde   :  { %v1192_v10 = vsel %vm1045_vm0, %v15018_v9, %v1014_v5  ;;  %14252 = vmatmul.mubr.msk.bf16.gmra.mrb[44].mxu0 %vm1422_vm1, %v12760_v59  ;;  %2856 = vrot.lane.b32.xlu1 %v2629_v48, %s15184_s8  ;;  %v13142_v59 = vld [vmem:[%s20885_s0 + $0x5c] sm:$0x1]  ;;  %v15024_v5 = vld [vmem:[%s20885_s0 + $0x1c8] sm:$0xf]  ;;  %v4330_v9 = vshrl.u32 %v16501_v34, 16 }
  0xdf   :  { %2854 = vrot.lane.b32.xlu0 %v2622_v60, %s15184_s8  ;;  %v12761_v16 = vcombine.low %v1192_v10, %v1195_v4  ;;  %v13141_v4 = vld [vmem:[%s20885_s0 + $0x54] sm:$0x1]  ;;  %v16565_v10 = vcombine.low %v13078_v58, %v13142_v59  ;;  %v4346_v20 = vshll.u32 %v16547_v63, 16  ;;  %v4344_v29 = vshrl.u32 %v16547_v63, 16  ;;  %v13146_v38 = vld [vmem:[%s20885_s0 + $0x7c] sm:$0x1] }
  0xe0   :  { %v1020_v22 = vpop.permute.xlu1 %1019  ;;  %v16581_v21 = vcombine.low %v13077_v3, %v13141_v4  ;;  %v4342_v34 = vor.u32 %v4341_v14, %v4337_v8  ;;  %v4335_v35 = vor.u32 %v4334_v15, %v4330_v9  ;;  %v13148_v63 = vld [vmem:[%s20885_s0 + $0x8c] sm:$0x1]  ;;  %v13147_v3 = vld [vmem:[%s20885_s0 + $0x84] sm:$0x1]  ;;  %v15030_v4 = vld [vmem:[%s20885_s0 + $0x1f8] sm:$0xf] }
  0xe1   :  { %v1201_v25 = vsel %vm1045_vm0, %v15019_v24, %v1020_v22  ;;  %14255 = vmatprep.mubr.msk.bf16.mxu1 %vm1422_vm1, %v12761_v16  ;;  %v1018_v26 = vpop.permute.xlu0 %1017  ;;  %v4353_v16 = vshll.u32 %v16535_v56, 16  ;;  %v13079_v24 = vld [vmem:[%s20885_s0 + $0x60] sm:$0xf]  ;;  %v4348_v40 = vrot.slane %v4346_v20, 1  ;;  %v4365_v46 = vshrl.u32 %v16565_v10, 16 }
  0xe2   :  { %v1198_v31 = vsel %vm1045_vm0, %v15020_v30, %v1018_v26  ;;  %2860 = vrot.lane.b32.xlu1 %v2643_v11, %s15184_s8  ;;  %v13080_v11 = vld [vmem:[%s20885_s0 + $0x68] sm:$0xf]  ;;  %v15026_v26 = vld [vmem:[%s20885_s0 + $0x1d8] sm:$0xf]  ;;  %v4367_v30 = vshll.u32 %v16565_v10, 16  ;;  %v4358_v56 = vshrl.u32 %v16581_v21, 16 }
  0xe3   :  { %v12762_v36 = vcombine.low %v1198_v31, %v1201_v25  ;;  %2858 = vrot.lane.b32.xlu0 %v2636_v17, %s15184_s8  ;;  %v13144_v17 = vld [vmem:[%s20885_s0 + $0x6c] sm:$0x1]  ;;  %v13143_v25 = vld [vmem:[%s20885_s0 + $0x64] sm:$0x1]  ;;  %v4349_v59 = vor.u32 %v4348_v40, %v4344_v29  ;;  %v13086_v10 = vld [vmem:[%s20885_s0 + $0x98] sm:$0xf] }
  0xe4   :  { %v1024_v42 = vpop.permute.xlu1 %1023  ;;  %v16597_v31 = vcombine.low %v13080_v11, %v13144_v17  ;;  %v13150_v11 = vld [vmem:[%s20885_s0 + $0x9c] sm:$0x1] }
  0xe5   :  { %v1207_v48 = vsel %vm1045_vm0, %v15021_v47, %v1024_v42  ;;  %14256 = vmatmul.mubr.msk.bf16.vlgmr.msra.gmra.mrb[0].mxu1 %vm1422_vm1, %v12762_v36  ;;  %v1022_v49 = vpop.permute.xlu0 %1021  ;;  %v4355_v36 = vrot.slane %v4353_v16, 1  ;;  %v16612_v42 = vcombine.low %v13079_v24, %v13143_v25  ;;  %v15028_v47 = vld [vmem:[%s20885_s0 + $0x1e8] sm:$0xf]  ;;  %v16671_v16 = vcombine.low %v13084_v62, %v13148_v63 }
  0xe6   :  { %v1204_v53 = vsel %vm1045_vm0, %v15022_v52, %v1022_v49  ;;  %2864 = vrot.lane.b32.xlu1 %v2657_v27, %s15184_s8  ;;  %14272 = vmatpush3.bf16.msra.mxu1 %v15023_v57  ;;  %v4381_v51 = vshll.u32 %v16597_v31, 16  ;;  %v16627_v52 = vcombine.low %v13082_v37, %v13146_v38  ;;  %v16635_v57 = vcombine.low %v13081_v43, %v13145_v44  ;;  %v13088_v37 = vld [vmem:[%s20885_s0 + $0xa8] sm:$0xf]  ;;  %v13152_v38 = vld [vmem:[%s20885_s0 + $0xac] sm:$0x1] }
  0xe7   :  { %v12763_v60 = vcombine.low %v1204_v53, %v1207_v48  ;;  %2862 = vrot.lane.b32.xlu0 %v2650_v32, %s15184_s8  ;;  %14273 = vmatprep.subr.bf16.mxu1 %v14669_v41  ;;  %v15027_v32 = vld [vmem:[%s20885_s0 + $0x1d0] sm:$0xf]  ;;  %v15029_v53 = vld [vmem:[%s20885_s0 + $0x1e0] sm:$0xf]  ;;  %v4356_v55 = vor.u32 %v4355_v36, %v4351_v23  ;;  %v4372_v14 = vshrl.u32 %v16612_v42, 16  ;;  %v16683_v25 = vcombine.low %v13086_v10, %v13150_v11 }
  0xe8   :  { %v1028_v1 = vpop.permute.xlu1 %1027  ;;  %v4383_v8 = vrot.slane %v4381_v51, 1  ;;  %v4395_v9 = vshll.u32 %v16627_v52, 16  ;;  %v4388_v15 = vshll.u32 %v16635_v57, 16  ;;  %v4393_v24 = vshrl.u32 %v16627_v52, 16  ;;  %v13087_v44 = vld [vmem:[%s20885_s0 + $0xa0] sm:$0xf] }
  0xe9   :  { %v1213_v6 = vsel %vm1045_vm0, %v15024_v5, %v1028_v1  ;;  %14259 = vmatprep.mubr.msk.bf16.mxu1 %vm1422_vm1, %v12763_v60  ;;  %v1026_v7 = vpop.permute.xlu0 %1025  ;;  %v4379_v1 = vshrl.u32 %v16597_v31, 16  ;;  %v4386_v31 = vshrl.u32 %v16635_v57, 16  ;;  %v4423_v43 = vshll.u32 %v16683_v25, 16  ;;  %v15035_v52 = vld [vmem:[%s20885_s0 + $0x8] sm:$0xf] }
  0xea   :  { %v1210_v13 = vsel %vm1045_vm0, %v15025_v12, %v1026_v7  ;;  %4751 = vrot.lane.b32.xlu1 %v4314_v50, %s15184_s8  ;;  %14274 = vmatpush3.bf16.msra.mxu1 %v14669_v41  ;;  %v4360_v41 = vshll.u32 %v16581_v21, 16  ;;  %v4369_v50 = vrot.slane %v4367_v30, 1  ;;  %v15031_v12 = vld [vmem:[%s20885_s0 + $0x1f0] sm:$0xf]  ;;  %v4397_v30 = vrot.slane %v4395_v9, 1 }
  0xeb   :  { %v12764_v18 = vcombine.low %v1210_v13, %v1213_v6  ;;  %4749 = vrot.lane.b32.xlu0 %v4307_v61, %s15184_s8  ;;  %14275 = vmatprep.subr.bf16.mxu1 %v14672_v0  ;;  %v4374_v61 = vshll.u32 %v16612_v42, 16  ;;  %v13085_v21 = vld [vmem:[%s20885_s0 + $0x90] sm:$0xf]  ;;  %v4384_v29 = vor.u32 %v4383_v8, %v4379_v1  ;;  %v16720_v51 = vcombine.low %v13088_v37, %v13152_v38  ;;  %v13090_v57 = vld [vmem:[%s20885_s0 + $0xb8] sm:$0xf] }
  0xec   :  { %v1032_v22 = vpop.permute.xlu1 %1031  ;;  %v4362_v60 = vrot.slane %v4360_v41, 1  ;;  %v4370_v7 = vor.u32 %v4369_v50, %v4365_v46  ;;  %v15034_v46 = vld [vmem:[%s20885_s0 + $0x10] sm:$0xf]  ;;  %v4407_v50 = vshrl.u32 %v16671_v16, 16  ;;  %v4425_v1 = vrot.slane %v4423_v43, 1 }
  0xed   :  { %v1219_v27 = vsel %vm1045_vm0, %v15026_v26, %v1032_v22  ;;  %14260 = vmatmul.mubr.msk.bf16.gmra.mrb[4].mxu1 %vm1422_vm1, %v12764_v18  ;;  %v1030_v28 = vpop.permute.xlu0 %1029  ;;  %v13149_v22 = vld [vmem:[%s20885_s0 + $0x94] sm:$0x1]  ;;  %v15032_v26 = vld [vmem:[%s20885_s0 + $0x208] sm:$0xf]  ;;  %v15037_v9 = vld [vmem:[%s20885_s0 + $0x18] sm:$0xf] }
  0xee   :  { %v1216_v33 = vsel %vm1045_vm0, %v15027_v32, %v1030_v28  ;;  %4755 = vrot.lane.b32.xlu1 %v4328_v2, %s15184_s8  ;;  %14276 = vmatpush3.bf16.msra.mxu1 %v14672_v0  ;;  %v13083_v2 = vld [vmem:[%s20885_s0 + $0x80] sm:$0xf]  ;;  %v4363_v18 = vor.u32 %v4362_v60, %v4358_v56  ;;  %v16697_v36 = vcombine.low %v13085_v21, %v13149_v22 }
  0xef   :  { %v12765_v39 = vcombine.low %v1216_v33, %v1219_v27  ;;  %4753 = vrot.lane.b32.xlu0 %v4321_v19, %s15184_s8  ;;  %v4376_v19 = vrot.slane %v4374_v61, 1  ;;  %v16674_v20 = vcombine.low %v13083_v2, %v13147_v3  ;;  %v15033_v32 = vld [vmem:[%s20885_s0 + $0x200] sm:$0xf]  ;;  %v13089_v2 = vld [vmem:[%s20885_s0 + $0xb0] sm:$0xf] }
  0xf0   :  { %v1036_v45 = vpop.permute.xlu1 %1035  ;;  %v4416_v56 = vshll.u32 %v16697_v36, 16  ;;  %v13153_v3 = vld [vmem:[%s20885_s0 + $0xb4] sm:$0x1]  ;;  %v13091_v22 = vld [vmem:[%s20885_s0 + $0xc0] sm:$0xf] }
  0xf1   :  { %v1225_v48 = vsel %vm1045_vm0, %v15028_v47, %v1036_v45  ;;  %14263 = vmatprep.mubr.msk.bf16.mxu1 %vm1422_vm1, %v12765_v39  ;;  %v1034_v49 = vpop.permute.xlu0 %1033  ;;  %v4377_v40 = vor.u32 %v4376_v19, %v4372_v14  ;;  %v4402_v41 = vshll.u32 %v16674_v20, 16  ;;  %v13151_v45 = vld [vmem:[%s20885_s0 + $0xa4] sm:$0x1]  ;;  %v4400_v60 = vshrl.u32 %v16674_v20, 16  ;;  %v13156_v19 = vld [vmem:[%s20885_s0 + $0xcc] sm:$0x1] }
  0xf2   :  { %v1222_v54 = vsel %vm1045_vm0, %v15029_v53, %v1034_v49  ;;  %4759 = vrot.lane.b32.xlu1 %v4342_v34, %s15184_s8  ;;  %v4390_v34 = vrot.slane %v4388_v15, 1  ;;  %v4398_v49 = vor.u32 %v4397_v30, %v4393_v24  ;;  %v16736_v62 = vcombine.low %v13087_v44, %v13151_v45  ;;  %v15038_v24 = vld [vmem:[%s20885_s0 + $0x30] sm:$0xf]  ;;  %v15039_v30 = vld [vmem:[%s20885_s0 + $0x28] sm:$0xf] }
  0xf3   :  { %v12766_v58 = vcombine.low %v1222_v54, %v1225_v48  ;;  %4757 = vrot.lane.b32.xlu0 %v4335_v35, %s15184_s8  ;;  %v4409_v35 = vshll.u32 %v16671_v16, 16  ;;  %v4404_v61 = vrot.slane %v4402_v41, 1  ;;  %v13093_v41 = vld [vmem:[%s20885_s0 + $0xd0] sm:$0xf]  ;;  %v15040_v45 = vld [vmem:[%s20885_s0 + $0x40] sm:$0xf] }
  0xf4   :  { %v1040_v0 = vpop.permute.xlu1 %1039  ;;  %v4391_v54 = vor.u32 %v4390_v34, %v4386_v31  ;;  %v4430_v16 = vshll.u32 %v16736_v62, 16 }
  0xf5   :  { %v1231_v5 = vsel %vm1045_vm0, %v15030_v4, %v1040_v0  ;;  %14264 = vmatmul.mubr.msk.bf16.gmra.mrb[8].mxu1 %vm1422_vm1, %v12766_v58  ;;  %v1038_v6 = vpop.permute.xlu0 %1037  ;;  %v13154_v58 = vld [vmem:[%s20885_s0 + $0xbc] sm:$0x1]  ;;  %v4421_v0 = vshrl.u32 %v16683_v25, 16  ;;  %v15036_v4 = vld [vmem:[%s20885_s0 + $0x20] sm:$0xf]  ;;  %v4405_v15 = vor.u32 %v4404_v61, %v4400_v60 }
  0xf6   :  { %v1228_v13 = vsel %vm1045_vm0, %v15031_v12, %v1038_v6  ;;  %4763 = vrot.lane.b32.xlu1 %v4356_v55, %s15184_s8  ;;  %v4411_v55 = vrot.slane %v4409_v35, 1  ;;  %v16751_v8 = vcombine.low %v13090_v57, %v13154_v58  ;;  %v4414_v12 = vshrl.u32 %v16697_v36, 16  ;;  %v13094_v35 = vld [vmem:[%s20885_s0 + $0xd8] sm:$0xf]  ;;  %v13158_v36 = vld [vmem:[%s20885_s0 + $0xdc] sm:$0x1] }
  0xf7   :  { %v12767_v17 = vcombine.low %v1228_v13, %v1231_v5  ;;  %4761 = vrot.lane.b32.xlu0 %v4349_v59, %s15184_s8  ;;  %v4418_v13 = vrot.slane %v4416_v56, 1  ;;  %v4426_v21 = vor.u32 %v4425_v1, %v4421_v0  ;;  %v4432_v38 = vrot.slane %v4430_v16, 1  ;;  %v13096_v56 = vld [vmem:[%s20885_s0 + $0xe8] sm:$0xf]  ;;  %v13160_v57 = vld [vmem:[%s20885_s0 + $0xec] sm:$0x1] }
  0xf8   :  { %v1044_v23 = vpop.permute.xlu1 %1043  ;;  %v4412_v11 = vor.u32 %v4411_v55, %v4407_v50  ;;  %v4449_v44 = vshrl.u32 %v16751_v8, 16  ;;  %v16812_v50 = vcombine.low %v13094_v35, %v13158_v36  ;;  %v13095_v0 = vld [vmem:[%s20885_s0 + $0xe0] sm:$0xf]  ;;  %v13159_v1 = vld [vmem:[%s20885_s0 + $0xe4] sm:$0x1] }
  0xf9   :  { %v1237_v27 = vsel %vm1045_vm0, %v15032_v26, %v1044_v23  ;;  %14267 = vmatprep.mubr.msk.bf16.mxu1 %vm1422_vm1, %v12767_v17  ;;  %v1042_v28 = vpop.permute.xlu0 %1041  ;;  %v16761_v17 = vcombine.low %v13089_v2, %v13153_v3  ;;  %v13155_v23 = vld [vmem:[%s20885_s0 + $0xc4] sm:$0x1]  ;;  %v15042_v2 = vld [vmem:[%s20885_s0 + $0x50] sm:$0xf]  ;;  %v13164_v35 = vld [vmem:[%s20885_s0 + $0x10c] sm:$0x1] }
  0xfa   :  { %v1234_v33 = vsel %vm1045_vm0, %v15033_v32, %v1042_v28  ;;  %4767 = vrot.lane.b32.xlu1 %v4370_v7, %s15184_s8  ;;  %v4437_v7 = vshll.u32 %v16720_v51, 16  ;;  %v4419_v32 = vor.u32 %v4418_v13, %v4414_v12 }
  0xfb   :  { %v12768_v39 = vcombine.low %v1234_v33, %v1237_v27  ;;  %4765 = vrot.lane.b32.xlu0 %v4363_v18, %s15184_s8  ;;  %v13092_v18 = vld [vmem:[%s20885_s0 + $0xc8] sm:$0xf]  ;;  %v4435_v27 = vshrl.u32 %v16720_v51, 16  ;;  %v4428_v33 = vshrl.u32 %v16736_v62, 16  ;;  %v15041_v51 = vld [vmem:[%s20885_s0 + $0x38] sm:$0xf] }
  0xfc   :  { %v2773_v42 = vpop.permute.xlu1 %2772  ;;  %v4439_v28 = vrot.slane %v4437_v7, 1  ;;  %v16788_v34 = vcombine.low %v13092_v18, %v13156_v19  ;;  %v16844_v7 = vcombine.low %v13096_v56, %v13160_v57  ;;  %v16860_v18 = vcombine.low %v13095_v0, %v13159_v1  ;;  %v13166_v56 = vld [vmem:[%s20885_s0 + $0x12c] sm:$0x1]  ;;  %v13101_v0 = vld [vmem:[%s20885_s0 + $0x120] sm:$0xf] }
  0xfd   :  { %v2903_v47 = vsel %vm1045_vm0, %v15034_v46, %v2773_v42  ;;  %14268 = vmatmul.mubr.msk.bf16.gmra.mrb[12].mxu1 %vm1422_vm1, %v12768_v39  ;;  %v2771_v48 = vpop.permute.xlu0 %2770  ;;  %v4444_v39 = vshll.u32 %v16761_v17, 16  ;;  %v13157_v42 = vld [vmem:[%s20885_s0 + $0xd4] sm:$0x1]  ;;  %v13165_v1 = vld [vmem:[%s20885_s0 + $0x124] sm:$0x1] }
  0xfe   :  { %v2900_v53 = vsel %vm1045_vm0, %v15035_v52, %v2771_v48  ;;  %4771 = vrot.lane.b32.xlu1 %v4384_v29, %s15184_s8  ;;  %v4451_v29 = vshll.u32 %v16751_v8, 16  ;;  %v4440_v48 = vor.u32 %v4439_v28, %v4435_v27  ;;  %v16821_v55 = vcombine.low %v13093_v41, %v13157_v42  ;;  %v13098_v8 = vld [vmem:[%s20885_s0 + $0xf8] sm:$0xf]  ;;  %v13163_v41 = vld [vmem:[%s20885_s0 + $0x104] sm:$0x1] }
  0xff   :  { %v13002_v59 = vcombine.low %v2900_v53, %v2903_v47  ;;  %4769 = vrot.lane.b32.xlu0 %v4377_v40, %s15184_s8  ;;  %v16798_v40 = vcombine.low %v13091_v22, %v13155_v23  ;;  %v4442_v53 = vshrl.u32 %v16761_v17, 16  ;;  %v4446_v60 = vrot.slane %v4444_v39, 1  ;;  %v13161_v22 = vld [vmem:[%s20885_s0 + $0xf4] sm:$0x1]  ;;  %v15044_v23 = vld [vmem:[%s20885_s0 + $0x60] sm:$0xf] }
 0x100   :  { %v2777_v63 = vpop.permute.xlu1 %2776  ;;  %v4493_v28 = vshll.u32 %v16844_v7, 16 }
 0x101   :  { %v2909_v5 = vsel %vm1045_vm0, %v15036_v4, %v2777_v63  ;;  %14277 = vmatprep.mubr.msk.bf16.mxu1 %vm1422_vm1, %v13002_v59  ;;  %v2775_v6 = vpop.permute.xlu0 %2774  ;;  %v4433_v59 = vor.u32 %v4432_v38, %v4428_v33  ;;  %v4458_v61 = vshll.u32 %v16798_v40, 16  ;;  %v4463_v63 = vshrl.u32 %v16788_v34, 16 }
 0x102   :  { %v2906_v10 = vsel %vm1045_vm0, %v15037_v9, %v2775_v6  ;;  %4775 = vrot.lane.b32.xlu1 %v4398_v49, %s15184_s8  ;;  %v4453_v49 = vrot.slane %v4451_v29, 1  ;;  %v4479_v6 = vshll.u32 %v16812_v50, 16  ;;  %v13162_v9 = vld [vmem:[%s20885_s0 + $0xfc] sm:$0x1]  ;;  %v4456_v13 = vshrl.u32 %v16798_v40, 16 }
 0x103   :  { %v13003_v14 = vcombine.low %v2906_v10, %v2909_v5  ;;  %4773 = vrot.lane.b32.xlu0 %v4391_v54, %s15184_s8  ;;  %v4465_v54 = vshll.u32 %v16788_v34, 16  ;;  %v15043_v10 = vld [vmem:[%s20885_s0 + $0x48] sm:$0xf]  ;;  %v4447_v16 = vor.u32 %v4446_v60, %v4442_v53  ;;  %v4460_v17 = vrot.slane %v4458_v61, 1  ;;  %v15045_v29 = vld [vmem:[%s20885_s0 + $0x58] sm:$0xf] }
 0x104   :  { %v2781_v20 = vpop.permute.xlu1 %2780  ;;  %v4454_v5 = vor.u32 %v4453_v49, %v4449_v44  ;;  %v4481_v27 = vrot.slane %v4479_v6, 1  ;;  %v13100_v34 = vld [vmem:[%s20885_s0 + $0x108] sm:$0xf]  ;;  %v4486_v38 = vshll.u32 %v16860_v18, 16  ;;  %v13099_v40 = vld [vmem:[%s20885_s0 + $0x100] sm:$0xf] }
 0x105   :  { %v2915_v25 = vsel %vm1045_vm0, %v15038_v24, %v2781_v20  ;;  %14278 = vmatmul.mubr.msk.bf16.vlgmr.msra.gmra.mrb[16].mxu1 %vm1422_vm1, %v13003_v14  ;;  %v2779_v26 = vpop.permute.xlu0 %2778  ;;  %v4467_v12 = vrot.slane %v4465_v54, 1  ;;  %v4472_v14 = vshll.u32 %v16821_v55, 16  ;;  %v16862_v20 = vcombine.low %v13098_v8, %v13162_v9  ;;  %v15046_v44 = vld [vmem:[%s20885_s0 + $0x70] sm:$0xf]  ;;  %v15049_v8 = vld [vmem:[%s20885_s0 + $0x78] sm:$0xf] }
 0x106   :  { %v2912_v31 = vsel %vm1045_vm0, %v15039_v30, %v2779_v26  ;;  %4779 = vrot.lane.b32.xlu1 %v4412_v11, %s15184_s8  ;;  %v4477_v26 = vshrl.u32 %v16812_v50, 16  ;;  %v4495_v49 = vrot.slane %v4493_v28, 1  ;;  %v15047_v50 = vld [vmem:[%s20885_s0 + $0x68] sm:$0xf]  ;;  %v16911_v53 = vcombine.low %v13100_v34, %v13164_v35 }
 0x107   :  { %v13004_v37 = vcombine.low %v2912_v31, %v2915_v25  ;;  %4777 = vrot.lane.b32.xlu0 %v4405_v15, %s15184_s8  ;;  %v4468_v31 = vor.u32 %v4467_v12, %v4463_v63  ;;  %v4474_v33 = vrot.slane %v4472_v14, 1  ;;  %v16913_v54 = vcombine.low %v13099_v40, %v13163_v41  ;;  %v15051_v28 = vld [vmem:[%s20885_s0 + $0x88] sm:$0xf]  ;;  %v13105_v41 = vld [vmem:[%s20885_s0 + $0x140] sm:$0xf] }
 0x108   :  { %v2785_v43 = vpop.permute.xlu1 %2784 }
 0x109   :  { %v2921_v46 = vsel %vm1045_vm0, %v15040_v45, %v2785_v43  ;;  %14281 = vmatprep.mubr.msk.bf16.mxu1 %vm1422_vm1, %v13004_v37  ;;  %v2783_v47 = vpop.permute.xlu0 %2782  ;;  %v4461_v37 = vor.u32 %v4460_v17, %v4456_v13  ;;  %v4507_v43 = vshll.u32 %v16862_v20, 16  ;;  %v4514_v12 = vshll.u32 %v16913_v54, 16  ;;  %v13168_v13 = vld [vmem:[%s20885_s0 + $0x13c] sm:$0x1] }
 0x10a   :  { %v2918_v52 = vsel %vm1045_vm0, %v15041_v51, %v2783_v47  ;;  %4783 = vrot.lane.b32.xlu1 %v4426_v21, %s15184_s8  ;;  %v13097_v21 = vld [vmem:[%s20885_s0 + $0xf0] sm:$0xf]  ;;  %v4482_v47 = vor.u32 %v4481_v27, %v4477_v26  ;;  %v16953_v17 = vcombine.low %v13101_v0, %v13165_v1 }
 0x10b   :  { %v13005_v58 = vcombine.low %v2918_v52, %v2921_v46  ;;  %4781 = vrot.lane.b32.xlu0 %v4419_v32, %s15184_s8  ;;  %v4470_v32 = vshrl.u32 %v16821_v55, 16  ;;  %v16891_v39 = vcombine.low %v13097_v21, %v13161_v22  ;;  %v13102_v55 = vld [vmem:[%s20885_s0 + $0x128] sm:$0xf]  ;;  %v4509_v63 = vrot.slane %v4507_v43, 1  ;;  %v13167_v21 = vld [vmem:[%s20885_s0 + $0x134] sm:$0x1] }
 0x10c   :  { %v2789_v62 = vpop.permute.xlu1 %2788  ;;  %v16936_v6 = vcombine.low %v13102_v55, %v13166_v56  ;;  %v15050_v22 = vld [vmem:[%s20885_s0 + $0x90] sm:$0xf]  ;;  %v4528_v35 = vshll.u32 %v16953_v17, 16  ;;  %v15052_v43 = vld [vmem:[%s20885_s0 + $0xa0] sm:$0xf] }
 0x10d   :  { %v2927_v3 = vsel %vm1045_vm0, %v15042_v2, %v2789_v62  ;;  %14282 = vmatmul.mubr.msk.bf16.gmra.mrb[20].mxu1 %vm1422_vm1, %v13005_v58  ;;  %v2787_v4 = vpop.permute.xlu0 %2786  ;;  %v4475_v52 = vor.u32 %v4474_v33, %v4470_v32  ;;  %v4484_v58 = vshrl.u32 %v16860_v18, 16  ;;  %v4500_v60 = vshll.u32 %v16891_v39, 16  ;;  %v15048_v2 = vld [vmem:[%s20885_s0 + $0x80] sm:$0xf]  ;;  %v13172_v55 = vld [vmem:[%s20885_s0 + $0x15c] sm:$0x1] }
 0x10e   :  { %v2924_v11 = vsel %vm1045_vm0, %v15043_v10, %v2787_v4  ;;  %4787 = vrot.lane.b32.xlu1 %v4440_v48, %s15184_s8  ;;  %v4491_v48 = vshrl.u32 %v16844_v7, 16  ;;  %v4505_v62 = vshrl.u32 %v16862_v20, 16  ;;  %v13104_v7 = vld [vmem:[%s20885_s0 + $0x138] sm:$0xf]  ;;  %v4498_v10 = vshrl.u32 %v16891_v39, 16 }
 0x10f   :  { %v13006_v15 = vcombine.low %v2924_v11, %v2927_v3  ;;  %4785 = vrot.lane.b32.xlu0 %v4433_v59, %s15184_s8  ;;  %v4488_v59 = vrot.slane %v4486_v38, 1  ;;  %v4521_v11 = vshll.u32 %v16911_v53, 16  ;;  %v13103_v20 = vld [vmem:[%s20885_s0 + $0x130] sm:$0xf]  ;;  %v4535_v26 = vshll.u32 %v16936_v6, 16 }
 0x110   :  { %v2793_v19 = vpop.permute.xlu1 %2792  ;;  %v16968_v27 = vcombine.low %v13104_v7, %v13168_v13  ;;  %v4516_v32 = vrot.slane %v4514_v12, 1  ;;  %v13170_v38 = vld [vmem:[%s20885_s0 + $0x14c] sm:$0x1]  ;;  %v4533_v40 = vshrl.u32 %v16936_v6, 16  ;;  %v15054_v0 = vld [vmem:[%s20885_s0 + $0xb0] sm:$0xf] }
 0x111   :  { %v2933_v24 = vsel %vm1045_vm0, %v15044_v23, %v2793_v19  ;;  %14285 = vmatprep.mubr.msk.bf16.mxu1 %vm1422_vm1, %v13006_v15  ;;  %v2791_v25 = vpop.permute.xlu0 %2790  ;;  %v4489_v15 = vor.u32 %v4488_v59, %v4484_v58  ;;  %v4510_v19 = vor.u32 %v4509_v63, %v4505_v62  ;;  %v15055_v6 = vld [vmem:[%s20885_s0 + $0xa8] sm:$0xf]  ;;  %v13174_v12 = vld [vmem:[%s20885_s0 + $0x16c] sm:$0x1] }
 0x112   :  { %v2930_v30 = vsel %vm1045_vm0, %v15045_v29, %v2791_v25  ;;  %4791 = vrot.lane.b32.xlu1 %v4454_v5, %s15184_s8  ;;  %v4496_v5 = vor.u32 %v4495_v49, %v4491_v48  ;;  %v4519_v25 = vshrl.u32 %v16911_v53, 16  ;;  %v4549_v48 = vshll.u32 %v16968_v27, 16  ;;  %v15053_v49 = vld [vmem:[%s20885_s0 + $0x98] sm:$0xf] }
 0x113   :  { %v13007_v36 = vcombine.low %v2930_v30, %v2933_v24  ;;  %4789 = vrot.lane.b32.xlu0 %v4447_v16, %s15184_s8  ;;  %v4502_v16 = vrot.slane %v4500_v60, 1  ;;  %v4523_v30 = vrot.slane %v4521_v11, 1  ;;  %v13107_v60 = vld [vmem:[%s20885_s0 + $0x150] sm:$0xf]  ;;  %v4547_v63 = vshrl.u32 %v16968_v27, 16 }
 0x114   :  { %v2797_v42 = vpop.permute.xlu1 %2796  ;;  %v13110_v11 = vld [vmem:[%s20885_s0 + $0x168] sm:$0xf]  ;;  %v13112_v27 = vld [vmem:[%s20885_s0 + $0x178] sm:$0xf] }
 0x115   :  { %v2939_v45 = vsel %vm1045_vm0, %v15046_v44, %v2797_v42  ;;  %14286 = vmatmul.mubr.msk.bf16.gmra.mrb[24].mxu1 %vm1422_vm1, %v13007_v36  ;;  %v2795_v46 = vpop.permute.xlu0 %2794  ;;  %v4503_v34 = vor.u32 %v4502_v16, %v4498_v10  ;;  %v16978_v36 = vcombine.low %v13103_v20, %v13167_v21  ;;  %v13169_v42 = vld [vmem:[%s20885_s0 + $0x144] sm:$0x1]  ;;  %v15056_v21 = vld [vmem:[%s20885_s0 + $0xc0] sm:$0xf] }
 0x116   :  { %v2936_v51 = vsel %vm1045_vm0, %v15047_v50, %v2795_v46  ;;  %4795 = vrot.lane.b32.xlu1 %v4468_v31, %s15184_s8  ;;  %v4512_v31 = vshrl.u32 %v16913_v54, 16  ;;  %v4537_v46 = vrot.slane %v4535_v26, 1  ;;  %v13108_v54 = vld [vmem:[%s20885_s0 + $0x158] sm:$0xf]  ;;  %v17015_v59 = vcombine.low %v13105_v41, %v13169_v42  ;;  %v13173_v20 = vld [vmem:[%s20885_s0 + $0x164] sm:$0x1] }
 0x117   :  { %v13008_v57 = vcombine.low %v2936_v51, %v2939_v45  ;;  %4793 = vrot.lane.b32.xlu0 %v4461_v37, %s15184_s8  ;;  %v13106_v37 = vld [vmem:[%s20885_s0 + $0x148] sm:$0xf]  ;;  %v4524_v51 = vor.u32 %v4523_v30, %v4519_v25  ;;  %v4542_v58 = vshll.u32 %v16978_v36, 16  ;;  %v17061_v26 = vcombine.low %v13110_v11, %v13174_v12  ;;  %v12919_v11 = vld [vmem:[%s20885_s0 + $0x1b4] sm:$0x1] }
 0x118   :  { %v2801_v61 = vpop.permute.xlu1 %2800  ;;  %v17005_v53 = vcombine.low %v13106_v37, %v13170_v38  ;;  %v4556_v16 = vshll.u32 %v17015_v59, 16  ;;  %v13111_v38 = vld [vmem:[%s20885_s0 + $0x170] sm:$0xf] }
 0x119   :  { %v2945_v3 = vsel %vm1045_vm0, %v15048_v2, %v2801_v61  ;;  %14289 = vmatprep.mubr.msk.bf16.mxu1 %vm1422_vm1, %v13008_v57  ;;  %v2799_v4 = vpop.permute.xlu0 %2798  ;;  %v4530_v57 = vrot.slane %v4528_v35, 1  ;;  %v13171_v61 = vld [vmem:[%s20885_s0 + $0x154] sm:$0x1] }
 0x11a   :  { %v2942_v9 = vsel %vm1045_vm0, %v15049_v8, %v2799_v4  ;;  %4799 = vrot.lane.b32.xlu1 %v4482_v47, %s15184_s8  ;;  %v4526_v47 = vshrl.u32 %v16953_v17, 16  ;;  %v4551_v4 = vrot.slane %v4549_v48, 1  ;;  %v4540_v8 = vshrl.u32 %v16978_v36, 16 }
 0x11b   :  { %v13009_v14 = vcombine.low %v2942_v9, %v2945_v3  ;;  %4797 = vrot.lane.b32.xlu0 %v4475_v52, %s15184_s8  ;;  %v4517_v52 = vor.u32 %v4516_v32, %v4512_v31  ;;  %v4538_v3 = vor.u32 %v4537_v46, %v4533_v40  ;;  %v4563_v9 = vshll.u32 %v17005_v53, 16 }
 0x11c   :  { %v2805_v18 = vpop.permute.xlu1 %2804  ;;  %v17038_v10 = vcombine.low %v13107_v60, %v13171_v61  ;;  %v4554_v32 = vshrl.u32 %v17015_v59, 16  ;;  %v4558_v36 = vrot.slane %v4556_v16, 1  ;;  %v4591_v48 = vshll.u32 %v17061_v26, 16  ;;  %v12852_v61 = vld [vmem:[%s20885_s0 + $0x198] sm:$0xf] }
 0x11d   :  { %v2951_v23 = vsel %vm1045_vm0, %v15050_v22, %v2805_v18  ;;  %14290 = vmatmul.mubr.msk.bf16.gmra.mrb[28].mxu1 %vm1422_vm1, %v13009_v14  ;;  %v2803_v24 = vpop.permute.xlu0 %2802  ;;  %v4531_v14 = vor.u32 %v4530_v57, %v4526_v47  ;;  %v4561_v18 = vshrl.u32 %v17005_v53, 16  ;;  %v4565_v31 = vrot.slane %v4563_v9, 1  ;;  %v12853_v57 = vld [vmem:[%s20885_s0 + $0x1a0] sm:$0xf] }
 0x11e   :  { %v2948_v29 = vsel %vm1045_vm0, %v15051_v28, %v2803_v24  ;;  %4803 = vrot.lane.b32.xlu1 %v4496_v5, %s15184_s8  ;;  %v17029_v5 = vcombine.low %v13108_v54, %v13172_v55  ;;  %v4552_v24 = vor.u32 %v4551_v4, %v4547_v63  ;;  %v13176_v28 = vld [vmem:[%s20885_s0 + $0x17c] sm:$0x1]  ;;  %v4568_v47 = vshrl.u32 %v17038_v10, 16  ;;  %v15060_v63 = vld [vmem:[%s20885_s0 + $0xe0] sm:$0xf] }
 0x11f   :  { %v13010_v33 = vcombine.low %v2948_v29, %v2951_v23  ;;  %4801 = vrot.lane.b32.xlu0 %v4489_v15, %s15184_s8  ;;  %v4544_v15 = vrot.slane %v4542_v58, 1  ;;  %v15057_v29 = vld [vmem:[%s20885_s0 + $0xb8] sm:$0xf]  ;;  %v17086_v42 = vcombine.low %v13112_v27, %v13176_v28  ;;  %v4559_v55 = vor.u32 %v4558_v36, %v4554_v32  ;;  %v12917_v58 = vld [vmem:[%s20885_s0 + $0x1a4] sm:$0x1] }
 0x120   :  { %v2809_v39 = vpop.permute.xlu1 %2808  ;;  %v4577_v25 = vshll.u32 %v17029_v5, 16  ;;  %v4575_v41 = vshrl.u32 %v17029_v5, 16  ;;  %v4593_v4 = vrot.slane %v4591_v48, 1  ;;  %v15061_v5 = vld [vmem:[%s20885_s0 + $0xd8] sm:$0xf]  ;;  %v17129_v9 = vcombine.low %v12853_v57, %v12917_v58 }
 0x121   :  { %v2957_v44 = vsel %vm1045_vm0, %v15052_v43, %v2809_v39  ;;  %14293 = vmatprep.mubr.msk.bf16.mxu1 %vm1422_vm1, %v13010_v33  ;;  %v2807_v45 = vpop.permute.xlu0 %2806  ;;  %v4570_v33 = vshll.u32 %v17038_v10, 16  ;;  %v4545_v35 = vor.u32 %v4544_v15, %v4540_v8  ;;  %v13175_v39 = vld [vmem:[%s20885_s0 + $0x174] sm:$0x1]  ;;  %v15058_v43 = vld [vmem:[%s20885_s0 + $0xd0] sm:$0xf]  ;;  %v4605_v60 = vshll.u32 %v17086_v42, 16 }
 0x122   :  { %v2954_v50 = vsel %vm1045_vm0, %v15053_v49, %v2807_v45  ;;  %4807 = vrot.lane.b32.xlu1 %v4510_v19, %s15184_s8  ;;  %v13109_v19 = vld [vmem:[%s20885_s0 + $0x160] sm:$0xf]  ;;  %v4579_v46 = vrot.slane %v4577_v25, 1  ;;  %v15059_v49 = vld [vmem:[%s20885_s0 + $0xc8] sm:$0xf]  ;;  %v17100_v53 = vcombine.low %v13111_v38, %v13175_v39 }
 0x123   :  { %v13011_v56 = vcombine.low %v2954_v50, %v2957_v44  ;;  %4805 = vrot.lane.b32.xlu0 %v4503_v34, %s15184_s8  ;;  %v17077_v37 = vcombine.low %v13109_v19, %v13173_v20  ;;  %v12855_v10 = vld [vmem:[%s20885_s0 + $0x1b0] sm:$0xf]  ;;  %v12854_v19 = vld [vmem:[%s20885_s0 + $0x1a8] sm:$0xf]  ;;  %v12918_v20 = vld [vmem:[%s20885_s0 + $0x1ac] sm:$0x1] }
 0x124   :  { %v2813_v62 = vpop.permute.xlu1 %2812  ;;  %v4598_v8 = vshll.u32 %v17100_v53, 16  ;;  %v17153_v25 = vcombine.low %v12855_v10, %v12919_v11  ;;  %v15063_v27 = vld [vmem:[%s20885_s0 + $0xe8] sm:$0xf]  ;;  %v13178_v32 = vld [vmem:[%s20885_s0 + $0x18c] sm:$0x1]  ;;  %v17170_v36 = vcombine.low %v12854_v19, %v12918_v20 }
 0x125   :  { %v2963_v1 = vsel %vm1045_vm0, %v15054_v0, %v2813_v62  ;;  %14294 = vmatmul.mubr.msk.bf16.gmra.mrb[32].mxu1 %vm1422_vm1, %v13011_v56  ;;  %v2811_v2 = vpop.permute.xlu0 %2810  ;;  %v4584_v56 = vshll.u32 %v17077_v37, 16  ;;  %v12916_v62 = vld [vmem:[%s20885_s0 + $0x19c] sm:$0x1]  ;;  %v13113_v39 = vld [vmem:[%s20885_s0 + $0x180] sm:$0xf] }
 0x126   :  { %v2960_v7 = vsel %vm1045_vm0, %v15055_v6, %v2811_v2  ;;  %4811 = vrot.lane.b32.xlu1 %v4524_v51, %s15184_s8  ;;  %v4566_v51 = vor.u32 %v4565_v31, %v4561_v18  ;;  %v4580_v2 = vor.u32 %v4579_v46, %v4575_v41  ;;  %v17139_v15 = vcombine.low %v12852_v61, %v12916_v62  ;;  %v15064_v41 = vld [vmem:[%s20885_s0 + $0x100] sm:$0xf]  ;;  %v13115_v58 = vld [vmem:[%s20885_s0 + $0x190] sm:$0xf] }
 0x127   :  { %v13012_v13 = vcombine.low %v2960_v7, %v2963_v1  ;;  %4809 = vrot.lane.b32.xlu0 %v4517_v52, %s15184_s8  ;;  %v4572_v52 = vrot.slane %v4570_v33, 1  ;;  %v4607_v18 = vrot.slane %v4605_v60, 1  ;;  %v2668_v31 = vshll.u32 %v17129_v9, 16  ;;  %v15066_v62 = vld [vmem:[%s20885_s0 + $0x120] sm:$0xf] }
 0x128   :  { %v2817_v17 = vpop.permute.xlu1 %2816  ;;  %v2680_v61 = vshrl.u32 %v17153_v25, 16  ;;  %v15068_v19 = vld [vmem:[%s20885_s0 + $0x130] sm:$0xf] }
 0x129   :  { %v2969_v22 = vsel %vm1045_vm0, %v15056_v21, %v2817_v17  ;;  %14297 = vmatprep.mubr.msk.bf16.mxu1 %vm1422_vm1, %v13012_v13  ;;  %v2815_v23 = vpop.permute.xlu0 %2814  ;;  %v4573_v7 = vor.u32 %v4572_v52, %v4568_v47  ;;  %v4582_v13 = vshrl.u32 %v17077_v37, 16  ;;  %v4603_v17 = vshrl.u32 %v17086_v42, 16  ;;  %v15062_v21 = vld [vmem:[%s20885_s0 + $0xf0] sm:$0xf]  ;;  %v15065_v47 = vld [vmem:[%s20885_s0 + $0xf8] sm:$0xf] }
 0x12a   :  { %v2966_v30 = vsel %vm1045_vm0, %v15057_v29, %v2815_v23  ;;  %4815 = vrot.lane.b32.xlu1 %v4538_v3, %s15184_s8  ;;  %v4589_v3 = vshrl.u32 %v17061_v26, 16  ;;  %v13114_v26 = vld [vmem:[%s20885_s0 + $0x188] sm:$0xf]  ;;  %v4596_v29 = vshrl.u32 %v17100_v53, 16  ;;  %v13116_v52 = vld [vmem:[%s20885_s0 + $0x198] sm:$0xf] }
 0x12b   :  { %v13013_v34 = vcombine.low %v2966_v30, %v2969_v22  ;;  %4813 = vrot.lane.b32.xlu0 %v4531_v14, %s15184_s8  ;;  %v4586_v14 = vrot.slane %v4584_v56, 1  ;;  %v4600_v30 = vrot.slane %v4598_v8, 1  ;;  %v4608_v38 = vor.u32 %v4607_v18, %v4603_v17  ;;  %v13180_v53 = vld [vmem:[%s20885_s0 + $0x19c] sm:$0x1]  ;;  %v12856_v17 = vld [vmem:[%s20885_s0 + $0x1b8] sm:$0xf] }
 0x12c   :  { %v2821_v40 = vpop.permute.xlu1 %2820  ;;  %v17185_v46 = vcombine.low %v13114_v26, %v13178_v32  ;;  %v2675_v56 = vshll.u32 %v17170_v36, 16  ;;  %v12920_v18 = vld [vmem:[%s20885_s0 + $0x1bc] sm:$0x1]  ;;  %v12923_v26 = vld [vmem:[%s20885_s0 + $0x1d4] sm:$0x1] }
 0x12d   :  { %v2975_v44 = vsel %vm1045_vm0, %v15058_v43, %v2821_v40  ;;  %14298 = vmatmul.mubr.msk.bf16.gmra.mrb[36].mxu1 %vm1422_vm1, %v13013_v34  ;;  %v2819_v45 = vpop.permute.xlu0 %2818  ;;  %v4587_v34 = vor.u32 %v4586_v14, %v4582_v13  ;;  %v13177_v40 = vld [vmem:[%s20885_s0 + $0x184] sm:$0x1]  ;;  %v12857_v13 = vld [vmem:[%s20885_s0 + $0x1c0] sm:$0xf] }
 0x12e   :  { %v2972_v50 = vsel %vm1045_vm0, %v15059_v49, %v2819_v45  ;;  %4819 = vrot.lane.b32.xlu1 %v4552_v24, %s15184_s8  ;;  %v4594_v24 = vor.u32 %v4593_v4, %v4589_v3  ;;  %v2682_v45 = vshll.u32 %v17153_v25, 16  ;;  %v4601_v49 = vor.u32 %v4600_v30, %v4596_v29  ;;  %v15067_v4 = vld [vmem:[%s20885_s0 + $0x118] sm:$0xf]  ;;  %v12921_v14 = vld [vmem:[%s20885_s0 + $0x1c4] sm:$0x1] }
 0x12f   :  { %v13014_v54 = vcombine.low %v2972_v50, %v2975_v44  ;;  %4817 = vrot.lane.b32.xlu0 %v4545_v35, %s15184_s8  ;;  %v2661_v35 = vshll.u32 %v17139_v15, 16  ;;  %v2666_v44 = vshrl.u32 %v17129_v9, 16  ;;  %v2670_v50 = vrot.slane %v2668_v31, 1  ;;  %v12859_v25 = vld [vmem:[%s20885_s0 + $0x1d0] sm:$0xf] }
 0x130   :  { %v2825_v59 = vpop.permute.xlu1 %2824  ;;  %v17201_v57 = vcombine.low %v13113_v39, %v13177_v40  ;;  %v17216_v3 = vcombine.low %v13116_v52, %v13180_v53  ;;  %v2677_v11 = vrot.slane %v2675_v56, 1  ;;  %v17260_v31 = vcombine.low %v12857_v13, %v12921_v14  ;;  %v12922_v39 = vld [vmem:[%s20885_s0 + $0x1cc] sm:$0x1]  ;;  %v15070_v40 = vld [vmem:[%s20885_s0 + $0x140] sm:$0xf] }
 0x131   :  { %v2981_v0 = vsel %vm1045_vm0, %v15060_v63, %v2825_v59  ;;  %14301 = vmatprep.mubr.msk.bf16.mxu1 %vm1422_vm1, %v13014_v54  ;;  %v2823_v1 = vpop.permute.xlu0 %2822  ;;  %v13179_v59 = vld [vmem:[%s20885_s0 + $0x194] sm:$0x1]  ;;  %v13182_v52 = vld [vmem:[%s20885_s0 + $0x1ac] sm:$0x1] }
 0x132   :  { %v2978_v6 = vsel %vm1045_vm0, %v15061_v5, %v2823_v1  ;;  %4823 = vrot.lane.b32.xlu1 %v4566_v51, %s15184_s8  ;;  %v2659_v51 = vshrl.u32 %v17139_v15, 16  ;;  %v2684_v1 = vrot.slane %v2682_v45, 1  ;;  %v17224_v8 = vcombine.low %v13115_v58, %v13179_v59  ;;  %v13181_v58 = vld [vmem:[%s20885_s0 + $0x1a4] sm:$0x1] }
 0x133   :  { %v13015_v12 = vcombine.low %v2978_v6, %v2981_v0  ;;  %4821 = vrot.lane.b32.xlu0 %v4559_v55, %s15184_s8  ;;  %v2663_v55 = vrot.slane %v2661_v35, 1  ;;  %v2671_v6 = vor.u32 %v2670_v50, %v2666_v44  ;;  %v4610_v29 = vshrl.u32 %v17201_v57, 16 }
 0x134   :  { %v2829_v16 = vpop.permute.xlu1 %2828  ;;  %v4626_v30 = vshll.u32 %v17224_v8, 16  ;;  %v17263_v35 = vcombine.low %v12856_v17, %v12920_v18  ;;  %v4631_v44 = vshrl.u32 %v17216_v3, 16  ;;  %v13119_v18 = vld [vmem:[%s20885_s0 + $0x1b0] sm:$0xf] }
 0x135   :  { %v2987_v22 = vsel %vm1045_vm0, %v15062_v21, %v2829_v16  ;;  %14302 = vmatmul.mubr.msk.bf16.gmra.mrb[40].mxu1 %vm1422_vm1, %v13015_v12  ;;  %v2827_v23 = vpop.permute.xlu0 %2826  ;;  %v2664_v10 = vor.u32 %v2663_v55, %v2659_v51  ;;  %v4612_v12 = vshll.u32 %v17201_v57, 16  ;;  %v4617_v16 = vshrl.u32 %v17185_v46, 16  ;;  %v13117_v57 = vld [vmem:[%s20885_s0 + $0x1a0] sm:$0xf] }
 0x136   :  { %v2984_v28 = vsel %vm1045_vm0, %v15063_v27, %v2827_v23  ;;  %4827 = vrot.lane.b32.xlu1 %v4580_v2, %s15184_s8  ;;  %v4619_v2 = vshll.u32 %v17185_v46, 16  ;;  %v15069_v27 = vld [vmem:[%s20885_s0 + $0x128] sm:$0xf]  ;;  %v4628_v50 = vrot.slane %v4626_v30, 1  ;;  %v2696_v51 = vshll.u32 %v17260_v31, 16 }
 0x137   :  { %v13016_v33 = vcombine.low %v2984_v28, %v2987_v22  ;;  %4825 = vrot.lane.b32.xlu0 %v4573_v7, %s15184_s8  ;;  %v2673_v7 = vshrl.u32 %v17170_v36, 16  ;;  %v2685_v22 = vor.u32 %v2684_v1, %v2680_v61  ;;  %v13118_v46 = vld [vmem:[%s20885_s0 + $0x1a8] sm:$0xf]  ;;  %v2689_v55 = vshll.u32 %v17263_v35, 16  ;;  %v15072_v61 = vld [vmem:[%s20885_s0 + $0x150] sm:$0xf] }
 0x138   :  { %v2833_v37 = vpop.permute.xlu1 %2832  ;;  %v4621_v23 = vrot.slane %v4619_v2, 1  ;;  %v2694_v1 = vshrl.u32 %v17260_v31, 16  ;;  %v17309_v2 = vcombine.low %v13118_v46, %v13182_v52  ;;  %v12925_v30 = vld [vmem:[%s20885_s0 + $0x1e4] sm:$0x1]  ;;  %v15077_v46 = vld [vmem:[%s20885_s0 + $0x168] sm:$0xf] }
 0x139   :  { %v2993_v42 = vsel %vm1045_vm0, %v15064_v41, %v2833_v37  ;;  %14305 = vmatprep.mubr.msk.bf16.mxu1 %vm1422_vm1, %v13016_v33  ;;  %v2831_v43 = vpop.permute.xlu0 %2830  ;;  %v2678_v33 = vor.u32 %v2677_v11, %v2673_v7  ;;  %v17265_v37 = vcombine.low %v12859_v25, %v12923_v26  ;;  %v2687_v11 = vshrl.u32 %v17263_v35, 16  ;;  %v12860_v35 = vld [vmem:[%s20885_s0 + $0x1d8] sm:$0xf]  ;;  %v12927_v52 = vld [vmem:[%s20885_s0 + $0x1f4] sm:$0x1] }
 0x13a   :  { %v2990_v48 = vsel %vm1045_vm0, %v15065_v47, %v2831_v43  ;;  %4831 = vrot.lane.b32.xlu1 %v4594_v24, %s15184_s8  ;;  %v4633_v24 = vshll.u32 %v17216_v3, 16  ;;  %v4622_v43 = vor.u32 %v4621_v23, %v4617_v16  ;;  %v15071_v47 = vld [vmem:[%s20885_s0 + $0x138] sm:$0xf]  ;;  %v4647_v23 = vshll.u32 %v17309_v2, 16 }
 0x13b   :  { %v13017_v54 = vcombine.low %v2990_v48, %v2993_v42  ;;  %4829 = vrot.lane.b32.xlu0 %v4587_v34, %s15184_s8  ;;  %v4614_v34 = vrot.slane %v4612_v12, 1  ;;  %v13120_v3 = vld [vmem:[%s20885_s0 + $0x1b8] sm:$0xf]  ;;  %v2691_v12 = vrot.slane %v2689_v55, 1 }
 0x13c   :  { %v2837_v60 = vpop.permute.xlu1 %2836  ;;  %v4635_v45 = vrot.slane %v4633_v24, 1  ;;  %v15075_v24 = vld [vmem:[%s20885_s0 + $0x158] sm:$0xf] }
 0x13d   :  { %v2999_v63 = vsel %vm1045_vm0, %v15066_v62, %v2837_v60  ;;  %14306 = vmatmul.mubr.msk.bf16.gmra.mrb[44].mxu1 %vm1422_vm1, %v13017_v54  ;;  %v2835_v0 = vpop.permute.xlu0 %2834  ;;  %v4615_v54 = vor.u32 %v4614_v34, %v4610_v29  ;;  %v2710_v60 = vshll.u32 %v17265_v37, 16  ;;  %v12861_v29 = vld [vmem:[%s20885_s0 + $0x1e0] sm:$0xf] }
 0x13e   :  { %v2996_v5 = vsel %vm1045_vm0, %v15067_v4, %v2835_v0  ;;  %4835 = vrot.lane.b32.xlu1 %v4608_v38, %s15184_s8  ;;  %v12858_v38 = vld [vmem:[%s20885_s0 + $0x1c8] sm:$0xf]  ;;  %v4636_v0 = vor.u32 %v4635_v45, %v4631_v44  ;;  %v13184_v4 = vld [vmem:[%s20885_s0 + $0x1bc] sm:$0x1]  ;;  %v4649_v44 = vrot.slane %v4647_v23, 1 }
 0x13f   :  { %v13018_v9 = vcombine.low %v2996_v5, %v2999_v63  ;;  %4833 = vrot.lane.b32.xlu0 %v4601_v49, %s15184_s8  ;;  %v4624_v49 = vshrl.u32 %v17224_v8, 16  ;;  %v17294_v56 = vcombine.low %v12858_v38, %v12922_v39  ;;  %v15073_v5 = vld [vmem:[%s20885_s0 + $0x148] sm:$0xf]  ;;  %v2698_v8 = vrot.slane %v2696_v51, 1  ;;  %v12863_v51 = vld [vmem:[%s20885_s0 + $0x1f0] sm:$0xf] }
 0x140   :  { %v2841_v15 = vpop.permute.xlu1 %2840  ;;  %v2712_v16 = vrot.slane %v2710_v60, 1  ;;  %v17328_v17 = vcombine.low %v13120_v3, %v13184_v4  ;;  %v12926_v60 = vld [vmem:[%s20885_s0 + $0x1ec] sm:$0x1] }
 0x141   :  { %v3005_v20 = vsel %vm1045_vm0, %v15068_v19, %v2841_v15  ;;  %14309 = vmatprep.mubr.msk.bf16.mxu1 %vm1422_vm1, %v13018_v9  ;;  %v2839_v21 = vpop.permute.xlu0 %2838  ;;  %v4629_v7 = vor.u32 %v4628_v50, %v4624_v49  ;;  %v17322_v9 = vcombine.low %v13117_v57, %v13181_v58  ;;  %v2703_v13 = vshll.u32 %v17294_v56, 16  ;;  %v13183_v19 = vld [vmem:[%s20885_s0 + $0x1b4] sm:$0x1] }
 0x142   :  { %v3002_v28 = vsel %vm1045_vm0, %v15069_v27, %v2839_v21  ;;  %2868 = vrot.lane.b32.xlu1 %v2671_v6, %s15184_s8  ;;  %v2708_v15 = vshrl.u32 %v17265_v37, 16  ;;  %v2699_v26 = vor.u32 %v2698_v8, %v2694_v1  ;;  %v2701_v27 = vshrl.u32 %v17294_v56, 16  ;;  %v13186_v8 = vld [vmem:[%s20885_s0 + $0x1cc] sm:$0x1] }
 0x143   :  { %v13019_v32 = vcombine.low %v3002_v28, %v3005_v20  ;;  %2866 = vrot.lane.b32.xlu0 %v2664_v10, %s15184_s8  ;;  %v15074_v20 = vld [vmem:[%s20885_s0 + $0x160] sm:$0xf]  ;;  %v4640_v28 = vshll.u32 %v17322_v9, 16  ;;  %v17356_v34 = vcombine.low %v13119_v18, %v13183_v19  ;;  %v4661_v39 = vshll.u32 %v17328_v17, 16 }
 0x144   :  { %v2845_v36 = vpop.permute.xlu1 %2844  ;;  %v2713_v38 = vor.u32 %v2712_v16, %v2708_v15  ;;  %v4638_v45 = vshrl.u32 %v17322_v9, 16  ;;  %v17377_v49 = vcombine.low %v12861_v29, %v12925_v30  ;;  %v4659_v57 = vshrl.u32 %v17328_v17, 16  ;;  %v13121_v15 = vld [vmem:[%s20885_s0 + $0x1c0] sm:$0xf]  ;;  %v13185_v16 = vld [vmem:[%s20885_s0 + $0x1c4] sm:$0x1] }
 0x145   :  { %v3011_v41 = vsel %vm1045_vm0, %v15070_v40, %v2845_v36  ;;  %14310 = vmatmul.mubr.msk.bf16.gmra.mrb[48].mxu1 %vm1422_vm1, %v13019_v32  ;;  %v2843_v42 = vpop.permute.xlu0 %2842  ;;  %v2692_v32 = vor.u32 %v2691_v12, %v2687_v11  ;;  %v12924_v36 = vld [vmem:[%s20885_s0 + $0x1dc] sm:$0x1]  ;;  %v15076_v40 = vld [vmem:[%s20885_s0 + $0x170] sm:$0xf]  ;;  %v4654_v55 = vshll.u32 %v17356_v34, 16  ;;  %v4663_v58 = vrot.slane %v4661_v39, 1 }
 0x146   :  { %v3008_v48 = vsel %vm1045_vm0, %v15071_v47, %v2843_v42  ;;  %2872 = vrot.lane.b32.xlu1 %v2685_v22, %s15184_s8  ;;  %v17379_v50 = vcombine.low %v12860_v35, %v12924_v36  ;;  %v17401_v1 = vcombine.low %v12863_v51, %v12927_v52  ;;  %v15080_v17 = vld [vmem:[%s20885_s0 + $0x190] sm:$0xf]  ;;  %v17451_v36 = vcombine.low %v13121_v15, %v13185_v16 }
 0x147   :  { %v13020_v53 = vcombine.low %v3008_v48, %v3011_v41  ;;  %2870 = vrot.lane.b32.xlu0 %v2678_v33, %s15184_s8  ;;  %v2705_v33 = vrot.slane %v2703_v13, 1  ;;  %v4642_v48 = vrot.slane %v4640_v28, 1  ;;  %v4656_v11 = vrot.slane %v4654_v55, 1 }
 0x148   :  { %v2849_v59 = vpop.permute.xlu1 %2848  ;;  %v2715_v29 = vshrl.u32 %v17379_v50, 16  ;;  %v2736_v39 = vshrl.u32 %v17401_v1, 16 }
 0x149   :  { %v3017_v62 = vsel %vm1045_vm0, %v15072_v61, %v2849_v59  ;;  %14313 = vmatprep.mubr.msk.bf16.mxu1 %vm1422_vm1, %v13020_v53  ;;  %v2847_v63 = vpop.permute.xlu0 %2846  ;;  %v12862_v59 = vld [vmem:[%s20885_s0 + $0x1e8] sm:$0xf]  ;;  %v15078_v61 = vld [vmem:[%s20885_s0 + $0x180] sm:$0xf]  ;;  %v4643_v4 = vor.u32 %v4642_v48, %v4638_v45  ;;  %v15083_v48 = vld [vmem:[%s20885_s0 + $0x10] sm:$0xf] }
 0x14a   :  { %v3014_v6 = vsel %vm1045_vm0, %v15073_v5, %v2847_v63  ;;  %4839 = vrot.lane.b32.xlu1 %v4622_v43, %s15184_s8  ;;  %v4645_v43 = vshrl.u32 %v17309_v2, 16  ;;  %v15079_v2 = vld [vmem:[%s20885_s0 + $0x178] sm:$0xf]  ;;  %v2724_v5 = vshll.u32 %v17377_v49, 16  ;;  %v17418_v12 = vcombine.low %v12862_v59, %v12926_v60  ;;  %v12928_v60 = vld [vmem:[%s20885_s0 + $0x1fc] sm:$0x1] }
 0x14b   :  { %v13021_v10 = vcombine.low %v3014_v6, %v3017_v62  ;;  %4837 = vrot.lane.b32.xlu0 %v4615_v54, %s15184_s8  ;;  %v2706_v54 = vor.u32 %v2705_v33, %v2701_v27  ;;  %v2717_v6 = vshll.u32 %v17379_v50, 16  ;;  %v12864_v59 = vld [vmem:[%s20885_s0 + $0x1f8] sm:$0xf] }
 0x14c   :  { %v2853_v14 = vpop.permute.xlu1 %2852  ;;  %v2726_v28 = vrot.slane %v2724_v5, 1  ;;  %v2731_v35 = vshll.u32 %v17418_v12, 16  ;;  %v2729_v52 = vshrl.u32 %v17418_v12, 16  ;;  %v12867_v12 = vld [vmem:[%s20885_s0 + $0x210] sm:$0xf] }
 0x14d   :  { %v3023_v21 = vsel %vm1045_vm0, %v15074_v20, %v2853_v14  ;;  %14314 = vmatmul.mubr.msk.bf16.gmra.mrb[52].mxu1 %vm1422_vm1, %v13021_v10  ;;  %v2851_v22 = vpop.permute.xlu0 %2850  ;;  %v4652_v10 = vshrl.u32 %v17356_v34, 16  ;;  %v4664_v14 = vor.u32 %v4663_v58, %v4659_v57  ;;  %v2719_v30 = vrot.slane %v2717_v6, 1  ;;  %v15085_v6 = vld [vmem:[%s20885_s0 + $0x20] sm:$0xf] }
 0x14e   :  { %v3020_v25 = vsel %vm1045_vm0, %v15075_v24, %v2851_v22  ;;  %4843 = vrot.lane.b32.xlu1 %v4636_v0, %s15184_s8  ;;  %v4650_v0 = vor.u32 %v4649_v44, %v4645_v43  ;;  %v2738_v22 = vshll.u32 %v17401_v1, 16  ;;  %v13124_v24 = vld [vmem:[%s20885_s0 + $0x1d8] sm:$0xf]  ;;  %v4668_v57 = vshll.u32 %v17451_v36, 16 }
 0x14f   :  { %v13022_v31 = vcombine.low %v3020_v25, %v3023_v21  ;;  %4841 = vrot.lane.b32.xlu0 %v4629_v7, %s15184_s8  ;;  %v13122_v7 = vld [vmem:[%s20885_s0 + $0x1c8] sm:$0xf]  ;;  %v2722_v21 = vshrl.u32 %v17377_v49, 16  ;;  %v4657_v34 = vor.u32 %v4656_v11, %v4652_v10  ;;  %v2720_v51 = vor.u32 %v2719_v30, %v2715_v29 }
 0x150   :  { %v2857_v37 = vpop.permute.xlu1 %2856  ;;  %v17433_v23 = vcombine.low %v13122_v7, %v13186_v8  ;;  %v15081_v25 = vld [vmem:[%s20885_s0 + $0x188] sm:$0xf]  ;;  %v2740_v45 = vrot.slane %v2738_v22, 1  ;;  %v17508_v11 = vcombine.low %v12864_v59, %v12928_v60 }
 0x151   :  { %v3029_v41 = vsel %vm1045_vm0, %v15076_v40, %v2857_v37  ;;  %14317 = vmatprep.mubr.msk.bf16.mxu1 %vm1422_vm1, %v13022_v31  ;;  %v2855_v42 = vpop.permute.xlu0 %2854  ;;  %v13188_v31 = vld [vmem:[%s20885_s0 + $0x1dc] sm:$0x1]  ;;  %v13123_v40 = vld [vmem:[%s20885_s0 + $0x1d0] sm:$0xf]  ;;  %v2727_v50 = vor.u32 %v2726_v28, %v2722_v21 }
 0x152   :  { %v3026_v47 = vsel %vm1045_vm0, %v15077_v46, %v2855_v42  ;;  %2876 = vrot.lane.b32.xlu1 %v2699_v26, %s15184_s8  ;;  %v15082_v42 = vld [vmem:[%s20885_s0 + $0x18] sm:$0xf]  ;;  %v4675_v46 = vshll.u32 %v17433_v23, 16 }
 0x153   :  { %v13023_v53 = vcombine.low %v3026_v47, %v3029_v41  ;;  %2874 = vrot.lane.b32.xlu0 %v2692_v32, %s15184_s8  ;;  %v13187_v41 = vld [vmem:[%s20885_s0 + $0x1d4] sm:$0x1]  ;;  %v17468_v47 = vcombine.low %v13124_v24, %v13188_v31  ;;  %v13126_v24 = vld [vmem:[%s20885_s0 + $0x1e8] sm:$0xf]  ;;  %v13190_v31 = vld [vmem:[%s20885_s0 + $0x1ec] sm:$0x1] }
 0x154   :  { %v2861_v56 = vpop.permute.xlu1 %2860  ;;  %v17484_v58 = vcombine.low %v13123_v40, %v13187_v41 }
 0x155   :  { %v3035_v62 = vsel %vm1045_vm0, %v15078_v61, %v2861_v56  ;;  %14318 = vmatmul.mubr.msk.bf16.gmra.mrb[56].mxu1 %vm1422_vm1, %v13023_v53  ;;  %v2859_v63 = vpop.permute.xlu0 %2858  ;;  %v12865_v53 = vld [vmem:[%s20885_s0 + $0x200] sm:$0xf]  ;;  %v2733_v56 = vrot.slane %v2731_v35, 1  ;;  %v4689_v5 = vshll.u32 %v17468_v47, 16  ;;  %v4687_v22 = vshrl.u32 %v17468_v47, 16 }
 0x156   :  { %v3032_v3 = vsel %vm1045_vm0, %v15079_v2, %v2859_v63  ;;  %2880 = vrot.lane.b32.xlu1 %v2713_v38, %s15184_s8  ;;  %v15084_v63 = vld [vmem:[%s20885_s0 + $0x28] sm:$0xf]  ;;  %v4680_v35 = vshrl.u32 %v17484_v58, 16 }
 0x157   :  { %v13024_v9 = vcombine.low %v3032_v3, %v3035_v62  ;;  %2878 = vrot.lane.b32.xlu0 %v2706_v54, %s15184_s8  ;;  %v12929_v54 = vld [vmem:[%s20885_s0 + $0x204] sm:$0x1]  ;;  %v4673_v62 = vshrl.u32 %v17433_v23, 16  ;;  %v2741_v3 = vor.u32 %v2740_v45, %v2736_v39  ;;  %v2734_v16 = vor.u32 %v2733_v56, %v2729_v52  ;;  %v12930_v23 = vld [vmem:[%s20885_s0 + $0x20c] sm:$0x1] }
 0x158   :  { %v2865_v13 = vpop.permute.xlu1 %2864  ;;  %v17506_v10 = vcombine.low %v12865_v53, %v12929_v54  ;;  %v4691_v29 = vrot.slane %v4689_v5, 1  ;;  %v17559_v45 = vcombine.low %v13126_v24, %v13190_v31  ;;  %v15089_v53 = vld [vmem:[%s20885_s0 + $0x40] sm:$0xf]  ;;  %v13191_v5 = vld [vmem:[%s20885_s0 + $0x1f4] sm:$0x1] }
 0x159   :  { %v3041_v18 = vsel %vm1045_vm0, %v15080_v17, %v2865_v13  ;;  %v14209_v19 = vpop.f32.mrb[0].mxu0  ;;  %14321 = vmatprep.mubr.msk.bf16.mxu1 %vm1422_vm1, %v13024_v9  ;;  %v2863_v20 = vpop.permute.xlu0 %2862  ;;  %v4666_v9 = vshrl.u32 %v17451_v36, 16  ;;  %v12931_v13 = vld [vmem:[%s20885_s0 + $0x214] sm:$0x1]  ;;  %v4670_v17 = vrot.slane %v4668_v57, 1  ;;  %v2743_v57 = vshrl.u32 %v17508_v11, 16 }
 0x15a   :  { %1811 = vst.msk [vmem:[#allocation3 + $0x10] sm:$0xff] %vm1808_vm2, %v14209_v19  ;;  %v3038_v26 = vsel %vm1045_vm0, %v15081_v25, %v2863_v20  ;;  %v1553_v27 = vpop.f32.mrb[1].mxu0  ;;  %4847 = vrot.lane.b32.xlu1 %v4650_v0, %s15184_s8  ;;  %v12866_v19 = vld [vmem:[%s20885_s0 + $0x208] sm:$0xf]  ;;  %v15086_v25 = vld [vmem:[%s20885_s0 + $0x38] sm:$0xf]  ;;  %v17536_v30 = vcombine.low %v12867_v12, %v12931_v13 }
 0x15b   :  { %v13025_v32 = vcombine.low %v3038_v26, %v3041_v18  ;;  %1809 = vst.msk [vmem:[#allocation3] sm:$0xff] %vm1808_vm2, %v1553_v27  ;;  %v14210_v33 = vpop.f32.mrb[2].mxu0  ;;  %4845 = vrot.lane.b32.xlu0 %v4643_v4, %s15184_s8  ;;  %v4677_v4 = vrot.slane %v4675_v46, 1  ;;  %v4682_v18 = vshll.u32 %v17484_v58, 16  ;;  %v2752_v36 = vshll.u32 %v17506_v10, 16 }
 0x15c   :  { %1812 = vst.msk [vmem:[#allocation3 + $0x18] sm:$0xff] %vm1808_vm2, %v14210_v33  ;;  %v1556_v37 = vpop.f32.mrb[3].mxu0  ;;  %v4752_v38 = vpop.permute.xlu1 %4751  ;;  %v15087_v33 = vld [vmem:[%s20885_s0 + $0x30] sm:$0xf]  ;;  %v4671_v40 = vor.u32 %v4670_v17, %v4666_v9  ;;  %v15088_v46 = vld [vmem:[%s20885_s0 + $0x48] sm:$0xf] }
 0x15d   :  { %1810 = vst.msk [vmem:[#allocation3 + $0x8] sm:$0xff] %vm1808_vm2, %v1556_v37  ;;  %v4882_v43 = vsel %vm1045_vm0, %v15082_v42, %v4752_v38  ;;  %14322 = vmatmul.mubr.msk.bf16.gmra.mrb[60].mxu1 %vm1422_vm1, %v13025_v32  ;;  %v4750_v44 = vpop.permute.xlu0 %4749  ;;  %v4678_v28 = vor.u32 %v4677_v4, %v4673_v62  ;;  %v13125_v32 = vld [vmem:[%s20885_s0 + $0x1e0] sm:$0xf]  ;;  %v2745_v37 = vshll.u32 %v17508_v11, 16  ;;  %v13189_v38 = vld [vmem:[%s20885_s0 + $0x1e4] sm:$0x1]  ;;  %v17556_v42 = vcombine.low %v12866_v19, %v12930_v23 }
 0x15e   :  { %v4879_v49 = vsel %vm1045_vm0, %v15083_v48, %v4750_v44  ;;  %4851 = vrot.lane.b32.xlu1 %v4664_v14, %s15184_s8  ;;  %v4684_v41 = vrot.slane %v4682_v18, 1  ;;  %v2750_v44 = vshrl.u32 %v17506_v10, 16  ;;  %v17567_v52 = vcombine.low %v13125_v32, %v13189_v38  ;;  %v13127_v4 = vld [vmem:[%s20885_s0 + $0x1f0] sm:$0xf] }
 0x15f   :  { %v13267_v55 = vcombine.low %v4879_v49, %v4882_v43  ;;  %4849 = vrot.lane.b32.xlu0 %v4657_v34, %s15184_s8  ;;  %v2754_v56 = vrot.slane %v2752_v36, 1  ;;  %v2747_v58 = vrot.slane %v2745_v37, 1  ;;  %v2759_v62 = vshll.u32 %v17556_v42, 16  ;;  %v15091_v12 = vld [vmem:[%s20885_s0 + $0x50] sm:$0xf] }
 0x160   :  { %v4756_v61 = vpop.permute.xlu1 %4755  ;;  %v2764_v9 = vshrl.u32 %v17536_v30, 16  ;;  %v4696_v11 = vshll.u32 %v17567_v52, 16  ;;  %v2757_v18 = vshrl.u32 %v17556_v42, 16  ;;  %v4701_v24 = vshrl.u32 %v17559_v45, 16 }
 0x161   :  { %v4888_v0 = vsel %vm1045_vm0, %v15084_v63, %v4756_v61  ;;  %v14213_v1 = vpop.f32.mrb[4].mxu0  ;;  %14347 = vmatprep.mubr.msk.bf16.mxu0 %vm1422_vm1, %v13267_v55  ;;  %v4754_v2 = vpop.permute.xlu0 %4753  ;;  %v4685_v61 = vor.u32 %v4684_v41, %v4680_v35  ;;  %v13128_v63 = vld [vmem:[%s20885_s0 + $0x1f8] sm:$0xf]  ;;  %v2761_v19 = vrot.slane %v2759_v62, 1  ;;  %v4694_v32 = vshrl.u32 %v17567_v52, 16 }
 0x162   :  { %1815 = vst.msk [vmem:[#allocation3 + $0x30] sm:$0xff] %vm1808_vm2, %v14213_v1  ;;  %v4885_v7 = vsel %vm1045_vm0, %v15085_v6, %v4754_v2  ;;  %v1569_v8 = vpop.f32.mrb[5].mxu0  ;;  %2884 = vrot.lane.b32.xlu1 %v2727_v50, %s15184_s8  ;;  %v4692_v50 = vor.u32 %v4691_v29, %v4687_v22  ;;  %v15090_v6 = vld [vmem:[%s20885_s0 + $0x58] sm:$0xf]  ;;  %v13194_v22 = vld [vmem:[%s20885_s0 + $0x20c] sm:$0x1] }
 0x163   :  { %v13268_v14 = vcombine.low %v4885_v7, %v4888_v0  ;;  %1813 = vst.msk [vmem:[#allocation3 + $0x20] sm:$0xff] %vm1808_vm2, %v1569_v8  ;;  %v14214_v15 = vpop.f32.mrb[6].mxu0  ;;  %2882 = vrot.lane.b32.xlu0 %v2720_v51, %s15184_s8  ;;  %v2766_v51 = vshll.u32 %v17536_v30, 16  ;;  %v13192_v0 = vld [vmem:[%s20885_s0 + $0x1fc] sm:$0x1]  ;;  %v2762_v42 = vor.u32 %v2761_v19, %v2757_v18 }
 0x164   :  { %1816 = vst.msk [vmem:[#allocation3 + $0x38] sm:$0xff] %vm1808_vm2, %v14214_v15  ;;  %v1572_v20 = vpop.f32.mrb[7].mxu0  ;;  %v4760_v21 = vpop.permute.xlu1 %4759  ;;  %v2748_v15 = vor.u32 %v2747_v58, %v2743_v57  ;;  %v15094_v52 = vld [vmem:[%s20885_s0 + $0x78] sm:$0xf]  ;;  %v15095_v58 = vld [vmem:[%s20885_s0 + $0x70] sm:$0xf] }
 0x165   :  { %1814 = vst.msk [vmem:[#allocation3 + $0x28] sm:$0xff] %vm1808_vm2, %v1572_v20  ;;  %v4894_v26 = vsel %vm1045_vm0, %v15086_v25, %v4760_v21  ;;  %14348 = vmatmul.mubr.msk.bf16.vlgmr.msra.gmra.mrb[48].mxu0 %vm1422_vm1, %v13268_v14  ;;  %v4758_v27 = vpop.permute.xlu0 %4757  ;;  %v2768_v10 = vrot.slane %v2766_v51, 1  ;;  %v2755_v14 = vor.u32 %v2754_v56, %v2750_v44  ;;  %v17610_v20 = vcombine.low %v13127_v4, %v13191_v5  ;;  %v13130_v21 = vld [vmem:[%s20885_s0 + $0x208] sm:$0xf]  ;;  %v13195_v51 = vld [vmem:[%s20885_s0 + $0x214] sm:$0x1] }
 0x166   :  { %v4891_v34 = vsel %vm1045_vm0, %v15087_v33, %v4758_v27  ;;  %2888 = vrot.lane.b32.xlu1 %v2741_v3, %s15184_s8  ;;  %v4703_v3 = vshll.u32 %v17559_v45, 16  ;;  %v13193_v27 = vld [vmem:[%s20885_s0 + $0x204] sm:$0x1]  ;;  %v4698_v33 = vrot.slane %v4696_v11, 1  ;;  %v13132_v45 = vld [vmem:[%s20885_s0 + $0x218] sm:$0xf] }
 0x167   :  { %v13269_v39 = vcombine.low %v4891_v34, %v4894_v26  ;;  %2886 = vrot.lane.b32.xlu0 %v2734_v16, %s15184_s8  ;;  %v17606_v16 = vcombine.low %v13128_v63, %v13192_v0  ;;  %v13129_v26 = vld [vmem:[%s20885_s0 + $0x200] sm:$0xf]  ;;  %v2769_v37 = vor.u32 %v2768_v10, %v2764_v9  ;;  %v4708_v57 = vshrl.u32 %v17610_v20, 16  ;;  %v15096_v4 = vld [vmem:[%s20885_s0 + $0x88] sm:$0xf] }
 0x168   :  { %v4764_v43 = vpop.permute.xlu1 %4763  ;;  %v4705_v25 = vrot.slane %v4703_v3, 1  ;;  %v15093_v34 = vld [vmem:[%s20885_s0 + $0x60] sm:$0xf]  ;;  %v17643_v44 = vcombine.low %v13129_v26, %v13193_v27  ;;  %v15099_v26 = vld [vmem:[%s20885_s0 + $0x90] sm:$0xf] }
 0x169   :  { %v4900_v47 = vsel %vm1045_vm0, %v15088_v46, %v4764_v43  ;;  %v14217_v48 = vpop.f32.mrb[8].mxu0  ;;  %14351 = vmatprep.mubr.msk.bf16.mxu0 %vm1422_vm1, %v13269_v39  ;;  %v4762_v49 = vpop.permute.xlu0 %4761  ;;  %v4717_v38 = vshll.u32 %v17606_v16, 16  ;;  %v17638_v39 = vcombine.low %v13130_v21, %v13194_v22  ;;  %v4710_v43 = vshll.u32 %v17610_v20, 16  ;;  %v13196_v46 = vld [vmem:[%s20885_s0 + $0x21c] sm:$0x1] }
 0x16a   :  { %1819 = vst.msk [vmem:[#allocation3 + $0x50] sm:$0xff] %vm1808_vm2, %v14217_v48  ;;  %v4897_v54 = vsel %vm1045_vm0, %v15089_v53, %v4762_v49  ;;  %v1585_v55 = vpop.f32.mrb[9].mxu0  ;;  %4855 = vrot.lane.b32.xlu1 %v4678_v28, %s15184_s8  ;;  %v15092_v28 = vld [vmem:[%s20885_s0 + $0x68] sm:$0xf]  ;;  %v4706_v49 = vor.u32 %v4705_v25, %v4701_v24  ;;  %v4715_v56 = vshrl.u32 %v17606_v16, 16  ;;  %v13260_v62 = vcombine.low %v13132_v45, %v13196_v46 }
 0x16b   :  { %v13270_v59 = vcombine.low %v4897_v54, %v4900_v47  ;;  %1817 = vst.msk [vmem:[#allocation3 + $0x40] sm:$0xff] %vm1808_vm2, %v1585_v55  ;;  %v14218_v60 = vpop.f32.mrb[10].mxu0  ;;  %4853 = vrot.lane.b32.xlu0 %v4671_v40, %s15184_s8  ;;  %v4699_v55 = vor.u32 %v4698_v33, %v4694_v32  ;;  %v4712_v0 = vrot.slane %v4710_v43, 1  ;;  %v4722_v9 = vshrl.u32 %v17643_v44, 16  ;;  %v15097_v10 = vld [vmem:[%s20885_s0 + $0x80] sm:$0xf] }
 0x16c   :  { %1820 = vst.msk [vmem:[#allocation3 + $0x58] sm:$0xff] %vm1808_vm2, %v14218_v60  ;;  %v1588_v1 = vpop.f32.mrb[11].mxu0  ;;  %v4768_v2 = vpop.permute.xlu1 %4767  ;;  %v4719_v60 = vrot.slane %v4717_v38, 1 }
 0x16d   :  { %1818 = vst.msk [vmem:[#allocation3 + $0x48] sm:$0xff] %vm1808_vm2, %v1588_v1  ;;  %v4906_v7 = vsel %vm1045_vm0, %v15090_v6, %v4768_v2  ;;  %14352 = vmatmul.mubr.msk.bf16.gmra.mrb[52].mxu0 %vm1422_vm1, %v13270_v59  ;;  %v4766_v8 = vpop.permute.xlu0 %4765  ;;  %v4724_v1 = vshll.u32 %v17643_v44, 16  ;;  %v4713_v18 = vor.u32 %v4712_v0, %v4708_v57 }
 0x16e   :  { %v4903_v13 = vsel %vm1045_vm0, %v15091_v12, %v4766_v8  ;;  %4859 = vrot.lane.b32.xlu1 %v4692_v50, %s15184_s8  ;;  %v13131_v50 = vld [vmem:[%s20885_s0 + $0x210] sm:$0xf]  ;;  %v4729_v8 = vshrl.u32 %v17638_v39, 16 }
 0x16f   :  { %v13271_v17 = vcombine.low %v4903_v13, %v4906_v7  ;;  %4857 = vrot.lane.b32.xlu0 %v4685_v61, %s15184_s8  ;;  %v4731_v61 = vshll.u32 %v17638_v39, 16  ;;  %v13259_v2 = vcombine.low %v13131_v50, %v13195_v51  ;;  %v4720_v13 = vor.u32 %v4719_v60, %v4715_v56  ;;  %v15104_v56 = vld [vmem:[%s20885_s0 + $0xc8] sm:$0xf]  ;;  %v15105_v60 = vld [vmem:[%s20885_s0 + $0xc0] sm:$0xf] }
 0x170   :  { %v4772_v23 = vpop.permute.xlu1 %4771  ;;  %v4726_v19 = vrot.slane %v4724_v1, 1 }
 0x171   :  { %v4912_v29 = vsel %vm1045_vm0, %v15092_v28, %v4772_v23  ;;  %v14221_v30 = vpop.f32.mrb[12].mxu0  ;;  %14355 = vmatprep.mubr.msk.bf16.mxu0 %vm1422_vm1, %v13271_v17  ;;  %v4770_v31 = vpop.permute.xlu0 %4769  ;;  %v4738_v20 = vshll.u32 %v13259_v2, 16  ;;  %v15098_v23 = vld [vmem:[%s20885_s0 + $0x98] sm:$0xf]  ;;  %v4736_v33 = vshrl.u32 %v13259_v2, 16 }
 0x172   :  { %1823 = vst.msk [vmem:[#allocation3 + $0x70] sm:$0xff] %vm1808_vm2, %v14221_v30  ;;  %v4909_v35 = vsel %vm1045_vm0, %v15093_v34, %v4770_v31  ;;  %v1601_v36 = vpop.f32.mrb[13].mxu0  ;;  %2892 = vrot.lane.b32.xlu1 %v2755_v14, %s15184_s8  ;;  %v4733_v14 = vrot.slane %v4731_v61, 1  ;;  %v4727_v32 = vor.u32 %v4726_v19, %v4722_v9 }
 0x173   :  { %v13272_v40 = vcombine.low %v4909_v35, %v4912_v29  ;;  %1821 = vst.msk [vmem:[#allocation3 + $0x60] sm:$0xff] %vm1808_vm2, %v1601_v36  ;;  %v14222_v41 = vpop.f32.mrb[14].mxu0  ;;  %2890 = vrot.lane.b32.xlu0 %v2748_v15, %s15184_s8  ;;  %v4745_v15 = vshll.u32 %v13260_v62, 16  ;;  %v4743_v29 = vshrl.u32 %v13260_v62, 16  ;;  %v4740_v34 = vrot.slane %v4738_v20, 1 }
 0x174   :  { %1824 = vst.msk [vmem:[#allocation3 + $0x78] sm:$0xff] %vm1808_vm2, %v14222_v41  ;;  %v1604_v47 = vpop.f32.mrb[15].mxu0  ;;  %v4776_v48 = vpop.permute.xlu1 %4775  ;;  %v4734_v28 = vor.u32 %v4733_v14, %v4729_v8  ;;  %v15100_v36 = vld [vmem:[%s20885_s0 + $0xa8] sm:$0xf]  ;;  %v15109_v14 = vld [vmem:[%s20885_s0 + $0xe0] sm:$0xf] }
 0x175   :  { %1822 = vst.msk [vmem:[#allocation3 + $0x68] sm:$0xff] %vm1808_vm2, %v1604_v47  ;;  %v4918_v53 = vsel %vm1045_vm0, %v15094_v52, %v4776_v48  ;;  %14356 = vmatmul.mubr.msk.bf16.gmra.mrb[56].mxu0 %vm1422_vm1, %v13272_v40  ;;  %v4774_v54 = vpop.permute.xlu0 %4773  ;;  %v4747_v30 = vrot.slane %v4745_v15, 1  ;;  %v15101_v40 = vld [vmem:[%s20885_s0 + $0xa0] sm:$0xf]  ;;  %v4741_v46 = vor.u32 %v4740_v34, %v4736_v33  ;;  %v15103_v52 = vld [vmem:[%s20885_s0 + $0xb0] sm:$0xf] }
 0x176   :  { %v4915_v59 = vsel %vm1045_vm0, %v15095_v58, %v4774_v54  ;;  %2896 = vrot.lane.b32.xlu1 %v2769_v37, %s15184_s8 }
 0x177   :  { %v13273_v63 = vcombine.low %v4915_v59, %v4918_v53  ;;  %2894 = vrot.lane.b32.xlu0 %v2762_v42, %s15184_s8  ;;  %v4748_v43 = vor.u32 %v4747_v30, %v4743_v29 }
 0x178   :  { %v4780_v3 = vpop.permute.xlu1 %4779 }
 0x179   :  { %v4924_v5 = vsel %vm1045_vm0, %v15096_v4, %v4780_v3  ;;  %v14225_v6 = vpop.f32.mrb[16].mxu0  ;;  %14359 = vmatprep.mubr.msk.bf16.mxu0 %vm1422_vm1, %v13273_v63  ;;  %v4778_v7 = vpop.permute.xlu0 %4777  ;;  %v15106_v3 = vld [vmem:[%s20885_s0 + $0xd8] sm:$0xf] }
 0x17a   :  { %1827 = vst.msk [vmem:[#allocation3 + $0x90] sm:$0xff] %vm1808_vm2, %v14225_v6  ;;  %v4921_v11 = vsel %vm1045_vm0, %v15097_v10, %v4778_v7  ;;  %v1617_v12 = vpop.f32.mrb[17].mxu0  ;;  %4863 = vrot.lane.b32.xlu1 %v4706_v49, %s15184_s8  ;;  %v15102_v49 = vld [vmem:[%s20885_s0 + $0xb8] sm:$0xf]  ;;  %v15107_v6 = vld [vmem:[%s20885_s0 + $0xd0] sm:$0xf] }
 0x17b   :  { %v13274_v16 = vcombine.low %v4921_v11, %v4924_v5  ;;  %1825 = vst.msk [vmem:[#allocation3 + $0x80] sm:$0xff] %vm1808_vm2, %v1617_v12  ;;  %v14226_v17 = vpop.f32.mrb[18].mxu0  ;;  %4861 = vrot.lane.b32.xlu0 %v4699_v55, %s15184_s8  ;;  %v15108_v10 = vld [vmem:[%s20885_s0 + $0xe8] sm:$0xf] }
 0x17c   :  { %1828 = vst.msk [vmem:[#allocation3 + $0x98] sm:$0xff] %vm1808_vm2, %v14226_v17  ;;  %v1620_v21 = vpop.f32.mrb[19].mxu0  ;;  %v4784_v22 = vpop.permute.xlu1 %4783 }
 0x17d   :  { %1826 = vst.msk [vmem:[#allocation3 + $0x88] sm:$0xff] %vm1808_vm2, %v1620_v21  ;;  %v4930_v24 = vsel %vm1045_vm0, %v15098_v23, %v4784_v22  ;;  %14360 = vmatmul.mubr.msk.bf16.gmra.mrb[60].mxu0 %vm1422_vm1, %v13274_v16  ;;  %v4782_v25 = vpop.permute.xlu0 %4781  ;;  %v15110_v21 = vld [vmem:[%s20885_s0 + $0xf8] sm:$0xf] }
 0x17e   :  { %v4927_v27 = vsel %vm1045_vm0, %v15099_v26, %v4782_v25  ;;  %4867 = vrot.lane.b32.xlu1 %v4720_v13, %s15184_s8 }
 0x17f   :  { %v13275_v31 = vcombine.low %v4927_v27, %v4930_v24  ;;  %4865 = vrot.lane.b32.xlu0 %v4713_v18, %s15184_s8  ;;  %v15111_v24 = vld [vmem:[%s20885_s0 + $0xf0] sm:$0xf] }
 0x180   :  { %v4788_v35 = vpop.permute.xlu1 %4787 }
 0x181   :  { %v4936_v37 = vsel %vm1045_vm0, %v15100_v36, %v4788_v35  ;;  %v14229_v38 = vpop.f32.mrb[20].mxu0  ;;  %14363 = vmatprep.mubr.msk.bf16.mxu0 %vm1422_vm1, %v13275_v31  ;;  %v4786_v39 = vpop.permute.xlu0 %4785 }
 0x182   :  { %1831 = vst.msk [vmem:[#allocation3 + $0xb0] sm:$0xff] %vm1808_vm2, %v14229_v38  ;;  %v4933_v41 = vsel %vm1045_vm0, %v15101_v40, %v4786_v39  ;;  %v1633_v42 = vpop.f32.mrb[21].mxu0  ;;  %4871 = vrot.lane.b32.xlu1 %v4734_v28, %s15184_s8  ;;  %v15112_v28 = vld [vmem:[%s20885_s0 + $0x108] sm:$0xf] }
 0x183   :  { %v13276_v44 = vcombine.low %v4933_v41, %v4936_v37  ;;  %1829 = vst.msk [vmem:[#allocation3 + $0xa0] sm:$0xff] %vm1808_vm2, %v1633_v42  ;;  %v14230_v45 = vpop.f32.mrb[22].mxu0  ;;  %4869 = vrot.lane.b32.xlu0 %v4727_v32, %s15184_s8  ;;  %v15113_v32 = vld [vmem:[%s20885_s0 + $0x100] sm:$0xf]  ;;  %v15114_v39 = vld [vmem:[%s20885_s0 + $0x128] sm:$0xf] }
 0x184   :  { %1832 = vst.msk [vmem:[#allocation3 + $0xb8] sm:$0xff] %vm1808_vm2, %v14230_v45  ;;  %v1636_v47 = vpop.f32.mrb[23].mxu0  ;;  %v4792_v48 = vpop.permute.xlu1 %4791  ;;  %v15115_v42 = vld [vmem:[%s20885_s0 + $0x120] sm:$0xf] }
 0x185   :  { %1830 = vst.msk [vmem:[#allocation3 + $0xa8] sm:$0xff] %vm1808_vm2, %v1636_v47  ;;  %v4942_v50 = vsel %vm1045_vm0, %v15102_v49, %v4792_v48  ;;  %14364 = vmatmul.mubr.msk.bf16.gmra.mrb[64].mxu0 %vm1422_vm1, %v13276_v44  ;;  %v4790_v51 = vpop.permute.xlu0 %4789 }
 0x186   :  { %v4939_v53 = vsel %vm1045_vm0, %v15103_v52, %v4790_v51  ;;  %4875 = vrot.lane.b32.xlu1 %v4748_v43, %s15184_s8  ;;  %v15117_v51 = vld [vmem:[%s20885_s0 + $0x130] sm:$0xf] }
 0x187   :  { %v13277_v54 = vcombine.low %v4939_v53, %v4942_v50  ;;  %4873 = vrot.lane.b32.xlu0 %v4741_v46, %s15184_s8  ;;  %v15116_v46 = vld [vmem:[%s20885_s0 + $0x138] sm:$0xf]  ;;  %v15185_v50 = vmov 0  }
 0x188   :  { %v4796_v55 = vpop.permute.xlu1 %4795  ;;  %6351 = vst.msk [vmem:[#allocation2] sm:$0xf] %vm6350_vm3, %v15185_v50  ;;  %6352 = vst.msk [vmem:[#allocation2 + $0x4] sm:$0xf] %vm6350_vm3, %v15185_v50 }
 0x189   :  { %v4948_v57 = vsel %vm1045_vm0, %v15104_v56, %v4796_v55  ;;  %v14233_v58 = vpop.f32.mrb[24].mxu0  ;;  %14367 = vmatprep.mubr.msk.bf16.mxu0 %vm1422_vm1, %v13277_v54  ;;  %v4794_v59 = vpop.permute.xlu0 %4793  ;;  %6353 = vst.msk [vmem:[#allocation2 + $0x8] sm:$0xf] %vm6350_vm3, %v15185_v50  ;;  %6354 = vst.msk [vmem:[#allocation2 + $0xc] sm:$0xf] %vm6350_vm3, %v15185_v50 }
 0x18a   :  { %1835 = vst.msk [vmem:[#allocation3 + $0xd0] sm:$0xff] %vm1808_vm2, %v14233_v58  ;;  %v4945_v61 = vsel %vm1045_vm0, %v15105_v60, %v4794_v59  ;;  %v1649_v62 = vpop.f32.mrb[25].mxu0  ;;  %v15118_v58 = vld [vmem:[%s20885_s0 + $0x148] sm:$0xf] }
 0x18b   :  { %v13278_v63 = vcombine.low %v4945_v61, %v4948_v57  ;;  %1833 = vst.msk [vmem:[#allocation3 + $0xc0] sm:$0xff] %vm1808_vm2, %v1649_v62  ;;  %v14234_v0 = vpop.f32.mrb[26].mxu0  ;;  %v15119_v61 = vld [vmem:[%s20885_s0 + $0x140] sm:$0xf] }
 0x18c   :  { %1836 = vst.msk [vmem:[#allocation3 + $0xd8] sm:$0xff] %vm1808_vm2, %v14234_v0  ;;  %v1652_v1 = vpop.f32.mrb[27].mxu0  ;;  %v4800_v2 = vpop.permute.xlu1 %4799 }
 0x18d   :  { %1834 = vst.msk [vmem:[#allocation3 + $0xc8] sm:$0xff] %vm1808_vm2, %v1652_v1  ;;  %v4954_v4 = vsel %vm1045_vm0, %v15106_v3, %v4800_v2  ;;  %14368 = vmatmul.mubr.msk.bf16.gmra.mrb[68].mxu0 %vm1422_vm1, %v13278_v63  ;;  %v4798_v5 = vpop.permute.xlu0 %4797  ;;  %v15120_v3 = vld [vmem:[%s20885_s0 + $0x158] sm:$0xf] }
 0x18e   :  { %v4951_v7 = vsel %vm1045_vm0, %v15107_v6, %v4798_v5  ;;  %6355 = vst.msk [vmem:[#allocation2 + $0x10] sm:$0xf] %vm6350_vm3, %v15185_v50  ;;  %6356 = vst.msk [vmem:[#allocation2 + $0x14] sm:$0xf] %vm6350_vm3, %v15185_v50 }
 0x18f   :  { %v13279_v8 = vcombine.low %v4951_v7, %v4954_v4  ;;  %6357 = vst.msk [vmem:[#allocation2 + $0x18] sm:$0xf] %vm6350_vm3, %v15185_v50  ;;  %6358 = vst.msk [vmem:[#allocation2 + $0x1c] sm:$0xf] %vm6350_vm3, %v15185_v50  ;;  %v6492_v1 = vld [vmem:[#allocation2] sm:$0x8] }
 0x190   :  { %v4804_v9 = vpop.permute.xlu1 %4803  ;;  %6359 = vst.msk [vmem:[#allocation2 + $0x20] sm:$0xf] %vm6350_vm3, %v15185_v50  ;;  %6360 = vst.msk [vmem:[#allocation2 + $0x24] sm:$0xf] %vm6350_vm3, %v15185_v50  ;;  %v18041_v2 = vld [vmem:[#allocation2 + $0x4] sm:$0xf] }
 0x191   :  { %v4960_v11 = vsel %vm1045_vm0, %v15108_v10, %v4804_v9  ;;  %v14237_v12 = vpop.f32.mrb[28].mxu0  ;;  %14371 = vmatprep.mubr.msk.bf16.mxu0 %vm1422_vm1, %v13279_v8  ;;  %v4802_v13 = vpop.permute.xlu0 %4801  ;;  %6361 = vst.msk [vmem:[#allocation2 + $0x28] sm:$0xf] %vm6350_vm3, %v15185_v50  ;;  %6362 = vst.msk [vmem:[#allocation2 + $0x2c] sm:$0xf] %vm6350_vm3, %v15185_v50  ;;  %v13335_v7 = vcombine.low %v6492_v1, %v18041_v2 }
 0x192   :  { %1839 = vst.msk [vmem:[#allocation3 + $0xf0] sm:$0xff] %vm1808_vm2, %v14237_v12  ;;  %v4957_v15 = vsel %vm1045_vm0, %v15109_v14, %v4802_v13  ;;  %v1665_v16 = vpop.f32.mrb[29].mxu0  ;;  %v15121_v8 = vld [vmem:[%s20885_s0 + $0x150] sm:$0xf]  ;;  %v13367_v13 = vcombine.low %v18041_v2, %v18041_v2 }
 0x193   :  { %v13280_v17 = vcombine.low %v4957_v15, %v4960_v11  ;;  %1837 = vst.msk [vmem:[#allocation3 + $0xe0] sm:$0xff] %vm1808_vm2, %v1665_v16  ;;  %v14238_v18 = vpop.f32.mrb[30].mxu0  ;;  %6748 = vrot.lane.b32.xlu0 %v13335_v7, %s15186_s7  ;;  %v15130_v7 = vld [vmem:[%s20885_s0 + $0x188] sm:$0xf] }
 0x194   :  { %1840 = vst.msk [vmem:[#allocation3 + $0xf8] sm:$0xff] %vm1808_vm2, %v14238_v18  ;;  %v1668_v19 = vpop.f32.mrb[31].mxu0  ;;  %v4808_v20 = vpop.permute.xlu1 %4807  ;;  %v15122_v18 = vld [vmem:[%s20885_s0 + $0x168] sm:$0xf] }
 0x195   :  { %1838 = vst.msk [vmem:[#allocation3 + $0xe8] sm:$0xff] %vm1808_vm2, %v1668_v19  ;;  %v4966_v22 = vsel %vm1045_vm0, %v15110_v21, %v4808_v20  ;;  %14372 = vmatmul.mubr.msk.bf16.gmra.mrb[72].mxu0 %vm1422_vm1, %v13280_v17  ;;  %v4806_v23 = vpop.permute.xlu0 %4805 }
 0x196   :  { %v4963_v25 = vsel %vm1045_vm0, %v15111_v24, %v4806_v23  ;;  %6363 = vst.msk [vmem:[#allocation2 + $0x30] sm:$0xf] %vm6350_vm3, %v15185_v50  ;;  %6364 = vst.msk [vmem:[#allocation2 + $0x34] sm:$0xf] %vm6350_vm3, %v15185_v50  ;;  %v6848_v23 = vshll.u32 %v13367_v13, 16 }
 0x197   :  { %v13281_v26 = vcombine.low %v4963_v25, %v4966_v22  ;;  %6365 = vst.msk [vmem:[#allocation2 + $0x38] sm:$0xf] %vm6350_vm3, %v15185_v50  ;;  %6366 = vst.msk [vmem:[#allocation2 + $0x3c] sm:$0xf] %vm6350_vm3, %v15185_v50  ;;  %v6845_v22 = vshrl.u32 %v13367_v13, 16 }
 0x198   :  { %v4812_v27 = vpop.permute.xlu1 %4811  ;;  %6367 = vst.msk [vmem:[#allocation2 + $0x40] sm:$0xf] %vm6350_vm3, %v15185_v50  ;;  %6368 = vst.msk [vmem:[#allocation2 + $0x44] sm:$0xf] %vm6350_vm3, %v15185_v50  ;;  %v15123_v24 = vld [vmem:[%s20885_s0 + $0x160] sm:$0xf] }
 0x199   :  { %v4972_v29 = vsel %vm1045_vm0, %v15112_v28, %v4812_v27  ;;  %v14241_v30 = vpop.f32.mrb[32].mxu0  ;;  %14375 = vmatprep.mubr.msk.bf16.mxu0 %vm1422_vm1, %v13281_v26  ;;  %v4810_v31 = vpop.permute.xlu0 %4809  ;;  %6369 = vst.msk [vmem:[#allocation2 + $0x48] sm:$0xf] %vm6350_vm3, %v15185_v50  ;;  %6370 = vst.msk [vmem:[#allocation2 + $0x4c] sm:$0xf] %vm6350_vm3, %v15185_v50  ;;  %v6847_v27 = vrot.slane %v6845_v22, 4 }
 0x19a   :  { %1843 = vst.msk [vmem:[#allocation3 + $0x110] sm:$0xff] %vm1808_vm2, %v14241_v30  ;;  %v4969_v33 = vsel %vm1045_vm0, %v15113_v32, %v4810_v31  ;;  %v1681_v34 = vpop.f32.mrb[33].mxu0  ;;  %v6850_v28 = vrot.slane %v6848_v23, 5  ;;  %v15124_v31 = vld [vmem:[%s20885_s0 + $0x178] sm:$0xf] }
 0x19b   :  { %v13282_v35 = vcombine.low %v4969_v33, %v4972_v29  ;;  %1841 = vst.msk [vmem:[#allocation3 + $0x100] sm:$0xff] %vm1808_vm2, %v1681_v34  ;;  %v14242_v36 = vpop.f32.mrb[34].mxu0 }
 0x19c   :  { %1844 = vst.msk [vmem:[#allocation3 + $0x118] sm:$0xff] %vm1808_vm2, %v14242_v36  ;;  %v1684_v37 = vpop.f32.mrb[35].mxu0  ;;  %v4816_v38 = vpop.permute.xlu1 %4815 }
 0x19d   :  { %1842 = vst.msk [vmem:[#allocation3 + $0x108] sm:$0xff] %vm1808_vm2, %v1684_v37  ;;  %v4978_v40 = vsel %vm1045_vm0, %v15114_v39, %v4816_v38  ;;  %14376 = vmatmul.mubr.msk.bf16.gmra.mrb[76].mxu0 %vm1422_vm1, %v13282_v35  ;;  %v4814_v41 = vpop.permute.xlu0 %4813  ;;  %v6851_v35 = vor.u32 %v6850_v28, %v6847_v27  ;;  %v15125_v38 = vld [vmem:[%s20885_s0 + $0x170] sm:$0xf] }
 0x19e   :  { %v4975_v43 = vsel %vm1045_vm0, %v15115_v42, %v4814_v41  ;;  %6371 = vst.msk [vmem:[#allocation2 + $0x50] sm:$0xf] %vm6350_vm3, %v15185_v50  ;;  %6372 = vst.msk [vmem:[#allocation2 + $0x54] sm:$0xf] %vm6350_vm3, %v15185_v50 }
 0x19f   :  { %v13283_v44 = vcombine.low %v4975_v43, %v4978_v40  ;;  %6373 = vst.msk [vmem:[#allocation2 + $0x58] sm:$0xf] %vm6350_vm3, %v15185_v50  ;;  %6374 = vst.msk [vmem:[#allocation2 + $0x5c] sm:$0xf] %vm6350_vm3, %v15185_v50 }
 0x1a0   :  { %v4820_v45 = vpop.permute.xlu1 %4819  ;;  %6375 = vst.msk [vmem:[#allocation2 + $0x60] sm:$0xf] %vm6350_vm3, %v15185_v50  ;;  %6376 = vst.msk [vmem:[#allocation2 + $0x64] sm:$0xf] %vm6350_vm3, %v15185_v50 }
 0x1a1   :  { %v17798_v47 = vsel %vm1045_vm0, %v15116_v46, %v4820_v45  ;;  %v17800_v48 = vpop.f32.mrb[36].mxu0  ;;  %14379 = vmatprep.mubr.msk.bf16.mxu0 %vm1422_vm1, %v13283_v44  ;;  %v17803_v49 = vpop.permute.xlu0 %4817  ;;  %6377 = vst.msk [vmem:[#allocation2 + $0x68] sm:$0xf] %vm6350_vm3, %v15185_v50  ;;  %6378 = vst.msk [vmem:[#allocation2 + $0x6c] sm:$0xf] %vm6350_vm3, %v15185_v50 }
 0x1a2   :  { %6379 = vst.msk [vmem:[#allocation2 + $0x70] sm:$0xf] %vm6350_vm3, %v15185_v50  ;;  %6380 = vst.msk [vmem:[#allocation2 + $0x74] sm:$0xf] %vm6350_vm3, %v15185_v50  ;;  %v4981_v52 = vsel %vm1045_vm0, %v15117_v51, %v17803_v49  ;;  %v1697_v53 = vpop.f32.mrb[37].mxu0 }
 0x1a3   :  { %6381 = vst.msk [vmem:[#allocation2 + $0x78] sm:$0xf] %vm6350_vm3, %v15185_v50  ;;  %6382 = vst.msk [vmem:[#allocation2 + $0x7c] sm:$0xf] %vm6350_vm3, %v15185_v50  ;;  %v13284_v54 = vcombine.low %v4981_v52, %v17798_v47  ;;  %v14246_v55 = vpop.f32.mrb[38].mxu0 }
 0x1a4   :  { %6383 = vst.msk [vmem:[#allocation2 + $0x80] sm:$0xf] %vm6350_vm3, %v15185_v50  ;;  %6384 = vst.msk [vmem:[#allocation2 + $0x84] sm:$0xf] %vm6350_vm3, %v15185_v50  ;;  %v1700_v56 = vpop.f32.mrb[39].mxu0  ;;  %v4824_v57 = vpop.permute.xlu1 %4823 }
 0x1a5   :  { %6385 = vst.msk [vmem:[#allocation2 + $0x88] sm:$0xf] %vm6350_vm3, %v15185_v50  ;;  %6386 = vst.msk [vmem:[#allocation2 + $0x8c] sm:$0xf] %vm6350_vm3, %v15185_v50  ;;  %v4990_v59 = vsel %vm1045_vm0, %v15118_v58, %v4824_v57  ;;  %14380 = vmatmul.mubr.msk.bf16.gmra.mrb[80].mxu0 %vm1422_vm1, %v13284_v54  ;;  %v4822_v60 = vpop.permute.xlu0 %4821  ;;  %v15126_v47 = vld [vmem:[%s20885_s0 + $0x1a0] sm:$0xf] }
 0x1a6   :  { %6387 = vst.msk [vmem:[#allocation2 + $0x90] sm:$0xf] %vm6350_vm3, %v15185_v50  ;;  %6388 = vst.msk [vmem:[#allocation2 + $0x94] sm:$0xf] %vm6350_vm3, %v15185_v50  ;;  %v4987_v62 = vsel %vm1045_vm0, %v15119_v61, %v4822_v60  ;;  %v15127_v51 = vld [vmem:[%s20885_s0 + $0x198] sm:$0xf] }
 0x1a7   :  { %6389 = vst.msk [vmem:[#allocation2 + $0x98] sm:$0xf] %vm6350_vm3, %v15185_v50  ;;  %6390 = vst.msk [vmem:[#allocation2 + $0x9c] sm:$0xf] %vm6350_vm3, %v15185_v50  ;;  %v13285_v63 = vcombine.low %v4987_v62, %v4990_v59  ;;  %v15128_v58 = vld [vmem:[%s20885_s0 + $0x1b0] sm:$0xf] }
 0x1a8   :  { %6391 = vst.msk [vmem:[#allocation2 + $0xa0] sm:$0xf] %vm6350_vm3, %v15185_v50  ;;  %6392 = vst.msk [vmem:[#allocation2 + $0xa4] sm:$0xf] %vm6350_vm3, %v15185_v50  ;;  %v4828_v0 = vpop.permute.xlu1 %4827 }
 0x1a9   :  { %6393 = vst.msk [vmem:[#allocation2 + $0xa8] sm:$0xf] %vm6350_vm3, %v15185_v50  ;;  %6394 = vst.msk [vmem:[#allocation2 + $0xac] sm:$0xf] %vm6350_vm3, %v15185_v50  ;;  %v4996_v4 = vsel %vm1045_vm0, %v15120_v3, %v4828_v0  ;;  %v14249_v5 = vpop.f32.mrb[40].mxu0  ;;  %14383 = vmatprep.mubr.msk.bf16.mxu0 %vm1422_vm1, %v13285_v63  ;;  %v4826_v6 = vpop.permute.xlu0 %4825 }
 0x1aa   :  { %6395 = vst.msk [vmem:[#allocation2 + $0xb0] sm:$0xf] %vm6350_vm3, %v15185_v50  ;;  %6396 = vst.msk [vmem:[#allocation2 + $0xb4] sm:$0xf] %vm6350_vm3, %v15185_v50  ;;  %v4993_v9 = vsel %vm1045_vm0, %v15121_v8, %v4826_v6  ;;  %v1713_v10 = vpop.f32.mrb[41].mxu0 }
 0x1ab   :  { %6397 = vst.msk [vmem:[#allocation2 + $0xb8] sm:$0xf] %vm6350_vm3, %v15185_v50  ;;  %6398 = vst.msk [vmem:[#allocation2 + $0xbc] sm:$0xf] %vm6350_vm3, %v15185_v50  ;;  %v13286_v11 = vcombine.low %v4993_v9, %v4996_v4  ;;  %v14250_v12 = vpop.f32.mrb[42].mxu0 }
 0x1ac   :  { %6399 = vst.msk [vmem:[#allocation2 + $0xc0] sm:$0xf] %vm6350_vm3, %v15185_v50  ;;  %6400 = vst.msk [vmem:[#allocation2 + $0xc4] sm:$0xf] %vm6350_vm3, %v15185_v50  ;;  %v1716_v14 = vpop.f32.mrb[43].mxu0  ;;  %v4832_v15 = vpop.permute.xlu1 %4831 }
 0x1ad   :  { %6401 = vst.msk [vmem:[#allocation2 + $0xc8] sm:$0xf] %vm6350_vm3, %v15185_v50  ;;  %6402 = vst.msk [vmem:[#allocation2 + $0xcc] sm:$0xf] %vm6350_vm3, %v15185_v50  ;;  %v5002_v19 = vsel %vm1045_vm0, %v15122_v18, %v4832_v15  ;;  %14384 = vmatmul.mubr.msk.bf16.gmra.mrb[84].mxu0 %vm1422_vm1, %v13286_v11  ;;  %v4830_v20 = vpop.permute.xlu0 %4829  ;;  %v15129_v63 = vld [vmem:[%s20885_s0 + $0x1a8] sm:$0xf] }
 0x1ae   :  { %6403 = vst.msk [vmem:[#allocation2 + $0xd0] sm:$0xf] %vm6350_vm3, %v15185_v50  ;;  %6404 = vst.msk [vmem:[#allocation2 + $0xd4] sm:$0xf] %vm6350_vm3, %v15185_v50  ;;  %v4999_v25 = vsel %vm1045_vm0, %v15123_v24, %v4830_v20  ;;  %v15131_v11 = vld [vmem:[%s20885_s0 + $0x180] sm:$0xf] }
 0x1af   :  { %6405 = vst.msk [vmem:[#allocation2 + $0xd8] sm:$0xf] %vm6350_vm3, %v15185_v50  ;;  %6406 = vst.msk [vmem:[#allocation2 + $0xdc] sm:$0xf] %vm6350_vm3, %v15185_v50  ;;  %v13287_v26 = vcombine.low %v4999_v25, %v5002_v19  ;;  %v15133_v20 = vld [vmem:[%s20885_s0 + $0x190] sm:$0xf] }
 0x1b0   :  { %6407 = vst.msk [vmem:[#allocation2 + $0xe0] sm:$0xf] %vm6350_vm3, %v15185_v50  ;;  %6408 = vst.msk [vmem:[#allocation2 + $0xe4] sm:$0xf] %vm6350_vm3, %v15185_v50  ;;  %v4836_v30 = vpop.permute.xlu1 %4835 }
 0x1b1   :  { %6409 = vst.msk [vmem:[#allocation2 + $0xe8] sm:$0xf] %vm6350_vm3, %v15185_v50  ;;  %6410 = vst.msk [vmem:[#allocation2 + $0xec] sm:$0xf] %vm6350_vm3, %v15185_v50  ;;  %v5008_v32 = vsel %vm1045_vm0, %v15124_v31, %v4836_v30  ;;  %v14253_v33 = vpop.f32.mrb[44].mxu0  ;;  %14387 = vmatprep.mubr.msk.bf16.mxu0 %vm1422_vm1, %v13287_v26  ;;  %v4834_v34 = vpop.permute.xlu0 %4833 }
 0x1b2   :  { %6411 = vst.msk [vmem:[#allocation2 + $0xf0] sm:$0xf] %vm6350_vm3, %v15185_v50  ;;  %6412 = vst.msk [vmem:[#allocation2 + $0xf4] sm:$0xf] %vm6350_vm3, %v15185_v50  ;;  %v5005_v39 = vsel %vm1045_vm0, %v15125_v38, %v4834_v34  ;;  %v1729_v40 = vpop.f32.mrb[45].mxu0 }
 0x1b3   :  { %6413 = vst.msk [vmem:[#allocation2 + $0xf8] sm:$0xf] %vm6350_vm3, %v15185_v50  ;;  %6414 = vst.msk [vmem:[#allocation2 + $0xfc] sm:$0xf] %vm6350_vm3, %v15185_v50  ;;  %v13288_v41 = vcombine.low %v5005_v39, %v5008_v32  ;;  %v14254_v42 = vpop.f32.mrb[46].mxu0 }
 0x1b4   :  { %6415 = vst.msk [vmem:[#allocation2 + $0x100] sm:$0xf] %vm6350_vm3, %v15185_v50  ;;  %6416 = vst.msk [vmem:[#allocation2 + $0x104] sm:$0xf] %vm6350_vm3, %v15185_v50  ;;  %v1732_v45 = vpop.f32.mrb[47].mxu0  ;;  %v2869_v46 = vpop.permute.xlu1 %2868 }
 0x1b5   :  { %6417 = vst.msk [vmem:[#allocation2 + $0x108] sm:$0xf] %vm6350_vm3, %v15185_v50  ;;  %6418 = vst.msk [vmem:[#allocation2 + $0x10c] sm:$0xf] %vm6350_vm3, %v15185_v50  ;;  %14388 = vmatmul.mubr.msk.bf16.gmra.mrb[88].mxu0 %vm1422_vm1, %v13288_v41  ;;  %v2867_v49 = vpop.permute.xlu0 %2866  ;;  %v15134_v26 = vld [vmem:[%s20885_s0 + $0x1c0] sm:$0xf] }
 0x1b6   :  { %6419 = vst.msk [vmem:[#allocation2 + $0x110] sm:$0xf] %vm6350_vm3, %v15185_v50  ;;  %6420 = vst.msk [vmem:[#allocation2 + $0x114] sm:$0xf] %vm6350_vm3, %v15185_v50  ;;  %v6524_v16 = vld [vmem:[#allocation2 + $0xd8] sm:$0x8]  ;;  %v3044_v52 = vsel %vm1045_vm0, %v15127_v51, %v2867_v49 }
 0x1b7   :  { %6421 = vst.msk [vmem:[#allocation2 + $0x118] sm:$0xf] %vm6350_vm3, %v15185_v50  ;;  %6422 = vst.msk [vmem:[#allocation2 + $0x11c] sm:$0xf] %vm6350_vm3, %v15185_v50  ;;  %v18059_v17 = vld [vmem:[#allocation2 + $0xdc] sm:$0xf] }
 0x1b8   :  { %6423 = vst.msk [vmem:[#allocation2 + $0x120] sm:$0xf] %vm6350_vm3, %v15185_v50  ;;  %6424 = vst.msk [vmem:[#allocation2 + $0x124] sm:$0xf] %vm6350_vm3, %v15185_v50  ;;  %v13351_v21 = vcombine.low %v6524_v16, %v18059_v17  ;;  %v13383_v29 = vcombine.low %v18059_v17, %v18059_v17  ;;  %v2873_v57 = vpop.permute.xlu1 %2872  ;;  %v15132_v16 = vld [vmem:[%s20885_s0 + $0x198] sm:$0xf] }
 0x1b9   :  { %6425 = vst.msk [vmem:[#allocation2 + $0x128] sm:$0xf] %vm6350_vm3, %v15185_v50  ;;  %6426 = vst.msk [vmem:[#allocation2 + $0x12c] sm:$0xf] %vm6350_vm3, %v15185_v50  ;;  %v3053_v59 = vsel %vm1045_vm0, %v15128_v58, %v2873_v57  ;;  %v2871_v61 = vpop.permute.xlu0 %2870  ;;  %v15136_v34 = vld [vmem:[%s20885_s0 + $0x1d0] sm:$0xf] }
 0x1ba   :  { %6427 = vst.msk [vmem:[#allocation2 + $0x130] sm:$0xf] %vm6350_vm3, %v15185_v50  ;;  %6428 = vst.msk [vmem:[#allocation2 + $0x134] sm:$0xf] %vm6350_vm3, %v15185_v50  ;;  %6780 = vrot.lane.b32.xlu0 %v13351_v21, %s15186_s7  ;;  %v6973_v36 = vshrl.u32 %v13383_v29, 16  ;;  %v6976_v37 = vshll.u32 %v13383_v29, 16  ;;  %v3050_v0 = vsel %vm1045_vm0, %v15129_v63, %v2871_v61 }
 0x1bb   :  { %6429 = vst.msk [vmem:[#allocation2 + $0x138] sm:$0xf] %vm6350_vm3, %v15185_v50  ;;  %6430 = vst.msk [vmem:[#allocation2 + $0x13c] sm:$0xf] %vm6350_vm3, %v15185_v50  ;;  %v13027_v3 = vcombine.low %v3050_v0, %v3053_v59  ;;  %v15135_v29 = vld [vmem:[%s20885_s0 + $0x1b8] sm:$0xf] }
 0x1bc   :  { %6431 = vst.msk [vmem:[#allocation2 + $0x140] sm:$0xf] %vm6350_vm3, %v15185_v50  ;;  %6432 = vst.msk [vmem:[#allocation2 + $0x144] sm:$0xf] %vm6350_vm3, %v15185_v50  ;;  %v6975_v43 = vrot.slane %v6973_v36, 4  ;;  %v6978_v44 = vrot.slane %v6976_v37, 5  ;;  %v4840_v6 = vpop.permute.xlu1 %4839 }
 0x1bd   :  { %6433 = vst.msk [vmem:[#allocation2 + $0x148] sm:$0xf] %vm6350_vm3, %v15185_v50  ;;  %6434 = vst.msk [vmem:[#allocation2 + $0x14c] sm:$0xf] %vm6350_vm3, %v15185_v50  ;;  %v5014_v8 = vsel %vm1045_vm0, %v15130_v7, %v4840_v6  ;;  %v4838_v9 = vpop.permute.xlu0 %4837  ;;  %v15137_v38 = vld [vmem:[%s20885_s0 + $0x1c8] sm:$0xf] }
 0x1be   :  { %6435 = vst.msk [vmem:[#allocation2 + $0x150] sm:$0xf] %vm6350_vm3, %v15185_v50  ;;  %6436 = vst.msk [vmem:[#allocation2 + $0x154] sm:$0xf] %vm6350_vm3, %v15185_v50  ;;  %7100 = vrot.lane.b32.xlu0 %v6851_v35, %s15187_s16 }
 0x1bf   :  { %6437 = vst.msk [vmem:[#allocation2 + $0x158] sm:$0xf] %vm6350_vm3, %v15185_v50  ;;  %6438 = vst.msk [vmem:[#allocation2 + $0x15c] sm:$0xf] %vm6350_vm3, %v15185_v50 }
 0x1c0   :  { %6439 = vst.msk [vmem:[#allocation2 + $0x160] sm:$0xf] %vm6350_vm3, %v15185_v50  ;;  %6440 = vst.msk [vmem:[#allocation2 + $0x164] sm:$0xf] %vm6350_vm3, %v15185_v50  ;;  %v4844_v15 = vpop.permute.xlu1 %4843 }
 0x1c1   :  { %6441 = vst.msk [vmem:[#allocation2 + $0x168] sm:$0xf] %vm6350_vm3, %v15185_v50  ;;  %6442 = vst.msk [vmem:[#allocation2 + $0x16c] sm:$0xf] %vm6350_vm3, %v15185_v50  ;;  %v4842_v19 = vpop.permute.xlu0 %4841 }
 0x1c2   :  { %6443 = vst.msk [vmem:[#allocation2 + $0x170] sm:$0xf] %vm6350_vm3, %v15185_v50  ;;  %6444 = vst.msk [vmem:[#allocation2 + $0x174] sm:$0xf] %vm6350_vm3, %v15185_v50  ;;  %v5017_v21 = vsel %vm1045_vm0, %v15133_v20, %v4842_v19 }
 0x1c3   :  { %6445 = vst.msk [vmem:[#allocation2 + $0x178] sm:$0xf] %vm6350_vm3, %v15185_v50  ;;  %6446 = vst.msk [vmem:[#allocation2 + $0x17c] sm:$0xf] %vm6350_vm3, %v15185_v50 }
 0x1c4   :  { %6447 = vst.msk [vmem:[#allocation2 + $0x180] sm:$0xf] %vm6350_vm3, %v15185_v50  ;;  %6448 = vst.msk [vmem:[#allocation2 + $0x184] sm:$0xf] %vm6350_vm3, %v15185_v50  ;;  %v2877_v25 = vpop.permute.xlu1 %2876 }
 0x1c5   :  { %6449 = vst.msk [vmem:[#allocation2 + $0x188] sm:$0xf] %vm6350_vm3, %v15185_v50  ;;  %6450 = vst.msk [vmem:[#allocation2 + $0x18c] sm:$0xf] %vm6350_vm3, %v15185_v50  ;;  %v3059_v27 = vsel %vm1045_vm0, %v15134_v26, %v2877_v25  ;;  %v2875_v28 = vpop.permute.xlu0 %2874 }
 0x1c6   :  { %6451 = vst.msk [vmem:[#allocation2 + $0x190] sm:$0xf] %vm6350_vm3, %v15185_v50  ;;  %6452 = vst.msk [vmem:[#allocation2 + $0x194] sm:$0xf] %vm6350_vm3, %v15185_v50  ;;  %v3056_v30 = vsel %vm1045_vm0, %v15135_v29, %v2875_v28 }
 0x1c7   :  { %6453 = vst.msk [vmem:[#allocation2 + $0x198] sm:$0xf] %vm6350_vm3, %v15185_v50  ;;  %6454 = vst.msk [vmem:[#allocation2 + $0x19c] sm:$0xf] %vm6350_vm3, %v15185_v50  ;;  %v13028_v31 = vcombine.low %v3056_v30, %v3059_v27  ;;  %v15147_v27 = vld [vmem:[%s20885_s0 + $0x1c0] sm:$0xf] }
 0x1c8   :  { %6455 = vst.msk [vmem:[#allocation2 + $0x1a0] sm:$0xf] %vm6350_vm3, %v15185_v50  ;;  %6456 = vst.msk [vmem:[#allocation2 + $0x1a4] sm:$0xf] %vm6350_vm3, %v15185_v50 }
 0x1c9   :  { %6457 = vst.msk [vmem:[#allocation2 + $0x1a8] sm:$0xf] %vm6350_vm3, %v15185_v50  ;;  %6458 = vst.msk [vmem:[#allocation2 + $0x1ac] sm:$0xf] %vm6350_vm3, %v15185_v50  ;;  %v6979_v50 = vor.u32 %v6978_v44, %v6975_v43  ;;  %v2879_v37 = vpop.permute.xlu0 %2878  ;;  %v15138_v44 = vld [vmem:[%s20885_s0 + $0x1a8] sm:$0xf] }
 0x1ca   :  { %1847 = vst.msk [vmem:[#allocation3 + $0x130] sm:$0xff] %vm1808_vm2, %v17800_v48  ;;  %1845 = vst.msk [vmem:[#allocation3 + $0x120] sm:$0xff] %vm1808_vm2, %v1697_v53  ;;  %v3047_v48 = vsel %vm1045_vm0, %v15126_v47, %v2869_v46  ;;  %v6556_v53 = vld [vmem:[#allocation2 + $0x8] sm:$0x1]  ;;  %v3062_v39 = vsel %vm1045_vm0, %v15137_v38, %v2879_v37  ;;  %v15139_v47 = vld [vmem:[%s20885_s0 + $0x1a0] sm:$0xf] }
 0x1cb   :  { %1848 = vst.msk [vmem:[#allocation3 + $0x138] sm:$0xff] %vm1808_vm2, %v14246_v55  ;;  %1846 = vst.msk [vmem:[#allocation3 + $0x128] sm:$0xff] %vm1808_vm2, %v1700_v56  ;;  %v13026_v54 = vcombine.low %v3044_v52, %v3047_v48  ;;  %7132 = vrot.lane.b32.xlu0 %v6979_v50, %s15187_s16  ;;  %v13399_v55 = vcombine.low %v18041_v2, %v6556_v53  ;;  %v14257_v56 = vpop.f32.mrb[0].mxu1  ;;  %v6572_v2 = vld [vmem:[#allocation2 + $0xe0] sm:$0x1]  ;;  %v3664_v37 = vld [vmem:[#allocation3 + $0x20] sm:$0xff] }
 0x1cc   :  { %1851 = vst.msk [vmem:[#allocation3 + $0x150] sm:$0xff] %vm1808_vm2, %v14249_v5  ;;  %1849 = vst.msk [vmem:[#allocation3 + $0x140] sm:$0xff] %vm1808_vm2, %v1713_v10  ;;  %v1745_v60 = vpop.f32.mrb[1].mxu1  ;;  %v13415_v5 = vcombine.low %v18059_v17, %v6572_v2  ;;  %v5020_v17 = vsel %vm1045_vm0, %v15132_v16, %v4844_v15  ;;  %v15140_v52 = vld [vmem:[%s20885_s0 + $0x1b8] sm:$0xf] }
 0x1cd   :  { %1852 = vst.msk [vmem:[#allocation3 + $0x158] sm:$0xff] %vm1808_vm2, %v14250_v12  ;;  %1850 = vst.msk [vmem:[#allocation3 + $0x148] sm:$0xff] %vm1808_vm2, %v1716_v14  ;;  %14325 = vmatprep.mubr.msk.bf16.mxu1 %vm1422_vm1, %v13026_v54  ;;  %v7260_v62 = vrot.slane %v13399_v55, 5  ;;  %v14258_v1 = vpop.f32.mrb[2].mxu1  ;;  %v5011_v12 = vsel %vm1045_vm0, %v15131_v11, %v4838_v9  ;;  %v13290_v23 = vcombine.low %v5017_v21, %v5020_v17  ;;  %v4846_v46 = vpop.permute.xlu0 %4845  ;;  %v3660_v11 = vld [vmem:[#allocation3] sm:$0xff]  ;;  %v3663_v17 = vld [vmem:[#allocation3 + $0x18] sm:$0xff] }
 0x1ce   :  { %1855 = vst.msk [vmem:[#allocation3 + $0x170] sm:$0xff] %vm1808_vm2, %v14253_v33  ;;  %1853 = vst.msk [vmem:[#allocation3 + $0x160] sm:$0xff] %vm1808_vm2, %v1729_v40  ;;  %v1748_v4 = vpop.f32.mrb[3].mxu1  ;;  %14326 = vmatmul.mubr.msk.bf16.gmra.mrb[64].mxu1 %vm1422_vm1, %v13027_v3  ;;  %v7276_v10 = vrot.slane %v13415_v5, 5  ;;  %v13289_v13 = vcombine.low %v5011_v12, %v5014_v8  ;;  %v2881_v33 = vpop.permute.xlu1 %2880  ;;  %v5023_v48 = vsel %vm1045_vm0, %v15139_v47, %v4846_v46  ;;  %v3662_v5 = vld [vmem:[#allocation3 + $0x10] sm:$0xff]  ;;  %v3661_v21 = vld [vmem:[#allocation3 + $0x8] sm:$0xff] }
 0x1cf   :  { %1856 = vst.msk [vmem:[#allocation3 + $0x178] sm:$0xff] %vm1808_vm2, %v14254_v42  ;;  %1854 = vst.msk [vmem:[#allocation3 + $0x168] sm:$0xff] %vm1808_vm2, %v1732_v45  ;;  %7292 = vrot.lane.b32.xlu0 %v7260_v62, %s15188_s25  ;;  %v14261_v14 = vpop.f32.mrb[4].mxu1  ;;  %v3065_v35 = vsel %vm1045_vm0, %v15136_v34, %v2881_v33  ;;  %14329 = vmatprep.mubr.msk.bf16.mxu1 %vm1422_vm1, %v13028_v31  ;;  %v15142_v62 = vld [vmem:[%s20885_s0 + $0x1e0] sm:$0xf]  ;;  %v3665_v47 = vld [vmem:[#allocation3 + $0x28] sm:$0xff] }
 0x1d0   :  { %1859 = vst.msk [vmem:[#allocation3 + $0x190] sm:$0xff] %vm1808_vm2, %v14257_v56  ;;  %1857 = vst.msk [vmem:[#allocation3 + $0x180] sm:$0xff] %vm1808_vm2, %v1745_v60  ;;  %v1761_v18 = vpop.f32.mrb[5].mxu1  ;;  %14391 = vmatprep.mubr.msk.bf16.mxu0 %vm1422_vm1, %v13289_v13  ;;  %v13029_v41 = vcombine.low %v3062_v39, %v3065_v35  ;;  %v15141_v56 = vld [vmem:[%s20885_s0 + $0x1b0] sm:$0xf]  ;;  %v3666_v31 = vld [vmem:[#allocation3 + $0x30] sm:$0xff] }
 0x1d1   :  { %1860 = vst.msk [vmem:[#allocation3 + $0x198] sm:$0xff] %vm1808_vm2, %v14258_v1  ;;  %1858 = vst.msk [vmem:[#allocation3 + $0x188] sm:$0xff] %vm1808_vm2, %v1748_v4  ;;  %v14262_v22 = vpop.f32.mrb[6].mxu1  ;;  %14392 = vmatmul.mubr.msk.bf16.gmra.mrb[92].mxu0 %vm1422_vm1, %v13290_v23  ;;  %v4850_v55 = vpop.permute.xlu0 %4849  ;;  %v15143_v1 = vld [vmem:[%s20885_s0 + $0x1d8] sm:$0xf] }
 0x1d2   :  { %1863 = vst.msk [vmem:[#allocation3 + $0x1b0] sm:$0xff] %vm1808_vm2, %v14261_v14  ;;  %1861 = vst.msk [vmem:[#allocation3 + $0x1a0] sm:$0xff] %vm1808_vm2, %v1761_v18  ;;  %v1764_v24 = vpop.f32.mrb[7].mxu1  ;;  %v4848_v43 = vpop.permute.xlu1 %4847  ;;  %v5029_v57 = vsel %vm1045_vm0, %v15141_v56, %v4850_v55  ;;  %v15144_v8 = vld [vmem:[%s20885_s0 + $0x1f0] sm:$0xf] }
 0x1d3   :  { %7324 = vrot.lane.b32.xlu0 %v7276_v10, %s15188_s25  ;;  %1864 = vst.msk [vmem:[#allocation3 + $0x1b8] sm:$0xff] %vm1808_vm2, %v14262_v22  ;;  %1862 = vst.msk [vmem:[#allocation3 + $0x1a8] sm:$0xff] %vm1808_vm2, %v1764_v24  ;;  %v14265_v32 = vpop.f32.mrb[8].mxu1  ;;  %v5026_v45 = vsel %vm1045_vm0, %v15138_v44, %v4848_v43  ;;  %v15145_v14 = vld [vmem:[%s20885_s0 + $0x1e8] sm:$0xf] }
 0x1d4   :  { %1867 = vst.msk [vmem:[#allocation3 + $0x1d0] sm:$0xff] %vm1808_vm2, %v14265_v32  ;;  %v1777_v36 = vpop.f32.mrb[9].mxu1  ;;  %v13291_v49 = vcombine.low %v5023_v48, %v5026_v45  ;;  %v15146_v24 = vld [vmem:[%s20885_s0 + $0x1c8] sm:$0xf]  ;;  %v15148_v34 = vld [vmem:[%s20885_s0 + $0x1d8] sm:$0xf] }
 0x1d5   :  { %1865 = vst.msk [vmem:[#allocation3 + $0x1c0] sm:$0xff] %vm1808_vm2, %v1777_v36  ;;  %v14266_v40 = vpop.f32.mrb[10].mxu1  ;;  %v2883_v0 = vpop.permute.xlu0 %2882  ;;  %v3667_v43 = vld [vmem:[#allocation3 + $0x38] sm:$0xff] }
 0x1d6   :  { %1868 = vst.msk [vmem:[#allocation3 + $0x1d8] sm:$0xff] %vm1808_vm2, %v14266_v40  ;;  %v1780_v42 = vpop.f32.mrb[11].mxu1  ;;  %14330 = vmatmul.mubr.msk.bf16.gmra.mrb[68].mxu1 %vm1422_vm1, %v13029_v41  ;;  %v4852_v51 = vpop.permute.xlu1 %4851  ;;  %14395 = vmatprep.mubr.msk.bf16.mxu0 %vm1422_vm1, %v13291_v49  ;;  %v3068_v2 = vsel %vm1045_vm0, %v15143_v1, %v2883_v0  ;;  %v15149_v40 = vld [vmem:[%s20885_s0 + $0x1d0] sm:$0xf] }
 0x1d7   :  { %1866 = vst.msk [vmem:[#allocation3 + $0x1c8] sm:$0xff] %vm1808_vm2, %v1780_v42  ;;  %v14269_v50 = vpop.f32.mrb[12].mxu1  ;;  %v5032_v53 = vsel %vm1045_vm0, %v15140_v52, %v4852_v51 }
 0x1d8   :  { %1871 = vst.msk [vmem:[#allocation3 + $0x1f0] sm:$0xff] %vm1808_vm2, %v14269_v50  ;;  %v1793_v54 = vpop.f32.mrb[13].mxu1  ;;  %v13292_v59 = vcombine.low %v5029_v57, %v5032_v53  ;;  %v15150_v50 = vld [vmem:[%s20885_s0 + $0x200] sm:$0xf]  ;;  %v15151_v53 = vld [vmem:[%s20885_s0 + $0x1f8] sm:$0xf] }
 0x1d9   :  { %1869 = vst.msk [vmem:[#allocation3 + $0x1e0] sm:$0xff] %vm1808_vm2, %v1793_v54  ;;  %v14270_v58 = vpop.f32.mrb[14].mxu1  ;;  %v2887_v12 = vpop.permute.xlu0 %2886  ;;  %v3670_v57 = vld [vmem:[#allocation3 + $0x50] sm:$0xff] }
 0x1da   :  { %1872 = vst.msk [vmem:[#allocation3 + $0x1f8] sm:$0xff] %vm1808_vm2, %v14270_v58  ;;  %v1796_v60 = vpop.f32.mrb[15].mxu1  ;;  %v2885_v61 = vpop.permute.xlu1 %2884  ;;  %14396 = vmatmul.mubr.msk.bf16.gmra.mrb[96].mxu0 %vm1422_vm1, %v13292_v59  ;;  %v3074_v15 = vsel %vm1045_vm0, %v15145_v14, %v2887_v12  ;;  %v15154_v12 = vld [vmem:[%s20885_s0 + $0x1e8] sm:$0xf] }
 0x1db   :  { %1870 = vst.msk [vmem:[#allocation3 + $0x1e8] sm:$0xff] %vm1808_vm2, %v1796_v60  ;;  %v3071_v63 = vsel %vm1045_vm0, %v15142_v62, %v2885_v61  ;;  %v14279_v4 = vpop.f32.mrb[16].mxu1  ;;  %v15152_v60 = vld [vmem:[%s20885_s0 + $0x210] sm:$0xf] }
 0x1dc   :  { %v13030_v3 = vcombine.low %v3068_v2, %v3071_v63  ;;  %v3726_v7 = vadd.f32 %v14279_v4, %v3662_v5  ;;  %v3405_v10 = vpop.f32.mrb[17].mxu1  ;;  %v3668_v63 = vld [vmem:[#allocation3 + $0x40] sm:$0xff]  ;;  %v15153_v2 = vld [vmem:[%s20885_s0 + $0x208] sm:$0xf] }
 0x1dd   :  { %v3724_v13 = vadd.f32 %v3660_v11, %v3405_v10  ;;  %v14280_v16 = vpop.f32.mrb[18].mxu1  ;;  %v4854_v26 = vpop.permute.xlu0 %4853  ;;  %v3671_v5 = vld [vmem:[#allocation3 + $0x58] sm:$0xff] }
 0x1de   :  { %v2889_v6 = vpop.permute.xlu1 %2888  ;;  %14333 = vmatprep.mubr.msk.bf16.mxu1 %vm1422_vm1, %v13030_v3  ;;  %3790 = vst.msk [vmem:[#allocation3 + $0x10] sm:$0xff] %vm1808_vm2, %v3726_v7  ;;  %v3727_v19 = vadd.f32 %v14280_v16, %v3663_v17  ;;  %v3408_v20 = vpop.f32.mrb[19].mxu1  ;;  %v5035_v28 = vsel %vm1045_vm0, %v15147_v27, %v4854_v26 }
 0x1df   :  { %v3077_v9 = vsel %vm1045_vm0, %v15144_v8, %v2889_v6  ;;  %3788 = vst.msk [vmem:[#allocation3] sm:$0xff] %vm1808_vm2, %v3724_v13  ;;  %v3725_v22 = vadd.f32 %v3661_v21, %v3408_v20 }
 0x1e0   :  { %v13031_v18 = vcombine.low %v3074_v15, %v3077_v9  ;;  %3791 = vst.msk [vmem:[#allocation3 + $0x18] sm:$0xff] %vm1808_vm2, %v3727_v19  ;;  %v14283_v30 = vpop.f32.mrb[20].mxu1  ;;  %v3669_v9 = vld [vmem:[#allocation3 + $0x48] sm:$0xff]  ;;  %v15155_v15 = vld [vmem:[%s20885_s0 + $0x1e0] sm:$0xf] }
 0x1e1   :  { %3789 = vst.msk [vmem:[#allocation3 + $0x8] sm:$0xff] %vm1808_vm2, %v3725_v22  ;;  %v3730_v33 = vadd.f32 %v14283_v30, %v3666_v31  ;;  %v3421_v36 = vpop.f32.mrb[21].mxu1  ;;  %v4858_v38 = vpop.permute.xlu0 %4857  ;;  %v3674_v19 = vld [vmem:[#allocation3 + $0x70] sm:$0xff]  ;;  %v15156_v22 = vld [vmem:[%s20885_s0 + $0x1f8] sm:$0xf]  ;;  %v3675_v31 = vld [vmem:[#allocation3 + $0x78] sm:$0xff] }
 0x1e2   :  { %v4856_v23 = vpop.permute.xlu1 %4855  ;;  %14334 = vmatmul.mubr.msk.bf16.gmra.mrb[72].mxu1 %vm1422_vm1, %v13031_v18  ;;  %v3728_v39 = vadd.f32 %v3664_v37, %v3421_v36  ;;  %v5041_v41 = vsel %vm1045_vm0, %v15149_v40, %v4858_v38  ;;  %v14284_v42 = vpop.f32.mrb[22].mxu1  ;;  %v15158_v38 = vld [vmem:[%s20885_s0 + $0x208] sm:$0xf] }
 0x1e3   :  { %v5038_v25 = vsel %vm1045_vm0, %v15146_v24, %v4856_v23  ;;  %3794 = vst.msk [vmem:[#allocation3 + $0x30] sm:$0xff] %vm1808_vm2, %v3730_v33  ;;  %v3731_v45 = vadd.f32 %v14284_v42, %v3667_v43  ;;  %v3424_v46 = vpop.f32.mrb[23].mxu1 }
 0x1e4   :  { %v13293_v29 = vcombine.low %v5035_v28, %v5038_v25  ;;  %3792 = vst.msk [vmem:[#allocation3 + $0x20] sm:$0xff] %vm1808_vm2, %v3728_v39  ;;  %v3729_v48 = vadd.f32 %v3665_v47, %v3424_v46  ;;  %v3672_v25 = vld [vmem:[#allocation3 + $0x60] sm:$0xff] }
 0x1e5   :  { %3795 = vst.msk [vmem:[#allocation3 + $0x38] sm:$0xff] %vm1808_vm2, %v3731_v45  ;;  %v2891_v52 = vpop.permute.xlu0 %2890  ;;  %v15157_v28 = vld [vmem:[%s20885_s0 + $0x1f0] sm:$0xf]  ;;  %v3678_v45 = vld [vmem:[#allocation3 + $0x90] sm:$0xff] }
 0x1e6   :  { %v4860_v32 = vpop.permute.xlu1 %4859  ;;  %14399 = vmatprep.mubr.msk.bf16.mxu0 %vm1422_vm1, %v13293_v29  ;;  %3793 = vst.msk [vmem:[#allocation3 + $0x28] sm:$0xff] %vm1808_vm2, %v3729_v48  ;;  %v3080_v54 = vsel %vm1045_vm0, %v15151_v53, %v2891_v52  ;;  %v15160_v48 = vld [vmem:[%s20885_s0 + $0x218] sm:$0xf] }
 0x1e7   :  { %v5044_v35 = vsel %vm1045_vm0, %v15148_v34, %v4860_v32 }
 0x1e8   :  { %v13294_v44 = vcombine.low %v5041_v41, %v5044_v35  ;;  %v14287_v56 = vpop.f32.mrb[24].mxu1  ;;  %v3673_v35 = vld [vmem:[#allocation3 + $0x68] sm:$0xff]  ;;  %v15159_v41 = vld [vmem:[%s20885_s0 + $0x200] sm:$0xf] }
 0x1e9   :  { %v3734_v59 = vadd.f32 %v14287_v56, %v3670_v57  ;;  %v3437_v62 = vpop.f32.mrb[25].mxu1  ;;  %v2895_v0 = vpop.permute.xlu0 %2894  ;;  %v3679_v57 = vld [vmem:[#allocation3 + $0x98] sm:$0xff] }
 0x1ea   :  { %v2893_v49 = vpop.permute.xlu1 %2892  ;;  %14400 = vmatmul.mubr.msk.bf16.gmra.mrb[100].mxu0 %vm1422_vm1, %v13294_v44  ;;  %v3732_v1 = vadd.f32 %v3668_v63, %v3437_v62  ;;  %v3086_v3 = vsel %vm1045_vm0, %v15153_v2, %v2895_v0  ;;  %v14288_v4 = vpop.f32.mrb[26].mxu1  ;;  %v3682_v0 = vld [vmem:[#allocation3 + $0xb0] sm:$0xff] }
 0x1eb   :  { %v3083_v51 = vsel %vm1045_vm0, %v15150_v50, %v2893_v49  ;;  %3798 = vst.msk [vmem:[#allocation3 + $0x50] sm:$0xff] %vm1808_vm2, %v3734_v59  ;;  %v3735_v7 = vadd.f32 %v14288_v4, %v3671_v5  ;;  %v3440_v8 = vpop.f32.mrb[27].mxu1 }
 0x1ec   :  { %v13032_v55 = vcombine.low %v3080_v54, %v3083_v51  ;;  %3796 = vst.msk [vmem:[#allocation3 + $0x40] sm:$0xff] %vm1808_vm2, %v3732_v1  ;;  %v3733_v10 = vadd.f32 %v3669_v9, %v3440_v8  ;;  %v3676_v51 = vld [vmem:[#allocation3 + $0x80] sm:$0xff]  ;;  %v3681_v9 = vld [vmem:[#allocation3 + $0xa8] sm:$0xff] }
 0x1ed   :  { %3799 = vst.msk [vmem:[#allocation3 + $0x58] sm:$0xff] %vm1808_vm2, %v3735_v7  ;;  %v4862_v14 = vpop.permute.xlu0 %4861  ;;  %v15161_v54 = vld [vmem:[%s20885_s0 + $0x210] sm:$0xf]  ;;  %s15189_s0 = smov 96  }
 0x1ee   :  { %v2897_v58 = vpop.permute.xlu1 %2896  ;;  %14337 = vmatprep.mubr.msk.bf16.mxu1 %vm1422_vm1, %v13032_v55  ;;  %3797 = vst.msk [vmem:[#allocation3 + $0x48] sm:$0xff] %vm1808_vm2, %v3733_v10  ;;  %v5047_v16 = vsel %vm1045_vm0, %v15155_v15, %v4862_v14  ;;  %v3684_v15 = vld [vmem:[#allocation3 + $0xc0] sm:$0xff] }
 0x1ef   :  { %v3089_v61 = vsel %vm1045_vm0, %v15152_v60, %v2897_v58 }
 0x1f0   :  { %v13033_v6 = vcombine.low %v3086_v3, %v3089_v61  ;;  %v14291_v18 = vpop.f32.mrb[28].mxu1  ;;  %v3677_v61 = vld [vmem:[#allocation3 + $0x88] sm:$0xff]  ;;  %v3680_v3 = vld [vmem:[#allocation3 + $0xa0] sm:$0xff] }
 0x1f1   :  { %v3738_v21 = vadd.f32 %v14291_v18, %v3674_v19  ;;  %v3453_v24 = vpop.f32.mrb[29].mxu1  ;;  %v4866_v26 = vpop.permute.xlu0 %4865  ;;  %v3687_v18 = vld [vmem:[#allocation3 + $0xd8] sm:$0xff] }
 0x1f2   :  { %v4864_v11 = vpop.permute.xlu1 %4863  ;;  %14338 = vmatmul.mubr.msk.bf16.gmra.mrb[76].mxu1 %vm1422_vm1, %v13033_v6  ;;  %v3736_v27 = vadd.f32 %v3672_v25, %v3453_v24  ;;  %v5053_v29 = vsel %vm1045_vm0, %v15157_v28, %v4866_v26  ;;  %v14292_v30 = vpop.f32.mrb[30].mxu1  ;;  %v3683_v6 = vld [vmem:[#allocation3 + $0xb8] sm:$0xff]  ;;  %v3690_v24 = vld [vmem:[#allocation3 + $0xf0] sm:$0xff] }
 0x1f3   :  { %v5050_v13 = vsel %vm1045_vm0, %v15154_v12, %v4864_v11  ;;  %3802 = vst.msk [vmem:[#allocation3 + $0x70] sm:$0xff] %vm1808_vm2, %v3738_v21  ;;  %v3739_v33 = vadd.f32 %v14292_v30, %v3675_v31  ;;  %v3456_v34 = vpop.f32.mrb[31].mxu1  ;;  %v3686_v12 = vld [vmem:[#allocation3 + $0xd0] sm:$0xff]  ;;  %v3685_v21 = vld [vmem:[#allocation3 + $0xc8] sm:$0xff]  ;;  %v3691_v30 = vld [vmem:[#allocation3 + $0xf8] sm:$0xff] }
 0x1f4   :  { %v13295_v17 = vcombine.low %v5047_v16, %v5050_v13  ;;  %3800 = vst.msk [vmem:[#allocation3 + $0x60] sm:$0xff] %vm1808_vm2, %v3736_v27  ;;  %v3737_v36 = vadd.f32 %v3673_v35, %v3456_v34  ;;  %v3688_v27 = vld [vmem:[#allocation3 + $0xe0] sm:$0xff] }
 0x1f5   :  { %3803 = vst.msk [vmem:[#allocation3 + $0x78] sm:$0xff] %vm1808_vm2, %v3739_v33  ;;  %v4870_v40 = vpop.permute.xlu0 %4869  ;;  %v3689_v33 = vld [vmem:[#allocation3 + $0xe8] sm:$0xff] }
 0x1f6   :  { %v4868_v20 = vpop.permute.xlu1 %4867  ;;  %14403 = vmatprep.mubr.msk.bf16.mxu0 %vm1422_vm1, %v13295_v17  ;;  %3801 = vst.msk [vmem:[#allocation3 + $0x68] sm:$0xff] %vm1808_vm2, %v3737_v36  ;;  %v5059_v42 = vsel %vm1045_vm0, %v15159_v41, %v4870_v40  ;;  %v3694_v36 = vld [vmem:[#allocation3 + $0x110] sm:$0xff] }
 0x1f7   :  { %v5056_v23 = vsel %vm1045_vm0, %v15156_v22, %v4868_v20 }
 0x1f8   :  { %v13296_v32 = vcombine.low %v5053_v29, %v5056_v23  ;;  %v14295_v44 = vpop.f32.mrb[32].mxu1 }
 0x1f9   :  { %v3742_v47 = vadd.f32 %v14295_v44, %v3678_v45  ;;  %v3469_v50 = vpop.f32.mrb[33].mxu1  ;;  %v4874_v52 = vpop.permute.xlu0 %4873  ;;  %v3693_v45 = vld [vmem:[#allocation3 + $0x108] sm:$0xff] }
 0x1fa   :  { %v4872_v37 = vpop.permute.xlu1 %4871  ;;  %14404 = vmatmul.mubr.msk.bf16.gmra.mrb[104].mxu0 %vm1422_vm1, %v13296_v32  ;;  %v3740_v53 = vadd.f32 %v3676_v51, %v3469_v50  ;;  %v5065_v55 = vsel %vm1045_vm0, %v15161_v54, %v4874_v52  ;;  %v14296_v56 = vpop.f32.mrb[34].mxu1  ;;  %v3696_v51 = vld [vmem:[#allocation3 + $0x120] sm:$0xff]  ;;  %v3699_v54 = vld [vmem:[#allocation3 + $0x138] sm:$0xff] }
 0x1fb   :  { %v5062_v39 = vsel %vm1045_vm0, %v15158_v38, %v4872_v37  ;;  %3806 = vst.msk [vmem:[#allocation3 + $0x90] sm:$0xff] %vm1808_vm2, %v3742_v47  ;;  %v3743_v59 = vadd.f32 %v14296_v56, %v3679_v57  ;;  %v3472_v60 = vpop.f32.mrb[35].mxu1  ;;  %v3697_v57 = vld [vmem:[#allocation3 + $0x128] sm:$0xff] }
 0x1fc   :  { %v13297_v43 = vcombine.low %v5059_v42, %v5062_v39  ;;  %3804 = vst.msk [vmem:[#allocation3 + $0x80] sm:$0xff] %vm1808_vm2, %v3740_v53  ;;  %v3741_v62 = vadd.f32 %v3677_v61, %v3472_v60  ;;  %v3692_v39 = vld [vmem:[#allocation3 + $0x100] sm:$0xff]  ;;  %v3695_v42 = vld [vmem:[#allocation3 + $0x118] sm:$0xff]  ;;  %v3702_v60 = vld [vmem:[#allocation3 + $0x150] sm:$0xff] }
 0x1fd   :  { %3807 = vst.msk [vmem:[#allocation3 + $0x98] sm:$0xff] %vm1808_vm2, %v3743_v59 }
 0x1fe   :  { %v4876_v46 = vpop.permute.xlu1 %4875  ;;  %14407 = vmatprep.mubr.msk.bf16.mxu0 %vm1422_vm1, %v13297_v43  ;;  %3805 = vst.msk [vmem:[#allocation3 + $0x88] sm:$0xff] %vm1808_vm2, %v3741_v62 }
 0x1ff   :  { %v5068_v49 = vsel %vm1045_vm0, %v15160_v48, %v4876_v46  ;;  %v3698_v48 = vld [vmem:[#allocation3 + $0x130] sm:$0xff] }
 0x200   :  { %v13298_v58 = vcombine.low %v5065_v55, %v5068_v49  ;;  %v14299_v63 = vpop.f32.mrb[36].mxu1 }
 0x201   :  { %v3746_v1 = vadd.f32 %v14299_v63, %v3682_v0  ;;  %v3485_v2 = vpop.f32.mrb[37].mxu1  ;;  %v3700_v63 = vld [vmem:[#allocation3 + $0x140] sm:$0xff] }
 0x202   :  { %14408 = vmatmul.mubr.msk.bf16.gmra.mrb[108].mxu0 %vm1422_vm1, %v13298_v58  ;;  %v3744_v4 = vadd.f32 %v3680_v3, %v3485_v2  ;;  %v14300_v5 = vpop.f32.mrb[38].mxu1  ;;  %v3703_v2 = vld [vmem:[#allocation3 + $0x158] sm:$0xff] }
 0x203   :  { %3810 = vst.msk [vmem:[#allocation3 + $0xb0] sm:$0xff] %vm1808_vm2, %v3746_v1  ;;  %v3747_v7 = vadd.f32 %v14300_v5, %v3683_v6  ;;  %v3488_v8 = vpop.f32.mrb[39].mxu1  ;;  %v3701_v5 = vld [vmem:[#allocation3 + $0x148] sm:$0xff] }
 0x204   :  { %3808 = vst.msk [vmem:[#allocation3 + $0xa0] sm:$0xff] %vm1808_vm2, %v3744_v4  ;;  %v3745_v10 = vadd.f32 %v3681_v9, %v3488_v8  ;;  %v3706_v8 = vld [vmem:[#allocation3 + $0x170] sm:$0xff] }
 0x205   :  { %3811 = vst.msk [vmem:[#allocation3 + $0xb8] sm:$0xff] %vm1808_vm2, %v3747_v7 }
 0x206   :  { %3809 = vst.msk [vmem:[#allocation3 + $0xa8] sm:$0xff] %vm1808_vm2, %v3745_v10 }
 0x208   :  { %v14303_v11 = vpop.f32.mrb[40].mxu1 }
 0x209   :  { %v3750_v13 = vadd.f32 %v14303_v11, %v3686_v12  ;;  %v3501_v14 = vpop.f32.mrb[41].mxu1  ;;  %v3704_v11 = vld [vmem:[#allocation3 + $0x160] sm:$0xff] }
 0x20a   :  { %v3748_v16 = vadd.f32 %v3684_v15, %v3501_v14  ;;  %v14304_v17 = vpop.f32.mrb[42].mxu1  ;;  %v3707_v14 = vld [vmem:[#allocation3 + $0x178] sm:$0xff] }
 0x20b   :  { %3814 = vst.msk [vmem:[#allocation3 + $0xd0] sm:$0xff] %vm1808_vm2, %v3750_v13  ;;  %v3751_v19 = vadd.f32 %v14304_v17, %v3687_v18  ;;  %v3504_v20 = vpop.f32.mrb[43].mxu1  ;;  %v3705_v17 = vld [vmem:[#allocation3 + $0x168] sm:$0xff] }
 0x20c   :  { %3812 = vst.msk [vmem:[#allocation3 + $0xc0] sm:$0xff] %vm1808_vm2, %v3748_v16  ;;  %v3749_v22 = vadd.f32 %v3685_v21, %v3504_v20  ;;  %v5641_v20 = vld [vmem:[#allocation3 + $0x10] sm:$0xff] }
 0x20d   :  { %3815 = vst.msk [vmem:[#allocation3 + $0xd8] sm:$0xff] %vm1808_vm2, %v3751_v19 }
 0x20e   :  { %3813 = vst.msk [vmem:[#allocation3 + $0xc8] sm:$0xff] %vm1808_vm2, %v3749_v22 }
 0x210   :  { %v14307_v23 = vpop.f32.mrb[44].mxu1 }
 0x211   :  { %v3754_v25 = vadd.f32 %v14307_v23, %v3690_v24  ;;  %v3517_v26 = vpop.f32.mrb[45].mxu1  ;;  %v5639_v23 = vld [vmem:[#allocation3] sm:$0xff] }
 0x212   :  { %v3752_v28 = vadd.f32 %v3688_v27, %v3517_v26  ;;  %v14308_v29 = vpop.f32.mrb[46].mxu1  ;;  %v5642_v26 = vld [vmem:[#allocation3 + $0x18] sm:$0xff] }
 0x213   :  { %3818 = vst.msk [vmem:[#allocation3 + $0xf0] sm:$0xff] %vm1808_vm2, %v3754_v25  ;;  %v3755_v31 = vadd.f32 %v14308_v29, %v3691_v30  ;;  %v3520_v32 = vpop.f32.mrb[47].mxu1  ;;  %v5640_v29 = vld [vmem:[#allocation3 + $0x8] sm:$0xff] }
 0x214   :  { %3816 = vst.msk [vmem:[#allocation3 + $0xe0] sm:$0xff] %vm1808_vm2, %v3752_v28  ;;  %v3753_v34 = vadd.f32 %v3689_v33, %v3520_v32  ;;  %v5645_v32 = vld [vmem:[#allocation3 + $0x30] sm:$0xff] }
 0x215   :  { %3819 = vst.msk [vmem:[#allocation3 + $0xf8] sm:$0xff] %vm1808_vm2, %v3755_v31 }
 0x216   :  { %3817 = vst.msk [vmem:[#allocation3 + $0xe8] sm:$0xff] %vm1808_vm2, %v3753_v34 }
 0x218   :  { %v14311_v35 = vpop.f32.mrb[48].mxu1 }
 0x219   :  { %v3758_v37 = vadd.f32 %v14311_v35, %v3694_v36  ;;  %v3533_v38 = vpop.f32.mrb[49].mxu1  ;;  %v5643_v35 = vld [vmem:[#allocation3 + $0x20] sm:$0xff] }
 0x21a   :  { %v3756_v40 = vadd.f32 %v3692_v39, %v3533_v38  ;;  %v14312_v41 = vpop.f32.mrb[50].mxu1  ;;  %v5646_v38 = vld [vmem:[#allocation3 + $0x38] sm:$0xff] }
 0x21b   :  { %3822 = vst.msk [vmem:[#allocation3 + $0x110] sm:$0xff] %vm1808_vm2, %v3758_v37  ;;  %v3759_v43 = vadd.f32 %v14312_v41, %v3695_v42  ;;  %v3536_v44 = vpop.f32.mrb[51].mxu1  ;;  %v5644_v42 = vld [vmem:[#allocation3 + $0x28] sm:$0xff] }
 0x21c   :  { %3820 = vst.msk [vmem:[#allocation3 + $0x100] sm:$0xff] %vm1808_vm2, %v3756_v40  ;;  %v3757_v46 = vadd.f32 %v3693_v45, %v3536_v44 }
 0x21d   :  { %3823 = vst.msk [vmem:[#allocation3 + $0x118] sm:$0xff] %vm1808_vm2, %v3759_v43 }
 0x21e   :  { %3821 = vst.msk [vmem:[#allocation3 + $0x108] sm:$0xff] %vm1808_vm2, %v3757_v46 }
 0x220   :  { %v14315_v47 = vpop.f32.mrb[52].mxu1 }
 0x221   :  { %v3762_v49 = vadd.f32 %v14315_v47, %v3698_v48  ;;  %v3549_v50 = vpop.f32.mrb[53].mxu1  ;;  %v5649_v47 = vld [vmem:[#allocation3 + $0x50] sm:$0xff] }
 0x222   :  { %v3760_v52 = vadd.f32 %v3696_v51, %v3549_v50  ;;  %v14316_v53 = vpop.f32.mrb[54].mxu1  ;;  %v5647_v51 = vld [vmem:[#allocation3 + $0x40] sm:$0xff] }
 0x223   :  { %3826 = vst.msk [vmem:[#allocation3 + $0x130] sm:$0xff] %vm1808_vm2, %v3762_v49  ;;  %v3763_v55 = vadd.f32 %v14316_v53, %v3699_v54  ;;  %v3552_v56 = vpop.f32.mrb[55].mxu1  ;;  %v5650_v54 = vld [vmem:[#allocation3 + $0x58] sm:$0xff] }
 0x224   :  { %3824 = vst.msk [vmem:[#allocation3 + $0x120] sm:$0xff] %vm1808_vm2, %v3760_v52  ;;  %v3761_v58 = vadd.f32 %v3697_v57, %v3552_v56 }
 0x225   :  { %3827 = vst.msk [vmem:[#allocation3 + $0x138] sm:$0xff] %vm1808_vm2, %v3763_v55 }
 0x226   :  { %3825 = vst.msk [vmem:[#allocation3 + $0x128] sm:$0xff] %vm1808_vm2, %v3761_v58  ;;  %v5648_v58 = vld [vmem:[#allocation3 + $0x48] sm:$0xff] }
 0x228   :  { %v14319_v59 = vpop.f32.mrb[56].mxu1 }
 0x229   :  { %v3766_v61 = vadd.f32 %v14319_v59, %v3702_v60  ;;  %v3565_v62 = vpop.f32.mrb[57].mxu1 }
 0x22a   :  { %v3764_v0 = vadd.f32 %v3700_v63, %v3565_v62  ;;  %v14320_v1 = vpop.f32.mrb[58].mxu1  ;;  %v5653_v63 = vld [vmem:[#allocation3 + $0x70] sm:$0xff] }
 0x22b   :  { %3830 = vst.msk [vmem:[#allocation3 + $0x150] sm:$0xff] %vm1808_vm2, %v3766_v61  ;;  %v3767_v3 = vadd.f32 %v14320_v1, %v3703_v2  ;;  %v3568_v4 = vpop.f32.mrb[59].mxu1 }
 0x22c   :  { %3828 = vst.msk [vmem:[#allocation3 + $0x140] sm:$0xff] %vm1808_vm2, %v3764_v0  ;;  %v3765_v6 = vadd.f32 %v3701_v5, %v3568_v4 }
 0x22d   :  { %3831 = vst.msk [vmem:[#allocation3 + $0x158] sm:$0xff] %vm1808_vm2, %v3767_v3  ;;  %v5651_v3 = vld [vmem:[#allocation3 + $0x60] sm:$0xff] }
 0x22e   :  { %3829 = vst.msk [vmem:[#allocation3 + $0x148] sm:$0xff] %vm1808_vm2, %v3765_v6  ;;  %v5654_v6 = vld [vmem:[#allocation3 + $0x78] sm:$0xff] }
 0x230   :  { %v14323_v7 = vpop.f32.mrb[60].mxu1 }
 0x231   :  { %v3770_v9 = vadd.f32 %v14323_v7, %v3706_v8  ;;  %v3581_v10 = vpop.f32.mrb[61].mxu1 }
 0x232   :  { %v3768_v12 = vadd.f32 %v3704_v11, %v3581_v10  ;;  %v14324_v13 = vpop.f32.mrb[62].mxu1  ;;  %v5652_v10 = vld [vmem:[#allocation3 + $0x68] sm:$0xff] }
 0x233   :  { %3834 = vst.msk [vmem:[#allocation3 + $0x170] sm:$0xff] %vm1808_vm2, %v3770_v9  ;;  %v3771_v15 = vadd.f32 %v14324_v13, %v3707_v14  ;;  %v3584_v16 = vpop.f32.mrb[63].mxu1 }
 0x234   :  { %3832 = vst.msk [vmem:[#allocation3 + $0x160] sm:$0xff] %vm1808_vm2, %v3768_v12  ;;  %v3769_v18 = vadd.f32 %v3705_v17, %v3584_v16 }
 0x235   :  { %3835 = vst.msk [vmem:[#allocation3 + $0x178] sm:$0xff] %vm1808_vm2, %v3771_v15  ;;  %v5657_v15 = vld [vmem:[#allocation3 + $0x90] sm:$0xff] }
 0x236   :  { %3833 = vst.msk [vmem:[#allocation3 + $0x168] sm:$0xff] %vm1808_vm2, %v3769_v18 }
 0x238   :  { %v14349_v19 = vpop.f32.mrb[48].mxu0 }
 0x239   :  { %v5705_v21 = vadd.f32 %v14349_v19, %v5641_v20  ;;  %v5384_v22 = vpop.f32.mrb[49].mxu0  ;;  %v5655_v19 = vld [vmem:[#allocation3 + $0x80] sm:$0xff] }
 0x23a   :  { %v5703_v24 = vadd.f32 %v5639_v23, %v5384_v22  ;;  %v14350_v25 = vpop.f32.mrb[50].mxu0  ;;  %v5658_v22 = vld [vmem:[#allocation3 + $0x98] sm:$0xff] }
 0x23b   :  { %5769 = vst.msk [vmem:[#allocation3 + $0x10] sm:$0xff] %vm1808_vm2, %v5705_v21  ;;  %v5706_v27 = vadd.f32 %v14350_v25, %v5642_v26  ;;  %v5387_v28 = vpop.f32.mrb[51].mxu0  ;;  %v5656_v26 = vld [vmem:[#allocation3 + $0x88] sm:$0xff] }
 0x23c   :  { %5767 = vst.msk [vmem:[#allocation3] sm:$0xff] %vm1808_vm2, %v5703_v24  ;;  %v5704_v30 = vadd.f32 %v5640_v29, %v5387_v28 }
 0x23d   :  { %5770 = vst.msk [vmem:[#allocation3 + $0x18] sm:$0xff] %vm1808_vm2, %v5706_v27 }
 0x23e   :  { %5768 = vst.msk [vmem:[#allocation3 + $0x8] sm:$0xff] %vm1808_vm2, %v5704_v30 }
 0x240   :  { %v14353_v31 = vpop.f32.mrb[52].mxu0 }
 0x241   :  { %v5709_v33 = vadd.f32 %v14353_v31, %v5645_v32  ;;  %v5400_v34 = vpop.f32.mrb[53].mxu0  ;;  %v5661_v31 = vld [vmem:[#allocation3 + $0xb0] sm:$0xff] }
 0x242   :  { %v5707_v36 = vadd.f32 %v5643_v35, %v5400_v34  ;;  %v14354_v37 = vpop.f32.mrb[54].mxu0  ;;  %v18325_v39 = vld [vmem:[#allocation3 + $0x10] sm:$0xff]  ;;  %v5659_v35 = vld [vmem:[#allocation3 + $0xa0] sm:$0xff] }
 0x243   :  { %5773 = vst.msk [vmem:[#allocation3 + $0x30] sm:$0xff] %vm1808_vm2, %v5709_v33  ;;  %v5710_v40 = vadd.f32 %v14354_v37, %v5646_v38  ;;  %5963 = vrot.lane.b32.xlu0 %v18325_v39, %s15189_s0  ;;  %v5403_v41 = vpop.f32.mrb[55].mxu0  ;;  %v18337_v45 = vld [vmem:[#allocation3] sm:$0xff]  ;;  %v5662_v38 = vld [vmem:[#allocation3 + $0xb8] sm:$0xff] }
 0x244   :  { %5771 = vst.msk [vmem:[#allocation3 + $0x20] sm:$0xff] %vm1808_vm2, %v5707_v36  ;;  %v5708_v43 = vadd.f32 %v5644_v42, %v5403_v41  ;;  %v18331_v44 = vld [vmem:[#allocation3 + $0x18] sm:$0xff] }
 0x245   :  { %5774 = vst.msk [vmem:[#allocation3 + $0x38] sm:$0xff] %vm1808_vm2, %v5710_v40  ;;  %5965 = vrot.lane.b32.xlu1 %v18331_v44, %s15189_s0  ;;  %v18341_v48 = vld [vmem:[#allocation3 + $0x8] sm:$0xff] }
 0x246   :  { %5772 = vst.msk [vmem:[#allocation3 + $0x28] sm:$0xff] %vm1808_vm2, %v5708_v43  ;;  %v5660_v43 = vld [vmem:[#allocation3 + $0xa8] sm:$0xff] }
 0x247   :  { %5959 = vrot.lane.b32.xlu0 %v18337_v45, %s15189_s0 }
 0x248   :  { %v14357_v46 = vpop.f32.mrb[56].mxu0 }
 0x249   :  { %v5713_v49 = vadd.f32 %v14357_v46, %v5649_v47  ;;  %5961 = vrot.lane.b32.xlu1 %v18341_v48, %s15189_s0  ;;  %v5416_v50 = vpop.f32.mrb[57].mxu0 }
 0x24a   :  { %v5711_v52 = vadd.f32 %v5647_v51, %v5416_v50  ;;  %v14358_v53 = vpop.f32.mrb[58].mxu0  ;;  %v18345_v55 = vld [vmem:[#allocation3 + $0x30] sm:$0xff] }
 0x24b   :  { %5777 = vst.msk [vmem:[#allocation3 + $0x50] sm:$0xff] %vm1808_vm2, %v5713_v49  ;;  %v5714_v56 = vadd.f32 %v14358_v53, %v5650_v54  ;;  %5971 = vrot.lane.b32.xlu0 %v18345_v55, %s15189_s0  ;;  %v5419_v57 = vpop.f32.mrb[59].mxu0  ;;  %v18357_v61 = vld [vmem:[#allocation3 + $0x20] sm:$0xff]  ;;  %v5665_v51 = vld [vmem:[#allocation3 + $0xd0] sm:$0xff] }
 0x24c   :  { %5775 = vst.msk [vmem:[#allocation3 + $0x40] sm:$0xff] %vm1808_vm2, %v5711_v52  ;;  %v5712_v59 = vadd.f32 %v5648_v58, %v5419_v57  ;;  %v18351_v60 = vld [vmem:[#allocation3 + $0x38] sm:$0xff] }
 0x24d   :  { %5778 = vst.msk [vmem:[#allocation3 + $0x58] sm:$0xff] %vm1808_vm2, %v5714_v56  ;;  %5973 = vrot.lane.b32.xlu1 %v18351_v60, %s15189_s0  ;;  %v18361_v0 = vld [vmem:[#allocation3 + $0x28] sm:$0xff]  ;;  %v5663_v56 = vld [vmem:[#allocation3 + $0xc0] sm:$0xff] }
 0x24e   :  { %5776 = vst.msk [vmem:[#allocation3 + $0x48] sm:$0xff] %vm1808_vm2, %v5712_v59  ;;  %v5666_v59 = vld [vmem:[#allocation3 + $0xd8] sm:$0xff] }
 0x24f   :  { %5967 = vrot.lane.b32.xlu0 %v18357_v61, %s15189_s0 }
 0x250   :  { %v14361_v62 = vpop.f32.mrb[60].mxu0 }
 0x251   :  { %v5717_v1 = vadd.f32 %v14361_v62, %v5653_v63  ;;  %5969 = vrot.lane.b32.xlu1 %v18361_v0, %s15189_s0  ;;  %v5432_v2 = vpop.f32.mrb[61].mxu0 }
 0x252   :  { %v5715_v4 = vadd.f32 %v5651_v3, %v5432_v2  ;;  %v14362_v5 = vpop.f32.mrb[62].mxu0  ;;  %v18365_v7 = vld [vmem:[#allocation3 + $0x50] sm:$0xff]  ;;  %v5664_v2 = vld [vmem:[#allocation3 + $0xc8] sm:$0xff] }
 0x253   :  { %5781 = vst.msk [vmem:[#allocation3 + $0x70] sm:$0xff] %vm1808_vm2, %v5717_v1  ;;  %v5718_v8 = vadd.f32 %v14362_v5, %v5654_v6  ;;  %5979 = vrot.lane.b32.xlu0 %v18365_v7, %s15189_s0  ;;  %v5435_v9 = vpop.f32.mrb[63].mxu0  ;;  %v18377_v13 = vld [vmem:[#allocation3 + $0x40] sm:$0xff] }
 0x254   :  { %5779 = vst.msk [vmem:[#allocation3 + $0x60] sm:$0xff] %vm1808_vm2, %v5715_v4  ;;  %v5716_v11 = vadd.f32 %v5652_v10, %v5435_v9  ;;  %v18371_v12 = vld [vmem:[#allocation3 + $0x58] sm:$0xff] }
 0x255   :  { %5782 = vst.msk [vmem:[#allocation3 + $0x78] sm:$0xff] %vm1808_vm2, %v5718_v8  ;;  %5981 = vrot.lane.b32.xlu1 %v18371_v12, %s15189_s0  ;;  %v18381_v16 = vld [vmem:[#allocation3 + $0x48] sm:$0xff]  ;;  %v5669_v8 = vld [vmem:[#allocation3 + $0xf0] sm:$0xff] }
 0x256   :  { %5780 = vst.msk [vmem:[#allocation3 + $0x68] sm:$0xff] %vm1808_vm2, %v5716_v11 }
 0x257   :  { %5975 = vrot.lane.b32.xlu0 %v18377_v13, %s15189_s0 }
 0x258   :  { %v14365_v14 = vpop.f32.mrb[64].mxu0 }
 0x259   :  { %v5721_v17 = vadd.f32 %v14365_v14, %v5657_v15  ;;  %5977 = vrot.lane.b32.xlu1 %v18381_v16, %s15189_s0  ;;  %v5448_v18 = vpop.f32.mrb[65].mxu0  ;;  %v5667_v14 = vld [vmem:[#allocation3 + $0xe0] sm:$0xff] }
 0x25a   :  { %v5719_v20 = vadd.f32 %v5655_v19, %v5448_v18  ;;  %v14366_v21 = vpop.f32.mrb[66].mxu0  ;;  %v18385_v23 = vld [vmem:[#allocation3 + $0x70] sm:$0xff]  ;;  %v5670_v18 = vld [vmem:[#allocation3 + $0xf8] sm:$0xff] }
 0x25b   :  { %5785 = vst.msk [vmem:[#allocation3 + $0x90] sm:$0xff] %vm1808_vm2, %v5721_v17  ;;  %v5722_v24 = vadd.f32 %v14366_v21, %v5658_v22  ;;  %5987 = vrot.lane.b32.xlu0 %v18385_v23, %s15189_s0  ;;  %v5451_v25 = vpop.f32.mrb[67].mxu0  ;;  %v18397_v29 = vld [vmem:[#allocation3 + $0x60] sm:$0xff]  ;;  %v5668_v22 = vld [vmem:[#allocation3 + $0xe8] sm:$0xff] }
 0x25c   :  { %5783 = vst.msk [vmem:[#allocation3 + $0x80] sm:$0xff] %vm1808_vm2, %v5719_v20  ;;  %v5720_v27 = vadd.f32 %v5656_v26, %v5451_v25  ;;  %v18391_v28 = vld [vmem:[#allocation3 + $0x78] sm:$0xff] }
 0x25d   :  { %5786 = vst.msk [vmem:[#allocation3 + $0x98] sm:$0xff] %vm1808_vm2, %v5722_v24  ;;  %5989 = vrot.lane.b32.xlu1 %v18391_v28, %s15189_s0  ;;  %v18401_v32 = vld [vmem:[#allocation3 + $0x68] sm:$0xff] }
 0x25e   :  { %5784 = vst.msk [vmem:[#allocation3 + $0x88] sm:$0xff] %vm1808_vm2, %v5720_v27 }
 0x25f   :  { %5983 = vrot.lane.b32.xlu0 %v18397_v29, %s15189_s0 }
 0x260   :  { %v14369_v30 = vpop.f32.mrb[68].mxu0 }
 0x261   :  { %v5725_v33 = vadd.f32 %v14369_v30, %v5661_v31  ;;  %5985 = vrot.lane.b32.xlu1 %v18401_v32, %s15189_s0  ;;  %v5464_v34 = vpop.f32.mrb[69].mxu0  ;;  %v5673_v30 = vld [vmem:[#allocation3 + $0x110] sm:$0xff] }
 0x262   :  { %v5723_v36 = vadd.f32 %v5659_v35, %v5464_v34  ;;  %v14370_v37 = vpop.f32.mrb[70].mxu0  ;;  %v18405_v40 = vld [vmem:[#allocation3 + $0x90] sm:$0xff]  ;;  %v5671_v35 = vld [vmem:[#allocation3 + $0x100] sm:$0xff] }
 0x263   :  { %5789 = vst.msk [vmem:[#allocation3 + $0xb0] sm:$0xff] %vm1808_vm2, %v5725_v33  ;;  %v5726_v41 = vadd.f32 %v14370_v37, %v5662_v38  ;;  %5995 = vrot.lane.b32.xlu0 %v18405_v40, %s15189_s0  ;;  %v5467_v42 = vpop.f32.mrb[71].mxu0  ;;  %v18417_v49 = vld [vmem:[#allocation3 + $0x80] sm:$0xff]  ;;  %v5674_v38 = vld [vmem:[#allocation3 + $0x118] sm:$0xff] }
 0x264   :  { %5787 = vst.msk [vmem:[#allocation3 + $0xa0] sm:$0xff] %vm1808_vm2, %v5723_v36  ;;  %v5724_v46 = vadd.f32 %v5660_v43, %v5467_v42  ;;  %v18411_v47 = vld [vmem:[#allocation3 + $0x98] sm:$0xff] }
 0x265   :  { %5790 = vst.msk [vmem:[#allocation3 + $0xb8] sm:$0xff] %vm1808_vm2, %v5726_v41  ;;  %5997 = vrot.lane.b32.xlu1 %v18411_v47, %s15189_s0  ;;  %v18421_v52 = vld [vmem:[#allocation3 + $0x88] sm:$0xff] }
 0x266   :  { %5788 = vst.msk [vmem:[#allocation3 + $0xa8] sm:$0xff] %vm1808_vm2, %v5724_v46  ;;  %v5672_v46 = vld [vmem:[#allocation3 + $0x108] sm:$0xff] }
 0x267   :  { %5991 = vrot.lane.b32.xlu0 %v18417_v49, %s15189_s0 }
 0x268   :  { %v14373_v50 = vpop.f32.mrb[72].mxu0 }
 0x269   :  { %v5729_v53 = vadd.f32 %v14373_v50, %v5665_v51  ;;  %5993 = vrot.lane.b32.xlu1 %v18421_v52, %s15189_s0  ;;  %v5480_v54 = vpop.f32.mrb[73].mxu0 }
 0x26a   :  { %v5727_v57 = vadd.f32 %v5663_v56, %v5480_v54  ;;  %v14374_v58 = vpop.f32.mrb[74].mxu0  ;;  %v18425_v62 = vld [vmem:[#allocation3 + $0xb0] sm:$0xff] }
 0x26b   :  { %5793 = vst.msk [vmem:[#allocation3 + $0xd0] sm:$0xff] %vm1808_vm2, %v5729_v53  ;;  %v5730_v63 = vadd.f32 %v14374_v58, %v5666_v59  ;;  %6003 = vrot.lane.b32.xlu0 %v18425_v62, %s15189_s0  ;;  %v5483_v1 = vpop.f32.mrb[75].mxu0  ;;  %v18437_v5 = vld [vmem:[#allocation3 + $0xa0] sm:$0xff]  ;;  %v5677_v56 = vld [vmem:[#allocation3 + $0x130] sm:$0xff] }
 0x26c   :  { %5791 = vst.msk [vmem:[#allocation3 + $0xc0] sm:$0xff] %vm1808_vm2, %v5727_v57  ;;  %v5728_v3 = vadd.f32 %v5664_v2, %v5483_v1  ;;  %v18431_v4 = vld [vmem:[#allocation3 + $0xb8] sm:$0xff] }
 0x26d   :  { %5794 = vst.msk [vmem:[#allocation3 + $0xd8] sm:$0xff] %vm1808_vm2, %v5730_v63  ;;  %6005 = vrot.lane.b32.xlu1 %v18431_v4, %s15189_s0  ;;  %v18441_v9 = vld [vmem:[#allocation3 + $0xa8] sm:$0xff]  ;;  %v5675_v63 = vld [vmem:[#allocation3 + $0x120] sm:$0xff] }
 0x26e   :  { %5792 = vst.msk [vmem:[#allocation3 + $0xc8] sm:$0xff] %vm1808_vm2, %v5728_v3  ;;  %v5678_v3 = vld [vmem:[#allocation3 + $0x138] sm:$0xff] }
 0x26f   :  { %5999 = vrot.lane.b32.xlu0 %v18437_v5, %s15189_s0 }
 0x270   :  { %v14377_v6 = vpop.f32.mrb[76].mxu0 }
 0x271   :  { %v5733_v10 = vadd.f32 %v14377_v6, %v5669_v8  ;;  %6001 = vrot.lane.b32.xlu1 %v18441_v9, %s15189_s0  ;;  %v5496_v11 = vpop.f32.mrb[77].mxu0 }
 0x272   :  { %v5731_v15 = vadd.f32 %v5667_v14, %v5496_v11  ;;  %v14378_v17 = vpop.f32.mrb[78].mxu0  ;;  %v18445_v19 = vld [vmem:[#allocation3 + $0xd0] sm:$0xff]  ;;  %v5676_v11 = vld [vmem:[#allocation3 + $0x128] sm:$0xff] }
 0x273   :  { %5797 = vst.msk [vmem:[#allocation3 + $0xf0] sm:$0xff] %vm1808_vm2, %v5733_v10  ;;  %v5734_v20 = vadd.f32 %v14378_v17, %v5670_v18  ;;  %6011 = vrot.lane.b32.xlu0 %v18445_v19, %s15189_s0  ;;  %v5499_v21 = vpop.f32.mrb[79].mxu0  ;;  %v18457_v26 = vld [vmem:[#allocation3 + $0xc0] sm:$0xff] }
 0x274   :  { %5795 = vst.msk [vmem:[#allocation3 + $0xe0] sm:$0xff] %vm1808_vm2, %v5731_v15  ;;  %v5732_v24 = vadd.f32 %v5668_v22, %v5499_v21  ;;  %v18451_v25 = vld [vmem:[#allocation3 + $0xd8] sm:$0xff] }
 0x275   :  { %5798 = vst.msk [vmem:[#allocation3 + $0xf8] sm:$0xff] %vm1808_vm2, %v5734_v20  ;;  %6013 = vrot.lane.b32.xlu1 %v18451_v25, %s15189_s0  ;;  %v18461_v31 = vld [vmem:[#allocation3 + $0xc8] sm:$0xff]  ;;  %v5681_v20 = vld [vmem:[#allocation3 + $0x150] sm:$0xff] }
 0x276   :  { %5796 = vst.msk [vmem:[#allocation3 + $0xe8] sm:$0xff] %vm1808_vm2, %v5732_v24 }
 0x277   :  { %6007 = vrot.lane.b32.xlu0 %v18457_v26, %s15189_s0 }
 0x278   :  { %v14381_v27 = vpop.f32.mrb[80].mxu0 }
 0x279   :  { %v5737_v33 = vadd.f32 %v14381_v27, %v5673_v30  ;;  %6009 = vrot.lane.b32.xlu1 %v18461_v31, %s15189_s0  ;;  %v5512_v34 = vpop.f32.mrb[81].mxu0  ;;  %v5679_v27 = vld [vmem:[#allocation3 + $0x140] sm:$0xff] }
 0x27a   :  { %v5735_v36 = vadd.f32 %v5671_v35, %v5512_v34  ;;  %v14382_v37 = vpop.f32.mrb[82].mxu0  ;;  %v18465_v41 = vld [vmem:[#allocation3 + $0xf0] sm:$0xff]  ;;  %v5682_v34 = vld [vmem:[#allocation3 + $0x158] sm:$0xff] }
 0x27b   :  { %5801 = vst.msk [vmem:[#allocation3 + $0x110] sm:$0xff] %vm1808_vm2, %v5737_v33  ;;  %v5738_v42 = vadd.f32 %v14382_v37, %v5674_v38  ;;  %6019 = vrot.lane.b32.xlu0 %v18465_v41, %s15189_s0  ;;  %v5515_v43 = vpop.f32.mrb[83].mxu0  ;;  %v18477_v53 = vld [vmem:[#allocation3 + $0xe0] sm:$0xff]  ;;  %v5680_v38 = vld [vmem:[#allocation3 + $0x148] sm:$0xff] }
 0x27c   :  { %5799 = vst.msk [vmem:[#allocation3 + $0x100] sm:$0xff] %vm1808_vm2, %v5735_v36  ;;  %v5736_v50 = vadd.f32 %v5672_v46, %v5515_v43  ;;  %v18471_v51 = vld [vmem:[#allocation3 + $0xf8] sm:$0xff] }
 0x27d   :  { %5802 = vst.msk [vmem:[#allocation3 + $0x118] sm:$0xff] %vm1808_vm2, %v5738_v42  ;;  %6021 = vrot.lane.b32.xlu1 %v18471_v51, %s15189_s0  ;;  %v18481_v57 = vld [vmem:[#allocation3 + $0xe8] sm:$0xff] }
 0x27e   :  { %5800 = vst.msk [vmem:[#allocation3 + $0x108] sm:$0xff] %vm1808_vm2, %v5736_v50 }
 0x27f   :  { %6015 = vrot.lane.b32.xlu0 %v18477_v53, %s15189_s0 }
 0x280   :  { %v14385_v54 = vpop.f32.mrb[84].mxu0 }
 0x281   :  { %v5741_v58 = vadd.f32 %v14385_v54, %v5677_v56  ;;  %6017 = vrot.lane.b32.xlu1 %v18481_v57, %s15189_s0  ;;  %v5528_v59 = vpop.f32.mrb[85].mxu0  ;;  %v3710_v54 = vld [vmem:[#allocation3 + $0x190] sm:$0xff] }
 0x282   :  { %v5739_v1 = vadd.f32 %v5675_v63, %v5528_v59  ;;  %v14386_v2 = vpop.f32.mrb[86].mxu0  ;;  %v18485_v6 = vld [vmem:[#allocation3 + $0x110] sm:$0xff]  ;;  %v3708_v63 = vld [vmem:[#allocation3 + $0x180] sm:$0xff] }
 0x283   :  { %5805 = vst.msk [vmem:[#allocation3 + $0x130] sm:$0xff] %vm1808_vm2, %v5741_v58  ;;  %v5742_v8 = vadd.f32 %v14386_v2, %v5678_v3  ;;  %6027 = vrot.lane.b32.xlu0 %v18485_v6, %s15189_s0  ;;  %v5531_v10 = vpop.f32.mrb[87].mxu0  ;;  %v18497_v17 = vld [vmem:[#allocation3 + $0x100] sm:$0xff] }
 0x284   :  { %5803 = vst.msk [vmem:[#allocation3 + $0x120] sm:$0xff] %vm1808_vm2, %v5739_v1  ;;  %v5740_v14 = vadd.f32 %v5676_v11, %v5531_v10  ;;  %v18491_v15 = vld [vmem:[#allocation3 + $0x118] sm:$0xff]  ;;  %v18525_v1 = vpop.permute.xlu0 %6748 }
 0x285   :  { %5806 = vst.msk [vmem:[#allocation3 + $0x138] sm:$0xff] %vm1808_vm2, %v5742_v8  ;;  %6029 = vrot.lane.b32.xlu1 %v18491_v15, %s15189_s0  ;;  %v18501_v21 = vld [vmem:[#allocation3 + $0x108] sm:$0xff]  ;;  %v3711_v8 = vld [vmem:[#allocation3 + $0x198] sm:$0xff] }
 0x286   :  { %5804 = vst.msk [vmem:[#allocation3 + $0x128] sm:$0xff] %vm1808_vm2, %v5740_v14 }
 0x287   :  { %6023 = vrot.lane.b32.xlu0 %v18497_v17, %s15189_s0 }
 0x288   :  { %v14389_v18 = vpop.f32.mrb[88].mxu0 }
 0x289   :  { %v5745_v22 = vadd.f32 %v14389_v18, %v5681_v20  ;;  %6025 = vrot.lane.b32.xlu1 %v18501_v21, %s15189_s0  ;;  %v5544_v24 = vpop.f32.mrb[89].mxu0  ;;  %v3709_v18 = vld [vmem:[#allocation3 + $0x188] sm:$0xff] }
 0x28a   :  { %v5743_v30 = vadd.f32 %v5679_v27, %v5544_v24  ;;  %v14390_v33 = vpop.f32.mrb[90].mxu0  ;;  %v18505_v35 = vld [vmem:[#allocation3 + $0x130] sm:$0xff]  ;;  %v18537_v27 = vpop.permute.xlu0 %6780 }
 0x28b   :  { %5809 = vst.msk [vmem:[#allocation3 + $0x150] sm:$0xff] %vm1808_vm2, %v5745_v22  ;;  %v5746_v36 = vadd.f32 %v14390_v33, %v5682_v34  ;;  %6035 = vrot.lane.b32.xlu0 %v18505_v35, %s15189_s0  ;;  %v5547_v37 = vpop.f32.mrb[91].mxu0  ;;  %v18517_v46 = vld [vmem:[#allocation3 + $0x120] sm:$0xff]  ;;  %v5685_v33 = vld [vmem:[#allocation3 + $0x170] sm:$0xff] }
 0x28c   :  { %5807 = vst.msk [vmem:[#allocation3 + $0x140] sm:$0xff] %vm1808_vm2, %v5743_v30  ;;  %v5744_v42 = vadd.f32 %v5680_v38, %v5547_v37  ;;  %v18511_v43 = vld [vmem:[#allocation3 + $0x138] sm:$0xff]  ;;  %v5683_v38 = vld [vmem:[#allocation3 + $0x160] sm:$0xff] }
 0x28d   :  { %5810 = vst.msk [vmem:[#allocation3 + $0x158] sm:$0xff] %vm1808_vm2, %v5746_v36  ;;  %6037 = vrot.lane.b32.xlu1 %v18511_v43, %s15189_s0  ;;  %v18521_v56 = vld [vmem:[#allocation3 + $0x128] sm:$0xff] }
 0x28e   :  { %5808 = vst.msk [vmem:[#allocation3 + $0x148] sm:$0xff] %vm1808_vm2, %v5744_v42 }
 0x28f   :  { %6031 = vrot.lane.b32.xlu0 %v18517_v46, %s15189_s0 }
 0x291   :  { %6033 = vrot.lane.b32.xlu1 %v18521_v56, %s15189_s0 }
 0x292   :  { %v5873_v10 = vld [vmem:[#allocation3 + $0x150] sm:$0xff] }
 0x293   :  { %6043 = vrot.lane.b32.xlu0 %v5873_v10, %s15189_s0  ;;  %v5871_v24 = vld [vmem:[#allocation3 + $0x140] sm:$0xff]  ;;  %v3714_v10 = vld [vmem:[#allocation3 + $0x1b0] sm:$0xff] }
 0x294   :  { %v18530_v22 = vld [vmem:[#allocation3 + $0x158] sm:$0xff] }
 0x295   :  { %6045 = vrot.lane.b32.xlu1 %v18530_v22, %s15189_s0  ;;  %v5872_v34 = vld [vmem:[#allocation3 + $0x148] sm:$0xff] }
 0x297   :  { %6039 = vrot.lane.b32.xlu0 %v5871_v24, %s15189_s0 }
 0x299   :  { %6041 = vrot.lane.b32.xlu1 %v5872_v34, %s15189_s0 }
 0x2a1   :  { %v14327_v50 = vpop.f32.mrb[64].mxu1 }
 0x2a2   :  { %v3774_v58 = vadd.f32 %v14327_v50, %v3710_v54  ;;  %v3597_v59 = vpop.f32.mrb[65].mxu1  ;;  %v5686_v54 = vld [vmem:[#allocation3 + $0x178] sm:$0xff] }
 0x2a3   :  { %v3772_v2 = vadd.f32 %v3708_v63, %v3597_v59  ;;  %v14328_v3 = vpop.f32.mrb[66].mxu1  ;;  %v5684_v63 = vld [vmem:[#allocation3 + $0x168] sm:$0xff] }
 0x2a4   :  { %3838 = vst.msk [vmem:[#allocation3 + $0x190] sm:$0xff] %vm1808_vm2, %v3774_v58  ;;  %v3775_v11 = vadd.f32 %v14328_v3, %v3711_v8  ;;  %v3600_v14 = vpop.f32.mrb[67].mxu1  ;;  %v14393_v30 = vpop.f32.mrb[92].mxu0 }
 0x2a5   :  { %3836 = vst.msk [vmem:[#allocation3 + $0x180] sm:$0xff] %vm1808_vm2, %v3772_v2  ;;  %v3773_v20 = vadd.f32 %v3709_v18, %v3600_v14  ;;  %v5749_v36 = vadd.f32 %v14393_v30, %v5685_v33  ;;  %v5560_v37 = vpop.f32.mrb[93].mxu0  ;;  %v18543_v3 = vpop.permute.xlu0 %7100  ;;  %v3712_v18 = vld [vmem:[#allocation3 + $0x1a0] sm:$0xff]  ;;  %v3715_v30 = vld [vmem:[#allocation3 + $0x1b8] sm:$0xff] }
 0x2a6   :  { %3839 = vst.msk [vmem:[#allocation3 + $0x198] sm:$0xff] %vm1808_vm2, %v3775_v11  ;;  %v5747_v42 = vadd.f32 %v5683_v38, %v5560_v37  ;;  %v14394_v50 = vpop.f32.mrb[94].mxu0  ;;  %v3713_v37 = vld [vmem:[#allocation3 + $0x1a8] sm:$0xff] }
 0x2a7   :  { %3837 = vst.msk [vmem:[#allocation3 + $0x188] sm:$0xff] %vm1808_vm2, %v3773_v20  ;;  %5813 = vst.msk [vmem:[#allocation3 + $0x170] sm:$0xff] %vm1808_vm2, %v5749_v36  ;;  %v5750_v58 = vadd.f32 %v14394_v50, %v5686_v54  ;;  %v5563_v59 = vpop.f32.mrb[95].mxu0 }
 0x2a8   :  { %5811 = vst.msk [vmem:[#allocation3 + $0x160] sm:$0xff] %vm1808_vm2, %v5747_v42  ;;  %v5748_v2 = vadd.f32 %v5684_v63, %v5563_v59 }
 0x2a9   :  { %5814 = vst.msk [vmem:[#allocation3 + $0x178] sm:$0xff] %vm1808_vm2, %v5750_v58  ;;  %v14331_v8 = vpop.f32.mrb[68].mxu1  ;;  %v18548_v38 = vpop.permute.xlu0 %7132 }
 0x2aa   :  { %5812 = vst.msk [vmem:[#allocation3 + $0x168] sm:$0xff] %vm1808_vm2, %v5748_v2  ;;  %v3778_v11 = vadd.f32 %v14331_v8, %v3714_v10  ;;  %v3613_v14 = vpop.f32.mrb[69].mxu1 }
 0x2ab   :  { %v3776_v20 = vadd.f32 %v3712_v18, %v3613_v14  ;;  %v14332_v24 = vpop.f32.mrb[70].mxu1  ;;  %v5689_v59 = vld [vmem:[#allocation3 + $0x190] sm:$0xff] }
 0x2ac   :  { %3842 = vst.msk [vmem:[#allocation3 + $0x1b0] sm:$0xff] %vm1808_vm2, %v3778_v11  ;;  %v3779_v34 = vadd.f32 %v14332_v24, %v3715_v30  ;;  %v3616_v36 = vpop.f32.mrb[71].mxu1  ;;  %v5687_v10 = vld [vmem:[#allocation3 + $0x180] sm:$0xff] }
 0x2ad   :  { %3840 = vst.msk [vmem:[#allocation3 + $0x1a0] sm:$0xff] %vm1808_vm2, %v3776_v20  ;;  %v3777_v42 = vadd.f32 %v3713_v37, %v3616_v36  ;;  %v14397_v58 = vpop.f32.mrb[96].mxu0  ;;  %v18556_v11 = vpop.permute.xlu0 %7292  ;;  %v5690_v20 = vld [vmem:[#allocation3 + $0x198] sm:$0xff] }
 0x2ae   :  { %v5877_v33 = vld [vmem:[#allocation3 + $0x170] sm:$0xff]  ;;  %3843 = vst.msk [vmem:[#allocation3 + $0x1b8] sm:$0xff] %vm1808_vm2, %v3779_v34  ;;  %v5753_v2 = vadd.f32 %v14397_v58, %v5689_v59  ;;  %v5576_v8 = vpop.f32.mrb[97].mxu0  ;;  %v3716_v58 = vld [vmem:[#allocation3 + $0x1c0] sm:$0xff] }
 0x2af   :  { %6051 = vrot.lane.b32.xlu0 %v5877_v33, %s15189_s0  ;;  %3841 = vst.msk [vmem:[#allocation3 + $0x1a8] sm:$0xff] %vm1808_vm2, %v3777_v42  ;;  %v5875_v54 = vld [vmem:[#allocation3 + $0x160] sm:$0xff]  ;;  %v5751_v14 = vadd.f32 %v5687_v10, %v5576_v8  ;;  %v14398_v18 = vpop.f32.mrb[98].mxu0  ;;  %v5688_v33 = vld [vmem:[#allocation3 + $0x188] sm:$0xff]  ;;  %v3718_v42 = vld [vmem:[#allocation3 + $0x1d0] sm:$0xff] }
 0x2b0   :  { %v5878_v50 = vld [vmem:[#allocation3 + $0x178] sm:$0xff]  ;;  %5817 = vst.msk [vmem:[#allocation3 + $0x190] sm:$0xff] %vm1808_vm2, %v5753_v2  ;;  %v5754_v24 = vadd.f32 %v14398_v18, %v5690_v20  ;;  %v5579_v30 = vpop.f32.mrb[99].mxu0  ;;  %v3717_v18 = vld [vmem:[#allocation3 + $0x1c8] sm:$0xff] }
 0x2b1   :  { %6053 = vrot.lane.b32.xlu1 %v5878_v50, %s15189_s0  ;;  %v5876_v63 = vld [vmem:[#allocation3 + $0x168] sm:$0xff]  ;;  %5815 = vst.msk [vmem:[#allocation3 + $0x180] sm:$0xff] %vm1808_vm2, %v5751_v14  ;;  %v5752_v34 = vadd.f32 %v5688_v33, %v5579_v30  ;;  %v18562_v36 = vpop.permute.xlu0 %7324  ;;  %v3719_v2 = vld [vmem:[#allocation3 + $0x1d8] sm:$0xff] }
 0x2b2   :  { %5818 = vst.msk [vmem:[#allocation3 + $0x198] sm:$0xff] %vm1808_vm2, %v5754_v24 }
 0x2b3   :  { %6047 = vrot.lane.b32.xlu0 %v5875_v54, %s15189_s0  ;;  %5816 = vst.msk [vmem:[#allocation3 + $0x188] sm:$0xff] %vm1808_vm2, %v5752_v34 }
 0x2b5   :  { %6049 = vrot.lane.b32.xlu1 %v5876_v63, %s15189_s0  ;;  %v14335_v37 = vpop.f32.mrb[72].mxu1  ;;  %v5964_v30 = vpop.permute.xlu0 %5963 }
 0x2b6   :  { %v3782_v50 = vadd.f32 %v14335_v37, %v3718_v42  ;;  %v3629_v54 = vpop.f32.mrb[73].mxu1  ;;  %v6153_v37 = vmax.f32 %v18325_v39, %v5964_v30  ;;  %v5694_v39 = vld [vmem:[#allocation3 + $0x1b8] sm:$0xff] }
 0x2b7   :  { %v3780_v59 = vadd.f32 %v3716_v58, %v3629_v54  ;;  %v14336_v63 = vpop.f32.mrb[74].mxu1  ;;  %v5881_v8 = vld [vmem:[#allocation3 + $0x190] sm:$0xff]  ;;  %v5966_v34 = vpop.permute.xlu1 %5965 }
 0x2b8   :  { %3846 = vst.msk [vmem:[#allocation3 + $0x1d0] sm:$0xff] %vm1808_vm2, %v3782_v50  ;;  %v3783_v10 = vadd.f32 %v14336_v63, %v3719_v2  ;;  %6059 = vrot.lane.b32.xlu0 %v5881_v8, %s15189_s0  ;;  %v3632_v14 = vpop.f32.mrb[75].mxu1  ;;  %v5879_v33 = vld [vmem:[#allocation3 + $0x180] sm:$0xff]  ;;  %v6154_v42 = vmax.f32 %v18331_v44, %v5966_v34  ;;  %v5693_v54 = vld [vmem:[#allocation3 + $0x1b0] sm:$0xff] }
 0x2b9   :  { %3844 = vst.msk [vmem:[#allocation3 + $0x1c0] sm:$0xff] %vm1808_vm2, %v3780_v59  ;;  %v3781_v20 = vadd.f32 %v3717_v18, %v3632_v14  ;;  %v5882_v24 = vld [vmem:[#allocation3 + $0x198] sm:$0xff]  ;;  %v18576_v59 = vld [vmem:[%s20887_s2] ss:$0 sm:$0xff]  ;;  %v5691_v8 = vld [vmem:[#allocation3 + $0x1a0] sm:$0xff] }
 0x2ba   :  { %3847 = vst.msk [vmem:[#allocation3 + $0x1d8] sm:$0xff] %vm1808_vm2, %v3783_v10  ;;  %6061 = vrot.lane.b32.xlu1 %v5882_v24, %s15189_s0  ;;  %v5880_v58 = vld [vmem:[#allocation3 + $0x188] sm:$0xff]  ;;  %v5960_v10 = vpop.permute.xlu0 %5959  ;;  %v6216_v14 = vmax.f32 %v6153_v37, %v6154_v42 }
 0x2bb   :  { %3845 = vst.msk [vmem:[#allocation3 + $0x1c8] sm:$0xff] %vm1808_vm2, %v3781_v20  ;;  %v5962_v24 = vpop.permute.xlu1 %5961 }
 0x2bc   :  { %6055 = vrot.lane.b32.xlu0 %v5879_v33, %s15189_s0  ;;  %v5692_v33 = vld [vmem:[#allocation3 + $0x1a8] sm:$0xff]  ;;  %v6255_v34 = vadd.f32 %v18576_v59, %v6216_v14 }
 0x2bd   :  { %v14401_v50 = vpop.f32.mrb[100].mxu0 }
 0x2be   :  { %v5757_v63 = vadd.f32 %v14401_v50, %v5693_v54  ;;  %6057 = vrot.lane.b32.xlu1 %v5880_v58, %s15189_s0  ;;  %v5592_v2 = vpop.f32.mrb[101].mxu0  ;;  %v6151_v50 = vmax.f32 %v18337_v45, %v5960_v10  ;;  %v6152_v54 = vmax.f32 %v18341_v48, %v5962_v24  ;;  %v5972_v37 = vpop.permute.xlu0 %5971  ;;  %v6287_v42 = vmax.f32 %v6255_v34, 0.0  ;;  %v3722_v45 = vld [vmem:[#allocation3 + $0x1f0] sm:$0xff]  ;;  %v3720_v24 = vld [vmem:[#allocation3 + $0x1e0] sm:$0xff] }
 0x2bf   :  { %v5755_v18 = vadd.f32 %v5691_v8, %v5592_v2  ;;  %v14402_v20 = vpop.f32.mrb[102].mxu0  ;;  %v6157_v14 = vmax.f32 %v18345_v55, %v5972_v37 }
 0x2c0   :  { %5821 = vst.msk [vmem:[#allocation3 + $0x1b0] sm:$0xff] %vm1808_vm2, %v5757_v63  ;;  %v5758_v44 = vadd.f32 %v14402_v20, %v5694_v39  ;;  %v5595_v30 = vpop.f32.mrb[103].mxu0  ;;  %v6215_v2 = vmax.f32 %v6151_v50, %v6152_v54  ;;  %v5974_v63 = vpop.permute.xlu1 %5973  ;;  %v6319_v8 = vpack.c.bf16 %v6287_v42, %v6287_v42  ;;  %v3723_v54 = vld [vmem:[#allocation3 + $0x1f8] sm:$0xff] }
 0x2c1   :  { %5819 = vst.msk [vmem:[#allocation3 + $0x1a0] sm:$0xff] %vm1808_vm2, %v5755_v18  ;;  %v5756_v58 = vadd.f32 %v5692_v33, %v5595_v30  ;;  %v6158_v18 = vmax.f32 %v18351_v60, %v5974_v63 }
 0x2c2   :  { %5822 = vst.msk [vmem:[#allocation3 + $0x1b8] sm:$0xff] %vm1808_vm2, %v5758_v44  ;;  %v6254_v20 = vadd.f32 %v18576_v59, %v6215_v2  ;;  %v5968_v30 = vpop.permute.xlu0 %5967  ;;  %v3721_v2 = vld [vmem:[#allocation3 + $0x1e8] sm:$0xff] }
 0x2c3   :  { %5820 = vst.msk [vmem:[#allocation3 + $0x1a8] sm:$0xff] %vm1808_vm2, %v5756_v58  ;;  %v6218_v33 = vmax.f32 %v6157_v14, %v6158_v18  ;;  %v6155_v55 = vmax.f32 %v18357_v61, %v5968_v30 }
 0x2c4   :  { %6461 = vst.msk [vmem:[#allocation2 + $0x1c] sm:$0xf] %vm6350_vm3, %v6319_v8  ;;  %v6286_v44 = vmax.f32 %v6254_v20, 0.0  ;;  %v5970_v60 = vpop.permute.xlu1 %5969 }
 0x2c5   :  { %v14339_v39 = vpop.f32.mrb[76].mxu1  ;;  %v6156_v8 = vmax.f32 %v18361_v0, %v5970_v60 }
 0x2c6   :  { %v3786_v10 = vadd.f32 %v14339_v39, %v3722_v45  ;;  %v3645_v48 = vpop.f32.mrb[77].mxu1  ;;  %v6318_v63 = vpack.c.bf16 %v6286_v44, %v6286_v44  ;;  %v6257_v39 = vadd.f32 %v18576_v59, %v6218_v33  ;;  %v5980_v61 = vpop.permute.xlu0 %5979 }
 0x2c7   :  { %v3784_v34 = vadd.f32 %v3720_v24, %v3645_v48  ;;  %v14340_v50 = vpop.f32.mrb[78].mxu1  ;;  %v5885_v58 = vld [vmem:[#allocation3 + $0x1b0] sm:$0xff]  ;;  %v6217_v45 = vmax.f32 %v6155_v55, %v6156_v8  ;;  %v6161_v30 = vmax.f32 %v18365_v7, %v5980_v61  ;;  %v5695_v55 = vld [vmem:[#allocation3 + $0x1c0] sm:$0xff] }
 0x2c8   :  { %3850 = vst.msk [vmem:[#allocation3 + $0x1f0] sm:$0xff] %vm1808_vm2, %v3786_v10  ;;  %v3787_v37 = vadd.f32 %v14340_v50, %v3723_v54  ;;  %6067 = vrot.lane.b32.xlu0 %v5885_v58, %s15189_s0  ;;  %v3648_v42 = vpop.f32.mrb[79].mxu1  ;;  %v6289_v18 = vmax.f32 %v6257_v39, 0.0  ;;  %v5883_v10 = vld [vmem:[#allocation3 + $0x1a0] sm:$0xff]  ;;  %v5982_v48 = vpop.permute.xlu1 %5981  ;;  %v5698_v39 = vld [vmem:[#allocation3 + $0x1d8] sm:$0xff] }
 0x2c9   :  { %3848 = vst.msk [vmem:[#allocation3 + $0x1e0] sm:$0xff] %vm1808_vm2, %v3784_v34  ;;  %v3785_v20 = vadd.f32 %v3721_v2, %v3648_v42  ;;  %v5886_v14 = vld [vmem:[#allocation3 + $0x1b8] sm:$0xff]  ;;  %v6256_v0 = vadd.f32 %v18576_v59, %v6217_v45  ;;  %v6162_v44 = vmax.f32 %v18371_v12, %v5982_v48  ;;  %v5697_v34 = vld [vmem:[#allocation3 + $0x1d0] sm:$0xff] }
 0x2ca   :  { %3851 = vst.msk [vmem:[#allocation3 + $0x1f8] sm:$0xff] %vm1808_vm2, %v3787_v37  ;;  %6069 = vrot.lane.b32.xlu1 %v5886_v14, %s15189_s0  ;;  %v6321_v24 = vpack.c.bf16 %v6289_v18, %v6289_v18  ;;  %v5884_v50 = vld [vmem:[#allocation3 + $0x1a8] sm:$0xff]  ;;  %v5976_v37 = vpop.permute.xlu0 %5975 }
 0x2cb   :  { %6460 = vst.msk [vmem:[#allocation2 + $0x10] sm:$0xf] %vm6350_vm3, %v6318_v63  ;;  %v6288_v60 = vmax.f32 %v6256_v0, 0.0  ;;  %v6220_v42 = vmax.f32 %v6161_v30, %v6162_v44  ;;  %v6159_v7 = vmax.f32 %v18377_v13, %v5976_v37  ;;  %v5696_v14 = vld [vmem:[#allocation3 + $0x1c8] sm:$0xff] }
 0x2cc   :  { %3849 = vst.msk [vmem:[#allocation3 + $0x1e8] sm:$0xff] %vm1808_vm2, %v3785_v20  ;;  %6063 = vrot.lane.b32.xlu0 %v5883_v10, %s15189_s0  ;;  %v5978_v8 = vpop.permute.xlu1 %5977 }
 0x2cd   :  { %v14405_v33 = vpop.f32.mrb[104].mxu0  ;;  %6463 = vst.msk [vmem:[#allocation2 + $0x34] sm:$0xf] %vm6350_vm3, %v6321_v24  ;;  %v6320_v61 = vpack.c.bf16 %v6288_v60, %v6288_v60  ;;  %v6259_v18 = vadd.f32 %v18576_v59, %v6220_v42  ;;  %v6160_v45 = vmax.f32 %v18381_v16, %v5978_v8 }
 0x2ce   :  { %v5761_v54 = vadd.f32 %v14405_v33, %v5697_v34  ;;  %6065 = vrot.lane.b32.xlu1 %v5884_v50, %s15189_s0  ;;  %v5608_v58 = vpop.f32.mrb[105].mxu0  ;;  %v5988_v48 = vpop.permute.xlu0 %5987 }
 0x2cf   :  { %v5759_v2 = vadd.f32 %v5695_v55, %v5608_v58  ;;  %v14406_v63 = vpop.f32.mrb[106].mxu0  ;;  %6462 = vst.msk [vmem:[#allocation2 + $0x28] sm:$0xf] %vm6350_vm3, %v6320_v61  ;;  %v6291_v24 = vmax.f32 %v6259_v18, 0.0  ;;  %v6219_v0 = vmax.f32 %v6159_v7, %v6160_v45  ;;  %v6165_v33 = vmax.f32 %v18385_v23, %v5988_v48  ;;  %v5701_v16 = vld [vmem:[#allocation3 + $0x1f0] sm:$0xff] }
 0x2d0   :  { %5825 = vst.msk [vmem:[#allocation3 + $0x1d0] sm:$0xff] %vm1808_vm2, %v5761_v54  ;;  %v5762_v12 = vadd.f32 %v14406_v63, %v5698_v39  ;;  %v5611_v20 = vpop.f32.mrb[107].mxu0  ;;  %v5990_v13 = vpop.permute.xlu1 %5989  ;;  %v5699_v55 = vld [vmem:[#allocation3 + $0x1e0] sm:$0xff] }
 0x2d1   :  { %5823 = vst.msk [vmem:[#allocation3 + $0x1c0] sm:$0xff] %vm1808_vm2, %v5759_v2  ;;  %v5760_v10 = vadd.f32 %v5696_v14, %v5611_v20  ;;  %v6323_v30 = vpack.c.bf16 %v6291_v24, %v6291_v24  ;;  %v6258_v44 = vadd.f32 %v18576_v59, %v6219_v0  ;;  %v6166_v34 = vmax.f32 %v18391_v28, %v5990_v13  ;;  %v5702_v39 = vld [vmem:[#allocation3 + $0x1f8] sm:$0xff] }
 0x2d2   :  { %5826 = vst.msk [vmem:[#allocation3 + $0x1d8] sm:$0xff] %vm1808_vm2, %v5762_v12  ;;  %v5984_v37 = vpop.permute.xlu0 %5983 }
 0x2d3   :  { %5824 = vst.msk [vmem:[#allocation3 + $0x1c8] sm:$0xff] %vm1808_vm2, %v5760_v10  ;;  %v6290_v60 = vmax.f32 %v6258_v44, 0.0  ;;  %v6222_v42 = vmax.f32 %v6165_v33, %v6166_v34  ;;  %v6163_v23 = vmax.f32 %v18397_v29, %v5984_v37  ;;  %v5700_v20 = vld [vmem:[#allocation3 + $0x1e8] sm:$0xff] }
 0x2d4   :  { %6465 = vst.msk [vmem:[#allocation2 + $0x4c] sm:$0xf] %vm6350_vm3, %v6323_v30  ;;  %v5986_v28 = vpop.permute.xlu1 %5985 }
 0x2d5   :  { %v14409_v50 = vpop.f32.mrb[108].mxu0  ;;  %v6322_v14 = vpack.c.bf16 %v6290_v60, %v6290_v60  ;;  %v6261_v61 = vadd.f32 %v18576_v59, %v6222_v42  ;;  %v6164_v18 = vmax.f32 %v18401_v32, %v5986_v28 }
 0x2d6   :  { %v5765_v54 = vadd.f32 %v14409_v50, %v5701_v16  ;;  %v5624_v58 = vpop.f32.mrb[109].mxu0  ;;  %v5996_v29 = vpop.permute.xlu0 %5995 }
 0x2d7   :  { %v5763_v2 = vadd.f32 %v5699_v55, %v5624_v58  ;;  %v14410_v63 = vpop.f32.mrb[110].mxu0  ;;  %v5889_v7 = vld [vmem:[#allocation3 + $0x1d0] sm:$0xff]  ;;  %6464 = vst.msk [vmem:[#allocation2 + $0x40] sm:$0xf] %vm6350_vm3, %v6322_v14  ;;  %v6293_v48 = vmax.f32 %v6261_v61, 0.0  ;;  %v6221_v24 = vmax.f32 %v6163_v23, %v6164_v18  ;;  %v6169_v44 = vmax.f32 %v18405_v40, %v5996_v29 }
 0x2d8   :  { %5829 = vst.msk [vmem:[#allocation3 + $0x1f0] sm:$0xff] %vm1808_vm2, %v5765_v54  ;;  %v5766_v12 = vadd.f32 %v14410_v63, %v5702_v39  ;;  %6075 = vrot.lane.b32.xlu0 %v5889_v7, %s15189_s0  ;;  %v5627_v8 = vpop.f32.mrb[111].mxu0  ;;  %v5887_v0 = vld [vmem:[#allocation3 + $0x1c0] sm:$0xff]  ;;  %v5998_v13 = vpop.permute.xlu1 %5997  ;;  %v6497_v55 = vld [vmem:[#allocation2 + $0x1c] sm:$0xf] }
 0x2d9   :  { %5827 = vst.msk [vmem:[#allocation3 + $0x1e0] sm:$0xff] %vm1808_vm2, %v5763_v2  ;;  %v5764_v45 = vadd.f32 %v5700_v20, %v5627_v8  ;;  %v18624_v10 = vld [vmem:[#allocation3 + $0x1d8] sm:$0xff]  ;;  %v6325_v32 = vpack.c.bf16 %v6293_v48, %v6293_v48  ;;  %v6260_v30 = vadd.f32 %v18576_v59, %v6221_v24  ;;  %v6170_v33 = vmax.f32 %v18411_v47, %v5998_v13  ;;  %v6495_v63 = vld [vmem:[#allocation2 + $0x10] sm:$0xf]  ;;  %v6496_v8 = vld [vmem:[#allocation2 + $0x18] sm:$0x8] }
 0x2da   :  { %5830 = vst.msk [vmem:[#allocation3 + $0x1f8] sm:$0xff] %vm1808_vm2, %v5766_v12  ;;  %6077 = vrot.lane.b32.xlu1 %v18624_v10, %s15189_s0  ;;  %v18635_v34 = vld [vmem:[#allocation3 + $0x1c8] sm:$0xff]  ;;  %v5992_v50 = vpop.permute.xlu0 %5991  ;;  %v13369_v7 = vcombine.low %v6497_v55, %v6497_v55  ;;  %v6558_v20 = vld [vmem:[#allocation2 + $0x20] sm:$0x1]  ;;  %v13368_v61 = vcombine.low %v6495_v63, %v6495_v63  ;;  %v6494_v48 = vld [vmem:[#allocation2 + $0xc] sm:$0x8]  ;;  %v13337_v13 = vcombine.low %v6496_v8, %v6497_v55 }
 0x2db   :  { %5828 = vst.msk [vmem:[#allocation3 + $0x1e8] sm:$0xff] %vm1808_vm2, %v5764_v45  ;;  %v6292_v16 = vmax.f32 %v6260_v30, 0.0  ;;  %v6224_v54 = vmax.f32 %v6169_v44, %v6170_v33  ;;  %v6167_v47 = vmax.f32 %v18417_v49, %v5992_v50  ;;  %v6557_v24 = vld [vmem:[#allocation2 + $0x14] sm:$0x1] }
 0x2dc   :  { %6071 = vrot.lane.b32.xlu0 %v5887_v0, %s15189_s0  ;;  %6467 = vst.msk [vmem:[#allocation2 + $0x64] sm:$0xf] %vm6350_vm3, %v6325_v32  ;;  %v5994_v37 = vpop.permute.xlu1 %5993  ;;  %v13401_v32 = vcombine.low %v6497_v55, %v6558_v20  ;;  %v6861_v30 = vshrl.u32 %v13369_v7, 16  ;;  %v6864_v44 = vshll.u32 %v13369_v7, 16 }
 0x2dd   :  { %v6324_v60 = vpack.c.bf16 %v6292_v16, %v6292_v16  ;;  %v6263_v40 = vadd.f32 %v18576_v59, %v6224_v54  ;;  %v6168_v42 = vmax.f32 %v18421_v52, %v5994_v37  ;;  %v13400_v54 = vcombine.low %v6495_v63, %v6557_v24 }
 0x2de   :  { %6073 = vrot.lane.b32.xlu1 %v18635_v34, %s15189_s0  ;;  %v6004_v39 = vpop.permute.xlu0 %6003 }
 0x2df   :  { %v5893_v58 = vld [vmem:[#allocation3 + $0x1f0] sm:$0xff]  ;;  %6466 = vst.msk [vmem:[#allocation2 + $0x58] sm:$0xf] %vm6350_vm3, %v6324_v60  ;;  %v6295_v23 = vmax.f32 %v6263_v40, 0.0  ;;  %v6223_v12 = vmax.f32 %v6167_v47, %v6168_v42  ;;  %v6173_v18 = vmax.f32 %v18425_v62, %v6004_v39  ;;  %v13336_v62 = vcombine.low %v6494_v48, %v6495_v63  ;;  %v6501_v63 = vld [vmem:[#allocation2 + $0x34] sm:$0xf] }
 0x2e0   :  { %6083 = vrot.lane.b32.xlu0 %v5893_v58, %s15189_s0  ;;  %v5891_v28 = vld [vmem:[#allocation3 + $0x1e0] sm:$0xff]  ;;  %v6006_v14 = vpop.permute.xlu1 %6005  ;;  %v6856_v58 = vshll.u32 %v13368_v61, 16  ;;  %v7262_v42 = vrot.slane %v13401_v32, 5  ;;  %v6866_v39 = vrot.slane %v6864_v44, 5  ;;  %v13371_v48 = vcombine.low %v6501_v63, %v6501_v63 }
 0x2e1   :  { %v5894_v2 = vld [vmem:[#allocation3 + $0x1f8] sm:$0xff]  ;;  %v6327_v49 = vpack.c.bf16 %v6295_v23, %v6295_v23  ;;  %v6262_v52 = vadd.f32 %v18576_v59, %v6223_v12  ;;  %v6174_v45 = vmax.f32 %v18431_v4, %v6006_v14  ;;  %v6853_v4 = vshrl.u32 %v13368_v61, 16 }
 0x2e2   :  { %6085 = vrot.lane.b32.xlu1 %v5894_v2, %s15189_s0  ;;  %v5892_v29 = vld [vmem:[#allocation3 + $0x1e8] sm:$0xff]  ;;  %v6000_v0 = vpop.permute.xlu0 %5999  ;;  %v6863_v2 = vrot.slane %v6861_v30, 4  ;;  %v6858_v20 = vrot.slane %v6856_v58, 5 }
 0x2e3   :  { %6469 = vst.msk [vmem:[#allocation2 + $0x7c] sm:$0xf] %vm6350_vm3, %v6327_v49  ;;  %v6294_v33 = vmax.f32 %v6262_v52, 0.0  ;;  %v6226_v50 = vmax.f32 %v6173_v18, %v6174_v45  ;;  %v6171_v40 = vmax.f32 %v18437_v5, %v6000_v0  ;;  %v6855_v8 = vrot.slane %v6853_v4, 4  ;;  %v6499_v49 = vld [vmem:[#allocation2 + $0x28] sm:$0xf] }
 0x2e4   :  { %6079 = vrot.lane.b32.xlu0 %v5891_v28, %s15189_s0  ;;  %v6002_v16 = vpop.permute.xlu1 %6001  ;;  %v7261_v28 = vrot.slane %v13400_v54, 5  ;;  %v6867_v18 = vor.u32 %v6866_v39, %v6863_v2  ;;  %v6500_v45 = vld [vmem:[#allocation2 + $0x30] sm:$0x8]  ;;  %v14782_v39 = vld [vmem:[%s20888_s3 + $0x8] sm:$0xff]  }
 0x2e5   :  { %v6326_v37 = vpack.c.bf16 %v6294_v33, %v6294_v33  ;;  %v6265_v60 = vadd.f32 %v18576_v59, %v6226_v50  ;;  %v6172_v55 = vmax.f32 %v18441_v9, %v6002_v16  ;;  %v6859_v30 = vor.u32 %v6858_v20, %v6855_v8 }
 0x2e6   :  { %6081 = vrot.lane.b32.xlu1 %v5892_v29, %s15189_s0  ;;  %v6012_v47 = vpop.permute.xlu0 %6011  ;;  %v6560_v29 = vld [vmem:[#allocation2 + $0x38] sm:$0x1]  ;;  %v13339_v4 = vcombine.low %v6500_v45, %v6501_v63 }
 0x2e7   :  { %6468 = vst.msk [vmem:[#allocation2 + $0x70] sm:$0xf] %vm6350_vm3, %v6326_v37  ;;  %v6297_v7 = vmax.f32 %v6265_v60, 0.0  ;;  %v6225_v23 = vmax.f32 %v6171_v40, %v6172_v55  ;;  %v6177_v14 = vmax.f32 %v18445_v19, %v6012_v47  ;;  %v13370_v19 = vcombine.low %v6499_v49, %v6499_v49 }
 0x2e8   :  { %6752 = vrot.lane.b32.xlu0 %v13337_v13, %s15186_s7  ;;  %v6014_v12 = vpop.permute.xlu1 %6013  ;;  %v6498_v13 = vld [vmem:[#allocation2 + $0x24] sm:$0x8]  ;;  %v13403_v58 = vcombine.low %v6501_v63, %v6560_v29  ;;  %v6877_v37 = vshrl.u32 %v13371_v48, 16  ;;  %v6880_v60 = vshll.u32 %v13371_v48, 16 }
 0x2e9   :  { %v6329_v5 = vpack.c.bf16 %v6297_v7, %v6297_v7  ;;  %v6264_v9 = vadd.f32 %v18576_v59, %v6225_v23  ;;  %v6178_v61 = vmax.f32 %v18451_v25, %v6014_v12  ;;  %v14779_v25 = vld [vmem:[%s20888_s3] sm:$0xff]   ;;  %v6872_v2 = vshll.u32 %v13370_v19, 16 }
 0x2ea   :  { %6750 = vrot.lane.b32.xlu1 %v13336_v62, %s15186_s7  ;;  %v6008_v52 = vpop.permute.xlu0 %6007  ;;  %v6559_v62 = vld [vmem:[#allocation2 + $0x2c] sm:$0x1]  ;;  %14411 = vmatprep.subr.bf16.mxu1 %v14779_v25  ;;  %v7264_v8 = vrot.slane %v13403_v58, 5  ;;  %v6879_v20 = vrot.slane %v6877_v37, 4 }
 0x2eb   :  { %6471 = vst.msk [vmem:[#allocation2 + $0x94] sm:$0xf] %vm6350_vm3, %v6329_v5  ;;  %v6296_v24 = vmax.f32 %v6264_v9, 0.0  ;;  %v6228_v0 = vmax.f32 %v6177_v14, %v6178_v61  ;;  %v6175_v50 = vmax.f32 %v18457_v26, %v6008_v52  ;;  %14412 = vmatpush3.bf16.msra.mxu1 %v14779_v25  ;;  %v13338_v26 = vcombine.low %v6498_v13, %v6499_v49  ;;  %v6505_v61 = vld [vmem:[#allocation2 + $0x4c] sm:$0xf] }
 0x2ec   :  { %7296 = vrot.lane.b32.xlu0 %v7262_v42, %s15188_s25  ;;  %v6010_v32 = vpop.permute.xlu1 %6009  ;;  %v13402_v42 = vcombine.low %v6499_v49, %v6559_v62  ;;  %v6882_v5 = vrot.slane %v6880_v60, 5  ;;  %14413 = vmatprep.subr.bf16.mxu1 %v14782_v39  ;;  %v14788_v62 = vld [vmem:[%s20888_s3 + $0x18] sm:$0xff]  }
 0x2ed   :  { %v6328_v44 = vpack.c.bf16 %v6296_v24, %v6296_v24  ;;  %v6267_v33 = vadd.f32 %v18576_v59, %v6228_v0  ;;  %v6176_v16 = vmax.f32 %v18461_v31, %v6010_v32  ;;  %v6869_v31 = vshrl.u32 %v13370_v19, 16  ;;  %v6503_v0 = vld [vmem:[#allocation2 + $0x40] sm:$0xf]  ;;  %v6502_v60 = vld [vmem:[#allocation2 + $0x3c] sm:$0x8] }
 0x2ee   :  { %7294 = vrot.lane.b32.xlu1 %v7261_v28, %s15188_s25  ;;  %v6020_v54 = vpop.permute.xlu0 %6019  ;;  %v7263_v52 = vrot.slane %v13402_v42, 5  ;;  %v6883_v32 = vor.u32 %v6882_v5, %v6879_v20 }
 0x2ef   :  { %6470 = vst.msk [vmem:[#allocation2 + $0x88] sm:$0xf] %vm6350_vm3, %v6328_v44  ;;  %v6299_v40 = vmax.f32 %v6267_v33, 0.0  ;;  %v6227_v55 = vmax.f32 %v6175_v50, %v6176_v16  ;;  %v6181_v63 = vmax.f32 %v18465_v41, %v6020_v54  ;;  %14414 = vmatpush3.bf16.msra.mxu1 %v14782_v39  ;;  %v6871_v41 = vrot.slane %v6869_v31, 4  ;;  %v6504_v44 = vld [vmem:[#allocation2 + $0x48] sm:$0x8] }
 0x2f0   :  { %7104 = vrot.lane.b32.xlu0 %v6867_v18, %s15187_s16  ;;  %v6022_v47 = vpop.permute.xlu1 %6021  ;;  %v6874_v18 = vrot.slane %v6872_v2, 5  ;;  %v6562_v33 = vld [vmem:[#allocation2 + $0x50] sm:$0x1]  ;;  %v6561_v16 = vld [vmem:[#allocation2 + $0x44] sm:$0x1] }
 0x2f1   :  { %v6331_v7 = vpack.c.bf16 %v6299_v40, %v6299_v40  ;;  %v6266_v23 = vadd.f32 %v18576_v59, %v6227_v55  ;;  %v6182_v12 = vmax.f32 %v18471_v51, %v6022_v47  ;;  %v14785_v51 = vld [vmem:[%s20888_s3 + $0x10] sm:$0xff]   ;;  %v13341_v55 = vcombine.low %v6504_v44, %v6505_v61 }
 0x2f2   :  { %7102 = vrot.lane.b32.xlu1 %v6859_v30, %s15187_s16  ;;  %v6016_v28 = vpop.permute.xlu0 %6015  ;;  %v13373_v30 = vcombine.low %v6505_v61, %v6505_v61  ;;  %14415 = vmatprep.subr.bf16.mxu1 %v14785_v51  ;;  %v13405_v47 = vcombine.low %v6505_v61, %v6562_v33  ;;  %v13404_v39 = vcombine.low %v6503_v0, %v6561_v16 }
 0x2f3   :  { %6473 = vst.msk [vmem:[#allocation2 + $0xac] sm:$0xf] %vm6350_vm3, %v6331_v7  ;;  %v6298_v9 = vmax.f32 %v6266_v23, 0.0  ;;  %v6230_v14 = vmax.f32 %v6181_v63, %v6182_v12  ;;  %v6179_v48 = vmax.f32 %v18477_v53, %v6016_v28  ;;  %14416 = vmatpush3.bf16.msra.mxu1 %v14785_v51  ;;  %v6875_v53 = vor.u32 %v6874_v18, %v6871_v41  ;;  %v6509_v41 = vld [vmem:[#allocation2 + $0x64] sm:$0xf] }
 0x2f4   :  { %6756 = vrot.lane.b32.xlu0 %v13339_v4, %s15186_s7  ;;  %v6018_v49 = vpop.permute.xlu1 %6017  ;;  %v6896_v42 = vshll.u32 %v13373_v30, 16  ;;  %14417 = vmatprep.subr.bf16.mxu1 %v14788_v62  ;;  %v7266_v5 = vrot.slane %v13405_v47, 5 }
 0x2f5   :  { %v6330_v45 = vpack.c.bf16 %v6298_v9, %v6298_v9  ;;  %v6269_v29 = vadd.f32 %v18576_v59, %v6230_v14  ;;  %v6180_v24 = vmax.f32 %v18481_v57, %v6018_v49  ;;  %v13372_v57 = vcombine.low %v6503_v0, %v6503_v0 }
 0x2f6   :  { %6754 = vrot.lane.b32.xlu1 %v13338_v26, %s15186_s7  ;;  %v6028_v13 = vpop.permute.xlu0 %6027  ;;  %v6893_v26 = vshrl.u32 %v13373_v30, 16  ;;  %v6898_v14 = vrot.slane %v6896_v42, 5  ;;  %v6564_v30 = vld [vmem:[#allocation2 + $0x68] sm:$0x1] }
 0x2f7   :  { %6472 = vst.msk [vmem:[#allocation2 + $0xa0] sm:$0xf] %vm6350_vm3, %v6330_v45  ;;  %v6301_v19 = vmax.f32 %v6269_v29, 0.0  ;;  %v6229_v25 = vmax.f32 %v6179_v48, %v6180_v24  ;;  %v6185_v58 = vmax.f32 %v18485_v6, %v6028_v13  ;;  %14418 = vmatpush3.bf16.msra.mxu1 %v14788_v62  ;;  %v13340_v6 = vcombine.low %v6502_v60, %v6503_v0  ;;  %v6506_v62 = vld [vmem:[#allocation2 + $0x54] sm:$0x8] }
 0x2f8   :  { %7300 = vrot.lane.b32.xlu0 %v7264_v8, %s15188_s25  ;;  %v6030_v50 = vpop.permute.xlu1 %6029  ;;  %v6888_v23 = vshll.u32 %v13372_v57, 16  ;;  %v6895_v9 = vrot.slane %v6893_v26, 4 }
 0x2f9   :  { %v6333_v54 = vpack.c.bf16 %v6301_v19, %v6301_v19  ;;  %v6268_v4 = vadd.f32 %v18576_v59, %v6229_v25  ;;  %v6186_v37 = vmax.f32 %v18491_v15, %v6030_v50  ;;  %v6885_v15 = vshrl.u32 %v13372_v57, 16 }
 0x2fa   :  { %7298 = vrot.lane.b32.xlu1 %v7263_v52, %s15188_s25  ;;  %v6024_v40 = vpop.permute.xlu0 %6023  ;;  %v7265_v52 = vrot.slane %v13404_v39, 5  ;;  %v6890_v45 = vrot.slane %v6888_v23, 5  ;;  %v6899_v13 = vor.u32 %v6898_v14, %v6895_v9  ;;  %v13375_v19 = vcombine.low %v6509_v41, %v6509_v41 }
 0x2fb   :  { %6475 = vst.msk [vmem:[#allocation2 + $0xc4] sm:$0xf] %vm6350_vm3, %v6333_v54  ;;  %v6300_v31 = vmax.f32 %v6268_v4, 0.0  ;;  %v6232_v2 = vmax.f32 %v6185_v58, %v6186_v37  ;;  %v6183_v28 = vmax.f32 %v18497_v17, %v6024_v40  ;;  %v6887_v51 = vrot.slane %v6885_v15, 4  ;;  %v6507_v17 = vld [vmem:[#allocation2 + $0x58] sm:$0xf] }
 0x2fc   :  { %7108 = vrot.lane.b32.xlu0 %v6883_v32, %s15187_s16  ;;  %v6026_v7 = vpop.permute.xlu1 %6025  ;;  %v6508_v32 = vld [vmem:[#allocation2 + $0x60] sm:$0x8]  ;;  %v6563_v54 = vld [vmem:[#allocation2 + $0x5c] sm:$0x1]  ;;  %v13407_v37 = vcombine.low %v6509_v41, %v6564_v30  ;;  %v6909_v60 = vshrl.u32 %v13375_v19, 16  ;;  %v6912_v40 = vshll.u32 %v13375_v19, 16  ;;  %v13342_v42 = vcombine.low %v6506_v62, %v6507_v17 }
 0x2fd   :  { %v6332_v63 = vpack.c.bf16 %v6300_v31, %v6300_v31  ;;  %v6271_v12 = vadd.f32 %v18576_v59, %v6232_v2  ;;  %v6184_v8 = vmax.f32 %v18501_v21, %v6026_v7  ;;  %v6891_v50 = vor.u32 %v6890_v45, %v6887_v51  ;;  %v15162_v7 = vld [vmem:[#allocation3 + $0x150] sm:$0xff]  ;;  %v15164_v51 = vld [vmem:[#allocation3 + $0x148] sm:$0xff] }
 0x2fe   :  { %7106 = vrot.lane.b32.xlu1 %v6875_v53, %s15187_s16  ;;  %v6036_v20 = vpop.permute.xlu0 %6035  ;;  %v13374_v53 = vcombine.low %v6507_v17, %v6507_v17  ;;  %v13343_v58 = vcombine.low %v6508_v32, %v6509_v41  ;;  %v15163_v41 = vld [vmem:[#allocation3 + $0x140] sm:$0xff] }
 0x2ff   :  { %6474 = vst.msk [vmem:[#allocation2 + $0xb8] sm:$0xf] %vm6350_vm3, %v6332_v63  ;;  %v6303_v61 = vmax.f32 %v6271_v12, 0.0  ;;  %v6231_v49 = vmax.f32 %v6183_v28, %v6184_v8  ;;  %v6189_v48 = vmax.f32 %v18505_v35, %v6036_v20  ;;  %v7268_v63 = vrot.slane %v13407_v37, 5 }
 0x300   :  { %6760 = vrot.lane.b32.xlu0 %v13341_v55, %s15186_s7  ;;  %v6038_v18 = vpop.permute.xlu1 %6037  ;;  %v6901_v31 = vshrl.u32 %v13374_v53, 16  ;;  %v6911_v12 = vrot.slane %v6909_v60, 4  ;;  %v6914_v28 = vrot.slane %v6912_v40, 5 }
 0x301   :  { %v6335_v29 = vpack.c.bf16 %v6303_v61, %v6303_v61  ;;  %v6270_v21 = vadd.f32 %v18576_v59, %v6231_v49  ;;  %v6190_v24 = vmax.f32 %v18511_v43, %v6038_v18 }
 0x302   :  { %6758 = vrot.lane.b32.xlu1 %v13340_v6, %s15186_s7  ;;  %v6032_v0 = vpop.permute.xlu0 %6031  ;;  %v6903_v61 = vrot.slane %v6901_v31, 4 }
 0x303   :  { %6477 = vst.msk [vmem:[#allocation2 + $0xf4] sm:$0xf] %vm6350_vm3, %v6335_v29  ;;  %v6302_v25 = vmax.f32 %v6270_v21, 0.0  ;;  %v6234_v44 = vmax.f32 %v6189_v48, %v6190_v24  ;;  %v6187_v43 = vmax.f32 %v18517_v46, %v6032_v0  ;;  %v13406_v46 = vcombine.low %v6507_v17, %v6563_v54  ;;  %v6511_v17 = vld [vmem:[#allocation2 + $0x70] sm:$0xf] }
 0x304   :  { %7304 = vrot.lane.b32.xlu0 %v7266_v5, %s15188_s25  ;;  %v6034_v33 = vpop.permute.xlu1 %6033  ;;  %v6513_v5 = vld [vmem:[#allocation2 + $0x7c] sm:$0xf]  ;;  %v6915_v29 = vor.u32 %v6914_v28, %v6911_v12  ;;  %v6512_v0 = vld [vmem:[#allocation2 + $0x78] sm:$0x8]  ;;  %v13376_v30 = vcombine.low %v6511_v17, %v6511_v17  ;;  %v6516_v28 = vld [vmem:[#allocation2 + $0x90] sm:$0x8] }
 0x305   :  { %v6334_v16 = vpack.c.bf16 %v6302_v25, %v6302_v25  ;;  %v6273_v35 = vadd.f32 %v18576_v59, %v6234_v44  ;;  %v6188_v57 = vmax.f32 %v18521_v56, %v6034_v33  ;;  %v6904_v56 = vshll.u32 %v13374_v53, 16  ;;  %v6510_v44 = vld [vmem:[#allocation2 + $0x6c] sm:$0x8]  ;;  %v6565_v33 = vld [vmem:[#allocation2 + $0x74] sm:$0x1] }
 0x306   :  { %7302 = vrot.lane.b32.xlu1 %v7265_v52, %s15188_s25  ;;  %v6044_v4 = vpop.permute.xlu0 %6043  ;;  %v7267_v14 = vrot.slane %v13406_v46, 5  ;;  %v13377_v21 = vcombine.low %v6513_v5, %v6513_v5  ;;  %v13408_v62 = vcombine.low %v6511_v17, %v6565_v33  ;;  %v6917_v54 = vshrl.u32 %v13376_v30, 16 }
 0x307   :  { %6476 = vst.msk [vmem:[#allocation2 + $0xe8] sm:$0xf] %vm6350_vm3, %v6334_v16  ;;  %v6305_v55 = vmax.f32 %v6273_v35, 0.0  ;;  %v6233_v47 = vmax.f32 %v6187_v43, %v6188_v57  ;;  %v6193_v6 = vmax.f32 %v15162_v7, %v6044_v4  ;;  %v6906_v49 = vrot.slane %v6904_v56, 5  ;;  %v15165_v56 = vld [vmem:[#allocation3 + $0x170] sm:$0xff] }
 0x308   :  { %7112 = vrot.lane.b32.xlu0 %v6899_v13, %s15187_s16  ;;  %v6046_v26 = vpop.permute.xlu1 %6045  ;;  %v6566_v13 = vld [vmem:[#allocation2 + $0x80] sm:$0x1]  ;;  %v6925_v16 = vshrl.u32 %v13377_v21, 16  ;;  %v6928_v35 = vshll.u32 %v13377_v21, 16  ;;  %v13344_v57 = vcombine.low %v6510_v44, %v6511_v17  ;;  %v6920_v4 = vshll.u32 %v13376_v30, 16 }
 0x309   :  { %v6337_v2 = vpack.c.bf16 %v6305_v55, %v6305_v55  ;;  %v6272_v39 = vadd.f32 %v18576_v59, %v6233_v47  ;;  %v6194_v15 = vmax.f32 %v18530_v22, %v6046_v26  ;;  %v6907_v32 = vor.u32 %v6906_v49, %v6903_v61  ;;  %v6517_v47 = vld [vmem:[#allocation2 + $0x94] sm:$0xf] }
 0x30a   :  { %7110 = vrot.lane.b32.xlu1 %v6891_v50, %s15187_s16  ;;  %v6040_v23 = vpop.permute.xlu0 %6039  ;;  %v13345_v50 = vcombine.low %v6512_v0, %v6513_v5  ;;  %v13409_v53 = vcombine.low %v6513_v5, %v6566_v13  ;;  %v6927_v40 = vrot.slane %v6925_v16, 4  ;;  %v6930_v55 = vrot.slane %v6928_v35, 5  ;;  %v15167_v61 = vld [vmem:[#allocation3 + $0x160] sm:$0xff] }
 0x30b   :  { %6479 = vst.msk [vmem:[#allocation2 + $0x10c] sm:$0xf] %vm6350_vm3, %v6337_v2  ;;  %v6304_v8 = vmax.f32 %v6272_v39, 0.0  ;;  %v6236_v20 = vmax.f32 %v6193_v6, %v6194_v15  ;;  %v6191_v18 = vmax.f32 %v15163_v41, %v6040_v23  ;;  %v6919_v46 = vrot.slane %v6917_v54, 4  ;;  %v15166_v39 = vld [vmem:[#allocation3 + $0x178] sm:$0xff] }
 0x30c   :  { %6764 = vrot.lane.b32.xlu0 %v13343_v58, %s15186_s7  ;;  %v6042_v9 = vpop.permute.xlu1 %6041  ;;  %v7270_v60 = vrot.slane %v13409_v53, 5  ;;  %v6922_v31 = vrot.slane %v6920_v4, 5  ;;  %v6515_v6 = vld [vmem:[#allocation2 + $0x88] sm:$0xf]  ;;  %v6931_v23 = vor.u32 %v6930_v55, %v6927_v40  ;;  %v6514_v41 = vld [vmem:[#allocation2 + $0x84] sm:$0x8] }
 0x30d   :  { %v6336_v52 = vpack.c.bf16 %v6304_v8, %v6304_v8  ;;  %v6275_v22 = vadd.f32 %v18576_v59, %v6236_v20  ;;  %v6192_v45 = vmax.f32 %v15164_v51, %v6042_v9  ;;  %v6568_v8 = vld [vmem:[#allocation2 + $0x98] sm:$0x1]  ;;  %v13378_v9 = vcombine.low %v6515_v6, %v6515_v6  ;;  %v6521_v53 = vld [vmem:[#allocation2 + $0xac] sm:$0xf] }
 0x30e   :  { %6762 = vrot.lane.b32.xlu1 %v13342_v42, %s15186_s7  ;;  %v7269_v42 = vrot.slane %v13408_v62, 5  ;;  %v6923_v5 = vor.u32 %v6922_v31, %v6919_v46  ;;  %v13347_v51 = vcombine.low %v6516_v28, %v6517_v47  ;;  %v6519_v62 = vld [vmem:[#allocation2 + $0xa0] sm:$0xf]  ;;  %v13381_v4 = vcombine.low %v6521_v53, %v6521_v53  ;;  %v6518_v31 = vld [vmem:[#allocation2 + $0x9c] sm:$0x8] }
 0x30f   :  { %6478 = vst.msk [vmem:[#allocation2 + $0x100] sm:$0xf] %vm6350_vm3, %v6336_v52  ;;  %v6307_v48 = vmax.f32 %v6275_v22, 0.0  ;;  %v6235_v24 = vmax.f32 %v6191_v18, %v6192_v45  ;;  %v15168_v52 = vld [vmem:[#allocation3 + $0x168] sm:$0xff]  ;;  %v6567_v18 = vld [vmem:[#allocation2 + $0x8c] sm:$0x1]  ;;  %v13411_v45 = vcombine.low %v6517_v47, %v6568_v8  ;;  %v13380_v55 = vcombine.low %v6519_v62, %v6519_v62 }
 0x310   :  { %7308 = vrot.lane.b32.xlu0 %v7268_v63, %s15188_s25  ;;  %v13379_v63 = vcombine.low %v6517_v47, %v6517_v47  ;;  %v13410_v0 = vcombine.low %v6515_v6, %v6567_v18  ;;  %v6933_v13 = vshrl.u32 %v13378_v9, 16  ;;  %v15169_v47 = vld [vmem:[#allocation3 + $0x190] sm:$0xff] }
 0x311   :  { %v6339_v19 = vpack.c.bf16 %v6307_v48, %v6307_v48  ;;  %v6274_v25 = vadd.f32 %v18576_v59, %v6235_v24  ;;  %v13346_v24 = vcombine.low %v6514_v41, %v6515_v6  ;;  %v6957_v6 = vshrl.u32 %v13381_v4, 16 }
 0x312   :  { %7306 = vrot.lane.b32.xlu1 %v7267_v14, %s15188_s25  ;;  %v6941_v17 = vshrl.u32 %v13379_v63, 16  ;;  %v7271_v16 = vrot.slane %v13410_v0, 5  ;;  %v6935_v35 = vrot.slane %v6933_v13, 4  ;;  %v6949_v8 = vshrl.u32 %v13380_v55, 16  ;;  %v6523_v13 = vld [vmem:[#allocation2 + $0xb8] sm:$0xf] }
 0x313   :  { %6481 = vst.msk [vmem:[#allocation2 + $0x124] sm:$0xf] %vm6350_vm3, %v6339_v19  ;;  %v6306_v43 = vmax.f32 %v6274_v25, 0.0  ;;  %v7272_v25 = vrot.slane %v13411_v45, 5  ;;  %v6959_v41 = vrot.slane %v6957_v6, 4 }
 0x314   :  { %7116 = vrot.lane.b32.xlu0 %v6915_v29, %s15187_s16  ;;  %v6944_v29 = vshll.u32 %v13379_v63, 16  ;;  %v6943_v44 = vrot.slane %v6941_v17, 4  ;;  %v6529_v17 = vld [vmem:[#allocation2 + $0xf4] sm:$0xf] }
 0x315   :  { %v6338_v58 = vpack.c.bf16 %v6306_v43, %v6306_v43 }
 0x316   :  { %7114 = vrot.lane.b32.xlu1 %v6907_v32, %s15187_s16  ;;  %v6936_v32 = vshll.u32 %v13378_v9, 16  ;;  %v6946_v33 = vrot.slane %v6944_v29, 5 }
 0x317   :  { %6480 = vst.msk [vmem:[#allocation2 + $0x118] sm:$0xf] %vm6350_vm3, %v6338_v58  ;;  %v6520_v58 = vld [vmem:[#allocation2 + $0xa8] sm:$0x8] }
 0x318   :  { %6768 = vrot.lane.b32.xlu0 %v13345_v50, %s15186_s7  ;;  %v6938_v43 = vrot.slane %v6936_v32, 5 }
 0x31a   :  { %6766 = vrot.lane.b32.xlu1 %v13344_v57, %s15186_s7  ;;  %v6939_v40 = vor.u32 %v6938_v43, %v6935_v35  ;;  %v6571_v35 = vld [vmem:[#allocation2 + $0xbc] sm:$0x1] }
 0x31c   :  { %7312 = vrot.lane.b32.xlu0 %v7270_v60, %s15188_s25 }
 0x31e   :  { %7310 = vrot.lane.b32.xlu1 %v7269_v42, %s15188_s25  ;;  %v15170_v42 = vld [vmem:[#allocation3 + $0x198] sm:$0xff] }
 0x320   :  { %7120 = vrot.lane.b32.xlu0 %v6931_v23, %s15187_s16 }
 0x321   :  { %v6052_v37 = vpop.permute.xlu0 %6051 }
 0x322   :  { %v6197_v2 = vmax.f32 %v15165_v56, %v6052_v37  ;;  %7118 = vrot.lane.b32.xlu1 %v6923_v5, %s15187_s16  ;;  %v6570_v37 = vld [vmem:[#allocation2 + $0xb0] sm:$0x1]  ;;  %v6569_v56 = vld [vmem:[#allocation2 + $0xa4] sm:$0x1]  ;;  %v18752_v5 = vld [vmem:[%s20887_s2] ss:$0 sm:$0xff] }
 0x323   :  { %v6054_v26 = vpop.permute.xlu1 %6053  ;;  %v13412_v28 = vcombine.low %v6519_v62, %v6569_v56 }
 0x324   :  { %v6198_v7 = vmax.f32 %v15166_v39, %v6054_v26  ;;  %6772 = vrot.lane.b32.xlu0 %v13347_v51, %s15186_s7  ;;  %v13349_v39 = vcombine.low %v6520_v58, %v6521_v53 }
 0x325   :  { %v6048_v15 = vpop.permute.xlu0 %6047  ;;  %v7273_v29 = vrot.slane %v13412_v28, 5  ;;  %v15176_v28 = vld [vmem:[#allocation3 + $0x1a0] sm:$0xff] }
 0x326   :  { %v6238_v12 = vmax.f32 %v6197_v2, %v6198_v7  ;;  %v6195_v49 = vmax.f32 %v15167_v61, %v6048_v15  ;;  %6770 = vrot.lane.b32.xlu1 %v13346_v24, %s15186_s7  ;;  %v13413_v7 = vcombine.low %v6521_v53, %v6570_v37  ;;  %v6960_v15 = vshll.u32 %v13381_v4, 16 }
 0x327   :  { %v6050_v20 = vpop.permute.xlu1 %6049  ;;  %v13414_v37 = vcombine.low %v6523_v13, %v6571_v35 }
 0x328   :  { %v6277_v14 = vadd.f32 %v18576_v59, %v6238_v12  ;;  %v6196_v22 = vmax.f32 %v15168_v52, %v6050_v20  ;;  %7316 = vrot.lane.b32.xlu0 %v7272_v25, %s15188_s25  ;;  %v13348_v12 = vcombine.low %v6518_v31, %v6519_v62  ;;  %v6952_v20 = vshll.u32 %v13380_v55, 16  ;;  %v6528_v25 = vld [vmem:[#allocation2 + $0xf0] sm:$0x8]  ;;  %v15174_v55 = vld [vmem:[#allocation3 + $0x1b0] sm:$0xff] }
 0x329   :  { %v6962_v18 = vrot.slane %v6960_v15, 5  ;;  %v7275_v15 = vrot.slane %v13414_v37, 5 }
 0x32a   :  { %v6309_v21 = vmax.f32 %v6277_v14, 0.0  ;;  %v6237_v48 = vmax.f32 %v6195_v49, %v6196_v22  ;;  %7314 = vrot.lane.b32.xlu1 %v7271_v16, %s15188_s25  ;;  %v6060_v54 = vpop.permute.xlu0 %6059  ;;  %v15172_v14 = vld [vmem:[#allocation3 + $0x180] sm:$0xff]  ;;  %v15173_v49 = vld [vmem:[#allocation3 + $0x188] sm:$0xff]  ;;  %v7274_v22 = vrot.slane %v13413_v7, 5  ;;  %v6533_v7 = vld [vmem:[#allocation2 + $0x10c] sm:$0xf] }
 0x32b   :  { %v6201_v26 = vmax.f32 %v15169_v47, %v6060_v54  ;;  %v6963_v32 = vor.u32 %v6962_v18, %v6959_v41  ;;  %v6522_v16 = vld [vmem:[#allocation2 + $0xb4] sm:$0x8]  ;;  %v6532_v41 = vld [vmem:[#allocation2 + $0x108] sm:$0x8]  ;;  %v6576_v18 = vld [vmem:[#allocation2 + $0x110] sm:$0x1] }
 0x32c   :  { %v6341_v30 = vpack.c.bf16 %v6309_v21, %v6309_v21  ;;  %v6276_v19 = vadd.f32 %v18576_v59, %v6237_v48  ;;  %v6947_v59 = vor.u32 %v6946_v33, %v6943_v44  ;;  %v6062_v60 = vpop.permute.xlu1 %6061  ;;  %v6951_v21 = vrot.slane %v6949_v8, 4  ;;  %v6574_v44 = vld [vmem:[#allocation2 + $0xf8] sm:$0x1] }
 0x32d   :  { %v6202_v46 = vmax.f32 %v15170_v42, %v6062_v60  ;;  %v6954_v48 = vrot.slane %v6952_v20, 5  ;;  %v13417_v62 = vcombine.low %v6529_v17, %v6574_v44  ;;  %v13350_v58 = vcombine.low %v6522_v16, %v6523_v13  ;;  %v15177_v20 = vld [vmem:[#allocation3 + $0x1a8] sm:$0xff] }
 0x32e   :  { %6483 = vst.msk [vmem:[#allocation2 + $0x13c] sm:$0xf] %vm6350_vm3, %v6341_v30  ;;  %v6308_v50 = vmax.f32 %v6276_v19, 0.0  ;;  %7124 = vrot.lane.b32.xlu0 %v6947_v59, %s15187_s16  ;;  %7122 = vrot.lane.b32.xlu1 %v6939_v40, %s15187_s16  ;;  %v6056_v2 = vpop.permute.xlu0 %6055  ;;  %v13385_v30 = vcombine.low %v6529_v17, %v6529_v17 }
 0x32f   :  { %v6240_v23 = vmax.f32 %v6201_v26, %v6202_v46  ;;  %v6199_v61 = vmax.f32 %v15172_v14, %v6056_v2  ;;  %v6955_v33 = vor.u32 %v6954_v48, %v6951_v21  ;;  %v15175_v26 = vld [vmem:[#allocation3 + $0x1b8] sm:$0xff]  ;;  %v7278_v31 = vrot.slane %v13417_v62, 5  ;;  %v6526_v21 = vld [vmem:[#allocation2 + $0xe4] sm:$0x8] }
 0x330   :  { %v6340_v57 = vpack.c.bf16 %v6308_v50, %v6308_v50  ;;  %v6058_v63 = vpop.permute.xlu1 %6057  ;;  %v13382_v50 = vcombine.low %v6523_v13, %v6523_v13  ;;  %v6989_v54 = vshrl.u32 %v13385_v30, 16  ;;  %v6992_v59 = vshll.u32 %v13385_v30, 16  ;;  %v6527_v14 = vld [vmem:[#allocation2 + $0xe8] sm:$0xf]  ;;  %v6573_v48 = vld [vmem:[#allocation2 + $0xec] sm:$0x1] }
 0x331   :  { %v6279_v9 = vadd.f32 %v18752_v5, %v6240_v23  ;;  %v6200_v52 = vmax.f32 %v15173_v49, %v6058_v63  ;;  %v13387_v49 = vcombine.low %v6533_v7, %v6533_v7 }
 0x332   :  { %6482 = vst.msk [vmem:[#allocation2 + $0x130] sm:$0xf] %vm6350_vm3, %v6340_v57  ;;  %6776 = vrot.lane.b32.xlu0 %v13349_v39, %s15186_s7  ;;  %6774 = vrot.lane.b32.xlu1 %v13348_v12, %s15186_s7  ;;  %v13353_v57 = vcombine.low %v6528_v25, %v6529_v17  ;;  %v6965_v60 = vshrl.u32 %v13382_v50, 16  ;;  %v6968_v40 = vshll.u32 %v13382_v50, 16  ;;  %v6991_v56 = vrot.slane %v6989_v54, 4 }
 0x333   :  { %v6311_v51 = vmax.f32 %v6279_v9, 0.0  ;;  %v6239_v45 = vmax.f32 %v6199_v61, %v6200_v52  ;;  %v6994_v2 = vrot.slane %v6992_v59, 5  ;;  %v7005_v13 = vshrl.u32 %v13387_v49, 16 }
 0x334   :  { %v6967_v23 = vrot.slane %v6965_v60, 4  ;;  %v6970_v63 = vrot.slane %v6968_v40, 5  ;;  %v13416_v25 = vcombine.low %v6527_v14, %v6573_v48  ;;  %v6531_v40 = vld [vmem:[#allocation2 + $0x100] sm:$0xf] }
 0x335   :  { %v6343_v24 = vpack.c.bf16 %v6311_v51, %v6311_v51  ;;  %v6278_v0 = vadd.f32 %v18752_v5, %v6239_v45  ;;  %v6995_v61 = vor.u32 %v6994_v2, %v6991_v56  ;;  %v13384_v45 = vcombine.low %v6527_v14, %v6527_v14 }
 0x336   :  { %7320 = vrot.lane.b32.xlu0 %v7274_v22, %s15188_s25  ;;  %7318 = vrot.lane.b32.xlu1 %v7273_v29, %s15188_s25  ;;  %v6971_v51 = vor.u32 %v6970_v63, %v6967_v23  ;;  %v7007_v35 = vrot.slane %v7005_v13, 4  ;;  %v7277_v54 = vrot.slane %v13416_v25, 5  ;;  %v6530_v23 = vld [vmem:[#allocation2 + $0xfc] sm:$0x8]  ;;  %v6575_v63 = vld [vmem:[#allocation2 + $0x104] sm:$0x1]  ;;  %v7359_v25 = vsel %vm7356_vm4, %v18525_v1, %v18543_v3 }
 0x337   :  { %6485 = vst.msk [vmem:[#allocation2 + $0x154] sm:$0xf] %vm6350_vm3, %v6343_v24  ;;  %v6310_v19 = vmax.f32 %v6278_v0, 0.0  ;;  %v13355_v24 = vcombine.low %v6532_v41, %v6533_v7  ;;  %v13419_v0 = vcombine.low %v6533_v7, %v6576_v18  ;;  %v6981_v44 = vshrl.u32 %v13384_v45, 16 }
 0x339   :  { %v6342_v53 = vpack.c.bf16 %v6310_v19, %v6310_v19  ;;  %v13352_v19 = vcombine.low %v6526_v21, %v6527_v14  ;;  %v7280_v16 = vrot.slane %v13419_v0, 5  ;;  %v6983_v59 = vrot.slane %v6981_v44, 4 }
 0x33a   :  { %7128 = vrot.lane.b32.xlu0 %v6963_v32, %s15187_s16  ;;  %7126 = vrot.lane.b32.xlu1 %v6955_v33, %s15187_s16  ;;  %v6068_v43 = vpop.permute.xlu0 %6067  ;;  %v7008_v32 = vshll.u32 %v13387_v49, 16  ;;  %v6984_v33 = vshll.u32 %v13384_v45, 16  ;;  %v15180_v45 = vld [vmem:[#allocation3 + $0x1f0] sm:$0xff] }
 0x33b   :  { %6484 = vst.msk [vmem:[#allocation2 + $0x148] sm:$0xf] %vm6350_vm3, %v6342_v53  ;;  %v6205_v47 = vmax.f32 %v15174_v55, %v6068_v43 }
 0x33c   :  { %v6070_v4 = vpop.permute.xlu1 %6069  ;;  %v7010_v43 = vrot.slane %v7008_v32, 5 }
 0x33d   :  { %v6206_v42 = vmax.f32 %v15175_v26, %v6070_v4  ;;  %v6986_v4 = vrot.slane %v6984_v33, 5 }
 0x33e   :  { %6784 = vrot.lane.b32.xlu0 %v13353_v57, %s15186_s7  ;;  %6778 = vrot.lane.b32.xlu1 %v13350_v58, %s15186_s7  ;;  %v6064_v46 = vpop.permute.xlu0 %6063  ;;  %v6537_v57 = vld [vmem:[#allocation2 + $0x124] sm:$0xf] }
 0x33f   :  { %v6242_v39 = vmax.f32 %v6205_v47, %v6206_v42  ;;  %v6203_v8 = vmax.f32 %v15176_v28, %v6064_v46  ;;  %v15178_v58 = vld [vmem:[#allocation3 + $0x1d0] sm:$0xff]  ;;  %v7011_v47 = vor.u32 %v7010_v43, %v7007_v35  ;;  %v13389_v26 = vcombine.low %v6537_v57, %v6537_v57  ;;  %v15182_v43 = vld [vmem:[#allocation3 + $0x1e0] sm:$0xff] }
 0x340   :  { %v6066_v6 = vpop.permute.xlu1 %6065  ;;  %v6536_v46 = vld [vmem:[#allocation2 + $0x120] sm:$0x8]  ;;  %v6987_v2 = vor.u32 %v6986_v4, %v6983_v59  ;;  %v6535_v59 = vld [vmem:[#allocation2 + $0x118] sm:$0xf] }
 0x341   :  { %v6281_v12 = vadd.f32 %v18752_v5, %v6242_v39  ;;  %v6204_v9 = vmax.f32 %v15177_v20, %v6066_v6  ;;  %v13386_v39 = vcombine.low %v6531_v40, %v6531_v40  ;;  %v15179_v6 = vld [vmem:[#allocation3 + $0x1c0] sm:$0xff]  ;;  %v13357_v28 = vcombine.low %v6536_v46, %v6537_v57 }
 0x342   :  { %7328 = vrot.lane.b32.xlu0 %v7278_v31, %s15188_s25  ;;  %7322 = vrot.lane.b32.xlu1 %v7275_v15, %s15188_s25  ;;  %v6578_v31 = vld [vmem:[#allocation2 + $0x128] sm:$0x1]  ;;  %v7021_v20 = vshrl.u32 %v13389_v26, 16 }
 0x343   :  { %v6313_v52 = vmax.f32 %v6281_v12, 0.0  ;;  %v6241_v22 = vmax.f32 %v6203_v8, %v6204_v9  ;;  %v13421_v8 = vcombine.low %v6537_v57, %v6578_v31  ;;  %v7024_v9 = vshll.u32 %v13389_v26, 16 }
 0x344   :  { %v6997_v41 = vshrl.u32 %v13386_v39, 16  ;;  %v7000_v18 = vshll.u32 %v13386_v39, 16  ;;  %v7023_v0 = vrot.slane %v7021_v20, 4 }
 0x345   :  { %v6345_v17 = vpack.c.bf16 %v6313_v52, %v6313_v52  ;;  %v6280_v29 = vadd.f32 %v18752_v5, %v6241_v22  ;;  %v13354_v52 = vcombine.low %v6530_v23, %v6531_v40  ;;  %v13418_v22 = vcombine.low %v6531_v40, %v6575_v63  ;;  %v6580_v40 = vld [vmem:[#allocation2 + $0x140] sm:$0x1] }
 0x346   :  { %7136 = vrot.lane.b32.xlu0 %v6995_v61, %s15187_s16  ;;  %7130 = vrot.lane.b32.xlu1 %v6971_v51, %s15187_s16  ;;  %v7026_v13 = vrot.slane %v7024_v9, 5 }
 0x347   :  { %6487 = vst.msk [vmem:[#allocation2 + $0x16c] sm:$0xf] %vm6350_vm3, %v6345_v17  ;;  %v6312_v30 = vmax.f32 %v6280_v29, 0.0  ;;  %v15181_v29 = vld [vmem:[#allocation3 + $0x1f8] sm:$0xff]  ;;  %v7279_v33 = vrot.slane %v13418_v22, 5 }
 0x349   :  { %v6344_v50 = vpack.c.bf16 %v6312_v30, %v6312_v30 }
 0x34a   :  { %6788 = vrot.lane.b32.xlu0 %v13355_v24, %s15186_s7  ;;  %6782 = vrot.lane.b32.xlu1 %v13352_v19, %s15186_s7  ;;  %v6076_v53 = vpop.permute.xlu0 %6075  ;;  %v7282_v24 = vrot.slane %v13421_v8, 5  ;;  %v6541_v19 = vld [vmem:[#allocation2 + $0x13c] sm:$0xf] }
 0x34b   :  { %6486 = vst.msk [vmem:[#allocation2 + $0x160] sm:$0xf] %vm6350_vm3, %v6344_v50  ;;  %v6209_v37 = vmax.f32 %v15178_v58, %v6076_v53  ;;  %v6999_v50 = vrot.slane %v6997_v41, 4  ;;  %v7002_v53 = vrot.slane %v7000_v18, 5  ;;  %v7027_v58 = vor.u32 %v7026_v13, %v7023_v0  ;;  %v6545_v41 = vld [vmem:[#allocation2 + $0x154] sm:$0xf] }
 0x34c   :  { %v6078_v62 = vpop.permute.xlu1 %6077 }
 0x34d   :  { %v6210_v60 = vmax.f32 %v18624_v10, %v6078_v62  ;;  %v15183_v62 = vld [vmem:[#allocation3 + $0x1e8] sm:$0xff]  ;;  %v7003_v26 = vor.u32 %v7002_v53, %v6999_v50 }
 0x34e   :  { %7332 = vrot.lane.b32.xlu0 %v7280_v16, %s15188_s25  ;;  %7326 = vrot.lane.b32.xlu1 %v7277_v54, %s15188_s25  ;;  %v6072_v55 = vpop.permute.xlu0 %6071 }
 0x34f   :  { %v6244_v42 = vmax.f32 %v6209_v37, %v6210_v60  ;;  %v6207_v15 = vmax.f32 %v15179_v6, %v6072_v55  ;;  %v13391_v37 = vcombine.low %v6541_v19, %v6541_v19  ;;  %v6540_v60 = vld [vmem:[#allocation2 + $0x138] sm:$0x8]  ;;  %v7454_v55 = vsel %vm1422_vm1, %v7359_v25, %v18556_v11 }
 0x350   :  { %v6074_v56 = vpop.permute.xlu1 %6073  ;;  %v13423_v6 = vcombine.low %v6541_v19, %v6580_v40  ;;  %v13432_v23 = vcombine.high %v7454_v55, %v7454_v55  ;;  %v13431_v20 = vcombine.low %v7454_v55, %v7454_v55 }
 0x351   :  { %v6283_v7 = vadd.f32 %v18752_v5, %v6244_v42  ;;  %v6208_v10 = vmax.f32 %v18635_v34, %v6074_v56  ;;  %v13388_v42 = vcombine.low %v6535_v59, %v6535_v59  ;;  %v6534_v56 = vld [vmem:[#allocation2 + $0x114] sm:$0x8] }
 0x352   :  { %7140 = vrot.lane.b32.xlu0 %v7011_v47, %s15187_s16  ;;  %7134 = vrot.lane.b32.xlu1 %v6987_v2, %s15187_s16  ;;  %v6084_v12 = vpop.permute.xlu0 %6083  ;;  %v6577_v2 = vld [vmem:[#allocation2 + $0x11c] sm:$0x1]  ;;  %v7686_v22 = vshrl.u32 %v13432_v23, 16 }
 0x353   :  { %v6315_v14 = vmax.f32 %v6283_v7, 0.0  ;;  %v6243_v61 = vmax.f32 %v6207_v15, %v6208_v10  ;;  %v6213_v17 = vmax.f32 %v15180_v45, %v6084_v12  ;;  %v13359_v7 = vcombine.low %v6540_v60, %v6541_v19 }
 0x354   :  { %v6086_v49 = vpop.permute.xlu1 %6085  ;;  %v7037_v15 = vshrl.u32 %v13391_v37, 16  ;;  %v7040_v10 = vshll.u32 %v13391_v37, 16  ;;  %v13356_v12 = vcombine.low %v6534_v56, %v6535_v59  ;;  %v7013_v8 = vshrl.u32 %v13388_v42, 16 }
 0x355   :  { %v6347_v34 = vpack.c.bf16 %v6315_v14, %v6315_v14  ;;  %v6282_v51 = vadd.f32 %v18752_v5, %v6243_v61  ;;  %v6214_v21 = vmax.f32 %v15181_v29, %v6086_v49  ;;  %v7284_v61 = vrot.slane %v13423_v6, 5 }
 0x356   :  { %6792 = vrot.lane.b32.xlu0 %v13357_v28, %s15186_s7  ;;  %6786 = vrot.lane.b32.xlu1 %v13354_v52, %s15186_s7  ;;  %v6080_v48 = vpop.permute.xlu0 %6079  ;;  %v13420_v28 = vcombine.low %v6535_v59, %v6577_v2  ;;  %v7039_v49 = vrot.slane %v7037_v15, 4  ;;  %v7042_v52 = vrot.slane %v7040_v10, 5  ;;  %v7681_v29 = vshrl.u32 %v13431_v20, 16 }
 0x357   :  { %6489 = vst.msk [vmem:[#allocation2 + $0x184] sm:$0xf] %vm6350_vm3, %v6347_v34  ;;  %v6314_v32 = vmax.f32 %v6282_v51, 0.0  ;;  %v6246_v30 = vmax.f32 %v6213_v17, %v6214_v21  ;;  %v6211_v57 = vmax.f32 %v15182_v43, %v6080_v48  ;;  %v7015_v51 = vrot.slane %v7013_v8, 4  ;;  %v6539_v17 = vld [vmem:[#allocation2 + $0x130] sm:$0xf] }
 0x358   :  { %v6082_v44 = vpop.permute.xlu1 %6081  ;;  %v7281_v34 = vrot.slane %v13420_v28, 5  ;;  %v7043_v13 = vor.u32 %v7042_v52, %v7039_v49  ;;  %v13393_v19 = vcombine.low %v6545_v41, %v6545_v41  ;;  %v7688_v25 = vrot.slane %v7686_v22, 7  ;;  %v6538_v43 = vld [vmem:[#allocation2 + $0x12c] sm:$0x8]  ;;  %v6548_v22 = vld [vmem:[#allocation2 + $0x168] sm:$0x8] }
 0x359   :  { %v6346_v16 = vpack.c.bf16 %v6314_v32, %v6314_v32  ;;  %v6285_v35 = vadd.f32 %v18752_v5, %v6246_v30  ;;  %v6212_v54 = vmax.f32 %v15183_v62, %v6082_v44  ;;  %v6544_v32 = vld [vmem:[#allocation2 + $0x150] sm:$0x8]  ;;  %v6582_v30 = vld [vmem:[#allocation2 + $0x158] sm:$0x1]  ;;  %v7689_v44 = vshll.u32 %v13432_v23, 16 }
 0x35a   :  { %7336 = vrot.lane.b32.xlu0 %v7282_v24, %s15188_s25  ;;  %7330 = vrot.lane.b32.xlu1 %v7279_v33, %s15188_s25  ;;  %v6753_v4 = vpop.permute.xlu0 %6752  ;;  %v13390_v50 = vcombine.low %v6539_v17, %v6539_v17  ;;  %v13495_v62 = vrot.slane %v7681_v29, 11  ;;  %v13361_v59 = vcombine.low %v6544_v32, %v6545_v41  ;;  %v7056_v60 = vshll.u32 %v13393_v19, 16  ;;  %v6584_v29 = vld [vmem:[#allocation2 + $0x170] sm:$0x1] }
 0x35b   :  { %6488 = vst.msk [vmem:[#allocation2 + $0x178] sm:$0xf] %vm6350_vm3, %v6346_v16  ;;  %v6317_v1 = vmax.f32 %v6285_v35, 0.0  ;;  %v6245_v3 = vmax.f32 %v6211_v57, %v6212_v54  ;;  %v6579_v57 = vld [vmem:[#allocation2 + $0x134] sm:$0x1]  ;;  %v7691_v40 = vor.u32 %v7689_v44, %v7688_v25  ;;  %v13358_v55 = vcombine.low %v6538_v43, %v6539_v17 }
 0x35c   :  { %v6751_v47 = vpop.permute.xlu1 %6750  ;;  %v6542_v25 = vld [vmem:[#allocation2 + $0x144] sm:$0x8] }
 0x35d   :  { %v6349_v46 = vpack.c.bf16 %v6317_v1, %v6317_v1  ;;  %v6284_v31 = vadd.f32 %v18752_v5, %v6245_v3  ;;  %v7016_v5 = vshll.u32 %v13388_v42, 16  ;;  %v7053_v3 = vshrl.u32 %v13393_v19, 16 }
 0x35e   :  { %7144 = vrot.lane.b32.xlu0 %v7027_v58, %s15187_s16  ;;  %7138 = vrot.lane.b32.xlu1 %v7003_v26, %s15187_s16  ;;  %v7297_v39 = vpop.permute.xlu0 %7296  ;;  %v7029_v26 = vshrl.u32 %v13390_v50, 16 }
 0x35f   :  { %6491 = vst.msk [vmem:[#allocation2 + $0x19c] sm:$0xf] %vm6350_vm3, %v6349_v46  ;;  %v6316_v11 = vmax.f32 %v6284_v31, 0.0  ;;  %v7018_v45 = vrot.slane %v7016_v5, 5  ;;  %v7055_v23 = vrot.slane %v7053_v3, 4 }
 0x360   :  { %v7295_v63 = vpop.permute.xlu1 %7294 }
 0x361   :  { %v6348_v9 = vpack.c.bf16 %v6316_v11, %v6316_v11  ;;  %v7019_v35 = vor.u32 %v7018_v45, %v7015_v51  ;;  %v7058_v11 = vrot.slane %v7056_v60, 5 }
 0x362   :  { %6796 = vrot.lane.b32.xlu0 %v13359_v7, %s15186_s7  ;;  %6790 = vrot.lane.b32.xlu1 %v13356_v12, %s15186_s7  ;;  %v7105_v14 = vpop.permute.xlu0 %7104  ;;  %v7692_v12 = vsel %vm18814_vm7, %v13495_v62, %v7691_v40 }
 0x363   :  { %6490 = vst.msk [vmem:[#allocation2 + $0x190] sm:$0xf] %vm6350_vm3, %v6348_v9  ;;  %v7365_v48 = vsel %vm7356_vm4, %v6753_v4, %v7105_v14  ;;  %v13425_v4 = vcombine.low %v6545_v41, %v6582_v30  ;;  %v7031_v9 = vrot.slane %v7029_v26, 4 }
 0x364   :  { %v7103_v18 = vpop.permute.xlu1 %7102  ;;  %v18809_v54 = vsel %vm1422_vm1, %v7365_v48, %v7297_v39  ;;  %v7032_v39 = vshll.u32 %v13390_v50, 16 }
 0x365   :  { %v7362_v21 = vsel %vm7356_vm4, %v6751_v47, %v7103_v18  ;;  %v13422_v47 = vcombine.low %v6539_v17, %v6579_v57  ;;  %v13436_v46 = vcombine.high %v18809_v54, %v18809_v54  ;;  %v7286_v7 = vrot.slane %v13425_v4, 5 }
 0x366   :  { %7340 = vrot.lane.b32.xlu0 %v7284_v61, %s15188_s25  ;;  %v7456_v24 = vsel %vm1422_vm1, %v7362_v21, %v7295_v63  ;;  %7334 = vrot.lane.b32.xlu1 %v7281_v34, %s15188_s25  ;;  %v6757_v0 = vpop.permute.xlu0 %6756  ;;  %v6549_v63 = vld [vmem:[#allocation2 + $0x16c] sm:$0xf]  ;;  %v7034_v14 = vrot.slane %v7032_v39, 5  ;;  %v6543_v61 = vld [vmem:[#allocation2 + $0x148] sm:$0xf]  ;;  %v13435_v18 = vcombine.low %v18809_v54, %v18809_v54  ;;  %v7059_v17 = vor.u32 %v7058_v11, %v7055_v23 }
 0x367   :  { %v13433_v33 = vcombine.low %v7456_v24, %v7456_v24  ;;  %v13434_v53 = vcombine.high %v7456_v24, %v7456_v24  ;;  %v7283_v28 = vrot.slane %v13422_v47, 5  ;;  %v7712_v8 = vshrl.u32 %v13436_v46, 16  ;;  %v6553_v39 = vld [vmem:[#allocation2 + $0x184] sm:$0xf] }
 0x368   :  { %v6755_v16 = vpop.permute.xlu1 %6754  ;;  %v13395_v41 = vcombine.low %v6549_v63, %v6549_v63  ;;  %v13392_v48 = vcombine.low %v6543_v61, %v6543_v61  ;;  %v7035_v30 = vor.u32 %v7034_v14, %v7031_v9  ;;  %v13363_v19 = vcombine.low %v6548_v22, %v6549_v63  ;;  %v6586_v22 = vld [vmem:[#allocation2 + $0x188] sm:$0x1] }
 0x369   :  { %v7694_v58 = vshrl.u32 %v13433_v33, 16  ;;  %v7699_v37 = vshrl.u32 %v13434_v53, 16  ;;  %v7702_v56 = vshll.u32 %v13434_v53, 16  ;;  %v7714_v24 = vrot.slane %v7712_v8, 7 }
 0x36a   :  { %7148 = vrot.lane.b32.xlu0 %v7043_v13, %s15187_s16  ;;  %7142 = vrot.lane.b32.xlu1 %v7019_v35, %s15187_s16  ;;  %v7301_v1 = vpop.permute.xlu0 %7300  ;;  %v13427_v33 = vcombine.low %v6549_v63, %v6584_v29  ;;  %v7069_v50 = vshrl.u32 %v13395_v41, 16  ;;  %v7072_v53 = vshll.u32 %v13395_v41, 16  ;;  %v7715_v35 = vshll.u32 %v13436_v46, 16 }
 0x36b   :  { %v7701_v31 = vrot.slane %v7699_v37, 7  ;;  %v13496_v6 = vrot.slane %v7694_v58, 11  ;;  %v13360_v54 = vcombine.low %v6542_v25, %v6543_v61  ;;  %v7045_v4 = vshrl.u32 %v13392_v48, 16 }
 0x36c   :  { %v7299_v2 = vpop.permute.xlu1 %7298  ;;  %v7048_v58 = vshll.u32 %v13392_v48, 16  ;;  %v7717_v37 = vor.u32 %v7715_v35, %v7714_v24  ;;  %v7071_v47 = vrot.slane %v7069_v50, 4  ;;  %v6546_v48 = vld [vmem:[#allocation2 + $0x15c] sm:$0x8] }
 0x36d   :  { %v7704_v15 = vor.u32 %v7702_v56, %v7701_v31 }
 0x36e   :  { %6800 = vrot.lane.b32.xlu0 %v13361_v59, %s15186_s7  ;;  %6794 = vrot.lane.b32.xlu1 %v13358_v55, %s15186_s7  ;;  %v7109_v10 = vpop.permute.xlu0 %7108  ;;  %v7288_v55 = vrot.slane %v13427_v33, 5  ;;  %v7050_v63 = vrot.slane %v7048_v58, 5 }
 0x36f   :  { %v7705_v20 = vsel %vm18814_vm7, %v13496_v6, %v7704_v15  ;;  %v7371_v34 = vsel %vm7356_vm4, %v6757_v0, %v7109_v10  ;;  %v6581_v0 = vld [vmem:[#allocation2 + $0x14c] sm:$0x1]  ;;  %v7047_v6 = vrot.slane %v7045_v4, 4 }
 0x370   :  { %v7107_v5 = vpop.permute.xlu1 %7106  ;;  %v13527_v52 = vcombine.low %v7692_v12, %v7705_v20  ;;  %v18836_v44 = vsel %vm1422_vm1, %v7371_v34, %v7301_v1  ;;  %v13424_v59 = vcombine.low %v6543_v61, %v6581_v0  ;;  %v6547_v12 = vld [vmem:[#allocation2 + $0x160] sm:$0xf]  ;;  %v13397_v20 = vcombine.low %v6553_v39, %v6553_v39 }
 0x371   :  { %v7368_v49 = vsel %vm7356_vm4, %v6755_v16, %v7107_v5  ;;  %v7707_v16 = vshrl.u32 %v13435_v18, 16  ;;  %v13440_v3 = vcombine.high %v18836_v44, %v18836_v44  ;;  %v6552_v5 = vld [vmem:[#allocation2 + $0x180] sm:$0x8]  ;;  %v13439_v9 = vcombine.low %v18836_v44, %v18836_v44 }
 0x372   :  { %7344 = vrot.lane.b32.xlu0 %v7286_v7, %s15188_s25  ;;  %v7460_v51 = vsel %vm1422_vm1, %v7368_v49, %v7299_v2  ;;  %7338 = vrot.lane.b32.xlu1 %v7283_v28, %s15188_s25  ;;  %v6761_v45 = vpop.permute.xlu0 %6760  ;;  %v7074_v2 = vrot.slane %v7072_v53, 5  ;;  %v7285_v7 = vrot.slane %v13424_v59, 5  ;;  %v13394_v18 = vcombine.low %v6547_v12, %v6547_v12 }
 0x373   :  { %v13437_v21 = vcombine.low %v7460_v51, %v7460_v51  ;;  %14419 = vmatprep.mubr.msk.bf16.mxu1 %vm1808_vm2, %v13527_v52  ;;  %v13438_v13 = vcombine.high %v7460_v51, %v7460_v51  ;;  %v13497_v26 = vrot.slane %v7707_v16, 11  ;;  %v7738_v10 = vshrl.u32 %v13440_v3, 16 }
 0x374   :  { %v6759_v32 = vpop.permute.xlu1 %6758  ;;  %v7075_v52 = vor.u32 %v7074_v2, %v7071_v47  ;;  %v7051_v29 = vor.u32 %v7050_v63, %v7047_v6  ;;  %v7741_v25 = vshll.u32 %v13440_v3, 16  ;;  %v13362_v50 = vcombine.low %v6546_v48, %v6547_v12  ;;  %v8417_v63 = vld [vmem:[#allocation2 + $0xc] sm:$0x8]  ;;  %v18878_v48 = vld [vmem:[#allocation2 + $0x28] sm:$0xf] }
 0x375   :  { %v7720_v43 = vshrl.u32 %v13437_v21, 16  ;;  %v7725_v57 = vshrl.u32 %v13438_v13, 16  ;;  %v7728_v60 = vshll.u32 %v13438_v13, 16  ;;  %v7718_v15 = vsel %vm18814_vm7, %v13497_v26, %v7717_v37 }
 0x376   :  { %7152 = vrot.lane.b32.xlu0 %v7059_v17, %s15187_s16  ;;  %7146 = vrot.lane.b32.xlu1 %v7035_v30, %s15187_s16  ;;  %v7305_v62 = vpop.permute.xlu0 %7304  ;;  %v7740_v34 = vrot.slane %v7738_v10, 7  ;;  %v13365_v21 = vcombine.low %v6552_v5, %v6553_v39  ;;  %v13429_v13 = vcombine.low %v6553_v39, %v6586_v22  ;;  %v7088_v30 = vshll.u32 %v13397_v20, 16 }
 0x377   :  { %v7727_v1 = vrot.slane %v7725_v57, 7  ;;  %v13498_v46 = vrot.slane %v7720_v43, 11  ;;  %v7061_v16 = vshrl.u32 %v13394_v18, 16  ;;  %v7064_v35 = vshll.u32 %v13394_v18, 16 }
 0x378   :  { %v7303_v40 = vpop.permute.xlu1 %7302  ;;  %v7743_v43 = vor.u32 %v7741_v25, %v7740_v34 }
 0x379   :  { %v7730_v31 = vor.u32 %v7728_v60, %v7727_v1  ;;  %v7063_v47 = vrot.slane %v7061_v16, 4  ;;  %v7066_v2 = vrot.slane %v7064_v35, 5  ;;  %v8425_v16 = vld [vmem:[#allocation2 + $0x3c] sm:$0x8]  ;;  %v18887_v35 = vld [vmem:[#allocation2 + $0x40] sm:$0xf] }
 0x37a   :  { %6804 = vrot.lane.b32.xlu0 %v13363_v19, %s15186_s7  ;;  %6798 = vrot.lane.b32.xlu1 %v13360_v54, %s15186_s7  ;;  %v7113_v56 = vpop.permute.xlu0 %7112  ;;  %v7733_v19 = vshrl.u32 %v13439_v9, 16 }
 0x37b   :  { %v7731_v23 = vsel %vm18814_vm7, %v13498_v46, %v7730_v31  ;;  %v7377_v14 = vsel %vm7356_vm4, %v6761_v45, %v7113_v56  ;;  %v6583_v45 = vld [vmem:[#allocation2 + $0x164] sm:$0x1] }
 0x37c   :  { %v7111_v11 = vpop.permute.xlu1 %7110  ;;  %v13528_v28 = vcombine.low %v7718_v15, %v7731_v23  ;;  %v7466_v24 = vsel %vm1422_vm1, %v7377_v14, %v7305_v62  ;;  %v13426_v53 = vcombine.low %v6547_v12, %v6583_v45  ;;  %v7290_v62 = vrot.slane %v13429_v13, 5  ;;  %v18869_v12 = vld [vmem:[#allocation2 + $0x10] sm:$0xf] }
 0x37d   :  { %v7374_v8 = vsel %vm7356_vm4, %v6759_v32, %v7111_v11  ;;  %v7085_v32 = vshrl.u32 %v13397_v20, 16  ;;  %v13444_v57 = vcombine.high %v7466_v24, %v7466_v24  ;;  %v13499_v37 = vrot.slane %v7733_v19, 11 }
 0x37e   :  { %7348 = vrot.lane.b32.xlu0 %v7288_v55, %s15188_s25  ;;  %v7464_v61 = vsel %vm1422_vm1, %v7374_v8, %v7303_v40  ;;  %7342 = vrot.lane.b32.xlu1 %v7285_v7, %s15188_s25  ;;  %v6765_v49 = vpop.permute.xlu0 %6764  ;;  %v7090_v40 = vrot.slane %v7088_v30, 5  ;;  %v7287_v55 = vrot.slane %v13426_v53, 5  ;;  %v13443_v6 = vcombine.low %v7466_v24, %v7466_v24  ;;  %v6550_v8 = vld [vmem:[#allocation2 + $0x174] sm:$0x8]  ;;  %v18885_v53 = vld [vmem:[#allocation2 + $0x1c] sm:$0xf] }
 0x37f   :  { %v13441_v41 = vcombine.low %v7464_v61, %v7464_v61  ;;  %14420 = vmatmul.mubr.msk.bf16.vlgmr.msra.gmra.mrb[80].mxu1 %vm1808_vm2, %v13528_v28  ;;  %v13442_v51 = vcombine.high %v7464_v61, %v7464_v61  ;;  %v7087_v58 = vrot.slane %v7085_v32, 4  ;;  %v7764_v26 = vshrl.u32 %v13444_v57, 16  ;;  %v6551_v61 = vld [vmem:[#allocation2 + $0x178] sm:$0xf] }
 0x380   :  { %v6763_v17 = vpop.permute.xlu1 %6762  ;;  %v7744_v31 = vsel %vm18814_vm7, %v13499_v37, %v7743_v43  ;;  %v7067_v14 = vor.u32 %v7066_v2, %v7063_v47  ;;  %v13563_v22 = vcombine.low %v8417_v63, %v18869_v12  ;;  %v7767_v18 = vshll.u32 %v13444_v57, 16  ;;  %v8423_v63 = vld [vmem:[#allocation2 + $0x30] sm:$0x8] }
 0x381   :  { %v7746_v0 = vshrl.u32 %v13441_v41, 16  ;;  %v7751_v44 = vshrl.u32 %v13442_v51, 16  ;;  %v7754_v59 = vshll.u32 %v13442_v51, 16  ;;  %v7091_v11 = vor.u32 %v7090_v40, %v7087_v58  ;;  %v18894_v58 = vld [vmem:[#allocation2 + $0x34] sm:$0xf] }
 0x382   :  { %7156 = vrot.lane.b32.xlu0 %v7075_v52, %s15187_s16  ;;  %7150 = vrot.lane.b32.xlu1 %v7051_v29, %s15187_s16  ;;  %v7309_v33 = vpop.permute.xlu0 %7308  ;;  %v7766_v5 = vrot.slane %v7764_v26, 7  ;;  %v7759_v41 = vshrl.u32 %v13443_v6, 16  ;;  %v13364_v29 = vcombine.low %v6550_v8, %v6551_v61  ;;  %v13396_v43 = vcombine.low %v6551_v61, %v6551_v61 }
 0x383   :  { %v7753_v54 = vrot.slane %v7751_v44, 7  ;;  %v13500_v3 = vrot.slane %v7746_v0, 11  ;;  %v13598_v6 = vcombine.low %v18894_v58, %v18894_v58 }
 0x384   :  { %v7307_v4 = vpop.permute.xlu1 %7306  ;;  %v7769_v24 = vor.u32 %v7767_v18, %v7766_v5  ;;  %v13501_v25 = vrot.slane %v7759_v41, 11  ;;  %v8433_v5 = vld [vmem:[#allocation2 + $0x6c] sm:$0x8]  ;;  %v18919_v41 = vld [vmem:[#allocation2 + $0x70] sm:$0xf]  ;;  %v13566_v18 = vcombine.low %v8423_v63, %v18894_v58 }
 0x385   :  { %v7756_v1 = vor.u32 %v7754_v59, %v7753_v54 }
 0x386   :  { %6808 = vrot.lane.b32.xlu0 %v13365_v21, %s15186_s7  ;;  %6802 = vrot.lane.b32.xlu1 %v13362_v50, %s15186_s7  ;;  %v7117_v60 = vpop.permute.xlu0 %7116  ;;  %v8421_v21 = vld [vmem:[#allocation2 + $0x24] sm:$0x8] }
 0x387   :  { %v7757_v56 = vsel %vm18814_vm7, %v13500_v3, %v7756_v1  ;;  %v7383_v15 = vsel %vm7356_vm4, %v6765_v49, %v7117_v60  ;;  %v6585_v49 = vld [vmem:[#allocation2 + $0x17c] sm:$0x1]  ;;  %v13565_v50 = vcombine.low %v8421_v21, %v18878_v48  ;;  %v8419_v1 = vld [vmem:[#allocation2 + $0x18] sm:$0x8]  ;;  %v13596_v60 = vcombine.low %v18885_v53, %v18885_v53 }
 0x388   :  { %v7115_v46 = vpop.permute.xlu1 %7114  ;;  %v13529_v7 = vcombine.low %v7744_v31, %v7757_v56  ;;  %v18874_v52 = vsel %vm1422_vm1, %v7383_v15, %v7309_v33  ;;  %v13428_v45 = vcombine.low %v6551_v61, %v6585_v49  ;;  %v8429_v31 = vld [vmem:[#allocation2 + $0x54] sm:$0x8]  ;;  %v18907_v56 = vld [vmem:[#allocation2 + $0x58] sm:$0xf] }
 0x389   :  { %v7380_v39 = vsel %vm7356_vm4, %v6763_v17, %v7115_v46  ;;  %v13448_v13 = vcombine.high %v18874_v52, %v18874_v52  ;;  %v13447_v40 = vcombine.low %v18874_v52, %v18874_v52  ;;  %v13567_v46 = vcombine.low %v8425_v16, %v18887_v35 }
 0x38a   :  { %7352 = vrot.lane.b32.xlu0 %v7290_v62, %s15188_s25  ;;  %v7468_v10 = vsel %vm1422_vm1, %v7380_v39, %v7307_v4  ;;  %7346 = vrot.lane.b32.xlu1 %v7287_v55, %s15188_s25  ;;  %v6769_v23 = vpop.permute.xlu0 %6768  ;;  %v7289_v59 = vrot.slane %v13428_v45, 5  ;;  %v7770_v4 = vsel %vm18814_vm7, %v13501_v25, %v7769_v24  ;;  %v7077_v39 = vshrl.u32 %v13396_v43, 16 }
 0x38b   :  { %v13445_v28 = vcombine.low %v7468_v10, %v7468_v10  ;;  %14423 = vmatprep.mubr.msk.bf16.mxu1 %vm1808_vm2, %v13529_v7  ;;  %v13446_v20 = vcombine.high %v7468_v10, %v7468_v10  ;;  %v7790_v57 = vshrl.u32 %v13448_v13, 16  ;;  %v7080_v7 = vshll.u32 %v13396_v43, 16  ;;  %v18929_v43 = vld [vmem:[#allocation2 + $0x4c] sm:$0xf] }
 0x38c   :  { %v6767_v9 = vpop.permute.xlu1 %6766  ;;  %v13569_v8 = vcombine.low %v8429_v31, %v18907_v56  ;;  %v7793_v61 = vshll.u32 %v13448_v13, 16  ;;  %v8797_v25 = vshll.u32 %v13598_v6, 16 }
 0x38d   :  { %v7772_v34 = vshrl.u32 %v13445_v28, 16  ;;  %v7777_v51 = vshrl.u32 %v13446_v20, 16  ;;  %v7780_v30 = vshll.u32 %v13446_v20, 16  ;;  %v7792_v15 = vrot.slane %v7790_v57, 7 }
 0x38e   :  { %7160 = vrot.lane.b32.xlu0 %v7091_v11, %s15187_s16  ;;  %7154 = vrot.lane.b32.xlu1 %v7067_v14, %s15187_s16  ;;  %v7313_v17 = vpop.permute.xlu0 %7312  ;;  %v13564_v11 = vcombine.low %v8419_v1, %v18885_v53  ;;  %v8778_v20 = vshrl.u32 %v13596_v60, 16  ;;  %v7785_v14 = vshrl.u32 %v13447_v40, 16  ;;  %v6587_v1 = vld [vmem:[#allocation2 + $0x194] sm:$0x1] }
 0x38f   :  { %v7779_v32 = vrot.slane %v7777_v51, 7  ;;  %v13502_v0 = vrot.slane %v7772_v34, 11  ;;  %v7079_v34 = vrot.slane %v7077_v39, 4  ;;  %v7082_v51 = vrot.slane %v7080_v7, 5 }
 0x390   :  { %v7311_v19 = vpop.permute.xlu1 %7310 }
 0x391   :  { %v7782_v44 = vor.u32 %v7780_v30, %v7779_v32  ;;  %v6555_v32 = vld [vmem:[#allocation2 + $0x190] sm:$0xf]  ;;  %v13571_v30 = vcombine.low %v8433_v5, %v18919_v41 }
 0x392   :  { %8673 = vrot.lane.b32.xlu0 %v13563_v22, %s15186_s7  ;;  %6806 = vrot.lane.b32.xlu1 %v13364_v29, %s15186_s7  ;;  %v7121_v33 = vpop.permute.xlu0 %7120  ;;  %v7795_v29 = vor.u32 %v7793_v61, %v7792_v15  ;;  %v8482_v15 = vld [vmem:[#allocation2 + $0x20] sm:$0x1] }
 0x393   :  { %v7783_v62 = vsel %vm18814_vm7, %v13502_v0, %v7782_v44  ;;  %v7389_v55 = vsel %vm7356_vm4, %v6769_v23, %v7121_v33  ;;  %v13503_v0 = vrot.slane %v7785_v14, 11  ;;  %v13628_v14 = vcombine.low %v18885_v53, %v8482_v15 }
 0x394   :  { %v7119_v54 = vpop.permute.xlu1 %7118  ;;  %v13530_v3 = vcombine.low %v7770_v4, %v7783_v62  ;;  %v18915_v28 = vsel %vm1422_vm1, %v7389_v55, %v7313_v17  ;;  %v8794_v17 = vshrl.u32 %v13598_v6, 16  ;;  %v7083_v62 = vor.u32 %v7082_v51, %v7079_v34  ;;  %v6554_v55 = vld [vmem:[#allocation2 + $0x18c] sm:$0x8] }
 0x395   :  { %v7386_v37 = vsel %vm7356_vm4, %v6767_v9, %v7119_v54  ;;  %v8781_v9 = vshll.u32 %v13596_v60, 16  ;;  %v18924_v21 = vcombine.high %v18915_v28, %v18915_v28  ;;  %v13398_v54 = vcombine.low %v6555_v32, %v6555_v32 }
 0x396   :  { %8677 = vrot.lane.b32.xlu0 %v13565_v50, %s15186_s7  ;;  %v7472_v47 = vsel %vm1422_vm1, %v7386_v37, %v7311_v19  ;;  %7350 = vrot.lane.b32.xlu1 %v7289_v59, %s15188_s25  ;;  %v18904_v26 = vpop.permute.xlu0 %6772  ;;  %v8780_v19 = vrot.slane %v8778_v20, 4  ;;  %v8796_v57 = vrot.slane %v8794_v17, 4  ;;  %v7796_v37 = vsel %vm18814_vm7, %v13503_v0, %v7795_v29  ;;  %v18954_v17 = vld [vmem:[#allocation2 + $0x64] sm:$0xf] }
 0x397   :  { %v13449_v2 = vcombine.low %v7472_v47, %v7472_v47  ;;  %14424 = vmatmul.mubr.msk.bf16.gmra.mrb[84].mxu1 %vm1808_vm2, %v13530_v3  ;;  %v13450_v10 = vcombine.high %v7472_v47, %v7472_v47  ;;  %v8783_v16 = vrot.slane %v8781_v9, 5  ;;  %v7816_v59 = vshrl.u32 %v18924_v21, 16 }
 0x398   :  { %v6771_v23 = vpop.permute.xlu1 %6770  ;;  %v8799_v47 = vrot.slane %v8797_v25, 5  ;;  %v13451_v31 = vcombine.low %v18915_v28, %v18915_v28  ;;  %v7096_v63 = vshll.u32 %v13398_v54, 16  ;;  %v13366_v28 = vcombine.low %v6554_v55, %v6555_v32 }
 0x399   :  { %v7798_v49 = vshrl.u32 %v13449_v2, 16  ;;  %v7803_v52 = vshrl.u32 %v13450_v10, 16  ;;  %v7806_v24 = vshll.u32 %v13450_v10, 16  ;;  %v8784_v6 = vor.u32 %v8783_v16, %v8780_v19 }
 0x39a   :  { %8681 = vrot.lane.b32.xlu0 %v13567_v46, %s15186_s7  ;;  %8675 = vrot.lane.b32.xlu1 %v13564_v11, %s15186_s7  ;;  %v7317_v22 = vpop.permute.xlu0 %7316  ;;  %v13600_v46 = vcombine.low %v18929_v43, %v18929_v43  ;;  %v7093_v11 = vshrl.u32 %v13398_v54, 16  ;;  %v8800_v9 = vor.u32 %v8799_v47, %v8796_v57  ;;  %v13602_v0 = vcombine.low %v18954_v17, %v18954_v17  ;;  %v8431_v47 = vld [vmem:[#allocation2 + $0x60] sm:$0x8] }
 0x39b   :  { %v7805_v45 = vrot.slane %v7803_v52, 7  ;;  %v13504_v44 = vrot.slane %v7798_v49, 11  ;;  %v7811_v49 = vshrl.u32 %v13451_v31, 16  ;;  %v7819_v52 = vshll.u32 %v18924_v21, 16 }
 0x39c   :  { %v7315_v13 = vpop.permute.xlu1 %7314  ;;  %v8810_v61 = vshrl.u32 %v13600_v46, 16  ;;  %v9186_v21 = vrot.slane %v13628_v14, 5  ;;  %v8829_v31 = vshll.u32 %v13602_v0, 16 }
 0x39d   :  { %v7808_v33 = vor.u32 %v7806_v24, %v7805_v45  ;;  %v7095_v45 = vrot.slane %v7093_v11, 4  ;;  %v7098_v24 = vrot.slane %v7096_v63, 5 }
 0x39e   :  { %8685 = vrot.lane.b32.xlu0 %v13569_v8, %s15186_s7  ;;  %8679 = vrot.lane.b32.xlu1 %v13566_v18, %s15186_s7  ;;  %v7818_v8 = vrot.slane %v7816_v59, 7  ;;  %v8812_v54 = vrot.slane %v8810_v61, 4 }
 0x39f   :  { %v7809_v3 = vsel %vm18814_vm7, %v13504_v44, %v7808_v33  ;;  %v13505_v44 = vrot.slane %v7811_v49, 11  ;;  %v8831_v49 = vrot.slane %v8829_v31, 5 }
 0x3a0   :  { %v7125_v50 = vpop.permute.xlu0 %7124  ;;  %v7123_v4 = vpop.permute.xlu1 %7122  ;;  %v13531_v40 = vcombine.low %v7796_v37, %v7809_v3  ;;  %v7099_v3 = vor.u32 %v7098_v24, %v7095_v45  ;;  %v8486_v24 = vld [vmem:[#allocation2 + $0x50] sm:$0x1] }
 0x3a1   :  { %v7392_v60 = vsel %vm7356_vm4, %v6771_v23, %v7123_v4  ;;  %v7395_v2 = vsel %vm7356_vm4, %v18904_v26, %v7125_v50  ;;  %v13430_v23 = vcombine.low %v6555_v32, %v6587_v1  ;;  %v7821_v32 = vor.u32 %v7819_v52, %v7818_v8 }
 0x3a2   :  { %8689 = vrot.lane.b32.xlu0 %v13571_v30, %s15186_s7  ;;  %v7476_v39 = vsel %vm1422_vm1, %v7392_v60, %v7315_v13  ;;  %7158 = vrot.lane.b32.xlu1 %v7083_v62, %s15187_s16  ;;  %v18949_v26 = vsel %vm1422_vm1, %v7395_v2, %v7317_v22  ;;  %v8484_v13 = vld [vmem:[#allocation2 + $0x38] sm:$0x1]  ;;  %v8813_v22 = vshll.u32 %v13600_v46, 16  ;;  %v13595_v4 = vcombine.low %v18869_v12, %v18869_v12 }
 0x3a3   :  { %v13453_v10 = vcombine.low %v7476_v39, %v7476_v39  ;;  %14427 = vmatprep.mubr.msk.bf16.mxu1 %vm1808_vm2, %v13531_v40  ;;  %v13454_v5 = vcombine.high %v7476_v39, %v7476_v39  ;;  %v7291_v29 = vrot.slane %v13430_v23, 5  ;;  %v13456_v53 = vcombine.high %v18949_v26, %v18949_v26 }
 0x3a4   :  { %v6777_v7 = vpop.permute.xlu0 %6776  ;;  %v6775_v20 = vpop.permute.xlu1 %6774  ;;  %v13630_v57 = vcombine.low %v18894_v58, %v8484_v13  ;;  %v8815_v59 = vrot.slane %v8813_v22, 5  ;;  %v7822_v1 = vsel %vm18814_vm7, %v13505_v44, %v7821_v32  ;;  %v8427_v58 = vld [vmem:[#allocation2 + $0x48] sm:$0x8]  ;;  %v8826_v46 = vshrl.u32 %v13602_v0, 16 }
 0x3a5   :  { %v7824_v18 = vshrl.u32 %v13453_v10, 16  ;;  %v7829_v34 = vshrl.u32 %v13454_v5, 16  ;;  %v7832_v19 = vshll.u32 %v13454_v5, 16  ;;  %v7842_v62 = vshrl.u32 %v13456_v53, 16 }
 0x3a6   :  { %9027 = vrot.lane.b32.xlu0 %v8784_v6, %s15187_s16  ;;  %6810 = vrot.lane.b32.xlu1 %v13366_v28, %s15186_s7  ;;  %v13455_v2 = vcombine.low %v18949_v26, %v18949_v26  ;;  %v9188_v10 = vrot.slane %v13630_v57, 5  ;;  %v8770_v11 = vshrl.u32 %v13595_v4, 16  ;;  %v8773_v63 = vshll.u32 %v13595_v4, 16 }
 0x3a7   :  { %v7831_v30 = vrot.slane %v7829_v34, 7  ;;  %v13506_v33 = vrot.slane %v7824_v18, 11  ;;  %v13597_v8 = vcombine.low %v18878_v48, %v18878_v48  ;;  %v7844_v5 = vrot.slane %v7842_v62, 7 }
 0x3a8   :  { %v7321_v51 = vpop.permute.xlu0 %7320  ;;  %v7319_v25 = vpop.permute.xlu1 %7318  ;;  %v13570_v26 = vcombine.low %v8431_v47, %v18954_v17  ;;  %v8816_v14 = vor.u32 %v8815_v59, %v8812_v54  ;;  %v8828_v61 = vrot.slane %v8826_v46, 4  ;;  %v7837_v52 = vshrl.u32 %v13455_v2, 16  ;;  %v8488_v54 = vld [vmem:[#allocation2 + $0x68] sm:$0x1] }
 0x3a9   :  { %v7834_v50 = vor.u32 %v7832_v19, %v7831_v30  ;;  %v7845_v18 = vshll.u32 %v13456_v53, 16  ;;  %v8772_v13 = vrot.slane %v8770_v11, 4  ;;  %v8775_v22 = vrot.slane %v8773_v63, 5  ;;  %v18997_v59 = vld [vmem:[#allocation2 + $0x28] sm:$0xf] }
 0x3aa   :  { %9031 = vrot.lane.b32.xlu0 %v8800_v9, %s15187_s16  ;;  %7354 = vrot.lane.b32.xlu1 %v7291_v29, %s15188_s25  ;;  %v8786_v32 = vshrl.u32 %v13597_v8, 16  ;;  %v8789_v30 = vshll.u32 %v13597_v8, 16  ;;  %v13632_v53 = vcombine.low %v18929_v43, %v8486_v24  ;;  %v13507_v44 = vrot.slane %v7837_v52, 11  ;;  %v10406_v52 = vld [vmem:[#allocation2 + $0x24] sm:$0x8] }
 0x3ab   :  { %v7835_v60 = vsel %vm18814_vm7, %v13506_v33, %v7834_v50  ;;  %v7847_v19 = vor.u32 %v7845_v18, %v7844_v5  ;;  %v8832_v57 = vor.u32 %v8831_v49, %v8828_v61  ;;  %v7407_v4 = vsel %vm7356_vm4, %v18537_v27, %v18548_v38  ;;  %v8483_v5 = vld [vmem:[#allocation2 + $0x2c] sm:$0x1]  ;;  %v19034_v24 = vld [vmem:[#allocation2 + $0x40] sm:$0xf] }
 0x3ac   :  { %v7129_v16 = vpop.permute.xlu0 %7128  ;;  %v7127_v37 = vpop.permute.xlu1 %7126  ;;  %v13532_v55 = vcombine.low %v7822_v1, %v7835_v60  ;;  %v8776_v62 = vor.u32 %v8775_v22, %v8772_v13  ;;  %v13634_v46 = vcombine.low %v18954_v17, %v8488_v54  ;;  %v13832_v27 = vcombine.low %v18997_v59, %v18997_v59  ;;  %v14883_v22 = vld [vmem:[%s20888_s3 + $0x20] sm:$0xff]  }
 0x3ad   :  { %v7398_v40 = vsel %vm7356_vm4, %v6775_v20, %v7127_v37  ;;  %v7401_v39 = vsel %vm7356_vm4, %v6777_v7, %v7129_v16  ;;  %v13568_v7 = vcombine.low %v8427_v58, %v18929_v43  ;;  %v8788_v37 = vrot.slane %v8786_v32, 4  ;;  %14451 = vmatprep.subr.bf16.mxu1 %v14883_v22 }
 0x3ae   :  { %9219 = vrot.lane.b32.xlu0 %v9186_v21, %s15188_s25  ;;  %v7480_v6 = vsel %vm1422_vm1, %v7398_v40, %v7319_v25  ;;  %7162 = vrot.lane.b32.xlu1 %v7099_v3, %s15187_s16  ;;  %v18985_v9 = vsel %vm1422_vm1, %v7401_v39, %v7321_v51  ;;  %v7848_v43 = vsel %vm18814_vm7, %v13507_v44, %v7847_v19  ;;  %v8791_v40 = vrot.slane %v8789_v30, 5 }
 0x3af   :  { %v13457_v23 = vcombine.low %v7480_v6, %v7480_v6  ;;  %14428 = vmatmul.mubr.msk.bf16.gmra.mrb[88].mxu1 %vm1808_vm2, %v13532_v55  ;;  %v13458_v20 = vcombine.high %v7480_v6, %v7480_v6  ;;  %v13460_v51 = vcombine.high %v18985_v9, %v18985_v9  ;;  %v8481_v55 = vld [vmem:[#allocation2 + $0x14] sm:$0x1]  ;;  %v19013_v38 = vsel %vm1422_vm1, %v7407_v4, %v18562_v36 }
 0x3b0   :  { %v18976_v15 = vpop.permute.xlu0 %6784  ;;  %v6779_v28 = vpop.permute.xlu1 %6778  ;;  %v13459_v31 = vcombine.low %v18985_v9, %v18985_v9  ;;  %v9190_v6 = vrot.slane %v13632_v53, 5  ;;  %v13627_v17 = vcombine.low %v18869_v12, %v8481_v55  ;;  %v8792_v8 = vor.u32 %v8791_v40, %v8788_v37  ;;  %14452 = vmatpush3.bf16.msra.mxu1 %v14883_v22 }
 0x3b1   :  { %v7850_v34 = vshrl.u32 %v13457_v23, 16  ;;  %v7855_v29 = vshrl.u32 %v13458_v20, 16  ;;  %v7858_v21 = vshll.u32 %v13458_v20, 16  ;;  %v7868_v3 = vshrl.u32 %v13460_v51, 16 }
 0x3b2   :  { %9223 = vrot.lane.b32.xlu0 %v9188_v10, %s15188_s25  ;;  %8683 = vrot.lane.b32.xlu1 %v13568_v7, %s15186_s7  ;;  %v13599_v23 = vcombine.low %v18887_v35, %v18887_v35  ;;  %v19028_v20 = vcombine.high %v19013_v38, %v19013_v38  ;;  %v10765_v7 = vshrl.u32 %v13832_v27, 16  ;;  %v7863_v9 = vshrl.u32 %v13459_v31, 16 }
 0x3b3   :  { %v7857_v25 = vrot.slane %v7855_v29, 7  ;;  %v13508_v33 = vrot.slane %v7850_v34, 11  ;;  %v7870_v36 = vrot.slane %v7868_v3, 7  ;;  %v9185_v18 = vrot.slane %v13627_v17, 5 }
 0x3b4   :  { %v18988_v45 = vpop.permute.xlu0 %7328  ;;  %v7323_v0 = vpop.permute.xlu1 %7322  ;;  %v13629_v34 = vcombine.low %v18878_v48, %v8483_v5  ;;  %v8802_v29 = vshrl.u32 %v13599_v23, 16  ;;  %v13601_v13 = vcombine.low %v18907_v56, %v18907_v56  ;;  %v13463_v48 = vcombine.low %v19013_v38, %v19013_v38 }
 0x3b5   :  { %v7860_v50 = vor.u32 %v7858_v21, %v7857_v25  ;;  %v8805_v25 = vshll.u32 %v13599_v23, 16  ;;  %v13800_v21 = vcombine.low %v10406_v52, %v18997_v59  ;;  %v13509_v44 = vrot.slane %v7863_v9, 11  ;;  %v8485_v9 = vld [vmem:[#allocation2 + $0x44] sm:$0x1] }
 0x3b6   :  { %9035 = vrot.lane.b32.xlu0 %v8816_v14, %s15187_s16  ;;  %8687 = vrot.lane.b32.xlu1 %v13570_v26, %s15186_s7  ;;  %v10768_v26 = vshll.u32 %v13832_v27, 16  ;;  %v7871_v14 = vshll.u32 %v13460_v51, 16  ;;  %v13834_v54 = vcombine.low %v19034_v24, %v19034_v24  ;;  %v7894_v4 = vshrl.u32 %v19028_v20, 16 }
 0x3b7   :  { %v7861_v60 = vsel %vm18814_vm7, %v13508_v33, %v7860_v50  ;;  %v8804_v37 = vrot.slane %v8802_v29, 4  ;;  %v8818_v3 = vshrl.u32 %v13601_v13, 16  ;;  %v13631_v22 = vcombine.low %v18887_v35, %v8485_v9 }
 0x3b8   :  { %v18995_v16 = vpop.permute.xlu0 %7136  ;;  %v7131_v1 = vpop.permute.xlu1 %7130  ;;  %v13533_v47 = vcombine.low %v7848_v43, %v7861_v60  ;;  %v7873_v32 = vor.u32 %v7871_v14, %v7870_v36  ;;  %v10770_v53 = vrot.slane %v10768_v26, 5  ;;  %v14889_v43 = vld [vmem:[%s20888_s3 + $0x30] sm:$0xff]   ;;  %v10781_v17 = vshrl.u32 %v13834_v54, 16 }
 0x3b9   :  { %v7404_v58 = vsel %vm7356_vm4, %v6779_v28, %v7131_v1  ;;  %v9192_v28 = vrot.slane %v13634_v46, 5  ;;  %v14886_v1 = vld [vmem:[%s20888_s3 + $0x28] sm:$0xff]   ;;  %v7413_v31 = vsel %vm7356_vm4, %v18976_v15, %v18995_v16  ;;  %v10784_v23 = vshll.u32 %v13834_v54, 16  ;;  %v14892_v15 = vld [vmem:[%s20888_s3 + $0x38] sm:$0xff]  }
 0x3ba   :  { %9039 = vrot.lane.b32.xlu0 %v8832_v57, %s15187_s16  ;;  %v7484_v2 = vsel %vm1422_vm1, %v7404_v58, %v7323_v0  ;;  %9025 = vrot.lane.b32.xlu1 %v8776_v62, %s15187_s16  ;;  %v10767_v0 = vrot.slane %v10765_v7, 4  ;;  %v9187_v62 = vrot.slane %v13629_v34, 5  ;;  %v7874_v40 = vsel %vm18814_vm7, %v13509_v44, %v7873_v32  ;;  %v10469_v32 = vld [vmem:[#allocation2 + $0x2c] sm:$0x1] }
 0x3bb   :  { %v13461_v10 = vcombine.low %v7484_v2, %v7484_v2  ;;  %14431 = vmatprep.mubr.msk.bf16.mxu1 %vm1808_vm2, %v13533_v47  ;;  %v13462_v11 = vcombine.high %v7484_v2, %v7484_v2  ;;  %v8807_v58 = vrot.slane %v8805_v25, 5  ;;  %v8821_v47 = vshll.u32 %v13601_v13, 16  ;;  %14453 = vmatprep.subr.bf16.mxu1 %v14886_v1 }
 0x3bc   :  { %v19019_v39 = vpop.permute.xlu0 %6788  ;;  %v6783_v63 = vpop.permute.xlu1 %6782  ;;  %v10771_v38 = vor.u32 %v10770_v53, %v10767_v0  ;;  %14454 = vmatpush3.bf16.msra.mxu1 %v14886_v1  ;;  %v7889_v36 = vshrl.u32 %v13463_v48, 16  ;;  %v8820_v7 = vrot.slane %v8818_v3, 4  ;;  %v19078_v14 = vsel %vm1422_vm1, %v7413_v31, %v18988_v45  ;;  %v19090_v48 = vld [vmem:[#allocation2 + $0x1c] sm:$0xf]  ;;  %v10471_v0 = vld [vmem:[#allocation2 + $0x44] sm:$0x1] }
 0x3bd   :  { %v7876_v12 = vshrl.u32 %v13461_v10, 16  ;;  %v7881_v61 = vshrl.u32 %v13462_v11, 16  ;;  %v7884_v19 = vshll.u32 %v13462_v11, 16  ;;  %v10410_v10 = vld [vmem:[#allocation2 + $0x3c] sm:$0x8]  ;;  %v7896_v11 = vrot.slane %v7894_v4, 7  ;;  %14455 = vmatprep.subr.bf16.mxu1 %v14889_v43 }
 0x3be   :  { %9227 = vrot.lane.b32.xlu0 %v9190_v6, %s15188_s25  ;;  %9029 = vrot.lane.b32.xlu1 %v8792_v8, %s15187_s16  ;;  %v8823_v26 = vrot.slane %v8821_v47, 5  ;;  %v10786_v34 = vrot.slane %v10784_v23, 5  ;;  %v13511_v29 = vrot.slane %v7889_v36, 11  ;;  %v19087_v45 = vcombine.high %v19078_v14, %v19078_v14 }
 0x3bf   :  { %v7883_v30 = vrot.slane %v7881_v61, 7  ;;  %v13510_v33 = vrot.slane %v7876_v12, 11  ;;  %v13603_v53 = vcombine.low %v18919_v41, %v18919_v41  ;;  %v13864_v54 = vcombine.low %v18997_v59, %v10469_v32 }
 0x3c0   :  { %v19031_v49 = vpop.permute.xlu0 %7332  ;;  %v7327_v51 = vpop.permute.xlu1 %7326  ;;  %14456 = vmatpush3.bf16.msra.mxu1 %v14889_v43  ;;  %v8824_v25 = vor.u32 %v8823_v26, %v8820_v7  ;;  %v7920_v3 = vshrl.u32 %v19087_v45, 16  ;;  %v13866_v59 = vcombine.low %v19034_v24, %v10471_v0  ;;  %v7923_v26 = vshll.u32 %v19087_v45, 16 }
 0x3c1   :  { %v7886_v50 = vor.u32 %v7884_v19, %v7883_v30  ;;  %14457 = vmatprep.subr.bf16.mxu1 %v14892_v15  ;;  %v8837_v47 = vshll.u32 %v13603_v53, 16 }
 0x3c2   :  { %9231 = vrot.lane.b32.xlu0 %v9192_v28, %s15188_s25  ;;  %9217 = vrot.lane.b32.xlu1 %v9185_v18, %s15188_s25  ;;  %v8808_v28 = vor.u32 %v8807_v58, %v8804_v37  ;;  %v10783_v18 = vrot.slane %v10781_v17, 4  ;;  %v13831_v37 = vcombine.low %v19090_v48, %v19090_v48  ;;  %v8834_v58 = vshrl.u32 %v13603_v53, 16  ;;  %v8437_v53 = vld [vmem:[#allocation2 + $0x84] sm:$0x8] }
 0x3c3   :  { %v7887_v55 = vsel %vm18814_vm7, %v13510_v33, %v7886_v50  ;;  %v7922_v36 = vrot.slane %v7920_v3, 7 }
 0x3c4   :  { %v19046_v57 = vpop.permute.xlu0 %7140  ;;  %v7135_v60 = vpop.permute.xlu1 %7134  ;;  %v13534_v27 = vcombine.low %v7874_v40, %v7887_v55  ;;  %v10787_v50 = vor.u32 %v10786_v34, %v10783_v18  ;;  %14458 = vmatpush3.bf16.msra.mxu1 %v14892_v15  ;;  %v10757_v17 = vshrl.u32 %v13831_v37, 16  ;;  %v10760_v23 = vshll.u32 %v13831_v37, 16 }
 0x3c5   :  { %v7410_v46 = vsel %vm7356_vm4, %v6783_v63, %v7135_v60  ;;  %v7897_v63 = vshll.u32 %v19028_v20, 16  ;;  %v13802_v20 = vcombine.low %v10410_v10, %v19034_v24  ;;  %v19118_v24 = vld [vmem:[#allocation2 + $0x88] sm:$0xf]  ;;  %v10404_v10 = vld [vmem:[#allocation2 + $0x18] sm:$0x8]  ;;  %v7925_v34 = vor.u32 %v7923_v26, %v7922_v36 }
 0x3c6   :  { %10662 = vrot.lane.b32.xlu0 %v13800_v21, %s15186_s7  ;;  %v7488_v2 = vsel %vm1422_vm1, %v7410_v46, %v7327_v51  ;;  %9221 = vrot.lane.b32.xlu1 %v9187_v62, %s15188_s25  ;;  %v8487_v21 = vld [vmem:[#allocation2 + $0x5c] sm:$0x1]  ;;  %v9189_v62 = vrot.slane %v13631_v22, 5  ;;  %v13467_v46 = vcombine.low %v19078_v14, %v19078_v14  ;;  %v10762_v18 = vrot.slane %v10760_v23, 5 }
 0x3c7   :  { %v13465_v8 = vcombine.low %v7488_v2, %v7488_v2  ;;  %14432 = vmatmul.mubr.msk.bf16.gmra.mrb[92].mxu1 %vm1808_vm2, %v13534_v27  ;;  %v13466_v16 = vcombine.high %v7488_v2, %v7488_v2  ;;  %v7899_v13 = vor.u32 %v7897_v63, %v7896_v11  ;;  %v13633_v60 = vcombine.low %v18907_v56, %v8487_v21 }
 0x3c8   :  { %v19068_v6 = vpop.permute.xlu0 %6792  ;;  %v6787_v5 = vpop.permute.xlu1 %6786  ;;  %v7419_v27 = vsel %vm7356_vm4, %v19019_v39, %v19046_v57  ;;  %v11173_v56 = vrot.slane %v13864_v54, 5  ;;  %v11175_v57 = vrot.slane %v13866_v59, 5  ;;  %v7915_v7 = vshrl.u32 %v13467_v46, 16 }
 0x3c9   :  { %v7902_v12 = vshrl.u32 %v13465_v8, 16  ;;  %v7907_v61 = vshrl.u32 %v13466_v16, 16  ;;  %v7910_v19 = vshll.u32 %v13466_v16, 16  ;;  %v7900_v4 = vsel %vm18814_vm7, %v13511_v29, %v7899_v13  ;;  %v19122_v8 = vld [vmem:[#allocation2 + $0x34] sm:$0xf] }
 0x3ca   :  { %11014 = vrot.lane.b32.xlu0 %v10771_v38, %s15187_s16  ;;  %9033 = vrot.lane.b32.xlu1 %v8808_v28, %s15187_s16  ;;  %v9191_v39 = vrot.slane %v13633_v60, 5  ;;  %v7494_v15 = vsel %vm1422_vm1, %v7419_v27, %v19031_v49  ;;  %v8836_v16 = vrot.slane %v8834_v58, 4  ;;  %v13605_v28 = vcombine.low %v19118_v24, %v19118_v24  ;;  %v8489_v27 = vld [vmem:[#allocation2 + $0x74] sm:$0x1] }
 0x3cb   :  { %v7909_v30 = vrot.slane %v7907_v61, 7  ;;  %v13512_v35 = vrot.slane %v7902_v12, 11  ;;  %v13799_v12 = vcombine.low %v10404_v10, %v19090_v48  ;;  %v10759_v61 = vrot.slane %v10757_v17, 4 }
 0x3cc   :  { %v19082_v52 = vpop.permute.xlu0 %7336  ;;  %v7331_v51 = vpop.permute.xlu1 %7330  ;;  %v13833_v49 = vcombine.low %v19122_v8, %v19122_v8  ;;  %v13472_v29 = vcombine.high %v7494_v15, %v7494_v15  ;;  %v8850_v45 = vshrl.u32 %v13605_v28, 16  ;;  %v13573_v46 = vcombine.low %v8437_v53, %v19118_v24 }
 0x3cd   :  { %v7912_v44 = vor.u32 %v7910_v19, %v7909_v30  ;;  %v8853_v30 = vshll.u32 %v13605_v28, 16  ;;  %v13513_v19 = vrot.slane %v7915_v7, 11  ;;  %v19164_v28 = vld [vmem:[#allocation2 + $0x4c] sm:$0xf] }
 0x3ce   :  { %10666 = vrot.lane.b32.xlu0 %v13802_v20, %s15186_s7  ;;  %9037 = vrot.lane.b32.xlu1 %v8824_v25, %s15187_s16  ;;  %v8852_v60 = vrot.slane %v8850_v45, 4 }
 0x3cf   :  { %v7913_v43 = vsel %vm18814_vm7, %v13512_v35, %v7912_v44  ;;  %v10773_v35 = vshrl.u32 %v13833_v49, 16  ;;  %v10776_v44 = vshll.u32 %v13833_v49, 16  ;;  %v8855_v59 = vrot.slane %v8853_v30, 5 }
 0x3d0   :  { %v19095_v33 = vpop.permute.xlu0 %7144  ;;  %v7139_v1 = vpop.permute.xlu1 %7138  ;;  %v13535_v55 = vcombine.low %v7900_v4, %v7913_v43  ;;  %v10763_v4 = vor.u32 %v10762_v18, %v10759_v61  ;;  %v10408_v43 = vld [vmem:[#allocation2 + $0x30] sm:$0x8]  ;;  %v19172_v18 = vld [vmem:[#allocation2 + $0x7c] sm:$0xf] }
 0x3d1   :  { %v7416_v40 = vsel %vm7356_vm4, %v6787_v5, %v7139_v1  ;;  %v8839_v5 = vrot.slane %v8837_v47, 5 }
 0x3d2   :  { %11018 = vrot.lane.b32.xlu0 %v10787_v50, %s15187_s16  ;;  %v7492_v38 = vsel %vm1422_vm1, %v7416_v40, %v7331_v51  ;;  %9225 = vrot.lane.b32.xlu1 %v9189_v62, %s15188_s25  ;;  %v7946_v50 = vshrl.u32 %v13472_v29, 16  ;;  %v7926_v62 = vsel %vm18814_vm7, %v13513_v19, %v7925_v34  ;;  %v13471_v40 = vcombine.low %v7494_v15, %v7494_v15  ;;  %v10470_v34 = vld [vmem:[#allocation2 + $0x38] sm:$0x1] }
 0x3d3   :  { %v13469_v2 = vcombine.low %v7492_v38, %v7492_v38  ;;  %14435 = vmatprep.mubr.msk.bf16.mxu1 %vm1808_vm2, %v13535_v55  ;;  %v13470_v11 = vcombine.high %v7492_v38, %v7492_v38  ;;  %v8840_v0 = vor.u32 %v8839_v5, %v8836_v16  ;;  %v7425_v55 = vsel %vm7356_vm4, %v19068_v6, %v19095_v33  ;;  %v10468_v33 = vld [vmem:[#allocation2 + $0x20] sm:$0x1] }
 0x3d4   :  { %v19116_v31 = vpop.permute.xlu0 %6796  ;;  %v6791_v63 = vpop.permute.xlu1 %6790  ;;  %v7948_v10 = vrot.slane %v7946_v50, 7  ;;  %v13801_v6 = vcombine.low %v10408_v43, %v19122_v8  ;;  %v19158_v36 = vsel %vm1422_vm1, %v7425_v55, %v19082_v52  ;;  %v13863_v26 = vcombine.low %v19090_v48, %v10468_v33 }
 0x3d5   :  { %v7928_v9 = vshrl.u32 %v13469_v2, 16  ;;  %v7933_v14 = vshrl.u32 %v13470_v11, 16  ;;  %v7936_v22 = vshll.u32 %v13470_v11, 16  ;;  %v10778_v2 = vrot.slane %v10776_v44, 5 }
 0x3d6   :  { %11206 = vrot.lane.b32.xlu0 %v11173_v56, %s15188_s25  ;;  %9229 = vrot.lane.b32.xlu1 %v9191_v39, %s15188_s25  ;;  %v10775_v56 = vrot.slane %v10773_v35, 4  ;;  %v8856_v11 = vor.u32 %v8855_v59, %v8852_v60  ;;  %v7941_v39 = vshrl.u32 %v13471_v40, 16  ;;  %v19169_v52 = vcombine.high %v19158_v36, %v19158_v36  ;;  %v19202_v60 = vld [vmem:[#allocation2 + $0x64] sm:$0xf]  ;;  %v8435_v40 = vld [vmem:[#allocation2 + $0x78] sm:$0x8] }
 0x3d7   :  { %v7935_v13 = vrot.slane %v7933_v14, 7  ;;  %v13514_v51 = vrot.slane %v7928_v9, 11  ;;  %v8491_v9 = vld [vmem:[#allocation2 + $0x8c] sm:$0x1]  ;;  %v11172_v30 = vrot.slane %v13863_v26, 5  ;;  %v13604_v19 = vcombine.low %v19172_v18, %v19172_v18 }
 0x3d8   :  { %v19130_v20 = vpop.permute.xlu0 %7340  ;;  %v7335_v32 = vpop.permute.xlu1 %7334  ;;  %v10779_v7 = vor.u32 %v10778_v2, %v10775_v56  ;;  %v13637_v45 = vcombine.low %v19118_v24, %v8491_v9  ;;  %v13865_v24 = vcombine.low %v19122_v8, %v10470_v34  ;;  %v19207_v56 = vld [vmem:[#allocation2 + $0x94] sm:$0xf]  ;;  %v14907_v2 = vld [vmem:[%s20888_s3 + $0x48] sm:$0xff]   ;;  %v13837_v33 = vcombine.low %v19202_v60, %v19202_v60 }
 0x3d9   :  { %v7938_v25 = vor.u32 %v7936_v22, %v7935_v13  ;;  %v13515_v13 = vrot.slane %v7941_v39, 11  ;;  %v8842_v55 = vshrl.u32 %v13604_v19, 16 }
 0x3da   :  { %11210 = vrot.lane.b32.xlu0 %v11175_v57, %s15188_s25  ;;  %10660 = vrot.lane.b32.xlu1 %v13799_v12, %s15186_s7  ;;  %v7949_v57 = vshll.u32 %v13472_v29, 16  ;;  %v13835_v29 = vcombine.low %v19164_v28, %v19164_v28  ;;  %v9195_v8 = vrot.slane %v13637_v45, 5  ;;  %v10416_v45 = vld [vmem:[#allocation2 + $0x60] sm:$0x8] }
 0x3db   :  { %v7939_v37 = vsel %vm18814_vm7, %v13514_v51, %v7938_v25  ;;  %v14905_v51 = vld [vmem:[%s20888_s3 + $0x40] sm:$0xff]   ;;  %v7972_v25 = vshrl.u32 %v19169_v52, 16 }
 0x3dc   :  { %v19137_v21 = vpop.permute.xlu0 %7148  ;;  %v7143_v54 = vpop.permute.xlu1 %7142  ;;  %v13536_v1 = vcombine.low %v7926_v62, %v7939_v37  ;;  %v7951_v14 = vor.u32 %v7949_v57, %v7948_v10  ;;  %v10792_v62 = vshll.u32 %v13835_v29, 16  ;;  %14491 = vmatprep.subr.bf16.mxu0 %v14905_v51  ;;  %v13475_v37 = vcombine.low %v19158_v36, %v19158_v36  ;;  %v14909_v10 = vld [vmem:[%s20888_s3 + $0x50] sm:$0xff]  }
 0x3dd   :  { %v7422_v3 = vsel %vm7356_vm4, %v6791_v63, %v7143_v54  ;;  %v13635_v63 = vcombine.low %v18919_v41, %v8489_v27  ;;  %v10412_v54 = vld [vmem:[#allocation2 + $0x48] sm:$0x8]  ;;  %14492 = vmatpush3.bf16.msra.mxu0 %v14905_v51 }
 0x3de   :  { %9041 = vrot.lane.b32.xlu0 %v8840_v0, %s15187_s16  ;;  %v7496_v58 = vsel %vm1422_vm1, %v7422_v3, %v7335_v32  ;;  %11012 = vrot.lane.b32.xlu1 %v10763_v4, %s15187_s16  ;;  %v7952_v53 = vsel %vm18814_vm7, %v13515_v13, %v7951_v14  ;;  %v10789_v4 = vshrl.u32 %v13835_v29, 16  ;;  %v7431_v3 = vsel %vm7356_vm4, %v19116_v31, %v19137_v21 }
 0x3df   :  { %v13473_v38 = vcombine.low %v7496_v58, %v7496_v58  ;;  %14436 = vmatmul.mubr.msk.bf16.gmra.mrb[96].mxu1 %vm1808_vm2, %v13536_v1  ;;  %v13474_v17 = vcombine.high %v7496_v58, %v7496_v58  ;;  %v9193_v49 = vrot.slane %v13635_v63, 5  ;;  %v8845_v58 = vshll.u32 %v13604_v19, 16  ;;  %14493 = vmatprep.subr.bf16.mxu0 %v14907_v2 }
 0x3e0   :  { %v19150_v47 = vpop.permute.xlu0 %6800  ;;  %v6795_v23 = vpop.permute.xlu1 %6794  ;;  %v11174_v31 = vrot.slane %v13865_v24, 5  ;;  %v13803_v21 = vcombine.low %v10412_v54, %v19164_v28  ;;  %v7967_v36 = vshrl.u32 %v13475_v37, 16 }
 0x3e1   :  { %v7954_v15 = vshrl.u32 %v13473_v38, 16  ;;  %v7959_v16 = vshrl.u32 %v13474_v17, 16  ;;  %v7962_v12 = vshll.u32 %v13474_v17, 16  ;;  %v19217_v17 = vsel %vm1422_vm1, %v7431_v3, %v19130_v20  ;;  %14494 = vmatpush3.bf16.msra.mxu0 %v14907_v2 }
 0x3e2   :  { %8693 = vrot.lane.b32.xlu0 %v13573_v46, %s15186_s7  ;;  %10664 = vrot.lane.b32.xlu1 %v13801_v6, %s15186_s7  ;;  %v7974_v46 = vrot.slane %v7972_v25, 7  ;;  %v10794_v6 = vrot.slane %v10792_v62, 5  ;;  %v8847_v20 = vrot.slane %v8845_v58, 5  ;;  %v19230_v9 = vcombine.high %v19217_v17, %v19217_v17 }
 0x3e3   :  { %v7961_v41 = vrot.slane %v7959_v16, 7  ;;  %v13516_v48 = vrot.slane %v7954_v15, 11  ;;  %v13572_v15 = vcombine.low %v8435_v40, %v19172_v18  ;;  %v8844_v16 = vrot.slane %v8842_v55, 4  ;;  %14495 = vmatprep.subr.bf16.mxu0 %v14909_v10 }
 0x3e4   :  { %v19162_v5 = vpop.permute.xlu0 %7344  ;;  %v7339_v61 = vpop.permute.xlu1 %7338  ;;  %v13517_v34 = vrot.slane %v7967_v36, 11  ;;  %v7998_v51 = vshrl.u32 %v19230_v9, 16  ;;  %v13479_v62 = vcombine.low %v19217_v17, %v19217_v17  ;;  %v8001_v17 = vshll.u32 %v19230_v9, 16  ;;  %v19268_v36 = vld [vmem:[#allocation2 + $0xa0] sm:$0xf] }
 0x3e5   :  { %v7964_v22 = vor.u32 %v7962_v12, %v7961_v41  ;;  %v14912_v12 = vld [vmem:[%s20888_s3 + $0x58] sm:$0xff]   ;;  %14496 = vmatpush3.bf16.msra.mxu0 %v14909_v10 }
 0x3e6   :  { %9045 = vrot.lane.b32.xlu0 %v8856_v11, %s15187_s16  ;;  %11016 = vrot.lane.b32.xlu1 %v10779_v7, %s15187_s16  ;;  %v7975_v11 = vshll.u32 %v19169_v52, 16  ;;  %v13606_v7 = vcombine.low %v19207_v56, %v19207_v56  ;;  %v7993_v10 = vshrl.u32 %v13479_v62, 16  ;;  %v8492_v9 = vld [vmem:[#allocation2 + $0x98] sm:$0x1] }
 0x3e7   :  { %v7965_v35 = vsel %vm18814_vm7, %v13516_v48, %v7964_v22  ;;  %14497 = vmatprep.subr.bf16.mxu0 %v14912_v12 }
 0x3e8   :  { %v19177_v32 = vpop.permute.xlu0 %7152  ;;  %v7147_v0 = vpop.permute.xlu1 %7146  ;;  %v13537_v50 = vcombine.low %v7952_v53, %v7965_v35  ;;  %v7977_v26 = vor.u32 %v7975_v11, %v7974_v46  ;;  %v8861_v19 = vshll.u32 %v13606_v7, 16  ;;  %v8000_v46 = vrot.slane %v7998_v51, 7 }
 0x3e9   :  { %v7428_v44 = vsel %vm7356_vm4, %v6795_v23, %v7147_v0  ;;  %v10791_v23 = vrot.slane %v10789_v4, 4  ;;  %v8848_v0 = vor.u32 %v8847_v20, %v8844_v16  ;;  %v7437_v37 = vsel %vm7356_vm4, %v19150_v47, %v19177_v32  ;;  %14498 = vmatpush3.bf16.msra.mxu0 %v14912_v12  ;;  %v8490_v32 = vld [vmem:[#allocation2 + $0x80] sm:$0x1] }
 0x3ea   :  { %9233 = vrot.lane.b32.xlu0 %v9193_v49, %s15188_s25  ;;  %v7500_v1 = vsel %vm1422_vm1, %v7428_v44, %v7339_v61  ;;  %11204 = vrot.lane.b32.xlu1 %v11172_v30, %s15188_s25  ;;  %v10805_v61 = vshrl.u32 %v13837_v33, 16  ;;  %v10808_v49 = vshll.u32 %v13837_v33, 16  ;;  %v8858_v30 = vshrl.u32 %v13606_v7, 16  ;;  %v19274_v7 = vld [vmem:[#allocation2 + $0x58] sm:$0xf] }
 0x3eb   :  { %v13477_v59 = vcombine.low %v7500_v1, %v7500_v1  ;;  %14439 = vmatprep.mubr.msk.bf16.mxu1 %vm1808_vm2, %v13537_v50  ;;  %v13478_v27 = vcombine.high %v7500_v1, %v7500_v1  ;;  %v10795_v22 = vor.u32 %v10794_v6, %v10791_v23  ;;  %v7978_v53 = vsel %vm18814_vm7, %v13517_v34, %v7977_v26  ;;  %v8439_v50 = vld [vmem:[#allocation2 + $0x90] sm:$0x8] }
 0x3ec   :  { %v19200_v43 = vpop.permute.xlu0 %6804  ;;  %v6799_v38 = vpop.permute.xlu1 %6798  ;;  %v10807_v54 = vrot.slane %v10805_v61, 4  ;;  %v10810_v4 = vrot.slane %v10808_v49, 5  ;;  %v8860_v55 = vrot.slane %v8858_v30, 4  ;;  %v8863_v58 = vrot.slane %v8861_v19, 5 }
 0x3ed   :  { %v7980_v63 = vshrl.u32 %v13477_v59, 16  ;;  %v7985_v39 = vshrl.u32 %v13478_v27, 16  ;;  %v7988_v52 = vshll.u32 %v13478_v27, 16  ;;  %v10472_v59 = vld [vmem:[#allocation2 + $0x50] sm:$0x1]  ;;  %v13574_v47 = vcombine.low %v8439_v50, %v19207_v56 }
 0x3ee   :  { %9237 = vrot.lane.b32.xlu0 %v9195_v8, %s15188_s25  ;;  %11208 = vrot.lane.b32.xlu1 %v11174_v31, %s15188_s25  ;;  %v13805_v8 = vcombine.low %v10416_v45, %v19202_v60  ;;  %v19261_v31 = vsel %vm1422_vm1, %v7437_v37, %v19162_v5  ;;  %v13867_v2 = vcombine.low %v19164_v28, %v10472_v59  ;;  %v19297_v50 = vld [vmem:[#allocation2 + $0xb8] sm:$0xf]  ;;  %v19303_v59 = vld [vmem:[#allocation2 + $0x70] sm:$0xf] }
 0x3ef   :  { %v7987_v14 = vrot.slane %v7985_v39, 7  ;;  %v13518_v29 = vrot.slane %v7980_v63, 11  ;;  %v8864_v11 = vor.u32 %v8863_v58, %v8860_v55  ;;  %v13636_v63 = vcombine.low %v19172_v18, %v8490_v32  ;;  %v10474_v39 = vld [vmem:[#allocation2 + $0x68] sm:$0x1]  ;;  %v10414_v55 = vld [vmem:[#allocation2 + $0x54] sm:$0x8] }
 0x3f0   :  { %v19223_v57 = vpop.permute.xlu0 %7348  ;;  %v7343_v41 = vpop.permute.xlu1 %7342  ;;  %v8003_v5 = vor.u32 %v8001_v17, %v8000_v46  ;;  %v11176_v26 = vrot.slane %v13867_v2, 5  ;;  %v13869_v61 = vcombine.low %v19202_v60, %v10474_v39  ;;  %v13836_v34 = vcombine.low %v19274_v7, %v19274_v7 }
 0x3f1   :  { %v7990_v13 = vor.u32 %v7988_v52, %v7987_v14  ;;  %v13607_v14 = vcombine.low %v19268_v36, %v19268_v36  ;;  %v13519_v52 = vrot.slane %v7993_v10, 11  ;;  %v9194_v49 = vrot.slane %v13636_v63, 5 }
 0x3f2   :  { %10668 = vrot.lane.b32.xlu0 %v13803_v21, %s15186_s7  ;;  %8691 = vrot.lane.b32.xlu1 %v13572_v15, %s15186_s7  ;;  %v10811_v21 = vor.u32 %v10810_v4, %v10807_v54  ;;  %v13484_v15 = vcombine.high %v19261_v31, %v19261_v31  ;;  %v13638_v30 = vcombine.low %v19207_v56, %v8492_v9  ;;  %v10797_v56 = vshrl.u32 %v13836_v34, 16 }
 0x3f3   :  { %v7991_v35 = vsel %vm18814_vm7, %v13518_v29, %v7990_v13  ;;  %v8866_v60 = vshrl.u32 %v13607_v14, 16  ;;  %v10800_v4 = vshll.u32 %v13836_v34, 16  ;;  %v13838_v17 = vcombine.low %v19303_v59, %v19303_v59 }
 0x3f4   :  { %v19237_v48 = vpop.permute.xlu0 %7156  ;;  %v7151_v25 = vpop.permute.xlu1 %7150  ;;  %v13538_v44 = vcombine.low %v7978_v53, %v7991_v35  ;;  %v8024_v29 = vshrl.u32 %v13484_v15, 16  ;;  %v10799_v2 = vrot.slane %v10797_v56, 4  ;;  %v13804_v39 = vcombine.low %v10414_v55, %v19274_v7 }
 0x3f5   :  { %v7434_v24 = vsel %vm7356_vm4, %v6799_v38, %v7151_v25  ;;  %v8869_v25 = vshll.u32 %v13607_v14, 16  ;;  %v8868_v58 = vrot.slane %v8866_v60, 4  ;;  %v10802_v10 = vrot.slane %v10800_v4, 5 }
 0x3f6   :  { %11020 = vrot.lane.b32.xlu0 %v10795_v22, %s15187_s16  ;;  %v7504_v3 = vsel %vm1422_vm1, %v7434_v24, %v7343_v41  ;;  %9043 = vrot.lane.b32.xlu1 %v8848_v0, %s15187_s16  ;;  %v8004_v22 = vsel %vm18814_vm7, %v13519_v52, %v8003_v5  ;;  %v13483_v0 = vcombine.low %v19261_v31, %v19261_v31  ;;  %v11178_v24 = vrot.slane %v13869_v61, 5 }
 0x3f7   :  { %v13481_v40 = vcombine.low %v7504_v3, %v7504_v3  ;;  %14440 = vmatmul.mubr.msk.bf16.gmra.mrb[100].mxu1 %vm1808_vm2, %v13538_v44  ;;  %v13482_v27 = vcombine.high %v7504_v3, %v7504_v3  ;;  %v8441_v44 = vld [vmem:[#allocation2 + $0x9c] sm:$0x8]  ;;  %v8026_v62 = vrot.slane %v8024_v29, 7  ;;  %v8871_v46 = vrot.slane %v8869_v25, 5 }
 0x3f8   :  { %v19253_v1 = vpop.permute.xlu0 %6808  ;;  %v6803_v38 = vpop.permute.xlu1 %6802  ;;  %v7443_v5 = vsel %vm7356_vm4, %v19200_v43, %v19237_v48  ;;  %v10803_v52 = vor.u32 %v10802_v10, %v10799_v2  ;;  %v10816_v34 = vshll.u32 %v13838_v17, 16 }
 0x3f9   :  { %v8006_v23 = vshrl.u32 %v13481_v40, 16  ;;  %v8011_v6 = vshrl.u32 %v13482_v27, 16  ;;  %v8014_v16 = vshll.u32 %v13482_v27, 16  ;;  %v13575_v40 = vcombine.low %v8441_v44, %v19268_v36 }
 0x3fa   :  { %10672 = vrot.lane.b32.xlu0 %v13805_v8, %s15186_s7  ;;  %8695 = vrot.lane.b32.xlu1 %v13574_v47, %s15186_s7  ;;  %v9196_v8 = vrot.slane %v13638_v30, 5  ;;  %v13609_v27 = vcombine.low %v19297_v50, %v19297_v50  ;;  %v8027_v47 = vshll.u32 %v13484_v15, 16  ;;  %v8872_v15 = vor.u32 %v8871_v46, %v8868_v58 }
 0x3fb   :  { %v8013_v28 = vrot.slane %v8011_v6, 7  ;;  %v13520_v41 = vrot.slane %v8006_v23, 11  ;;  %v7510_v61 = vsel %vm1422_vm1, %v7443_v5, %v19223_v57 }
 0x3fc   :  { %v19266_v33 = vpop.permute.xlu0 %7352  ;;  %v7347_v20 = vpop.permute.xlu1 %7346  ;;  %v8029_v23 = vor.u32 %v8027_v47, %v8026_v62  ;;  %v8885_v14 = vshll.u32 %v13609_v27, 16  ;;  %v8495_v62 = vld [vmem:[#allocation2 + $0xbc] sm:$0x1]  ;;  %v13487_v58 = vcombine.low %v7510_v61, %v7510_v61 }
 0x3fd   :  { %v8016_v18 = vor.u32 %v8014_v16, %v8013_v28  ;;  %v8882_v28 = vshrl.u32 %v13609_v27, 16 }
 0x3fe   :  { %11024 = vrot.lane.b32.xlu0 %v10811_v21, %s15187_s16  ;;  %9047 = vrot.lane.b32.xlu1 %v8864_v11, %s15187_s16  ;;  %v8887_v30 = vrot.slane %v8885_v14, 5 }
 0x3ff   :  { %v8017_v45 = vsel %vm18814_vm7, %v13520_v41, %v8016_v18  ;;  %v8445_v41 = vld [vmem:[#allocation2 + $0xb4] sm:$0x8]  ;;  %v10813_v18 = vshrl.u32 %v13838_v17, 16  ;;  %v8884_v57 = vrot.slane %v8882_v28, 4 }
 0x400   :  { %v19279_v12 = vpop.permute.xlu0 %7160  ;;  %v7155_v13 = vpop.permute.xlu1 %7154  ;;  %v13539_v51 = vcombine.low %v8004_v22, %v8017_v45  ;;  %v13577_v45 = vcombine.low %v8445_v41, %v19297_v50  ;;  %v19376_v41 = vld [vmem:[#allocation2 + $0x94] sm:$0xf] }
 0x401   :  { %v7440_v19 = vsel %vm7356_vm4, %v6803_v38, %v7155_v13  ;;  %v8019_v38 = vshrl.u32 %v13483_v0, 16  ;;  %v10418_v13 = vld [vmem:[#allocation2 + $0x6c] sm:$0x8]  ;;  %v10815_v0 = vrot.slane %v10813_v18, 4  ;;  %v7449_v46 = vsel %vm7356_vm4, %v19253_v1, %v19279_v12 }
 0x402   :  { %11212 = vrot.lane.b32.xlu0 %v11176_v26, %s15188_s25  ;;  %v7508_v53 = vsel %vm1422_vm1, %v7440_v19, %v7347_v20  ;;  %9235 = vrot.lane.b32.xlu1 %v9194_v49, %s15188_s25  ;;  %v13488_v19 = vcombine.high %v7510_v61, %v7510_v61  ;;  %v13806_v25 = vcombine.low %v10418_v13, %v19303_v59 }
 0x403   :  { %v13485_v54 = vcombine.low %v7508_v53, %v7508_v53  ;;  %14443 = vmatprep.mubr.msk.bf16.mxu1 %vm1808_vm2, %v13539_v51  ;;  %v13486_v37 = vcombine.high %v7508_v53, %v7508_v53  ;;  %v13521_v16 = vrot.slane %v8019_v38, 11  ;;  %v8493_v51 = vld [vmem:[#allocation2 + $0xa4] sm:$0x1]  ;;  %v10818_v53 = vrot.slane %v10816_v34, 5  ;;  %v10475_v38 = vld [vmem:[#allocation2 + $0x74] sm:$0x1] }
 0x404   :  { %v19295_v35 = vpop.permute.xlu0 %8673  ;;  %v19300_v3 = vpop.permute.xlu1 %6806  ;;  %v13639_v56 = vcombine.low %v19268_v36, %v8493_v51  ;;  %v8050_v4 = vshrl.u32 %v13488_v19, 16  ;;  %v19352_v36 = vld [vmem:[#allocation2 + $0xac] sm:$0xf] }
 0x405   :  { %v8032_v32 = vshrl.u32 %v13485_v54, 16  ;;  %v8037_v31 = vshrl.u32 %v13486_v37, 16  ;;  %v8040_v11 = vshll.u32 %v13486_v37, 16  ;;  %v8030_v43 = vsel %vm18814_vm7, %v13521_v16, %v8029_v23  ;;  %v19343_v37 = vld [vmem:[#allocation2 + $0x7c] sm:$0xf] }
 0x406   :  { %11216 = vrot.lane.b32.xlu0 %v11178_v24, %s15188_s25  ;;  %9239 = vrot.lane.b32.xlu1 %v9196_v8, %s15188_s25  ;;  %v10473_v24 = vld [vmem:[#allocation2 + $0x5c] sm:$0x1]  ;;  %v8888_v54 = vor.u32 %v8887_v30, %v8884_v57  ;;  %v13839_v2 = vcombine.low %v19343_v37, %v19343_v37  ;;  %v8052_v10 = vrot.slane %v8050_v4, 7  ;;  %v19379_v57 = vld [vmem:[#allocation2 + $0xc4] sm:$0xf] }
 0x407   :  { %v8039_v6 = vrot.slane %v8037_v31, 7  ;;  %v13522_v20 = vrot.slane %v8032_v32, 11  ;;  %v13868_v55 = vcombine.low %v19274_v7, %v10473_v24  ;;  %v9197_v31 = vrot.slane %v13639_v56, 5 }
 0x408   :  { %v19309_v21 = vpop.permute.xlu0 %8677  ;;  %v7351_v63 = vpop.permute.xlu1 %7350  ;;  %v13641_v7 = vcombine.low %v19297_v50, %v8495_v62  ;;  %v8045_v50 = vshrl.u32 %v13487_v58, 16  ;;  %v10824_v16 = vshll.u32 %v13839_v2, 16 }
 0x409   :  { %v8042_v26 = vor.u32 %v8040_v11, %v8039_v6  ;;  %v11177_v23 = vrot.slane %v13868_v55, 5  ;;  %v13870_v6 = vcombine.low %v19303_v59, %v10475_v38  ;;  %v13608_v11 = vcombine.low %v19352_v36, %v19352_v36 }
 0x40a   :  { %8697 = vrot.lane.b32.xlu0 %v13575_v40, %s15186_s7  ;;  %10670 = vrot.lane.b32.xlu1 %v13804_v39, %s15186_s7  ;;  %v10819_v40 = vor.u32 %v10818_v53, %v10815_v0  ;;  %v9199_v28 = vrot.slane %v13641_v7, 5  ;;  %v13841_v0 = vcombine.low %v19376_v41, %v19376_v41  ;;  %v13610_v55 = vcombine.low %v19379_v57, %v19379_v57 }
 0x40b   :  { %v8043_v48 = vsel %vm18814_vm7, %v13522_v20, %v8042_v26  ;;  %v11179_v61 = vrot.slane %v13870_v6, 5  ;;  %v8877_v34 = vshll.u32 %v13608_v11, 16 }
 0x40c   :  { %v19319_v9 = vpop.permute.xlu0 %8681  ;;  %v19323_v49 = vpop.permute.xlu1 %8675  ;;  %v13540_v29 = vcombine.low %v8030_v43, %v8043_v48  ;;  %v8443_v43 = vld [vmem:[#allocation2 + $0xa8] sm:$0x8]  ;;  %v8874_v48 = vshrl.u32 %v13608_v11, 16  ;;  %v10840_v7 = vshll.u32 %v13841_v0, 16  ;;  %v8890_v6 = vshrl.u32 %v13610_v55, 16 }
 0x40d   :  { %v13576_v24 = vcombine.low %v8443_v43, %v19352_v36  ;;  %v8893_v11 = vshll.u32 %v13610_v55, 16 }
 0x40e   :  { %9049 = vrot.lane.b32.xlu0 %v8872_v15, %s15187_s16  ;;  %11022 = vrot.lane.b32.xlu1 %v10803_v52, %s15187_s16  ;;  %v10420_v52 = vld [vmem:[#allocation2 + $0x78] sm:$0x8] }
 0x40f   :  { %14444 = vmatmul.mubr.msk.bf16.gmra.mrb[104].mxu1 %vm1808_vm2, %v13540_v29  ;;  %v13523_v29 = vrot.slane %v8045_v50, 11  ;;  %v10476_v50 = vld [vmem:[#allocation2 + $0x80] sm:$0x1] }
 0x410   :  { %v19331_v22 = vpop.permute.xlu0 %8685  ;;  %v19335_v60 = vpop.permute.xlu1 %8679 }
 0x412   :  { %8701 = vrot.lane.b32.xlu0 %v13577_v45, %s15186_s7  ;;  %10674 = vrot.lane.b32.xlu1 %v13806_v25, %s15186_s7  ;;  %v10826_v25 = vrot.slane %v10824_v16, 5 }
 0x414   :  { %v19340_v44 = vpop.permute.xlu0 %8689  ;;  %v7159_v8 = vpop.permute.xlu1 %7158 }
 0x415   :  { %v7446_v27 = vsel %vm7356_vm4, %v19300_v3, %v7159_v8  ;;  %v19363_v3 = vsel %vm1422_vm1, %v7449_v46, %v19266_v33  ;;  %v10821_v33 = vshrl.u32 %v13839_v2, 16  ;;  %v8876_v8 = vrot.slane %v8874_v48, 4 }
 0x416   :  { %9053 = vrot.lane.b32.xlu0 %v8888_v54, %s15187_s16  ;;  %v7512_v47 = vsel %vm1422_vm1, %v7446_v27, %v7351_v63  ;;  %11026 = vrot.lane.b32.xlu1 %v10819_v40, %s15187_s16  ;;  %v8053_v63 = vshll.u32 %v13488_v19, 16  ;;  %v19374_v26 = vcombine.high %v19363_v3, %v19363_v3  ;;  %v13807_v19 = vcombine.low %v10420_v52, %v19343_v37  ;;  %v19414_v52 = vld [vmem:[#allocation2 + $0x88] sm:$0xf] }
 0x417   :  { %v13489_v1 = vcombine.low %v7512_v47, %v7512_v47  ;;  %v13490_v12 = vcombine.high %v7512_v47, %v7512_v47  ;;  %v10823_v51 = vrot.slane %v10821_v33, 4  ;;  %v8879_v40 = vrot.slane %v8877_v34, 5  ;;  %v19408_v33 = vld [vmem:[#allocation2 + $0xe8] sm:$0xf] }
 0x418   :  { %v19356_v32 = vpop.permute.xlu0 %9027  ;;  %v6811_v17 = vpop.permute.xlu1 %6810  ;;  %v8055_v20 = vor.u32 %v8053_v63, %v8052_v10  ;;  %v8076_v53 = vshrl.u32 %v19374_v26, 16  ;;  %v13491_v58 = vcombine.low %v19363_v3, %v19363_v3  ;;  %v8892_v34 = vrot.slane %v8890_v6, 4  ;;  %v19456_v6 = vld [vmem:[#allocation2 + $0x9c] sm:$0x8] }
 0x419   :  { %v8058_v39 = vshrl.u32 %v13489_v1, 16  ;;  %v8063_v5 = vshrl.u32 %v13490_v12, 16  ;;  %v8066_v14 = vshll.u32 %v13490_v12, 16  ;;  %v10827_v47 = vor.u32 %v10826_v25, %v10823_v51  ;;  %v10424_v12 = vld [vmem:[#allocation2 + $0x90] sm:$0x8] }
 0x41a   :  { %9241 = vrot.lane.b32.xlu0 %v9197_v31, %s15188_s25  ;;  %11214 = vrot.lane.b32.xlu1 %v11177_v23, %s15188_s25  ;;  %v8056_v54 = vsel %vm18814_vm7, %v13523_v29, %v8055_v20  ;;  %v10837_v31 = vshrl.u32 %v13841_v0, 16  ;;  %v8078_v2 = vrot.slane %v8076_v53, 7  ;;  %v8880_v3 = vor.u32 %v8879_v40, %v8876_v8  ;;  %v8494_v0 = vld [vmem:[#allocation2 + $0xb0] sm:$0x1]  ;;  %v10478_v53 = vld [vmem:[#allocation2 + $0x98] sm:$0x1] }
 0x41b   :  { %v8065_v59 = vrot.slane %v8063_v5, 7  ;;  %v13524_v13 = vrot.slane %v8058_v39, 11  ;;  %v8071_v63 = vshrl.u32 %v13491_v58, 16  ;;  %v8079_v39 = vshll.u32 %v19374_v26, 16  ;;  %v19437_v40 = vld [vmem:[#allocation2 + $0x100] sm:$0xf] }
 0x41c   :  { %v19370_v15 = vpop.permute.xlu0 %9031  ;;  %v7355_v18 = vpop.permute.xlu1 %7354  ;;  %v13809_v20 = vcombine.low %v10424_v12, %v19376_v41  ;;  %v8895_v29 = vrot.slane %v8893_v11, 5  ;;  %v13640_v58 = vcombine.low %v19352_v36, %v8494_v0 }
 0x41d   :  { %v8068_v45 = vor.u32 %v8066_v14, %v8065_v59  ;;  %v10839_v59 = vrot.slane %v10837_v31, 4  ;;  %v10842_v14 = vrot.slane %v10840_v7, 5 }
 0x41e   :  { %9245 = vrot.lane.b32.xlu0 %v9199_v28, %s15188_s25  ;;  %11218 = vrot.lane.b32.xlu1 %v11179_v61, %s15188_s25 }
 0x41f   :  { %v8069_v56 = vsel %vm18814_vm7, %v13524_v13, %v8068_v45  ;;  %v13871_v13 = vcombine.low %v19343_v37, %v10476_v50  ;;  %v13611_v45 = vcombine.low %v19408_v33, %v19408_v33  ;;  %v10843_v37 = vor.u32 %v10842_v14, %v10839_v59  ;;  %v8449_v50 = vld [vmem:[#allocation2 + $0xe4] sm:$0x8]  ;;  %v19463_v59 = vld [vmem:[#allocation2 + $0xfc] sm:$0x8] }
 0x420   :  { %v19382_v30 = vpop.permute.xlu0 %9219  ;;  %v7163_v4 = vpop.permute.xlu1 %7162  ;;  %v13541_v62 = vcombine.low %v8056_v54, %v8069_v56  ;;  %v9286_v54 = vsel %vm7356_vm4, %v19323_v49, %v19356_v32  ;;  %v8896_v49 = vor.u32 %v8895_v29, %v8892_v34  ;;  %v13579_v34 = vcombine.low %v8449_v50, %v19408_v33 }
 0x421   :  { %v7452_v46 = vsel %vm7356_vm4, %v6811_v17, %v7163_v4  ;;  %v8447_v17 = vld [vmem:[#allocation2 + $0xc0] sm:$0x8]  ;;  %v9380_v4 = vsel %vm1422_vm1, %v9286_v54, %v19382_v30  ;;  %v8898_v30 = vshrl.u32 %v13611_v45, 16  ;;  %v8901_v31 = vshll.u32 %v13611_v45, 16 }
 0x422   :  { %10676 = vrot.lane.b32.xlu0 %v13807_v19, %s15186_s7  ;;  %v7516_v27 = vsel %vm1422_vm1, %v7452_v46, %v7355_v18  ;;  %8699 = vrot.lane.b32.xlu1 %v13576_v24, %s15186_s7  ;;  %v8081_v18 = vor.u32 %v8079_v39, %v8078_v2  ;;  %v13578_v48 = vcombine.low %v8447_v17, %v19379_v57  ;;  %v13525_v19 = vrot.slane %v8071_v63, 11  ;;  %v10422_v17 = vld [vmem:[#allocation2 + $0x84] sm:$0x8]  ;;  %v19459_v63 = vld [vmem:[#allocation2 + $0xa0] sm:$0xf] }
 0x423   :  { %14447 = vmatprep.mubr.msk.bf16.mxu1 %vm1808_vm2, %v13541_v62  ;;  %v13493_v10 = vcombine.low %v7516_v27, %v7516_v27  ;;  %v13494_v1 = vcombine.high %v7516_v27, %v7516_v27  ;;  %v13840_v24 = vcombine.low %v19414_v52, %v19414_v52  ;;  %v13873_v46 = vcombine.low %v19376_v41, %v10478_v53  ;;  %v8496_v27 = vld [vmem:[#allocation2 + $0xc8] sm:$0x1] }
 0x424   :  { %v19402_v38 = vpop.permute.xlu0 %9223  ;;  %v19404_v23 = vpop.permute.xlu1 %8683  ;;  %v8082_v62 = vsel %vm18814_vm7, %v13525_v19, %v8081_v18  ;;  %v9292_v2 = vsel %vm7356_vm4, %v19335_v60, %v19370_v15  ;;  %v13613_v41 = vcombine.low %v19437_v40, %v19437_v40  ;;  %v9198_v15 = vrot.slane %v13640_v58, 5 }
 0x425   :  { %v8084_v5 = vshrl.u32 %v13493_v10, 16  ;;  %v8089_v28 = vshrl.u32 %v13494_v1, 16  ;;  %v8092_v43 = vshll.u32 %v13494_v1, 16  ;;  %v10829_v7 = vshrl.u32 %v13840_v24, 16 }
 0x426   :  { %11028 = vrot.lane.b32.xlu0 %v10827_v47, %s15187_s16  ;;  %9051 = vrot.lane.b32.xlu1 %v8880_v3, %s15187_s16  ;;  %v11180_v47 = vrot.slane %v13871_v13, 5  ;;  %v19445_v10 = vcombine.high %v9380_v4, %v9380_v4  ;;  %v10832_v36 = vshll.u32 %v13840_v24, 16  ;;  %v9384_v12 = vsel %vm1422_vm1, %v9292_v2, %v19402_v38 }
 0x427   :  { %v8091_v61 = vrot.slane %v8089_v28, 7  ;;  %v13526_v51 = vrot.slane %v8084_v5, 11  ;;  %v13642_v3 = vcombine.low %v19379_v57, %v8496_v27  ;;  %v11182_v11 = vrot.slane %v13873_v46, 5 }
 0x428   :  { %v19411_v16 = vpop.permute.xlu0 %9035  ;;  %v19417_v26 = vpop.permute.xlu1 %8687  ;;  %v13661_v39 = vcombine.low %v9380_v4, %v9380_v4  ;;  %v8900_v5 = vrot.slane %v8898_v30, 4  ;;  %v8903_v28 = vrot.slane %v8901_v31, 5  ;;  %v9620_v57 = vshrl.u32 %v19445_v10, 16 }
 0x429   :  { %v8094_v25 = vor.u32 %v8092_v43, %v8091_v61  ;;  %v13666_v38 = vcombine.high %v9384_v12, %v9384_v12  ;;  %v10834_v18 = vrot.slane %v10832_v36, 5  ;;  %v8914_v61 = vshrl.u32 %v13613_v41, 16  ;;  %v19469_v43 = vld [vmem:[#allocation2 + $0xec] sm:$0x1] }
 0x42a   :  { %10680 = vrot.lane.b32.xlu0 %v13809_v20, %s15186_s7  ;;  %8703 = vrot.lane.b32.xlu1 %v13578_v48, %s15186_s7  ;;  %v19461_v20 = vrot.slane %v10829_v7, 4  ;;  %v9200_v48 = vrot.slane %v13642_v3, 5  ;;  %v13808_v29 = vcombine.low %v10422_v17, %v19414_v52  ;;  %v13842_v13 = vcombine.low %v19459_v63, %v19459_v63 }
 0x42b   :  { %v8095_v8 = vsel %vm18814_vm7, %v13526_v51, %v8094_v25  ;;  %v13581_v51 = vcombine.low %v19463_v59, %v19437_v40  ;;  %v13810_v25 = vcombine.low %v19456_v6, %v19459_v63  ;;  %v8917_v0 = vshll.u32 %v13613_v41, 16  ;;  %v19555_v6 = vld [vmem:[#allocation2 + $0xf4] sm:$0xf] }
 0x42c   :  { %v19429_v56 = vpop.permute.xlu0 %9039  ;;  %v9026_v55 = vpop.permute.xlu1 %9025  ;;  %v13542_v32 = vcombine.low %v8082_v62, %v8095_v8  ;;  %v9615_v53 = vshrl.u32 %v13661_v39, 16  ;;  %v8904_v54 = vor.u32 %v8903_v28, %v8900_v5  ;;  %v9622_v4 = vrot.slane %v9620_v57, 7 }
 0x42d   :  { %v9283_v45 = vsel %vm7356_vm4, %v19295_v35, %v9026_v55  ;;  %v9646_v62 = vshrl.u32 %v13666_v38, 16  ;;  %v10835_v8 = vor.u32 %v10834_v18, %v19461_v20  ;;  %v19489_v55 = vrot.slane %v8914_v61, 4 }
 0x42e   :  { %11032 = vrot.lane.b32.xlu0 %v10843_v37, %s15187_s16  ;;  %9055 = vrot.lane.b32.xlu1 %v8896_v49, %s15187_s16  ;;  %v13643_v37 = vcombine.low %v19408_v33, %v19469_v43  ;;  %v13665_v49 = vcombine.low %v9384_v12, %v9384_v12  ;;  %v10845_v46 = vshrl.u32 %v13842_v13, 16  ;;  %v9623_v27 = vshll.u32 %v19445_v10, 16 }
 0x42f   :  { %14448 = vmatmul.mubr.msk.bf16.gmra.mrb[108].mxu1 %vm1808_vm2, %v13542_v32  ;;  %v19495_v31 = vrot.slane %v8917_v0, 5  ;;  %v10848_v7 = vshll.u32 %v13842_v13, 16  ;;  %v13724_v2 = vrot.slane %v9615_v53, 11  ;;  %v9648_v17 = vrot.slane %v9646_v62, 7 }
 0x430   :  { %v19449_v1 = vpop.permute.xlu0 %9227  ;;  %v9030_v60 = vpop.permute.xlu1 %9029  ;;  %v9625_v12 = vor.u32 %v9623_v27, %v9622_v4  ;;  %v9649_v5 = vshll.u32 %v13666_v38, 16 }
 0x432   :  { %11220 = vrot.lane.b32.xlu0 %v11180_v47, %s15188_s25  ;;  %9243 = vrot.lane.b32.xlu1 %v9198_v15, %s15188_s25  ;;  %v9289_v47 = vsel %vm7356_vm4, %v19309_v21, %v9030_v60  ;;  %v9641_v21 = vshrl.u32 %v13665_v49, 16  ;;  %v9298_v60 = vsel %vm7356_vm4, %v19404_v23, %v19411_v16  ;;  %v9651_v23 = vor.u32 %v9649_v5, %v9648_v17 }
 0x433   :  { %v19506_v28 = vsel %vm1422_vm1, %v9298_v60, %v19449_v1  ;;  %v10477_v1 = vld [vmem:[#allocation2 + $0x8c] sm:$0x1] }
 0x434   :  { %v19467_v14 = vpop.permute.xlu0 %9231  ;;  %v9218_v19 = vpop.permute.xlu1 %9217  ;;  %v19519_v0 = vcombine.high %v19506_v28, %v19506_v28 }
 0x435   :  { %v9378_v24 = vsel %vm1422_vm1, %v9283_v45, %v9218_v19  ;;  %v13726_v45 = vrot.slane %v9641_v21, 11  ;;  %v9304_v19 = vsel %vm7356_vm4, %v19417_v26, %v19429_v56  ;;  %v8920_v26 = vor.u32 %v19495_v31, %v19489_v55  ;;  %v19543_v55 = vld [vmem:[#allocation2 + $0xa8] sm:$0x8] }
 0x436   :  { %11224 = vrot.lane.b32.xlu0 %v11182_v11, %s15188_s25  ;;  %9247 = vrot.lane.b32.xlu1 %v9200_v48, %s15188_s25  ;;  %v13659_v32 = vcombine.low %v9378_v24, %v9378_v24  ;;  %v13660_v58 = vcombine.high %v9378_v24, %v9378_v24  ;;  %v10847_v48 = vrot.slane %v10845_v46, 4  ;;  %v8499_v24 = vld [vmem:[#allocation2 + $0x104] sm:$0x1]  ;;  %v13872_v56 = vcombine.low %v19414_v52, %v10477_v1  ;;  %v19545_v52 = vld [vmem:[#allocation2 + $0xac] sm:$0xf] }
 0x437   :  { %v9672_v27 = vshrl.u32 %v19519_v0, 16  ;;  %v13843_v17 = vcombine.low %v19545_v52, %v19545_v52 }
 0x438   :  { %v19486_v35 = vpop.permute.xlu0 %10662  ;;  %v9222_v30 = vpop.permute.xlu1 %9221  ;;  %v9602_v36 = vshrl.u32 %v13659_v32, 16  ;;  %v9607_v41 = vshrl.u32 %v13660_v58, 16  ;;  %v9610_v39 = vshll.u32 %v13660_v58, 16  ;;  %v10479_v32 = vld [vmem:[#allocation2 + $0xa4] sm:$0x1]  ;;  %v9652_v58 = vsel %vm18814_vm7, %v13726_v45, %v9651_v23 }
 0x439   :  { %v9382_v3 = vsel %vm1422_vm1, %v9289_v47, %v9222_v30  ;;  %v13874_v31 = vcombine.low %v19459_v63, %v10479_v32  ;;  %v9674_v43 = vrot.slane %v9672_v27, 7 }
 0x43a   :  { %8705 = vrot.lane.b32.xlu0 %v13579_v34, %s15186_s7  ;;  %v13663_v15 = vcombine.low %v9382_v3, %v9382_v3  ;;  %v13664_v11 = vcombine.high %v9382_v3, %v9382_v3  ;;  %10678 = vrot.lane.b32.xlu1 %v13808_v29, %s15186_s7  ;;  %v9609_v50 = vrot.slane %v9607_v41, 7  ;;  %v13723_v18 = vrot.slane %v9602_v36, 11 }
 0x43b   :  { %v10850_v34 = vrot.slane %v10848_v7, 5  ;;  %v9626_v29 = vsel %vm18814_vm7, %v13724_v2, %v9625_v12  ;;  %v19553_v7 = vld [vmem:[#allocation2 + $0xf0] sm:$0x8]  ;;  %v9201_v41 = vrot.slane %v13643_v37, 5  ;;  %v11181_v3 = vrot.slane %v13872_v56, 5 }
 0x43c   :  { %v19499_v10 = vpop.permute.xlu0 %11014  ;;  %v9628_v20 = vshrl.u32 %v13663_v15, 16  ;;  %v9633_v59 = vshrl.u32 %v13664_v11, 16  ;;  %v9034_v57 = vpop.permute.xlu1 %9033  ;;  %v9612_v61 = vor.u32 %v9610_v39, %v9609_v50  ;;  %v9636_v13 = vshll.u32 %v13664_v11, 16  ;;  %v19595_v56 = vld [vmem:[#allocation2 + $0x10c] sm:$0xf] }
 0x43d   :  { %v10851_v36 = vor.u32 %v10850_v34, %v10847_v48  ;;  %v13811_v12 = vcombine.low %v19543_v55, %v19545_v52  ;;  %v13580_v33 = vcombine.low %v19553_v7, %v19555_v6  ;;  %v11183_v60 = vrot.slane %v13874_v31, 5 }
 0x43e   :  { %9057 = vrot.lane.b32.xlu0 %v8904_v54, %s15187_s16  ;;  %v9635_v16 = vrot.slane %v9633_v59, 7  ;;  %11030 = vrot.lane.b32.xlu1 %v10835_v8, %s15187_s16  ;;  %v9613_v53 = vsel %vm18814_vm7, %v13723_v18, %v9612_v61  ;;  %v19525_v54 = vsel %vm1422_vm1, %v9304_v19, %v19467_v14  ;;  %v13725_v4 = vrot.slane %v9628_v20, 11 }
 0x43f   :  { %v13763_v49 = vcombine.low %v9613_v53, %v9626_v29  ;;  %v19550_v47 = vcombine.high %v19525_v54, %v19525_v54  ;;  %v13612_v50 = vcombine.low %v19555_v6, %v19555_v6  ;;  %v13673_v18 = vcombine.low %v19525_v54, %v19525_v54  ;;  %v19589_v53 = vld [vmem:[#allocation2 + $0xc4] sm:$0xf] }
 0x440   :  { %v19512_v38 = vpop.permute.xlu0 %10666  ;;  %v9638_v62 = vor.u32 %v9636_v13, %v9635_v16  ;;  %v9038_v8 = vpop.permute.xlu1 %9037  ;;  %v10853_v48 = vshrl.u32 %v13843_v17, 16  ;;  %v13845_v27 = vcombine.low %v19589_v53, %v19589_v53 }
 0x441   :  { %14459 = vmatprep.mubr.msk.bf16.mxu1 %vm1808_vm2, %v13763_v49  ;;  %v9698_v37 = vshrl.u32 %v19550_v47, 16  ;;  %v9301_v5 = vsel %vm7356_vm4, %v19331_v22, %v9038_v8  ;;  %v10856_v22 = vshll.u32 %v13843_v17, 16  ;;  %v8906_v19 = vshrl.u32 %v13612_v50, 16 }
 0x442   :  { %8709 = vrot.lane.b32.xlu0 %v13581_v51, %s15186_s7  ;;  %v9639_v46 = vsel %vm18814_vm7, %v13725_v4, %v9638_v62  ;;  %10682 = vrot.lane.b32.xlu1 %v13810_v25, %s15186_s7  ;;  %v13645_v51 = vcombine.low %v19437_v40, %v8499_v24  ;;  %v13669_v40 = vcombine.low %v19506_v28, %v19506_v28  ;;  %v8909_v62 = vshll.u32 %v13612_v50, 16 }
 0x443   :  { %v13764_v30 = vcombine.low %v9639_v46, %v9652_v58  ;;  %v9295_v25 = vsel %vm7356_vm4, %v19319_v9, %v9034_v57  ;;  %v9675_v57 = vshll.u32 %v19519_v0, 16  ;;  %v9700_v1 = vrot.slane %v9698_v37, 7 }
 0x444   :  { %v19540_v14 = vpop.permute.xlu0 %11018  ;;  %v9226_v2 = vpop.permute.xlu1 %9225  ;;  %v9203_v21 = vrot.slane %v13645_v51, 5  ;;  %v9667_v39 = vshrl.u32 %v13669_v40, 16  ;;  %v9693_v8 = vshrl.u32 %v13673_v18, 16  ;;  %v9701_v49 = vshll.u32 %v19550_v47, 16 }
 0x445   :  { %v9386_v63 = vsel %vm1422_vm1, %v9295_v25, %v9226_v2  ;;  %14460 = vmatmul.mubr.msk.bf16.vlgmr.msra.gmra.mrb[112].mxu1 %vm1808_vm2, %v13764_v30  ;;  %v9677_v13 = vor.u32 %v9675_v57, %v9674_v43  ;;  %v10855_v51 = vrot.slane %v10853_v48, 4  ;;  %v10858_v55 = vrot.slane %v10856_v22, 5  ;;  %v10482_v48 = vld [vmem:[#allocation2 + $0xc8] sm:$0x1] }
 0x446   :  { %9061 = vrot.lane.b32.xlu0 %v8920_v26, %s15187_s16  ;;  %v13667_v9 = vcombine.low %v9386_v63, %v9386_v63  ;;  %v13668_v15 = vcombine.high %v9386_v63, %v9386_v63  ;;  %11034 = vrot.lane.b32.xlu1 %v10851_v36, %s15187_s16  ;;  %v13728_v0 = vrot.slane %v9667_v39, 11  ;;  %v9703_v47 = vor.u32 %v9701_v49, %v9700_v1  ;;  %v10432_v39 = vld [vmem:[#allocation2 + $0xc0] sm:$0x8]  ;;  %v8498_v1 = vld [vmem:[#allocation2 + $0xf8] sm:$0x1] }
 0x447   :  { %v8908_v2 = vrot.slane %v8906_v19, 4  ;;  %v8911_v36 = vrot.slane %v8909_v62, 5  ;;  %v13730_v63 = vrot.slane %v9693_v8, 11  ;;  %v10869_v43 = vshrl.u32 %v13845_v27, 16 }
 0x448   :  { %v19572_v11 = vpop.permute.xlu0 %11206  ;;  %v9654_v28 = vshrl.u32 %v13667_v9, 16  ;;  %v9659_v20 = vshrl.u32 %v13668_v15, 16  ;;  %v9230_v59 = vpop.permute.xlu1 %9229  ;;  %v9662_v29 = vshll.u32 %v13668_v15, 16  ;;  %v9678_v30 = vsel %vm18814_vm7, %v13728_v0, %v9677_v13 }
 0x449   :  { %v9390_v61 = vsel %vm1422_vm1, %v9301_v5, %v9230_v59  ;;  %v11273_v9 = vsel %vm7356_vm4, %v19486_v35, %v19499_v10  ;;  %v10872_v37 = vshll.u32 %v13845_v27, 16  ;;  %v8455_v59 = vld [vmem:[#allocation2 + $0x108] sm:$0x8]  ;;  %v10871_v22 = vrot.slane %v10869_v43, 4  ;;  %v19661_v27 = vld [vmem:[#allocation2 + $0x114] sm:$0x8] }
 0x44a   :  { %9249 = vrot.lane.b32.xlu0 %v9201_v41, %s15188_s25  ;;  %v9661_v34 = vrot.slane %v9659_v20, 7  ;;  %v13671_v23 = vcombine.low %v9390_v61, %v9390_v61  ;;  %11222 = vrot.lane.b32.xlu1 %v11181_v3, %s15188_s25  ;;  %v13672_v45 = vcombine.high %v9390_v61, %v9390_v61  ;;  %v13727_v24 = vrot.slane %v9654_v28, 11  ;;  %v10480_v61 = vld [vmem:[#allocation2 + $0xb0] sm:$0x1] }
 0x44b   :  { %v13614_v41 = vcombine.low %v19595_v56, %v19595_v56  ;;  %v19622_v50 = vsel %vm1422_vm1, %v11273_v9, %v19572_v11  ;;  %v8912_v20 = vor.u32 %v8911_v36, %v8908_v2  ;;  %v10874_v13 = vrot.slane %v10872_v37, 5 }
 0x44c   :  { %v19587_v16 = vpop.permute.xlu0 %11210  ;;  %v9664_v54 = vor.u32 %v9662_v29, %v9661_v34  ;;  %v19591_v4 = vpop.permute.xlu1 %10660  ;;  %v9680_v32 = vshrl.u32 %v13671_v23, 16  ;;  %v9685_v26 = vshrl.u32 %v13672_v45, 16  ;;  %v9688_v7 = vshll.u32 %v13672_v45, 16  ;;  %v8500_v45 = vld [vmem:[#allocation2 + $0x110] sm:$0x1] }
 0x44d   :  { %v8922_v57 = vshrl.u32 %v13614_v41, 16  ;;  %v8925_v11 = vshll.u32 %v13614_v41, 16  ;;  %v19634_v34 = vcombine.high %v19622_v50, %v19622_v50  ;;  %v13813_v23 = vcombine.low %v10432_v39, %v19589_v53 }
 0x44e   :  { %9253 = vrot.lane.b32.xlu0 %v9203_v21, %s15188_s25  ;;  %v9665_v58 = vsel %vm18814_vm7, %v13727_v24, %v9664_v54  ;;  %11226 = vrot.lane.b32.xlu1 %v11183_v60, %s15188_s25  ;;  %v9687_v31 = vrot.slane %v9685_v26, 7  ;;  %v13729_v3 = vrot.slane %v9680_v32, 11  ;;  %v9704_v60 = vsel %vm18814_vm7, %v13730_v63, %v9703_v47  ;;  %v19650_v32 = vld [vmem:[#allocation2 + $0x118] sm:$0xf] }
 0x44f   :  { %v13765_v25 = vcombine.low %v9665_v58, %v9678_v30  ;;  %v11279_v19 = vsel %vm7356_vm4, %v19512_v38, %v19540_v14  ;;  %v13582_v0 = vcombine.low %v8455_v59, %v19595_v56  ;;  %v8924_v62 = vrot.slane %v8922_v57, 4  ;;  %v19691_v59 = vld [vmem:[#allocation2 + $0x130] sm:$0xf] }
 0x450   :  { %v19600_v46 = vpop.permute.xlu0 %9041  ;;  %v19606_v40 = vpop.permute.xlu1 %11012  ;;  %v9690_v17 = vor.u32 %v9688_v7, %v9687_v31  ;;  %v11371_v24 = vsel %vm1422_vm1, %v11279_v19, %v19587_v16  ;;  %v8927_v8 = vrot.slane %v8925_v11, 5  ;;  %v13875_v49 = vcombine.low %v19545_v52, %v10480_v61  ;;  %v19663_v52 = vld [vmem:[#allocation2 + $0xb8] sm:$0xf]  ;;  %v19673_v7 = vld [vmem:[#allocation2 + $0xb4] sm:$0x8] }
 0x451   :  { %14463 = vmatprep.mubr.msk.bf16.mxu1 %vm1808_vm2, %v13765_v25  ;;  %v13644_v26 = vcombine.low %v19555_v6, %v8498_v1  ;;  %v13877_v58 = vcombine.low %v19589_v53, %v10482_v48  ;;  %v13646_v38 = vcombine.low %v19595_v56, %v8500_v45  ;;  %v11607_v14 = vshrl.u32 %v19634_v34, 16 }
 0x452   :  { %10684 = vrot.lane.b32.xlu0 %v13811_v12, %s15186_s7  ;;  %v14421_v15 = vpop.f32.mrb[80].mxu1  ;;  %8707 = vrot.lane.b32.xlu1 %v13580_v33, %s15186_s7  ;;  %v10859_v12 = vor.u32 %v10858_v55, %v10855_v51  ;;  %v9691_v35 = vsel %vm18814_vm7, %v13729_v3, %v9690_v17  ;;  %v10875_v51 = vor.u32 %v10874_v13, %v10871_v22  ;;  %v11184_v31 = vrot.slane %v13875_v49, 5  ;;  %v19696_v13 = vld [vmem:[#allocation2 + $0xd0] sm:$0xf] }
 0x453   :  { %8387 = vst.msk [vmem:[#allocation4 + $0x10] sm:$0xff] %vm1808_vm2, %v14421_v15  ;;  %v8258_v10 = vpop.f32.mrb[81].mxu1  ;;  %v13766_v28 = vcombine.low %v9691_v35, %v9704_v60  ;;  %v19659_v55 = vcombine.high %v11371_v24, %v11371_v24  ;;  %v13615_v6 = vcombine.low %v19650_v32, %v19650_v32  ;;  %v13897_v53 = vcombine.low %v19622_v50, %v19622_v50 }
 0x454   :  { %v19616_v21 = vpop.permute.xlu0 %8693  ;;  %8385 = vst.msk [vmem:[#allocation4] sm:$0xff] %vm1808_vm2, %v8258_v10  ;;  %v14422_v33 = vpop.f32.mrb[82].mxu1  ;;  %v11270_v56 = vsel %vm7356_vm4, %v19591_v4, %v19606_v40  ;;  %v8928_v47 = vor.u32 %v8927_v8, %v8924_v62  ;;  %v9202_v2 = vrot.slane %v13644_v26, 5  ;;  %v11186_v36 = vrot.slane %v13877_v58, 5 }
 0x455   :  { %v19628_v5 = vpop.permute.xlu1 %10664  ;;  %8388 = vst.msk [vmem:[#allocation4 + $0x18] sm:$0xff] %vm1808_vm2, %v14422_v33  ;;  %v8261_v18 = vpop.f32.mrb[83].mxu1  ;;  %14464 = vmatmul.mubr.msk.bf16.gmra.mrb[116].mxu1 %vm1808_vm2, %v13766_v28  ;;  %v9204_v41 = vrot.slane %v13646_v38, 5  ;;  %v11609_v63 = vrot.slane %v11607_v14, 7  ;;  %v13583_v4 = vcombine.low %v19661_v27, %v19650_v32  ;;  %v13844_v40 = vcombine.low %v19663_v52, %v19663_v52 }
 0x456   :  { %11036 = vrot.lane.b32.xlu0 %v10859_v12, %s15187_s16  ;;  %8386 = vst.msk [vmem:[#allocation4 + $0x8] sm:$0xff] %vm1808_vm2, %v8261_v18  ;;  %9059 = vrot.lane.b32.xlu1 %v8912_v20, %s15187_s16  ;;  %v11633_v9 = vshrl.u32 %v19659_v55, 16  ;;  %v13812_v12 = vcombine.low %v19673_v7, %v19663_v52  ;;  %v8930_v43 = vshrl.u32 %v13615_v6, 16  ;;  %v11602_v37 = vshrl.u32 %v13897_v53, 16 }
 0x457   :  { %v11610_v60 = vshll.u32 %v19634_v34, 16  ;;  %v13901_v50 = vcombine.low %v11371_v24, %v11371_v24  ;;  %v8933_v20 = vshll.u32 %v13615_v6, 16  ;;  %v10861_v61 = vshrl.u32 %v13844_v40, 16 }
 0x458   :  { %v19639_v29 = vpop.permute.xlu0 %9045  ;;  %v10864_v48 = vshll.u32 %v13844_v40, 16  ;;  %v11635_v34 = vrot.slane %v11633_v9, 7  ;;  %v13960_v1 = vrot.slane %v11602_v37, 11  ;;  %v11636_v19 = vshll.u32 %v19659_v55, 16  ;;  %v8461_v9 = vld [vmem:[#allocation2 + $0x12c] sm:$0x8] }
 0x459   :  { %v11017_v54 = vpop.permute.xlu1 %11016  ;;  %v11612_v57 = vor.u32 %v11610_v60, %v11609_v63  ;;  %v11628_v45 = vshrl.u32 %v13901_v50, 16  ;;  %v13617_v24 = vcombine.low %v19691_v59, %v19691_v59  ;;  %v8932_v38 = vrot.slane %v8930_v43, 4 }
 0x45a   :  { %10688 = vrot.lane.b32.xlu0 %v13813_v23, %s15186_s7  ;;  %8711 = vrot.lane.b32.xlu1 %v13582_v0, %s15186_s7  ;;  %v11276_v35 = vsel %vm7356_vm4, %v19628_v5, %v11017_v54  ;;  %v8935_v14 = vrot.slane %v8933_v20, 5  ;;  %v11638_v55 = vor.u32 %v11636_v19, %v11635_v34  ;;  %v9307_v63 = vsel %vm7356_vm4, %v19340_v44, %v19600_v46 }
 0x45b   :  { %v11613_v26 = vsel %vm18814_vm7, %v13960_v1, %v11612_v57  ;;  %v8946_v7 = vshrl.u32 %v13617_v24, 16  ;;  %v8501_v57 = vld [vmem:[#allocation2 + $0x11c] sm:$0x1]  ;;  %v9313_v1 = vsel %vm7356_vm4, %v19616_v21, %v19639_v29 }
 0x45c   :  { %v19657_v16 = vpop.permute.xlu0 %9233 }
 0x45d   :  { %v11205_v30 = vpop.permute.xlu1 %11204  ;;  %v19727_v60 = vsel %vm1422_vm1, %v9307_v63, %v19657_v16  ;;  %v13585_v16 = vcombine.low %v8461_v9, %v19691_v59 }
 0x45e   :  { %11040 = vrot.lane.b32.xlu0 %v10875_v51, %s15187_s16  ;;  %v11365_v25 = vsel %vm1422_vm1, %v11270_v56, %v11205_v30  ;;  %9063 = vrot.lane.b32.xlu1 %v8928_v47, %s15187_s16  ;;  %v13846_v51 = vcombine.low %v19696_v13, %v19696_v13  ;;  %v10863_v47 = vrot.slane %v10861_v61, 4 }
 0x45f   :  { %v13895_v3 = vcombine.low %v11365_v25, %v11365_v25  ;;  %v13896_v15 = vcombine.high %v11365_v25, %v11365_v25  ;;  %v13962_v25 = vrot.slane %v11628_v45, 11 }
 0x460   :  { %v19677_v17 = vpop.permute.xlu0 %9237  ;;  %v10880_v43 = vshll.u32 %v13846_v51, 16 }
 0x461   :  { %v11209_v10 = vpop.permute.xlu1 %11208  ;;  %v11589_v39 = vshrl.u32 %v13895_v3, 16  ;;  %v11594_v33 = vshrl.u32 %v13896_v15, 16  ;;  %v11597_v23 = vshll.u32 %v13896_v15, 16  ;;  %v10877_v15 = vshrl.u32 %v13846_v51, 16  ;;  %v19762_v51 = vld [vmem:[#allocation2 + $0x124] sm:$0xf] }
 0x462   :  { %11228 = vrot.lane.b32.xlu0 %v11184_v31, %s15188_s25  ;;  %v11369_v28 = vsel %vm1422_vm1, %v11276_v35, %v11209_v10  ;;  %9251 = vrot.lane.b32.xlu1 %v9202_v2, %s15188_s25  ;;  %v10866_v31 = vrot.slane %v10864_v48, 5  ;;  %v11639_v37 = vsel %vm18814_vm7, %v13962_v25, %v11638_v55  ;;  %v9398_v45 = vsel %vm1422_vm1, %v9313_v1, %v19677_v17 }
 0x463   :  { %v13899_v11 = vcombine.low %v11369_v28, %v11369_v28  ;;  %v11596_v5 = vrot.slane %v11594_v33, 7  ;;  %v13900_v22 = vcombine.high %v11369_v28, %v11369_v28  ;;  %v13959_v54 = vrot.slane %v11589_v39, 11 }
 0x464   :  { %v19694_v18 = vpop.permute.xlu0 %10668  ;;  %v10867_v39 = vor.u32 %v10866_v31, %v10863_v47  ;;  %v8948_v28 = vrot.slane %v8946_v7, 4  ;;  %v10879_v34 = vrot.slane %v10877_v15, 4  ;;  %v19760_v17 = vcombine.high %v9398_v45, %v9398_v45 }
 0x465   :  { %v19699_v0 = vpop.permute.xlu1 %8691  ;;  %v11599_v62 = vor.u32 %v11597_v23, %v11596_v5  ;;  %v11615_v8 = vshrl.u32 %v13899_v11, 16  ;;  %v11620_v49 = vshrl.u32 %v13900_v22, 16  ;;  %v11623_v53 = vshll.u32 %v13900_v22, 16  ;;  %v10481_v23 = vld [vmem:[#allocation2 + $0xbc] sm:$0x1] }
 0x466   :  { %11232 = vrot.lane.b32.xlu0 %v11186_v36, %s15188_s25  ;;  %9255 = vrot.lane.b32.xlu1 %v9204_v41, %s15188_s25  ;;  %v8949_v41 = vshll.u32 %v13617_v24, 16  ;;  %v13676_v11 = vcombine.high %v19727_v60, %v19727_v60  ;;  %v10882_v5 = vrot.slane %v10880_v43, 5  ;;  %v8503_v22 = vld [vmem:[#allocation2 + $0x134] sm:$0x1]  ;;  %v13647_v24 = vcombine.low %v19650_v32, %v8501_v57  ;;  %v19792_v57 = vld [vmem:[#allocation2 + $0x10c] sm:$0xf] }
 0x467   :  { %v11600_v27 = vsel %vm18814_vm7, %v13959_v54, %v11599_v62  ;;  %v11622_v6 = vrot.slane %v11620_v49, 7  ;;  %v13961_v2 = vrot.slane %v11615_v8, 11  ;;  %v19751_v54 = vld [vmem:[#allocation2 + $0xf4] sm:$0xf]  ;;  %v13876_v62 = vcombine.low %v19663_v52, %v10481_v23 }
 0x468   :  { %v19707_v58 = vpop.permute.xlu0 %11020  ;;  %v13999_v30 = vcombine.low %v11600_v27, %v11613_v26  ;;  %v8951_v20 = vrot.slane %v8949_v41, 5  ;;  %v13649_v8 = vcombine.low %v19691_v59, %v8503_v22  ;;  %v9711_v49 = vshrl.u32 %v13676_v11, 16 }
 0x469   :  { %v19713_v56 = vpop.permute.xlu1 %9043  ;;  %v11625_v36 = vor.u32 %v11623_v53, %v11622_v6  ;;  %v10883_v29 = vor.u32 %v10882_v5, %v10879_v34  ;;  %v13847_v32 = vcombine.low %v19751_v54, %v19751_v54  ;;  %v13675_v52 = vcombine.low %v19727_v60, %v19727_v60  ;;  %v19772_v6 = vld [vmem:[#allocation2 + $0x120] sm:$0x8] }
 0x46a   :  { %8713 = vrot.lane.b32.xlu0 %v13583_v4, %s15186_s7  ;;  %v14425_v3 = vpop.f32.mrb[84].mxu1  ;;  %14499 = vmatprep.mubr.msk.bf16.mxu0 %vm1808_vm2, %v13999_v30  ;;  %v8936_v4 = vor.u32 %v8935_v14, %v8932_v38  ;;  %v8952_v21 = vor.u32 %v8951_v20, %v8948_v28  ;;  %v19758_v38 = vld [vmem:[#allocation2 + $0xf0] sm:$0x8]  ;;  %v10483_v14 = vld [vmem:[#allocation2 + $0xd4] sm:$0x1]  ;;  %v9310_v59 = vsel %vm7356_vm4, %v19699_v0, %v19713_v56  ;;  %v9205_v27 = vrot.slane %v13647_v24, 5 }
 0x46b   :  { %10686 = vrot.lane.b32.xlu1 %v13812_v12, %s15186_s7  ;;  %v11626_v44 = vsel %vm18814_vm7, %v13961_v2, %v11625_v36  ;;  %8391 = vst.msk [vmem:[#allocation4 + $0x30] sm:$0xff] %vm1808_vm2, %v14425_v3  ;;  %v8274_v46 = vpop.f32.mrb[85].mxu1  ;;  %v10434_v12 = vld [vmem:[#allocation2 + $0xcc] sm:$0x8]  ;;  %v11185_v30 = vrot.slane %v13876_v62, 5  ;;  %v9207_v47 = vrot.slane %v13649_v8, 5  ;;  %v13815_v31 = vcombine.low %v19758_v38, %v19751_v54 }
 0x46c   :  { %v19721_v40 = vpop.permute.xlu0 %10672  ;;  %v14000_v50 = vcombine.low %v11626_v44, %v11639_v37  ;;  %8389 = vst.msk [vmem:[#allocation4 + $0x20] sm:$0xff] %vm1808_vm2, %v8274_v46  ;;  %v14426_v35 = vpop.f32.mrb[86].mxu1  ;;  %v13814_v48 = vcombine.low %v10434_v12, %v19696_v13  ;;  %v9713_v7 = vrot.slane %v9711_v49, 7  ;;  %v13878_v0 = vcombine.low %v19696_v13, %v10483_v14  ;;  %v19798_v24 = vld [vmem:[#allocation2 + $0x13c] sm:$0xf] }
 0x46d   :  { %v8696_v10 = vpop.permute.xlu1 %8695  ;;  %8392 = vst.msk [vmem:[#allocation4 + $0x38] sm:$0xff] %vm1808_vm2, %v14426_v35  ;;  %v8277_v33 = vpop.f32.mrb[87].mxu1  ;;  %v13616_v56 = vcombine.low %v19762_v51, %v19762_v51  ;;  %v9737_v36 = vshrl.u32 %v19760_v17, 16  ;;  %v13584_v63 = vcombine.low %v19772_v6, %v19762_v51  ;;  %v10885_v3 = vshrl.u32 %v13847_v32, 16 }
 0x46e   :  { %9065 = vrot.lane.b32.xlu0 %v8936_v4, %s15187_s16  ;;  %8390 = vst.msk [vmem:[#allocation4 + $0x28] sm:$0xff] %vm1808_vm2, %v8277_v33  ;;  %14500 = vmatmul.mubr.msk.bf16.vlgmr.msra.gmra.mrb[112].mxu0 %vm1808_vm2, %v14000_v50  ;;  %v9706_v4 = vshrl.u32 %v13675_v52, 16  ;;  %v9714_v9 = vshll.u32 %v13676_v11, 16  ;;  %v13679_v15 = vcombine.low %v9398_v45, %v9398_v45  ;;  %v10888_v46 = vshll.u32 %v13847_v32, 16 }
 0x46f   :  { %11038 = vrot.lane.b32.xlu1 %v10867_v39, %s15187_s16  ;;  %v11187_v39 = vrot.slane %v13878_v0, 5  ;;  %v8938_v33 = vshrl.u32 %v13616_v56, 16  ;;  %v9740_v34 = vshll.u32 %v19760_v17, 16  ;;  %v8941_v23 = vshll.u32 %v13616_v56, 16 }
 0x470   :  { %v19741_v61 = vpop.permute.xlu0 %11024  ;;  %v9716_v12 = vor.u32 %v9714_v9, %v9713_v7  ;;  %v13731_v11 = vrot.slane %v9706_v4, 11  ;;  %v10887_v49 = vrot.slane %v10885_v3, 4  ;;  %v13618_v6 = vcombine.low %v19798_v24, %v19798_v24  ;;  %v10440_v4 = vld [vmem:[#allocation2 + $0x108] sm:$0x8] }
 0x471   :  { %v9048_v19 = vpop.permute.xlu1 %9047  ;;  %v11282_v7 = vsel %vm7356_vm4, %v19694_v18, %v19707_v58 }
 0x472   :  { %8717 = vrot.lane.b32.xlu0 %v13585_v16, %s15186_s7  ;;  %v9316_v43 = vsel %vm7356_vm4, %v8696_v10, %v9048_v19  ;;  %v9739_v16 = vrot.slane %v9737_v36, 7  ;;  %v9717_v62 = vsel %vm18814_vm7, %v13731_v11, %v9716_v12 }
 0x473   :  { %10690 = vrot.lane.b32.xlu1 %v13814_v48, %s15186_s7  ;;  %v9732_v48 = vshrl.u32 %v13679_v15, 16 }
 0x474   :  { %v19756_v26 = vpop.permute.xlu0 %11212  ;;  %v9742_v38 = vor.u32 %v9740_v34, %v9739_v16  ;;  %v8502_v16 = vld [vmem:[#allocation2 + $0x128] sm:$0x1] }
 0x475   :  { %v9236_v55 = vpop.permute.xlu1 %9235  ;;  %v19825_v3 = vsel %vm1422_vm1, %v11282_v7, %v19756_v26  ;;  %v8957_v26 = vshll.u32 %v13618_v6, 16 }
 0x476   :  { %9069 = vrot.lane.b32.xlu0 %v8952_v21, %s15187_s16  ;;  %v9396_v53 = vsel %vm1422_vm1, %v9310_v59, %v9236_v55  ;;  %v10890_v21 = vrot.slane %v10888_v46, 5  ;;  %v8940_v55 = vrot.slane %v8938_v33, 4  ;;  %v13904_v46 = vcombine.high %v19825_v3, %v19825_v3 }
 0x477   :  { %v13677_v25 = vcombine.low %v9396_v53, %v9396_v53  ;;  %11042 = vrot.lane.b32.xlu1 %v10883_v29, %s15187_s16  ;;  %v13678_v41 = vcombine.high %v9396_v53, %v9396_v53  ;;  %v13849_v29 = vcombine.low %v19792_v57, %v19792_v57  ;;  %v13733_v53 = vrot.slane %v9732_v48, 11 }
 0x478   :  { %v19778_v2 = vpop.permute.xlu0 %11216 }
 0x479   :  { %v9240_v37 = vpop.permute.xlu1 %9239  ;;  %v9719_v60 = vshrl.u32 %v13677_v25, 16  ;;  %v9724_v13 = vshrl.u32 %v13678_v41, 16  ;;  %v9727_v20 = vshll.u32 %v13678_v41, 16  ;;  %v10901_v56 = vshrl.u32 %v13849_v29, 16 }
 0x47a   :  { %9257 = vrot.lane.b32.xlu0 %v9205_v27, %s15188_s25  ;;  %v9400_v44 = vsel %vm1422_vm1, %v9316_v43, %v9240_v37  ;;  %v8943_v27 = vrot.slane %v8941_v23, 5  ;;  %v10904_v36 = vshll.u32 %v13849_v29, 16  ;;  %v9743_v41 = vsel %vm18814_vm7, %v13733_v53, %v9742_v38  ;;  %v8463_v37 = vld [vmem:[#allocation2 + $0x138] sm:$0x8] }
 0x47b   :  { %v13681_v50 = vcombine.low %v9400_v44, %v9400_v44  ;;  %11230 = vrot.lane.b32.xlu1 %v11185_v30, %s15188_s25  ;;  %v9726_v28 = vrot.slane %v9724_v13, 7  ;;  %v13682_v10 = vcombine.high %v9400_v44, %v9400_v44  ;;  %v13732_v22 = vrot.slane %v9719_v60, 11  ;;  %v10484_v44 = vld [vmem:[#allocation2 + $0xf8] sm:$0x1] }
 0x47c   :  { %v19790_v35 = vpop.permute.xlu0 %8697  ;;  %v8944_v43 = vor.u32 %v8943_v27, %v8940_v55  ;;  %v8954_v60 = vshrl.u32 %v13618_v6, 16  ;;  %v10906_v33 = vrot.slane %v10904_v36, 5  ;;  %v8959_v23 = vrot.slane %v8957_v26, 5 }
 0x47d   :  { %v19795_v5 = vpop.permute.xlu1 %10670  ;;  %v9729_v1 = vor.u32 %v9727_v20, %v9726_v28  ;;  %v9745_v45 = vshrl.u32 %v13681_v50, 16  ;;  %v9750_v19 = vshrl.u32 %v13682_v10, 16  ;;  %v9753_v32 = vshll.u32 %v13682_v10, 16  ;;  %v10486_v10 = vld [vmem:[#allocation2 + $0x110] sm:$0x1] }
 0x47e   :  { %9261 = vrot.lane.b32.xlu0 %v9207_v47, %s15188_s25  ;;  %v13817_v50 = vcombine.low %v10440_v4, %v19792_v57  ;;  %v11288_v28 = vsel %vm7356_vm4, %v19721_v40, %v19741_v61  ;;  %v13586_v20 = vcombine.low %v8463_v37, %v19798_v24  ;;  %v8956_v34 = vrot.slane %v8954_v60, 4 }
 0x47f   :  { %11234 = vrot.lane.b32.xlu1 %v11187_v39, %s15188_s25  ;;  %v9730_v17 = vsel %vm18814_vm7, %v13732_v22, %v9729_v1  ;;  %v9752_v14 = vrot.slane %v9750_v19, 7  ;;  %v13734_v30 = vrot.slane %v9745_v45, 11  ;;  %v10903_v39 = vrot.slane %v10901_v56, 4  ;;  %v8504_v1 = vld [vmem:[#allocation2 + $0x140] sm:$0x1] }
 0x480   :  { %v19803_v8 = vpop.permute.xlu0 %9049  ;;  %v13767_v59 = vcombine.low %v9717_v62, %v9730_v17  ;;  %v11377_v11 = vsel %vm1422_vm1, %v11288_v28, %v19778_v2  ;;  %v13879_v22 = vcombine.low %v19751_v54, %v10484_v44  ;;  %v13648_v45 = vcombine.low %v19762_v51, %v8502_v16  ;;  %v19858_v2 = vld [vmem:[#allocation2 + $0x148] sm:$0xf]  ;;  %v19863_v54 = vld [vmem:[#allocation2 + $0x100] sm:$0xf] }
 0x481   :  { %v19809_v52 = vpop.permute.xlu1 %11022  ;;  %v9755_v47 = vor.u32 %v9753_v32, %v9752_v14  ;;  %v11646_v19 = vshrl.u32 %v13904_v46, 16  ;;  %v10907_v61 = vor.u32 %v10906_v33, %v10903_v39  ;;  %v13881_v62 = vcombine.low %v19792_v57, %v10486_v10  ;;  %v19871_v32 = vld [vmem:[#allocation2 + $0xfc] sm:$0x8]  ;;  %v19893_v39 = vld [vmem:[#allocation2 + $0x160] sm:$0xf] }
 0x482   :  { %10692 = vrot.lane.b32.xlu0 %v13815_v31, %s15186_s7  ;;  %v14429_v25 = vpop.f32.mrb[88].mxu1  ;;  %14467 = vmatprep.mubr.msk.bf16.mxu1 %vm1808_vm2, %v13767_v59  ;;  %v10891_v31 = vor.u32 %v10890_v21, %v10887_v49  ;;  %v19856_v49 = vld [vmem:[#allocation2 + $0x144] sm:$0x8]  ;;  %v19860_v21 = vcombine.high %v11377_v11, %v11377_v11  ;;  %v13650_v29 = vcombine.low %v19798_v24, %v8504_v1  ;;  %v11188_v14 = vrot.slane %v13879_v22, 5  ;;  %v19899_v22 = vld [vmem:[#allocation2 + $0x118] sm:$0xf] }
 0x483   :  { %8715 = vrot.lane.b32.xlu1 %v13584_v63, %s15186_s7  ;;  %v9756_v18 = vsel %vm18814_vm7, %v13734_v30, %v9755_v47  ;;  %8395 = vst.msk [vmem:[#allocation4 + $0x50] sm:$0xff] %vm1808_vm2, %v14429_v25  ;;  %v8290_v58 = vpop.f32.mrb[89].mxu1  ;;  %v13903_v51 = vcombine.low %v19825_v3, %v19825_v3  ;;  %v11285_v38 = vsel %vm7356_vm4, %v19795_v5, %v19809_v52  ;;  %v9206_v55 = vrot.slane %v13648_v45, 5 }
 0x484   :  { %v19819_v0 = vpop.permute.xlu0 %8701  ;;  %8393 = vst.msk [vmem:[#allocation4 + $0x40] sm:$0xff] %vm1808_vm2, %v8290_v58  ;;  %v14430_v63 = vpop.f32.mrb[90].mxu1  ;;  %v13768_v15 = vcombine.low %v9743_v41, %v9756_v18  ;;  %v8960_v57 = vor.u32 %v8959_v23, %v8956_v34  ;;  %v13587_v24 = vcombine.low %v19856_v49, %v19858_v2  ;;  %v13619_v27 = vcombine.low %v19858_v2, %v19858_v2 }
 0x485   :  { %v19831_v9 = vpop.permute.xlu1 %10674  ;;  %8396 = vst.msk [vmem:[#allocation4 + $0x58] sm:$0xff] %vm1808_vm2, %v14430_v63  ;;  %v8293_v13 = vpop.f32.mrb[91].mxu1  ;;  %v11648_v6 = vrot.slane %v11646_v19, 7  ;;  %v11190_v52 = vrot.slane %v13881_v62, 5  ;;  %v13848_v30 = vcombine.low %v19863_v54, %v19863_v54  ;;  %v11672_v47 = vshrl.u32 %v19860_v21, 16 }
 0x486   :  { %11044 = vrot.lane.b32.xlu0 %v10891_v31, %s15187_s16  ;;  %8394 = vst.msk [vmem:[#allocation4 + $0x48] sm:$0xff] %vm1808_vm2, %v8293_v13  ;;  %14468 = vmatmul.mubr.msk.bf16.gmra.mrb[120].mxu1 %vm1808_vm2, %v13768_v15  ;;  %v9208_v25 = vrot.slane %v13650_v29, 5  ;;  %v13816_v31 = vcombine.low %v19871_v32, %v19863_v54  ;;  %v11641_v56 = vshrl.u32 %v13903_v51, 16  ;;  %v11649_v36 = vshll.u32 %v13904_v46, 16 }
 0x487   :  { %9067 = vrot.lane.b32.xlu1 %v8944_v43, %s15187_s16  ;;  %v13907_v41 = vcombine.low %v11377_v11, %v11377_v11  ;;  %v8962_v15 = vshrl.u32 %v13619_v27, 16  ;;  %v8965_v26 = vshll.u32 %v13619_v27, 16  ;;  %v10893_v13 = vshrl.u32 %v13848_v30, 16 }
 0x488   :  { %v19840_v12 = vpop.permute.xlu0 %9053  ;;  %v11651_v43 = vor.u32 %v11649_v36, %v11648_v6  ;;  %v11674_v44 = vrot.slane %v11672_v47, 7  ;;  %v13963_v33 = vrot.slane %v11641_v56, 11  ;;  %v11675_v28 = vshll.u32 %v19860_v21, 16  ;;  %v8469_v56 = vld [vmem:[#allocation2 + $0x15c] sm:$0x8] }
 0x489   :  { %v11027_v48 = vpop.permute.xlu1 %11026  ;;  %v11667_v16 = vshrl.u32 %v13907_v41, 16  ;;  %v10896_v10 = vshll.u32 %v13848_v30, 16  ;;  %v8964_v19 = vrot.slane %v8962_v15, 4  ;;  %v13621_v62 = vcombine.low %v19893_v39, %v19893_v39 }
 0x48a   :  { %10696 = vrot.lane.b32.xlu0 %v13817_v50, %s15186_s7  ;;  %v11291_v3 = vsel %vm7356_vm4, %v19831_v9, %v11027_v48  ;;  %v11652_v1 = vsel %vm18814_vm7, %v13963_v33, %v11651_v43  ;;  %v11677_v49 = vor.u32 %v11675_v28, %v11674_v44  ;;  %v13850_v32 = vcombine.low %v19899_v22, %v19899_v22  ;;  %v10485_v44 = vld [vmem:[#allocation2 + $0x104] sm:$0x1]  ;;  %v10487_v33 = vld [vmem:[#allocation2 + $0x11c] sm:$0x1] }
 0x48b   :  { %8719 = vrot.lane.b32.xlu1 %v13586_v20, %s15186_s7  ;;  %v9319_v6 = vsel %vm7356_vm4, %v19790_v35, %v19803_v8  ;;  %v8978_v30 = vshrl.u32 %v13621_v62, 16  ;;  %v8981_v47 = vshll.u32 %v13621_v62, 16  ;;  %v19962_v62 = vld [vmem:[#allocation2 + $0x154] sm:$0xf] }
 0x48c   :  { %v19853_v40 = vpop.permute.xlu0 %9241 }
 0x48d   :  { %v11215_v17 = vpop.permute.xlu1 %11214 }
 0x48e   :  { %11048 = vrot.lane.b32.xlu0 %v10907_v61, %s15187_s16  ;;  %v11375_v59 = vsel %vm1422_vm1, %v11285_v38, %v11215_v17  ;;  %v8967_v61 = vrot.slane %v8965_v26, 5  ;;  %v8980_v26 = vrot.slane %v8978_v30, 4 }
 0x48f   :  { %v13905_v53 = vcombine.low %v11375_v59, %v11375_v59  ;;  %9071 = vrot.lane.b32.xlu1 %v8960_v57, %s15187_s16  ;;  %v13906_v7 = vcombine.high %v11375_v59, %v11375_v59  ;;  %v10895_v57 = vrot.slane %v10893_v13, 4  ;;  %v13965_v59 = vrot.slane %v11667_v16, 11 }
 0x490   :  { %v19879_v5 = vpop.permute.xlu0 %9245  ;;  %v8983_v13 = vrot.slane %v8981_v47, 5 }
 0x491   :  { %v11219_v18 = vpop.permute.xlu1 %11218  ;;  %v11654_v58 = vshrl.u32 %v13905_v53, 16  ;;  %v11659_v4 = vshrl.u32 %v13906_v7, 16  ;;  %v11662_v50 = vshll.u32 %v13906_v7, 16  ;;  %v11678_v7 = vsel %vm18814_vm7, %v13965_v59, %v11677_v49 }
 0x492   :  { %11236 = vrot.lane.b32.xlu0 %v11188_v14, %s15188_s25  ;;  %v11379_v63 = vsel %vm1422_vm1, %v11291_v3, %v11219_v18  ;;  %v10898_v14 = vrot.slane %v10896_v10, 5  ;;  %v10442_v18 = vld [vmem:[#allocation2 + $0x114] sm:$0x8] }
 0x493   :  { %v13909_v37 = vcombine.low %v11379_v63, %v11379_v63  ;;  %9259 = vrot.lane.b32.xlu1 %v9206_v55, %s15188_s25  ;;  %v11661_v46 = vrot.slane %v11659_v4, 7  ;;  %v13910_v9 = vcombine.high %v11379_v63, %v11379_v63  ;;  %v13964_v11 = vrot.slane %v11654_v58, 11  ;;  %v8505_v63 = vld [vmem:[#allocation2 + $0x14c] sm:$0x1] }
 0x494   :  { %v19891_v60 = vpop.permute.xlu0 %10676  ;;  %v10899_v3 = vor.u32 %v10898_v14, %v10895_v57  ;;  %v10909_v58 = vshrl.u32 %v13850_v32, 16 }
 0x495   :  { %v19896_v20 = vpop.permute.xlu1 %8699  ;;  %v11664_v48 = vor.u32 %v11662_v50, %v11661_v46  ;;  %v11680_v34 = vshrl.u32 %v13909_v37, 16  ;;  %v11685_v23 = vshrl.u32 %v13910_v9, 16  ;;  %v11688_v51 = vshll.u32 %v13910_v9, 16  ;;  %v8507_v46 = vld [vmem:[#allocation2 + $0x164] sm:$0x1] }
 0x496   :  { %11240 = vrot.lane.b32.xlu0 %v11190_v52, %s15188_s25  ;;  %v13589_v37 = vcombine.low %v8469_v56, %v19893_v39  ;;  %v9325_v50 = vsel %vm7356_vm4, %v19819_v0, %v19840_v12  ;;  %v13818_v9 = vcombine.low %v10442_v18, %v19899_v22  ;;  %v10911_v10 = vrot.slane %v10909_v58, 4 }
 0x497   :  { %9263 = vrot.lane.b32.xlu1 %v9208_v25, %s15188_s25  ;;  %v11665_v21 = vsel %vm18814_vm7, %v13964_v11, %v11664_v48  ;;  %v11687_v29 = vrot.slane %v11685_v23, 7  ;;  %v13966_v55 = vrot.slane %v11680_v34, 11  ;;  %v19926_v25 = vsel %vm1422_vm1, %v9319_v6, %v19853_v40 }
 0x498   :  { %v19904_v45 = vpop.permute.xlu0 %11028  ;;  %v14001_v17 = vcombine.low %v11652_v1, %v11665_v21  ;;  %v10912_v40 = vshll.u32 %v13850_v32, 16  ;;  %v13684_v15 = vcombine.high %v19926_v25, %v19926_v25  ;;  %v9406_v16 = vsel %vm1422_vm1, %v9325_v50, %v19879_v5  ;;  %v19958_v5 = vld [vmem:[#allocation2 + $0x124] sm:$0xf] }
 0x499   :  { %v19910_v38 = vpop.permute.xlu1 %9051  ;;  %v11690_v27 = vor.u32 %v11688_v51, %v11687_v29  ;;  %v13651_v48 = vcombine.low %v19858_v2, %v8505_v63  ;;  %v13880_v34 = vcombine.low %v19863_v54, %v10485_v44  ;;  %v13653_v23 = vcombine.low %v19893_v39, %v8507_v46  ;;  %v10444_v29 = vld [vmem:[#allocation2 + $0x120] sm:$0x8] }
 0x49a   :  { %8721 = vrot.lane.b32.xlu0 %v13587_v24, %s15186_s7  ;;  %v14433_v53 = vpop.f32.mrb[92].mxu1  ;;  %14503 = vmatprep.mubr.msk.bf16.mxu0 %vm1808_vm2, %v14001_v17  ;;  %v8968_v24 = vor.u32 %v8967_v61, %v8964_v19  ;;  %v10914_v11 = vrot.slane %v10912_v40, 5  ;;  %v9763_v1 = vshrl.u32 %v13684_v15, 16  ;;  %v8984_v12 = vor.u32 %v8983_v13, %v8980_v26  ;;  %v19991_v26 = vld [vmem:[#allocation2 + $0x13c] sm:$0xf] }
 0x49b   :  { %10694 = vrot.lane.b32.xlu1 %v13816_v31, %s15186_s7  ;;  %v11691_v35 = vsel %vm18814_vm7, %v13966_v55, %v11690_v27  ;;  %8399 = vst.msk [vmem:[#allocation4 + $0x70] sm:$0xff] %vm1808_vm2, %v14433_v53  ;;  %v8306_v8 = vpop.f32.mrb[93].mxu1  ;;  %v13882_v19 = vcombine.low %v19899_v22, %v10487_v33  ;;  %v19960_v61 = vcombine.high %v9406_v16, %v9406_v16  ;;  %v9209_v21 = vrot.slane %v13651_v48, 5  ;;  %v19970_v22 = vld [vmem:[#allocation2 + $0x150] sm:$0x8] }
 0x49c   :  { %v19920_v52 = vpop.permute.xlu0 %10680  ;;  %8397 = vst.msk [vmem:[#allocation4 + $0x60] sm:$0xff] %vm1808_vm2, %v8306_v8  ;;  %v14434_v31 = vpop.f32.mrb[94].mxu1  ;;  %v14002_v41 = vcombine.low %v11678_v7, %v11691_v35  ;;  %v13683_v2 = vcombine.low %v19926_v25, %v19926_v25  ;;  %v9322_v54 = vsel %vm7356_vm4, %v19896_v20, %v19910_v38  ;;  %v10915_v49 = vor.u32 %v10914_v11, %v10911_v10  ;;  %v19997_v11 = vld [vmem:[#allocation2 + $0x16c] sm:$0xf] }
 0x49d   :  { %v19932_v36 = vpop.permute.xlu1 %8703  ;;  %8400 = vst.msk [vmem:[#allocation4 + $0x78] sm:$0xff] %vm1808_vm2, %v14434_v31  ;;  %v8309_v4 = vpop.f32.mrb[95].mxu1  ;;  %v11189_v17 = vrot.slane %v13880_v34, 5  ;;  %v9211_v57 = vrot.slane %v13653_v23, 5  ;;  %v13851_v14 = vcombine.low %v19958_v5, %v19958_v5  ;;  %v9765_v32 = vrot.slane %v9763_v1, 7 }
 0x49e   :  { %9073 = vrot.lane.b32.xlu0 %v8968_v24, %s15187_s16  ;;  %8398 = vst.msk [vmem:[#allocation4 + $0x68] sm:$0xff] %vm1808_vm2, %v8309_v4  ;;  %14504 = vmatmul.mubr.msk.bf16.gmra.mrb[116].mxu0 %vm1808_vm2, %v14002_v41  ;;  %v11191_v38 = vrot.slane %v13882_v19, 5  ;;  %v13620_v55 = vcombine.low %v19962_v62, %v19962_v62  ;;  %v9789_v27 = vshrl.u32 %v19960_v61, 16  ;;  %v13819_v53 = vcombine.low %v10444_v29, %v19958_v5 }
 0x49f   :  { %11046 = vrot.lane.b32.xlu1 %v10899_v3, %s15187_s16  ;;  %v13588_v24 = vcombine.low %v19970_v22, %v19962_v62  ;;  %v9758_v30 = vshrl.u32 %v13683_v2, 16  ;;  %v9766_v47 = vshll.u32 %v13684_v15, 16  ;;  %v13687_v7 = vcombine.low %v9406_v16, %v9406_v16 }
 0x4a0   :  { %v19941_v43 = vpop.permute.xlu0 %11032  ;;  %v10917_v41 = vshrl.u32 %v13851_v14, 16  ;;  %v10920_v40 = vshll.u32 %v13851_v14, 16  ;;  %v8970_v4 = vshrl.u32 %v13620_v55, 16  ;;  %v9791_v63 = vrot.slane %v9789_v27, 7 }
 0x4a1   :  { %v9056_v28 = vpop.permute.xlu1 %9055  ;;  %v9768_v3 = vor.u32 %v9766_v47, %v9765_v32  ;;  %v13735_v13 = vrot.slane %v9758_v30, 11  ;;  %v9784_v44 = vshrl.u32 %v13687_v7, 16  ;;  %v9792_v46 = vshll.u32 %v19960_v61, 16  ;;  %v10448_v30 = vld [vmem:[#allocation2 + $0x138] sm:$0x8] }
 0x4a2   :  { %8725 = vrot.lane.b32.xlu0 %v13589_v37, %s15186_s7  ;;  %v9328_v25 = vsel %vm7356_vm4, %v19932_v36, %v9056_v28  ;;  %v10919_v23 = vrot.slane %v10917_v41, 4  ;;  %v10922_v1 = vrot.slane %v10920_v40, 5  ;;  %v13622_v22 = vcombine.low %v19997_v11, %v19997_v11 }
 0x4a3   :  { %10698 = vrot.lane.b32.xlu1 %v13818_v9, %s15186_s7  ;;  %v8973_v9 = vshll.u32 %v13620_v55, 16  ;;  %v9769_v48 = vsel %vm18814_vm7, %v13735_v13, %v9768_v3  ;;  %v9794_v19 = vor.u32 %v9792_v46, %v9791_v63  ;;  %v11294_v14 = vsel %vm7356_vm4, %v19891_v60, %v19904_v45  ;;  %v8506_v63 = vld [vmem:[#allocation2 + $0x158] sm:$0x1] }
 0x4a4   :  { %v19955_v0 = vpop.permute.xlu0 %11220 }
 0x4a5   :  { %v9244_v39 = vpop.permute.xlu1 %9243  ;;  %v8975_v29 = vrot.slane %v8973_v9, 5 }
 0x4a6   :  { %9077 = vrot.lane.b32.xlu0 %v8984_v12, %s15187_s16  ;;  %v9404_v51 = vsel %vm1422_vm1, %v9322_v54, %v9244_v39  ;;  %v13853_v12 = vcombine.low %v19991_v26, %v19991_v26 }
 0x4a7   :  { %v13685_v59 = vcombine.low %v9404_v51, %v9404_v51  ;;  %11050 = vrot.lane.b32.xlu1 %v10915_v49, %s15187_s16  ;;  %v13686_v6 = vcombine.high %v9404_v51, %v9404_v51  ;;  %v13737_v51 = vrot.slane %v9784_v44, 11 }
 0x4a8   :  { %v19976_v20 = vpop.permute.xlu0 %11224  ;;  %v10933_v55 = vshrl.u32 %v13853_v12, 16  ;;  %v10936_v27 = vshll.u32 %v13853_v12, 16  ;;  %v20060_v12 = vld [vmem:[#allocation2 + $0x174] sm:$0x8] }
 0x4a9   :  { %v9248_v35 = vpop.permute.xlu1 %9247  ;;  %v9771_v8 = vshrl.u32 %v13685_v59, 16  ;;  %v9776_v56 = vshrl.u32 %v13686_v6, 16  ;;  %v9779_v37 = vshll.u32 %v13686_v6, 16  ;;  %v9795_v6 = vsel %vm18814_vm7, %v13737_v51, %v9794_v19 }
 0x4aa   :  { %9265 = vrot.lane.b32.xlu0 %v9209_v21, %s15188_s25  ;;  %v9408_v31 = vsel %vm1422_vm1, %v9328_v25, %v9248_v35  ;;  %v8972_v21 = vrot.slane %v8970_v4, 4  ;;  %v8471_v35 = vld [vmem:[#allocation2 + $0x168] sm:$0x8]  ;;  %v10935_v40 = vrot.slane %v10933_v55, 4  ;;  %v10938_v4 = vrot.slane %v10936_v27, 5 }
 0x4ab   :  { %v13689_v18 = vcombine.low %v9408_v31, %v9408_v31  ;;  %11238 = vrot.lane.b32.xlu1 %v11189_v17, %s15188_s25  ;;  %v9778_v15 = vrot.slane %v9776_v56, 7  ;;  %v13690_v36 = vcombine.high %v9408_v31, %v9408_v31  ;;  %v13736_v33 = vrot.slane %v9771_v8, 11  ;;  %v10488_v31 = vld [vmem:[#allocation2 + $0x128] sm:$0x1] }
 0x4ac   :  { %v19989_v58 = vpop.permute.xlu0 %8705  ;;  %v8976_v25 = vor.u32 %v8975_v29, %v8972_v21  ;;  %v8986_v8 = vshrl.u32 %v13622_v22, 16 }
 0x4ad   :  { %v19994_v50 = vpop.permute.xlu1 %10678  ;;  %v9781_v16 = vor.u32 %v9779_v37, %v9778_v15  ;;  %v9797_v28 = vshrl.u32 %v13689_v18, 16  ;;  %v9802_v10 = vshrl.u32 %v13690_v36, 16  ;;  %v9805_v54 = vshll.u32 %v13690_v36, 16  ;;  %v10490_v15 = vld [vmem:[#allocation2 + $0x140] sm:$0x1] }
 0x4ae   :  { %9269 = vrot.lane.b32.xlu0 %v9211_v57, %s15188_s25  ;;  %v13821_v18 = vcombine.low %v10448_v30, %v19991_v26  ;;  %v11300_v37 = vsel %vm7356_vm4, %v19920_v52, %v19941_v43  ;;  %v13590_v36 = vcombine.low %v8471_v35, %v19997_v11  ;;  %v8988_v46 = vrot.slane %v8986_v8, 4 }
 0x4af   :  { %11242 = vrot.lane.b32.xlu1 %v11191_v38, %s15188_s25  ;;  %v9782_v61 = vsel %vm18814_vm7, %v13736_v33, %v9781_v16  ;;  %v9804_v2 = vrot.slane %v9802_v10, 7  ;;  %v13738_v17 = vrot.slane %v9797_v28, 11  ;;  %v10923_v38 = vor.u32 %v10922_v1, %v10919_v23  ;;  %v8508_v16 = vld [vmem:[#allocation2 + $0x170] sm:$0x1]  ;;  %v20055_v23 = vld [vmem:[#allocation2 + $0x178] sm:$0xf] }
 0x4b0   :  { %v20002_v34 = vpop.permute.xlu0 %9057  ;;  %v13769_v49 = vcombine.low %v9769_v48, %v9782_v61  ;;  %v11385_v13 = vsel %vm1422_vm1, %v11300_v37, %v19976_v20  ;;  %v13883_v33 = vcombine.low %v19958_v5, %v10488_v31  ;;  %v13652_v28 = vcombine.low %v19962_v62, %v8506_v63  ;;  %v20062_v5 = vld [vmem:[#allocation2 + $0x130] sm:$0xf] }
 0x4b1   :  { %v20008_v39 = vpop.permute.xlu1 %11030  ;;  %v9807_v57 = vor.u32 %v9805_v54, %v9804_v2  ;;  %v13885_v10 = vcombine.low %v19991_v26, %v10490_v15  ;;  %v10939_v43 = vor.u32 %v10938_v4, %v10935_v40  ;;  %v20057_v20 = vcombine.high %v11385_v13, %v11385_v13  ;;  %v20070_v54 = vld [vmem:[#allocation2 + $0x12c] sm:$0x8]  ;;  %v20092_v40 = vld [vmem:[#allocation2 + $0x190] sm:$0xf] }
 0x4b2   :  { %10700 = vrot.lane.b32.xlu0 %v13819_v53, %s15186_s7  ;;  %v14437_v32 = vpop.f32.mrb[96].mxu1  ;;  %14471 = vmatprep.mubr.msk.bf16.mxu1 %vm1808_vm2, %v13769_v49  ;;  %v20024_v53 = vsel %vm1422_vm1, %v11294_v14, %v19955_v0  ;;  %v8989_v0 = vshll.u32 %v13622_v22, 16  ;;  %v13654_v1 = vcombine.low %v19997_v11, %v8508_v16  ;;  %v11297_v26 = vsel %vm7356_vm4, %v19994_v50, %v20008_v39 }
 0x4b3   :  { %8723 = vrot.lane.b32.xlu1 %v13588_v24, %s15186_s7  ;;  %v9808_v60 = vsel %vm18814_vm7, %v13738_v17, %v9807_v57  ;;  %8403 = vst.msk [vmem:[#allocation4 + $0x90] sm:$0xff] %vm1808_vm2, %v14437_v32  ;;  %v8322_v45 = vpop.f32.mrb[97].mxu1  ;;  %v13912_v41 = vcombine.high %v20024_v53, %v20024_v53  ;;  %v13911_v62 = vcombine.low %v20024_v53, %v20024_v53  ;;  %v11192_v2 = vrot.slane %v13883_v33, 5  ;;  %v20098_v33 = vld [vmem:[#allocation2 + $0x148] sm:$0xf] }
 0x4b4   :  { %v20018_v59 = vpop.permute.xlu0 %8709  ;;  %8401 = vst.msk [vmem:[#allocation4 + $0x80] sm:$0xff] %vm1808_vm2, %v8322_v45  ;;  %v14438_v24 = vpop.f32.mrb[98].mxu1  ;;  %v13770_v7 = vcombine.low %v9795_v6, %v9808_v60  ;;  %v8991_v9 = vrot.slane %v8989_v0, 5  ;;  %v9210_v49 = vrot.slane %v13652_v28, 5  ;;  %v11194_v21 = vrot.slane %v13885_v10, 5 }
 0x4b5   :  { %v20030_v47 = vpop.permute.xlu1 %10682  ;;  %8404 = vst.msk [vmem:[#allocation4 + $0x98] sm:$0xff] %vm1808_vm2, %v14438_v24  ;;  %v8325_v56 = vpop.f32.mrb[99].mxu1  ;;  %v11698_v48 = vshrl.u32 %v13912_v41, 16  ;;  %v13623_v29 = vcombine.low %v20055_v23, %v20055_v23  ;;  %v13591_v50 = vcombine.low %v20060_v12, %v20055_v23  ;;  %v13852_v39 = vcombine.low %v20062_v5, %v20062_v5 }
 0x4b6   :  { %11052 = vrot.lane.b32.xlu0 %v10923_v38, %s15187_s16  ;;  %8402 = vst.msk [vmem:[#allocation4 + $0x88] sm:$0xff] %vm1808_vm2, %v8325_v56  ;;  %14472 = vmatmul.mubr.msk.bf16.gmra.mrb[124].mxu1 %vm1808_vm2, %v13770_v7  ;;  %v8992_v61 = vor.u32 %v8991_v9, %v8988_v46  ;;  %v11724_v57 = vshrl.u32 %v20057_v20, 16  ;;  %v9212_v32 = vrot.slane %v13654_v1, 5  ;;  %v13820_v38 = vcombine.low %v20070_v54, %v20062_v5 }
 0x4b7   :  { %9075 = vrot.lane.b32.xlu1 %v8976_v25, %s15187_s16  ;;  %v11700_v22 = vrot.slane %v11698_v48, 7  ;;  %v11693_v55 = vshrl.u32 %v13911_v62, 16  ;;  %v11701_v27 = vshll.u32 %v13912_v41, 16  ;;  %v13915_v6 = vcombine.low %v11385_v13, %v11385_v13 }
 0x4b8   :  { %v20039_v3 = vpop.permute.xlu0 %9061  ;;  %v8994_v7 = vshrl.u32 %v13623_v29, 16  ;;  %v8997_v0 = vshll.u32 %v13623_v29, 16  ;;  %v10925_v56 = vshrl.u32 %v13852_v39, 16  ;;  %v11726_v31 = vrot.slane %v11724_v57, 7 }
 0x4b9   :  { %v11035_v44 = vpop.permute.xlu1 %11034  ;;  %v11703_v25 = vor.u32 %v11701_v27, %v11700_v22  ;;  %v13967_v4 = vrot.slane %v11693_v55, 11  ;;  %v11719_v63 = vshrl.u32 %v13915_v6, 16  ;;  %v11727_v15 = vshll.u32 %v20057_v20, 16  ;;  %v8477_v55 = vld [vmem:[#allocation2 + $0x18c] sm:$0x8] }
 0x4ba   :  { %10704 = vrot.lane.b32.xlu0 %v13821_v18, %s15186_s7  ;;  %v11303_v53 = vsel %vm7356_vm4, %v20030_v47, %v11035_v44  ;;  %v8996_v10 = vrot.slane %v8994_v7, 4  ;;  %v8999_v48 = vrot.slane %v8997_v0, 5  ;;  %v13854_v54 = vcombine.low %v20098_v33, %v20098_v33 }
 0x4bb   :  { %8727 = vrot.lane.b32.xlu1 %v13590_v36, %s15186_s7  ;;  %v10928_v36 = vshll.u32 %v13852_v39, 16  ;;  %v11704_v16 = vsel %vm18814_vm7, %v13967_v4, %v11703_v25  ;;  %v11729_v20 = vor.u32 %v11727_v15, %v11726_v31  ;;  %v9331_v29 = vsel %vm7356_vm4, %v19989_v58, %v20002_v34  ;;  %v10489_v31 = vld [vmem:[#allocation2 + $0x134] sm:$0x1]  ;;  %v10491_v4 = vld [vmem:[#allocation2 + $0x14c] sm:$0x1] }
 0x4bc   :  { %v20053_v52 = vpop.permute.xlu0 %9249 }
 0x4bd   :  { %v11223_v19 = vpop.permute.xlu1 %11222 }
 0x4be   :  { %11056 = vrot.lane.b32.xlu0 %v10939_v43, %s15187_s16  ;;  %v11383_v11 = vsel %vm1422_vm1, %v11297_v26, %v11223_v19  ;;  %v13625_v43 = vcombine.low %v20092_v40, %v20092_v40 }
 0x4bf   :  { %v13913_v51 = vcombine.low %v11383_v11, %v11383_v11  ;;  %9079 = vrot.lane.b32.xlu1 %v8992_v61, %s15187_s16  ;;  %v13914_v14 = vcombine.high %v11383_v11, %v11383_v11  ;;  %v10927_v61 = vrot.slane %v10925_v56, 4  ;;  %v13969_v11 = vrot.slane %v11719_v63, 11 }
 0x4c0   :  { %v20076_v17 = vpop.permute.xlu0 %9253  ;;  %v9010_v39 = vshrl.u32 %v13625_v43, 16  ;;  %v9013_v57 = vshll.u32 %v13625_v43, 16  ;;  %v20161_v43 = vld [vmem:[#allocation2 + $0x184] sm:$0xf] }
 0x4c1   :  { %v11227_v60 = vpop.permute.xlu1 %11226  ;;  %v11706_v45 = vshrl.u32 %v13913_v51, 16  ;;  %v11711_v30 = vshrl.u32 %v13914_v14, 16  ;;  %v11714_v18 = vshll.u32 %v13914_v14, 16  ;;  %v11730_v14 = vsel %vm18814_vm7, %v13969_v11, %v11729_v20 }
 0x4c2   :  { %11244 = vrot.lane.b32.xlu0 %v11192_v2, %s15188_s25  ;;  %v11387_v24 = vsel %vm1422_vm1, %v11303_v53, %v11227_v60  ;;  %v10930_v2 = vrot.slane %v10928_v36, 5  ;;  %v10450_v60 = vld [vmem:[#allocation2 + $0x144] sm:$0x8]  ;;  %v9012_v0 = vrot.slane %v9010_v39, 4  ;;  %v9015_v56 = vrot.slane %v9013_v57, 5 }
 0x4c3   :  { %v13917_v35 = vcombine.low %v11387_v24, %v11387_v24  ;;  %9267 = vrot.lane.b32.xlu1 %v9210_v49, %s15188_s25  ;;  %v11713_v41 = vrot.slane %v11711_v30, 7  ;;  %v13918_v47 = vcombine.high %v11387_v24, %v11387_v24  ;;  %v13968_v13 = vrot.slane %v11706_v45, 11  ;;  %v8509_v24 = vld [vmem:[#allocation2 + $0x17c] sm:$0x1] }
 0x4c4   :  { %v20090_v8 = vpop.permute.xlu0 %10684  ;;  %v10931_v53 = vor.u32 %v10930_v2, %v10927_v61  ;;  %v10941_v45 = vshrl.u32 %v13854_v54, 16 }
 0x4c5   :  { %v20095_v37 = vpop.permute.xlu1 %8707  ;;  %v11716_v44 = vor.u32 %v11714_v18, %v11713_v41  ;;  %v11732_v46 = vshrl.u32 %v13917_v35, 16  ;;  %v11737_v9 = vshrl.u32 %v13918_v47, 16  ;;  %v11740_v62 = vshll.u32 %v13918_v47, 16  ;;  %v8511_v41 = vld [vmem:[#allocation2 + $0x194] sm:$0x1] }
 0x4c6   :  { %11248 = vrot.lane.b32.xlu0 %v11194_v21, %s15188_s25  ;;  %v13593_v35 = vcombine.low %v8477_v55, %v20092_v40  ;;  %v9337_v18 = vsel %vm7356_vm4, %v20018_v59, %v20039_v3  ;;  %v13822_v47 = vcombine.low %v10450_v60, %v20098_v33  ;;  %v10943_v36 = vrot.slane %v10941_v45, 4 }
 0x4c7   :  { %9271 = vrot.lane.b32.xlu1 %v9212_v32, %s15188_s25  ;;  %v11717_v1 = vsel %vm18814_vm7, %v13968_v13, %v11716_v44  ;;  %v11739_v12 = vrot.slane %v11737_v9, 7  ;;  %v13970_v49 = vrot.slane %v11732_v46, 11  ;;  %v20125_v32 = vsel %vm1422_vm1, %v9331_v29, %v20053_v52 }
 0x4c8   :  { %v20103_v28 = vpop.permute.xlu0 %11036  ;;  %v14003_v19 = vcombine.low %v11704_v16, %v11717_v1  ;;  %v10944_v52 = vshll.u32 %v13854_v54, 16  ;;  %v13692_v7 = vcombine.high %v20125_v32, %v20125_v32  ;;  %v9414_v63 = vsel %vm1422_vm1, %v9337_v18, %v20076_v17  ;;  %v20157_v17 = vld [vmem:[#allocation2 + $0x154] sm:$0xf] }
 0x4c9   :  { %v20109_v26 = vpop.permute.xlu1 %9059  ;;  %v11742_v21 = vor.u32 %v11740_v62, %v11739_v12  ;;  %v13655_v44 = vcombine.low %v20055_v23, %v8509_v24  ;;  %v13884_v46 = vcombine.low %v20062_v5, %v10489_v31  ;;  %v13657_v9 = vcombine.low %v20092_v40, %v8511_v41  ;;  %v10452_v12 = vld [vmem:[#allocation2 + $0x150] sm:$0x8] }
 0x4ca   :  { %8729 = vrot.lane.b32.xlu0 %v13591_v50, %s15186_s7  ;;  %v14441_v22 = vpop.f32.mrb[100].mxu1  ;;  %14507 = vmatprep.mubr.msk.bf16.mxu0 %vm1808_vm2, %v14003_v19  ;;  %v9000_v50 = vor.u32 %v8999_v48, %v8996_v10  ;;  %v10946_v13 = vrot.slane %v10944_v52, 5  ;;  %v9815_v16 = vshrl.u32 %v13692_v7, 16  ;;  %v9016_v3 = vor.u32 %v9015_v56, %v9012_v0  ;;  %v20190_v0 = vld [vmem:[#allocation2 + $0x16c] sm:$0xf] }
 0x4cb   :  { %10702 = vrot.lane.b32.xlu1 %v13820_v38, %s15186_s7  ;;  %v11743_v58 = vsel %vm18814_vm7, %v13970_v49, %v11742_v21  ;;  %8407 = vst.msk [vmem:[#allocation4 + $0xb0] sm:$0xff] %vm1808_vm2, %v14441_v22  ;;  %v8338_v34 = vpop.f32.mrb[101].mxu1  ;;  %v13886_v10 = vcombine.low %v20098_v33, %v10491_v4  ;;  %v20159_v48 = vcombine.high %v9414_v63, %v9414_v63  ;;  %v9213_v1 = vrot.slane %v13655_v44, 5  ;;  %v20169_v33 = vld [vmem:[#allocation2 + $0x180] sm:$0x8] }
 0x4cc   :  { %v20119_v51 = vpop.permute.xlu0 %10688  ;;  %8405 = vst.msk [vmem:[#allocation4 + $0xa0] sm:$0xff] %vm1808_vm2, %v8338_v34  ;;  %v14442_v38 = vpop.f32.mrb[102].mxu1  ;;  %v14004_v6 = vcombine.low %v11730_v14, %v11743_v58  ;;  %v13691_v23 = vcombine.low %v20125_v32, %v20125_v32  ;;  %v9334_v5 = vsel %vm7356_vm4, %v20095_v37, %v20109_v26  ;;  %v10947_v20 = vor.u32 %v10946_v13, %v10943_v36  ;;  %v20196_v13 = vld [vmem:[#allocation2 + $0x19c] sm:$0xf] }
 0x4cd   :  { %v20131_v27 = vpop.permute.xlu1 %8711  ;;  %8408 = vst.msk [vmem:[#allocation4 + $0xb8] sm:$0xff] %vm1808_vm2, %v14442_v38  ;;  %v8341_v30 = vpop.f32.mrb[103].mxu1  ;;  %v11193_v19 = vrot.slane %v13884_v46, 5  ;;  %v9215_v61 = vrot.slane %v13657_v9, 5  ;;  %v13855_v2 = vcombine.low %v20157_v17, %v20157_v17  ;;  %v9817_v54 = vrot.slane %v9815_v16, 7 }
 0x4ce   :  { %9081 = vrot.lane.b32.xlu0 %v9000_v50, %s15187_s16  ;;  %8406 = vst.msk [vmem:[#allocation4 + $0xa8] sm:$0xff] %vm1808_vm2, %v8341_v30  ;;  %14508 = vmatmul.mubr.msk.bf16.gmra.mrb[120].mxu0 %vm1808_vm2, %v14004_v6  ;;  %v11195_v26 = vrot.slane %v13886_v10, 5  ;;  %v13624_v49 = vcombine.low %v20161_v43, %v20161_v43  ;;  %v9841_v21 = vshrl.u32 %v20159_v48, 16  ;;  %v13823_v22 = vcombine.low %v10452_v12, %v20157_v17 }
 0x4cf   :  { %11054 = vrot.lane.b32.xlu1 %v10931_v53, %s15187_s16  ;;  %v13592_v50 = vcombine.low %v20169_v33, %v20161_v43  ;;  %v9810_v39 = vshrl.u32 %v13691_v23, 16  ;;  %v9818_v57 = vshll.u32 %v13692_v7, 16  ;;  %v13695_v14 = vcombine.low %v9414_v63, %v9414_v63 }
 0x4d0   :  { %v20140_v25 = vpop.permute.xlu0 %11040  ;;  %v10949_v6 = vshrl.u32 %v13855_v2, 16  ;;  %v10952_v52 = vshll.u32 %v13855_v2, 16  ;;  %v9002_v30 = vshrl.u32 %v13624_v49, 16  ;;  %v9843_v24 = vrot.slane %v9841_v21, 7 }
 0x4d1   :  { %v9064_v15 = vpop.permute.xlu1 %9063  ;;  %v9820_v53 = vor.u32 %v9818_v57, %v9817_v54  ;;  %v13739_v56 = vrot.slane %v9810_v39, 11  ;;  %v9836_v31 = vshrl.u32 %v13695_v14, 16  ;;  %v9844_v41 = vshll.u32 %v20159_v48, 16  ;;  %v10456_v39 = vld [vmem:[#allocation2 + $0x168] sm:$0x8] }
 0x4d2   :  { %8733 = vrot.lane.b32.xlu0 %v13593_v35, %s15186_s7  ;;  %v9340_v32 = vsel %vm7356_vm4, %v20131_v27, %v9064_v15  ;;  %v10951_v9 = vrot.slane %v10949_v6, 4  ;;  %v10954_v16 = vrot.slane %v10952_v52, 5  ;;  %v13626_v33 = vcombine.low %v20196_v13, %v20196_v13 }
 0x4d3   :  { %10706 = vrot.lane.b32.xlu1 %v13822_v47, %s15186_s7  ;;  %v9005_v47 = vshll.u32 %v13624_v49, 16  ;;  %v9821_v44 = vsel %vm18814_vm7, %v13739_v56, %v9820_v53  ;;  %v9846_v10 = vor.u32 %v9844_v41, %v9843_v24  ;;  %v11306_v2 = vsel %vm7356_vm4, %v20090_v8, %v20103_v28  ;;  %v8510_v24 = vld [vmem:[#allocation2 + $0x188] sm:$0x1] }
 0x4d4   :  { %v20154_v59 = vpop.permute.xlu0 %11228 }
 0x4d5   :  { %v9252_v40 = vpop.permute.xlu1 %9251  ;;  %v9007_v12 = vrot.slane %v9005_v47, 5 }
 0x4d6   :  { %9085 = vrot.lane.b32.xlu0 %v9016_v3, %s15187_s16  ;;  %v9412_v62 = vsel %vm1422_vm1, %v9334_v5, %v9252_v40  ;;  %v13857_v3 = vcombine.low %v20190_v0, %v20190_v0 }
 0x4d7   :  { %v13693_v11 = vcombine.low %v9412_v62, %v9412_v62  ;;  %11058 = vrot.lane.b32.xlu1 %v10947_v20, %s15187_s16  ;;  %v13694_v29 = vcombine.high %v9412_v62, %v9412_v62  ;;  %v13741_v62 = vrot.slane %v9836_v31, 11 }
 0x4d8   :  { %v20175_v37 = vpop.permute.xlu0 %11232  ;;  %v10965_v49 = vshrl.u32 %v13857_v3, 16  ;;  %v10968_v21 = vshll.u32 %v13857_v3, 16  ;;  %v20261_v3 = vld [vmem:[#allocation2 + $0x15c] sm:$0x8] }
 0x4d9   :  { %v9256_v58 = vpop.permute.xlu1 %9255  ;;  %v9823_v34 = vshrl.u32 %v13693_v11, 16  ;;  %v9828_v55 = vshrl.u32 %v13694_v29, 16  ;;  %v9831_v35 = vshll.u32 %v13694_v29, 16  ;;  %v9847_v29 = vsel %vm18814_vm7, %v13741_v62, %v9846_v10  ;;  %v20263_v10 = vld [vmem:[#allocation2 + $0x160] sm:$0xf] }
 0x4da   :  { %9273 = vrot.lane.b32.xlu0 %v9213_v1, %s15188_s25  ;;  %v9416_v38 = vsel %vm1422_vm1, %v9340_v32, %v9256_v58  ;;  %v9004_v1 = vrot.slane %v9002_v30, 4  ;;  %v8479_v58 = vld [vmem:[#allocation2 + $0x198] sm:$0x8]  ;;  %v10967_v52 = vrot.slane %v10965_v49, 4  ;;  %v10970_v30 = vrot.slane %v10968_v21, 5 }
 0x4db   :  { %v13697_v60 = vcombine.low %v9416_v38, %v9416_v38  ;;  %11246 = vrot.lane.b32.xlu1 %v11193_v19, %s15188_s25  ;;  %v9830_v7 = vrot.slane %v9828_v55, 7  ;;  %v13698_v27 = vcombine.high %v9416_v38, %v9416_v38  ;;  %v13740_v4 = vrot.slane %v9823_v34, 11  ;;  %v10492_v38 = vld [vmem:[#allocation2 + $0x158] sm:$0x1] }
 0x4dc   :  { %v20188_v45 = vpop.permute.xlu0 %8713  ;;  %v9008_v32 = vor.u32 %v9007_v12, %v9004_v1  ;;  %v9018_v34 = vshrl.u32 %v13626_v33, 16  ;;  %v13887_v47 = vcombine.low %v20157_v17, %v10492_v38 }
 0x4dd   :  { %v20193_v18 = vpop.permute.xlu1 %10686  ;;  %v9833_v63 = vor.u32 %v9831_v35, %v9830_v7  ;;  %v9849_v15 = vshrl.u32 %v13697_v60, 16  ;;  %v9854_v36 = vshrl.u32 %v13698_v27, 16  ;;  %v9857_v5 = vshll.u32 %v13698_v27, 16 }
 0x4de   :  { %9277 = vrot.lane.b32.xlu0 %v9215_v61, %s15188_s25  ;;  %v13825_v60 = vcombine.low %v10456_v39, %v20190_v0  ;;  %v11312_v7 = vsel %vm7356_vm4, %v20119_v51, %v20140_v25  ;;  %v13594_v35 = vcombine.low %v8479_v58, %v20196_v13  ;;  %v9020_v31 = vrot.slane %v9018_v34, 4 }
 0x4df   :  { %11250 = vrot.lane.b32.xlu1 %v11195_v26, %s15188_s25  ;;  %v9834_v48 = vsel %vm18814_vm7, %v13740_v4, %v9833_v63  ;;  %v9856_v23 = vrot.slane %v9854_v36, 7  ;;  %v13742_v19 = vrot.slane %v9849_v15, 11  ;;  %v10955_v26 = vor.u32 %v10954_v16, %v10951_v9  ;;  %v10494_v4 = vld [vmem:[#allocation2 + $0x170] sm:$0x1]  ;;  %v8512_v63 = vld [vmem:[#allocation2 + $0x1a0] sm:$0x1] }
 0x4e0   :  { %v20201_v46 = vpop.permute.xlu0 %9065  ;;  %v13771_v20 = vcombine.low %v9821_v44, %v9834_v48  ;;  %v11393_v27 = vsel %vm1422_vm1, %v11312_v7, %v20175_v37  ;;  %v13656_v15 = vcombine.low %v20161_v43, %v8510_v24  ;;  %v10971_v25 = vor.u32 %v10970_v30, %v10967_v52  ;;  %v20253_v44 = vld [vmem:[#allocation2 + $0x180] sm:$0x8]  ;;  %v20255_v37 = vld [vmem:[#allocation2 + $0x184] sm:$0xf]  ;;  %v20291_v52 = vld [vmem:[#allocation2 + $0x19c] sm:$0xf] }
 0x4e1   :  { %v20207_v40 = vpop.permute.xlu1 %11038  ;;  %v9859_v61 = vor.u32 %v9857_v5, %v9856_v23  ;;  %v20257_v9 = vcombine.high %v11393_v27, %v11393_v27  ;;  %v13889_v16 = vcombine.low %v20190_v0, %v10494_v4  ;;  %v13658_v17 = vcombine.low %v20196_v13, %v8512_v63  ;;  %v20297_v4 = vld [vmem:[#allocation2 + $0x178] sm:$0xf] }
 0x4e2   :  { %10708 = vrot.lane.b32.xlu0 %v13823_v22, %s15186_s7  ;;  %v14445_v54 = vpop.f32.mrb[104].mxu1  ;;  %14475 = vmatprep.mubr.msk.bf16.mxu1 %vm1808_vm2, %v13771_v20  ;;  %v20223_v22 = vsel %vm1422_vm1, %v11306_v2, %v20154_v59  ;;  %v9021_v59 = vshll.u32 %v13626_v33, 16  ;;  %v11309_v48 = vsel %vm7356_vm4, %v20193_v18, %v20207_v40  ;;  %v11196_v20 = vrot.slane %v13887_v47, 5 }
 0x4e3   :  { %8731 = vrot.lane.b32.xlu1 %v13592_v50, %s15186_s7  ;;  %v9860_v8 = vsel %vm18814_vm7, %v13742_v19, %v9859_v61  ;;  %8411 = vst.msk [vmem:[#allocation4 + $0xd0] sm:$0xff] %vm1808_vm2, %v14445_v54  ;;  %v8354_v28 = vpop.f32.mrb[105].mxu1  ;;  %v13920_v6 = vcombine.high %v20223_v22, %v20223_v22  ;;  %v13919_v43 = vcombine.low %v20223_v22, %v20223_v22  ;;  %v9214_v1 = vrot.slane %v13656_v15, 5 }
 0x4e4   :  { %v20217_v11 = vpop.permute.xlu0 %8717  ;;  %8409 = vst.msk [vmem:[#allocation4 + $0xc0] sm:$0xff] %vm1808_vm2, %v8354_v28  ;;  %v14446_v50 = vpop.f32.mrb[106].mxu1  ;;  %v13772_v14 = vcombine.low %v9847_v29, %v9860_v8  ;;  %v9023_v41 = vrot.slane %v9021_v59, 5  ;;  %v13827_v13 = vcombine.low %v20253_v44, %v20255_v37  ;;  %v13859_v12 = vcombine.low %v20255_v37, %v20255_v37 }
 0x4e5   :  { %v20229_v57 = vpop.permute.xlu1 %10690  ;;  %8412 = vst.msk [vmem:[#allocation4 + $0xd8] sm:$0xff] %vm1808_vm2, %v14446_v50  ;;  %v8357_v55 = vpop.f32.mrb[107].mxu1  ;;  %v11750_v36 = vshrl.u32 %v13920_v6, 16  ;;  %v13824_v18 = vcombine.low %v20261_v3, %v20263_v10  ;;  %v13856_v40 = vcombine.low %v20263_v10, %v20263_v10  ;;  %v11776_v61 = vshrl.u32 %v20257_v9, 16 }
 0x4e6   :  { %11060 = vrot.lane.b32.xlu0 %v10955_v26, %s15187_s16  ;;  %8410 = vst.msk [vmem:[#allocation4 + $0xc8] sm:$0xff] %vm1808_vm2, %v8357_v55  ;;  %14476 = vmatmul.mubr.msk.bf16.gmra.mrb[128].mxu1 %vm1808_vm2, %v13772_v14  ;;  %v9024_v5 = vor.u32 %v9023_v41, %v9020_v31  ;;  %v11198_v54 = vrot.slane %v13889_v16, 5  ;;  %v9216_v26 = vrot.slane %v13658_v17, 5  ;;  %v11745_v49 = vshrl.u32 %v13919_v43, 16 }
 0x4e7   :  { %9083 = vrot.lane.b32.xlu1 %v9008_v32, %s15187_s16  ;;  %v11752_v33 = vrot.slane %v11750_v36, 7  ;;  %v11753_v21 = vshll.u32 %v13920_v6, 16  ;;  %v13923_v29 = vcombine.low %v11393_v27, %v11393_v27  ;;  %v10981_v14 = vshrl.u32 %v13859_v12, 16 }
 0x4e8   :  { %v20238_v53 = vpop.permute.xlu0 %9069  ;;  %v10984_v59 = vshll.u32 %v13859_v12, 16  ;;  %v10957_v55 = vshrl.u32 %v13856_v40, 16  ;;  %v11778_v38 = vrot.slane %v11776_v61, 7  ;;  %v13971_v30 = vrot.slane %v11745_v49, 11  ;;  %v10464_v49 = vld [vmem:[#allocation2 + $0x198] sm:$0x8] }
 0x4e9   :  { %v11043_v56 = vpop.permute.xlu1 %11042  ;;  %v11755_v32 = vor.u32 %v11753_v21, %v11752_v33  ;;  %v11771_v24 = vshrl.u32 %v13923_v29, 16  ;;  %v11779_v7 = vshll.u32 %v20257_v9, 16  ;;  %v10960_v27 = vshll.u32 %v13856_v40, 16 }
 0x4ea   :  { %10712 = vrot.lane.b32.xlu0 %v13825_v60, %s15186_s7  ;;  %v11315_v22 = vsel %vm7356_vm4, %v20229_v57, %v11043_v56  ;;  %v10983_v36 = vrot.slane %v10981_v14, 4  ;;  %v13861_v44 = vcombine.low %v20291_v52, %v20291_v52  ;;  %v9343_v33 = vsel %vm7356_vm4, %v20188_v45, %v20201_v46  ;;  %v10496_v14 = vld [vmem:[#allocation2 + $0x188] sm:$0x1] }
 0x4eb   :  { %8735 = vrot.lane.b32.xlu1 %v13594_v35, %s15186_s7  ;;  %v11756_v63 = vsel %vm18814_vm7, %v13971_v30, %v11755_v32  ;;  %v11781_v9 = vor.u32 %v11779_v7, %v11778_v38  ;;  %v9349_v32 = vsel %vm7356_vm4, %v20217_v11, %v20238_v53  ;;  %v13891_v30 = vcombine.low %v20255_v37, %v10496_v14  ;;  %v10498_v7 = vld [vmem:[#allocation2 + $0x1a0] sm:$0x1]  ;;  %v10495_v37 = vld [vmem:[#allocation2 + $0x17c] sm:$0x1] }
 0x4ec   :  { %v20251_v51 = vpop.permute.xlu0 %9257  ;;  %v10997_v40 = vshrl.u32 %v13861_v44, 16  ;;  %v11000_v61 = vshll.u32 %v13861_v44, 16 }
 0x4ed   :  { %v11231_v23 = vpop.permute.xlu1 %11230 }
 0x4ee   :  { %11064 = vrot.lane.b32.xlu0 %v10971_v25, %s15187_s16  ;;  %v11391_v0 = vsel %vm1422_vm1, %v11309_v48, %v11231_v23  ;;  %v10986_v25 = vrot.slane %v10984_v59, 5  ;;  %v10959_v23 = vrot.slane %v10957_v55, 4 }
 0x4ef   :  { %v13921_v62 = vcombine.low %v11391_v0, %v11391_v0  ;;  %9087 = vrot.lane.b32.xlu1 %v9024_v5, %s15187_s16  ;;  %v13922_v2 = vcombine.high %v11391_v0, %v11391_v0  ;;  %v10962_v5 = vrot.slane %v10960_v27, 5  ;;  %v13973_v0 = vrot.slane %v11771_v24, 11 }
 0x4f0   :  { %v20277_v19 = vpop.permute.xlu0 %9261 }
 0x4f1   :  { %v11235_v8 = vpop.permute.xlu1 %11234  ;;  %v11758_v28 = vshrl.u32 %v13921_v62, 16  ;;  %v11763_v39 = vshrl.u32 %v13922_v2, 16  ;;  %v11766_v60 = vshll.u32 %v13922_v2, 16  ;;  %v11782_v2 = vsel %vm18814_vm7, %v13973_v0, %v11781_v9 }
 0x4f2   :  { %11252 = vrot.lane.b32.xlu0 %v11196_v20, %s15188_s25  ;;  %v11395_v50 = vsel %vm1422_vm1, %v11315_v22, %v11235_v8  ;;  %v13858_v20 = vcombine.low %v20297_v4, %v20297_v4  ;;  %v10458_v22 = vld [vmem:[#allocation2 + $0x174] sm:$0x8] }
 0x4f3   :  { %v13925_v58 = vcombine.low %v11395_v50, %v11395_v50  ;;  %9275 = vrot.lane.b32.xlu1 %v9214_v1, %s15188_s25  ;;  %v11765_v6 = vrot.slane %v11763_v39, 7  ;;  %v13926_v57 = vcombine.high %v11395_v50, %v11395_v50  ;;  %v13972_v56 = vrot.slane %v11758_v28, 11 }
 0x4f4   :  { %v20289_v34 = vpop.permute.xlu0 %10692  ;;  %v10973_v21 = vshrl.u32 %v13858_v20, 16  ;;  %v10976_v29 = vshll.u32 %v13858_v20, 16  ;;  %v10999_v39 = vrot.slane %v10997_v40, 4  ;;  %v11002_v50 = vrot.slane %v11000_v61, 5 }
 0x4f5   :  { %v20294_v35 = vpop.permute.xlu1 %8715  ;;  %v11768_v31 = vor.u32 %v11766_v60, %v11765_v6  ;;  %v11784_v41 = vshrl.u32 %v13925_v58, 16  ;;  %v11789_v47 = vshrl.u32 %v13926_v57, 16  ;;  %v11792_v3 = vshll.u32 %v13926_v57, 16  ;;  %v10493_v60 = vld [vmem:[#allocation2 + $0x164] sm:$0x1] }
 0x4f6   :  { %11256 = vrot.lane.b32.xlu0 %v11198_v54, %s15188_s25  ;;  %v9418_v54 = vsel %vm1422_vm1, %v9343_v33, %v20251_v51  ;;  %v13829_v51 = vcombine.low %v10464_v49, %v20291_v52  ;;  %v20335_v58 = vsel %vm1422_vm1, %v9349_v32, %v20277_v19  ;;  %v13826_v55 = vcombine.low %v10458_v22, %v20297_v4  ;;  %v20374_v22 = vld [vmem:[#allocation2 + $0x1a8] sm:$0xf] }
 0x4f7   :  { %9279 = vrot.lane.b32.xlu1 %v9216_v26, %s15188_s25  ;;  %v11769_v16 = vsel %vm18814_vm7, %v13972_v56, %v11768_v31  ;;  %v11791_v17 = vrot.slane %v11789_v47, 7  ;;  %v13974_v1 = vrot.slane %v11784_v41, 11  ;;  %v13700_v8 = vcombine.high %v9418_v54, %v9418_v54  ;;  %v20350_v41 = vld [vmem:[#allocation2 + $0x190] sm:$0xf] }
 0x4f8   :  { %v20302_v15 = vpop.permute.xlu0 %11044  ;;  %v14005_v48 = vcombine.low %v11756_v63, %v11769_v16  ;;  %v10975_v38 = vrot.slane %v10973_v21, 4  ;;  %v10978_v6 = vrot.slane %v10976_v29, 5  ;;  %v11003_v19 = vor.u32 %v11002_v50, %v10999_v39 }
 0x4f9   :  { %v9068_v43 = vpop.permute.xlu1 %9067  ;;  %v11794_v12 = vor.u32 %v11792_v3, %v11791_v17  ;;  %v9867_v24 = vshrl.u32 %v13700_v8, 16  ;;  %v20346_v27 = vcombine.high %v20335_v58, %v20335_v58  ;;  %v13888_v31 = vcombine.low %v20263_v10, %v10493_v60 }
 0x4fa   :  { %10716 = vrot.lane.b32.xlu0 %v13827_v13, %s15186_s7  ;;  %14511 = vmatprep.mubr.msk.bf16.mxu0 %vm1808_vm2, %v14005_v48  ;;  %v10987_v13 = vor.u32 %v10986_v25, %v10983_v36  ;;  %v13699_v47 = vcombine.low %v9418_v54, %v9418_v54  ;;  %v9346_v63 = vsel %vm7356_vm4, %v20294_v35, %v9068_v43  ;;  %v11200_v16 = vrot.slane %v13891_v30, 5 }
 0x4fb   :  { %10710 = vrot.lane.b32.xlu1 %v13824_v18, %s15186_s7  ;;  %v11795_v26 = vsel %vm18814_vm7, %v13974_v1, %v11794_v12  ;;  %v10963_v18 = vor.u32 %v10962_v5, %v10959_v23  ;;  %v10979_v44 = vor.u32 %v10978_v6, %v10975_v38  ;;  %v13893_v10 = vcombine.low %v20291_v52, %v10498_v7  ;;  %v10462_v38 = vld [vmem:[#allocation2 + $0x18c] sm:$0x8] }
 0x4fc   :  { %v20316_v62 = vpop.permute.xlu0 %10696  ;;  %v14006_v46 = vcombine.low %v11782_v2, %v11795_v26  ;;  %v9869_v17 = vrot.slane %v9867_v24, 7  ;;  %v13890_v35 = vcombine.low %v20297_v4, %v10495_v37  ;;  %v13860_v43 = vcombine.low %v20350_v41, %v20350_v41 }
 0x4fd   :  { %v8720_v45 = vpop.permute.xlu1 %8719  ;;  %v9893_v23 = vshrl.u32 %v20346_v27, 16  ;;  %v11197_v20 = vrot.slane %v13888_v31, 5  ;;  %v9862_v0 = vshrl.u32 %v13699_v47, 16  ;;  %v9870_v1 = vshll.u32 %v13700_v8, 16 }
 0x4fe   :  { %11068 = vrot.lane.b32.xlu0 %v10987_v13, %s15187_s16  ;;  %14512 = vmatmul.mubr.msk.bf16.gmra.mrb[124].mxu0 %vm1808_vm2, %v14006_v46  ;;  %v13703_v52 = vcombine.low %v20335_v58, %v20335_v58  ;;  %v11202_v61 = vrot.slane %v13893_v10, 5  ;;  %v11199_v49 = vrot.slane %v13890_v35, 5  ;;  %v10989_v46 = vshrl.u32 %v13860_v43, 16  ;;  %v10466_v35 = vld [vmem:[#allocation2 + $0x1a4] sm:$0x8] }
 0x4ff   :  { %11062 = vrot.lane.b32.xlu1 %v10963_v18, %s15187_s16  ;;  %v9872_v2 = vor.u32 %v9870_v1, %v9869_v17  ;;  %v9895_v18 = vrot.slane %v9893_v23, 7  ;;  %v13743_v8 = vrot.slane %v9862_v0, 11  ;;  %v9896_v39 = vshll.u32 %v20346_v27, 16 }
 0x500   :  { %v20327_v28 = vpop.permute.xlu0 %11048  ;;  %v10992_v14 = vshll.u32 %v13860_v43, 16  ;;  %v10991_v31 = vrot.slane %v10989_v46, 4 }
 0x501   :  { %v9072_v59 = vpop.permute.xlu1 %9071  ;;  %v9873_v6 = vsel %vm18814_vm7, %v13743_v8, %v9872_v2  ;;  %v9898_v30 = vor.u32 %v9896_v39, %v9895_v18  ;;  %v10307_v2 = vld [vmem:[#allocation4] sm:$0xff]  ;;  %v10310_v18 = vld [vmem:[#allocation4 + $0x18] sm:$0xff] }
 0x502   :  { %10720 = vrot.lane.b32.xlu0 %v13829_v51, %s15186_s7  ;;  %v14449_v57 = vpop.f32.mrb[108].mxu1  ;;  %v9352_v12 = vsel %vm7356_vm4, %v8720_v45, %v9072_v59  ;;  %v9888_v51 = vshrl.u32 %v13703_v52, 16  ;;  %v10994_v37 = vrot.slane %v10992_v14, 5 }
 0x503   :  { %8415 = vst.msk [vmem:[#allocation4 + $0xf0] sm:$0xff] %vm1808_vm2, %v14449_v57  ;;  %10714 = vrot.lane.b32.xlu1 %v13826_v55, %s15186_s7  ;;  %v8370_v11 = vpop.f32.mrb[109].mxu1  ;;  %v13862_v57 = vcombine.low %v20374_v22, %v20374_v22 }
 0x504   :  { %v20342_v53 = vpop.permute.xlu0 %11236  ;;  %8413 = vst.msk [vmem:[#allocation4 + $0xe0] sm:$0xff] %vm1808_vm2, %v8370_v11  ;;  %v14450_v56 = vpop.f32.mrb[110].mxu1  ;;  %v13745_v47 = vrot.slane %v9888_v51, 11  ;;  %v10499_v51 = vld [vmem:[#allocation2 + $0x1ac] sm:$0x1] }
 0x505   :  { %8416 = vst.msk [vmem:[#allocation4 + $0xf8] sm:$0xff] %vm1808_vm2, %v14450_v56  ;;  %v9260_v36 = vpop.permute.xlu1 %9259  ;;  %v8373_v25 = vpop.f32.mrb[111].mxu1  ;;  %v13828_v56 = vcombine.low %v10462_v38, %v20350_v41 }
 0x506   :  { %11072 = vrot.lane.b32.xlu0 %v11003_v19, %s15187_s16  ;;  %v9420_v9 = vsel %vm1422_vm1, %v9346_v63, %v9260_v36  ;;  %8414 = vst.msk [vmem:[#allocation4 + $0xe8] sm:$0xff] %vm1808_vm2, %v8373_v25  ;;  %v11318_v25 = vsel %vm7356_vm4, %v20289_v34, %v20302_v15  ;;  %v9899_v10 = vsel %vm18814_vm7, %v13745_v47, %v9898_v30 }
 0x507   :  { %v13701_v3 = vcombine.low %v9420_v9, %v9420_v9  ;;  %11066 = vrot.lane.b32.xlu1 %v10979_v44, %s15187_s16  ;;  %v13702_v5 = vcombine.high %v9420_v9, %v9420_v9  ;;  %v11005_v9 = vshrl.u32 %v13862_v57, 16  ;;  %v11397_v17 = vsel %vm1422_vm1, %v11318_v25, %v20342_v53 }
 0x508   :  { %v20360_v48 = vpop.permute.xlu0 %11240  ;;  %v10995_v15 = vor.u32 %v10994_v37, %v10991_v31  ;;  %v13928_v23 = vcombine.high %v11397_v17, %v11397_v17  ;;  %v11324_v53 = vsel %vm7356_vm4, %v20316_v62, %v20327_v28  ;;  %v13927_v39 = vcombine.low %v11397_v17, %v11397_v17 }
 0x509   :  { %v9264_v33 = vpop.permute.xlu1 %9263  ;;  %v9875_v13 = vshrl.u32 %v13701_v3, 16  ;;  %v9880_v40 = vshrl.u32 %v13702_v5, 16  ;;  %v9883_v29 = vshll.u32 %v13702_v5, 16  ;;  %v11007_v0 = vrot.slane %v11005_v9, 4 }
 0x50a   :  { %11260 = vrot.lane.b32.xlu0 %v11200_v16, %s15188_s25  ;;  %v9424_v4 = vsel %vm1422_vm1, %v9352_v12, %v9264_v33  ;;  %v11008_v16 = vshll.u32 %v13862_v57, 16  ;;  %v11401_v52 = vsel %vm1422_vm1, %v11324_v53, %v20360_v48 }
 0x50b   :  { %v13705_v54 = vcombine.low %v9424_v4, %v9424_v4  ;;  %11254 = vrot.lane.b32.xlu1 %v11197_v20, %s15188_s25  ;;  %v9882_v21 = vrot.slane %v9880_v40, 7  ;;  %v13706_v45 = vcombine.high %v9424_v4, %v9424_v4  ;;  %v13744_v32 = vrot.slane %v9875_v13, 11  ;;  %v10309_v13 = vld [vmem:[#allocation4 + $0x10] sm:$0xff]  ;;  %v10497_v40 = vld [vmem:[#allocation2 + $0x194] sm:$0x1] }
 0x50c   :  { %v20372_v26 = vpop.permute.xlu0 %8721  ;;  %v13830_v20 = vcombine.low %v10466_v35, %v20374_v22  ;;  %v11010_v1 = vrot.slane %v11008_v16, 5  ;;  %v13932_v62 = vcombine.high %v11401_v52, %v11401_v52  ;;  %v13892_v8 = vcombine.low %v20350_v41, %v10497_v40 }
 0x50d   :  { %v20377_v50 = vpop.permute.xlu1 %10694  ;;  %v9885_v58 = vor.u32 %v9883_v29, %v9882_v21  ;;  %v9901_v59 = vshrl.u32 %v13705_v54, 16  ;;  %v9906_v55 = vshrl.u32 %v13706_v45, 16  ;;  %v9909_v19 = vshll.u32 %v13706_v45, 16  ;;  %v10308_v45 = vld [vmem:[#allocation4 + $0x8] sm:$0xff] }
 0x50e   :  { %11264 = vrot.lane.b32.xlu0 %v11202_v61, %s15188_s25  ;;  %v11802_v54 = vshrl.u32 %v13928_v23, 16  ;;  %v11011_v29 = vor.u32 %v11010_v1, %v11007_v0  ;;  %v11828_v57 = vshrl.u32 %v13932_v62, 16  ;;  %v11201_v30 = vrot.slane %v13892_v8, 5 }
 0x50f   :  { %11258 = vrot.lane.b32.xlu1 %v11199_v49, %s15188_s25  ;;  %v9886_v24 = vsel %vm18814_vm7, %v13744_v32, %v9885_v58  ;;  %v9908_v11 = vrot.slane %v9906_v55, 7  ;;  %v13746_v63 = vrot.slane %v9901_v59, 11  ;;  %v11831_v35 = vshll.u32 %v13932_v62, 16  ;;  %v10311_v62 = vld [vmem:[#allocation4 + $0x20] sm:$0xff] }
 0x510   :  { %v20383_v60 = vpop.permute.xlu0 %9073  ;;  %v13773_v27 = vcombine.low %v9873_v6, %v9886_v24  ;;  %v11804_v55 = vrot.slane %v11802_v54, 7  ;;  %v13894_v6 = vcombine.low %v20374_v22, %v10499_v51  ;;  %v11797_v24 = vshrl.u32 %v13927_v39, 16 }
 0x511   :  { %v11047_v7 = vpop.permute.xlu1 %11046  ;;  %v9911_v36 = vor.u32 %v9909_v19, %v9908_v11  ;;  %v11805_v11 = vshll.u32 %v13928_v23, 16  ;;  %v13931_v19 = vcombine.low %v11401_v52, %v11401_v52  ;;  %v11830_v25 = vrot.slane %v11828_v57, 7 }
 0x512   :  { %14479 = vmatprep.mubr.msk.bf16.mxu1 %vm1808_vm2, %v13773_v27  ;;  %v11321_v14 = vsel %vm7356_vm4, %v20377_v50, %v11047_v7  ;;  %v11203_v22 = vrot.slane %v13894_v6, 5  ;;  %v13975_v17 = vrot.slane %v11797_v24, 11 }
 0x513   :  { %10718 = vrot.lane.b32.xlu1 %v13828_v56, %s15186_s7  ;;  %v9912_v3 = vsel %vm18814_vm7, %v13746_v63, %v9911_v36  ;;  %v11807_v47 = vor.u32 %v11805_v11, %v11804_v55  ;;  %v11833_v53 = vor.u32 %v11831_v35, %v11830_v25 }
 0x514   :  { %v20395_v44 = vpop.permute.xlu0 %8725  ;;  %v13774_v34 = vcombine.low %v9899_v10, %v9912_v3  ;;  %v11823_v3 = vshrl.u32 %v13931_v19, 16 }
 0x515   :  { %v10699_v43 = vpop.permute.xlu1 %10698  ;;  %v11808_v0 = vsel %vm18814_vm7, %v13975_v17, %v11807_v47 }
 0x516   :  { %14480 = vmatmul.mubr.msk.bf16.gmra.mrb[132].mxu1 %vm1808_vm2, %v13774_v34 }
 0x517   :  { %11070 = vrot.lane.b32.xlu1 %v10995_v15, %s15187_s16 }
 0x518   :  { %v20405_v5 = vpop.permute.xlu0 %9077  ;;  %v14461_v33 = vpop.f32.mrb[112].mxu1 }
 0x519   :  { %v11051_v12 = vpop.permute.xlu1 %11050  ;;  %v10341_v4 = vadd.f32 %v14461_v33, %v10309_v13  ;;  %v10180_v61 = vpop.f32.mrb[113].mxu1  ;;  %v9361_v6 = vsel %vm7356_vm4, %v20395_v44, %v20405_v5 }
 0x51a   :  { %v10339_v49 = vadd.f32 %v10307_v2, %v10180_v61  ;;  %v14462_v46 = vpop.f32.mrb[114].mxu1  ;;  %v11327_v7 = vsel %vm7356_vm4, %v10699_v43, %v11051_v12 }
 0x51b   :  { %10722 = vrot.lane.b32.xlu1 %v13830_v20, %s15186_s7  ;;  %10373 = vst.msk [vmem:[#allocation4 + $0x10] sm:$0xff] %vm1808_vm2, %v10341_v4  ;;  %v10342_v28 = vadd.f32 %v14462_v46, %v10310_v18  ;;  %v10183_v48 = vpop.f32.mrb[115].mxu1  ;;  %v13977_v4 = vrot.slane %v11823_v3, 11  ;;  %v9355_v46 = vsel %vm7356_vm4, %v20372_v26, %v20383_v60 }
 0x51c   :  { %v20414_v21 = vpop.permute.xlu0 %9265  ;;  %10371 = vst.msk [vmem:[#allocation4] sm:$0xff] %vm1808_vm2, %v10339_v49  ;;  %v10340_v32 = vadd.f32 %v10308_v45, %v10183_v48  ;;  %v10313_v49 = vld [vmem:[#allocation4 + $0x30] sm:$0xff] }
 0x51d   :  { %v11239_v58 = vpop.permute.xlu1 %11238  ;;  %10374 = vst.msk [vmem:[#allocation4 + $0x18] sm:$0xff] %vm1808_vm2, %v10342_v28  ;;  %v11834_v48 = vsel %vm18814_vm7, %v13977_v4, %v11833_v53  ;;  %v9426_v45 = vsel %vm1422_vm1, %v9355_v46, %v20414_v21 }
 0x51e   :  { %v11399_v59 = vsel %vm1422_vm1, %v11321_v14, %v11239_v58  ;;  %10372 = vst.msk [vmem:[#allocation4 + $0x8] sm:$0xff] %vm1808_vm2, %v10340_v32  ;;  %v10314_v14 = vld [vmem:[#allocation4 + $0x38] sm:$0xff]  ;;  %v10312_v32 = vld [vmem:[#allocation4 + $0x28] sm:$0xff]  ;;  %v13707_v19 = vcombine.low %v9426_v45, %v9426_v45 }
 0x51f   :  { %v13929_v38 = vcombine.low %v11399_v59, %v11399_v59  ;;  %11074 = vrot.lane.b32.xlu1 %v11011_v29, %s15187_s16  ;;  %v13930_v50 = vcombine.high %v11399_v59, %v11399_v59 }
 0x520   :  { %v20425_v41 = vpop.permute.xlu0 %9269 }
 0x521   :  { %v11243_v27 = vpop.permute.xlu1 %11242  ;;  %v11810_v56 = vshrl.u32 %v13929_v38, 16  ;;  %v11815_v31 = vshrl.u32 %v13930_v50, 16  ;;  %v11818_v16 = vshll.u32 %v13930_v50, 16  ;;  %v13708_v38 = vcombine.high %v9426_v45, %v9426_v45 }
 0x522   :  { %v11403_v37 = vsel %vm1422_vm1, %v11327_v7, %v11243_v27  ;;  %v9430_v57 = vsel %vm1422_vm1, %v9361_v6, %v20425_v41 }
 0x523   :  { %v13933_v63 = vcombine.low %v11403_v37, %v11403_v37  ;;  %11262 = vrot.lane.b32.xlu1 %v11201_v30, %s15188_s25  ;;  %v11817_v9 = vrot.slane %v11815_v31, 7  ;;  %v13934_v10 = vcombine.high %v11403_v37, %v11403_v37  ;;  %v13976_v34 = vrot.slane %v11810_v56, 11 }
 0x524   :  { %v20431_v36 = vpop.permute.xlu0 %10700  ;;  %v9919_v30 = vshrl.u32 %v13708_v38, 16  ;;  %v13712_v11 = vcombine.high %v9430_v57, %v9430_v57  ;;  %v13711_v25 = vcombine.low %v9430_v57, %v9430_v57 }
 0x525   :  { %v8724_v43 = vpop.permute.xlu1 %8723  ;;  %v11820_v15 = vor.u32 %v11818_v16, %v11817_v9  ;;  %v11836_v23 = vshrl.u32 %v13933_v63, 16  ;;  %v11841_v20 = vshrl.u32 %v13934_v10, 16  ;;  %v11844_v33 = vshll.u32 %v13934_v10, 16 }
 0x526   :  { %v9921_v31 = vrot.slane %v9919_v30, 7  ;;  %v9945_v44 = vshrl.u32 %v13712_v11, 16  ;;  %v9914_v63 = vshrl.u32 %v13707_v19, 16  ;;  %v9940_v53 = vshrl.u32 %v13711_v25, 16  ;;  %v12295_v30 = vld [vmem:[#allocation4 + $0x8] sm:$0xff] }
 0x527   :  { %11266 = vrot.lane.b32.xlu1 %v11203_v22, %s15188_s25  ;;  %v11821_v52 = vsel %vm18814_vm7, %v13976_v34, %v11820_v15  ;;  %v11843_v12 = vrot.slane %v11841_v20, 7  ;;  %v13978_v61 = vrot.slane %v11836_v23, 11  ;;  %v9922_v22 = vshll.u32 %v13708_v38, 16 }
 0x528   :  { %v20436_v1 = vpop.permute.xlu0 %11052  ;;  %v14007_v40 = vcombine.low %v11808_v0, %v11821_v52  ;;  %v14465_v54 = vpop.f32.mrb[116].mxu1  ;;  %v9947_v34 = vrot.slane %v9945_v44, 7  ;;  %v13747_v0 = vrot.slane %v9914_v63, 11  ;;  %v9948_v52 = vshll.u32 %v13712_v11, 16 }
 0x529   :  { %v9076_v13 = vpop.permute.xlu1 %9075  ;;  %v11846_v2 = vor.u32 %v11844_v33, %v11843_v12  ;;  %v10345_v18 = vadd.f32 %v14465_v54, %v10313_v49  ;;  %v10196_v29 = vpop.f32.mrb[117].mxu1  ;;  %v9924_v3 = vor.u32 %v9922_v22, %v9921_v31 }
 0x52a   :  { %14515 = vmatprep.mubr.msk.bf16.mxu0 %vm1808_vm2, %v14007_v40  ;;  %v10343_v51 = vadd.f32 %v10311_v62, %v10196_v29  ;;  %v14466_v39 = vpop.f32.mrb[118].mxu1  ;;  %v9358_v7 = vsel %vm7356_vm4, %v8724_v43, %v9076_v13  ;;  %v9950_v54 = vor.u32 %v9948_v52, %v9947_v34 }
 0x52b   :  { %v11847_v8 = vsel %vm18814_vm7, %v13978_v61, %v11846_v2  ;;  %10377 = vst.msk [vmem:[#allocation4 + $0x30] sm:$0xff] %vm1808_vm2, %v10345_v18  ;;  %v10346_v26 = vadd.f32 %v14466_v39, %v10314_v14  ;;  %v10199_v60 = vpop.f32.mrb[119].mxu1  ;;  %v9925_v61 = vsel %vm18814_vm7, %v13747_v0, %v9924_v3  ;;  %v12296_v39 = vld [vmem:[#allocation4 + $0x10] sm:$0xff]  ;;  %v11330_v14 = vsel %vm7356_vm4, %v20431_v36, %v20436_v1 }
 0x52c   :  { %v20444_v28 = vpop.permute.xlu0 %10704  ;;  %v14008_v59 = vcombine.low %v11834_v48, %v11847_v8  ;;  %10375 = vst.msk [vmem:[#allocation4 + $0x20] sm:$0xff] %vm1808_vm2, %v10343_v51  ;;  %v10344_v55 = vadd.f32 %v10312_v32, %v10199_v60  ;;  %v13749_v48 = vrot.slane %v9940_v53, 11  ;;  %v12294_v32 = vld [vmem:[#allocation4] sm:$0xff] }
 0x52d   :  { %v8728_v58 = vpop.permute.xlu1 %8727  ;;  %10378 = vst.msk [vmem:[#allocation4 + $0x38] sm:$0xff] %vm1808_vm2, %v10346_v26 }
 0x52e   :  { %14516 = vmatmul.mubr.msk.bf16.gmra.mrb[128].mxu0 %vm1808_vm2, %v14008_v59  ;;  %10376 = vst.msk [vmem:[#allocation4 + $0x28] sm:$0xff] %vm1808_vm2, %v10344_v55  ;;  %v9951_v59 = vsel %vm18814_vm7, %v13749_v48, %v9950_v54 }
 0x530   :  { %v20456_v21 = vpop.permute.xlu0 %11056 }
 0x531   :  { %v9080_v50 = vpop.permute.xlu1 %9079 }
 0x532   :  { %v9364_v41 = vsel %vm7356_vm4, %v8728_v58, %v9080_v50  ;;  %v12297_v50 = vld [vmem:[#allocation4 + $0x18] sm:$0xff] }
 0x534   :  { %v11245_v24 = vpop.permute.xlu0 %11244 }
 0x535   :  { %v9268_v27 = vpop.permute.xlu1 %9267  ;;  %v11405_v55 = vsel %vm1422_vm1, %v11330_v14, %v11245_v24 }
 0x536   :  { %v9428_v56 = vsel %vm1422_vm1, %v9358_v7, %v9268_v27  ;;  %v13936_v27 = vcombine.high %v11405_v55, %v11405_v55  ;;  %v13935_v22 = vcombine.low %v11405_v55, %v11405_v55 }
 0x537   :  { %v13709_v37 = vcombine.low %v9428_v56, %v9428_v56  ;;  %v13710_v5 = vcombine.high %v9428_v56, %v9428_v56  ;;  %v11336_v56 = vsel %vm7356_vm4, %v20444_v28, %v20456_v21 }
 0x538   :  { %v20466_v47 = vpop.permute.xlu0 %11248  ;;  %v11854_v44 = vshrl.u32 %v13936_v27, 16  ;;  %v11857_v34 = vshll.u32 %v13936_v27, 16  ;;  %v10315_v27 = vld [vmem:[#allocation4 + $0x40] sm:$0xff] }
 0x539   :  { %v9272_v9 = vpop.permute.xlu1 %9271  ;;  %v9927_v16 = vshrl.u32 %v13709_v37, 16  ;;  %v9932_v10 = vshrl.u32 %v13710_v5, 16  ;;  %v9935_v23 = vshll.u32 %v13710_v5, 16  ;;  %v11409_v31 = vsel %vm1422_vm1, %v11336_v56, %v20466_v47 }
 0x53a   :  { %v9432_v17 = vsel %vm1422_vm1, %v9364_v41, %v9272_v9  ;;  %v13940_v63 = vcombine.high %v11409_v31, %v11409_v31  ;;  %v11856_v28 = vrot.slane %v11854_v44, 7 }
 0x53b   :  { %v13713_v35 = vcombine.low %v9432_v17, %v9432_v17  ;;  %v9934_v15 = vrot.slane %v9932_v10, 7  ;;  %v13714_v20 = vcombine.high %v9432_v17, %v9432_v17  ;;  %v13748_v33 = vrot.slane %v9927_v16, 11 }
 0x53c   :  { %v20470_v43 = vpop.permute.xlu0 %8729  ;;  %v11880_v17 = vshrl.u32 %v13940_v63, 16 }
 0x53d   :  { %v10703_v12 = vpop.permute.xlu1 %10702  ;;  %v9937_v13 = vor.u32 %v9935_v23, %v9934_v15  ;;  %v9953_v40 = vshrl.u32 %v13713_v35, 16  ;;  %v9958_v4 = vshrl.u32 %v13714_v20, 16  ;;  %v9961_v18 = vshll.u32 %v13714_v20, 16 }
 0x53e   :  { %v11849_v35 = vshrl.u32 %v13935_v22, 16  ;;  %v13939_v15 = vcombine.low %v11409_v31, %v11409_v31 }
 0x53f   :  { %v9938_v49 = vsel %vm18814_vm7, %v13748_v33, %v9937_v13  ;;  %v9960_v46 = vrot.slane %v9958_v4, 7  ;;  %v13750_v45 = vrot.slane %v9953_v40, 11  ;;  %v11859_v33 = vor.u32 %v11857_v34, %v11856_v28 }
 0x540   :  { %v20474_v2 = vpop.permute.xlu0 %9081  ;;  %v13775_v62 = vcombine.low %v9925_v61, %v9938_v49  ;;  %v11882_v61 = vrot.slane %v11880_v17, 7 }
 0x541   :  { %v11055_v29 = vpop.permute.xlu1 %11054  ;;  %v9963_v8 = vor.u32 %v9961_v18, %v9960_v46  ;;  %v14501_v51 = vpop.f32.mrb[112].mxu0  ;;  %v13979_v18 = vrot.slane %v11849_v35, 11 }
 0x542   :  { %v12328_v26 = vadd.f32 %v14501_v51, %v12296_v39  ;;  %14483 = vmatprep.mubr.msk.bf16.mxu1 %vm1808_vm2, %v13775_v62  ;;  %v12167_v60 = vpop.f32.mrb[113].mxu0  ;;  %v11333_v25 = vsel %vm7356_vm4, %v10703_v12, %v11055_v29  ;;  %v11875_v29 = vshrl.u32 %v13939_v15, 16  ;;  %v11883_v62 = vshll.u32 %v13940_v63, 16 }
 0x543   :  { %v9964_v38 = vsel %vm18814_vm7, %v13750_v45, %v9963_v8  ;;  %v12326_v6 = vadd.f32 %v12294_v32, %v12167_v60  ;;  %v14502_v57 = vpop.f32.mrb[114].mxu0  ;;  %v11860_v14 = vsel %vm18814_vm7, %v13979_v18, %v11859_v33 }
 0x544   :  { %v20482_v58 = vpop.permute.xlu0 %8733  ;;  %12360 = vst.msk [vmem:[#allocation4 + $0x10] sm:$0xff] %vm1808_vm2, %v12328_v26  ;;  %v12329_v36 = vadd.f32 %v14502_v57, %v12297_v50  ;;  %v12170_v1 = vpop.f32.mrb[115].mxu0  ;;  %v13776_v19 = vcombine.low %v9951_v59, %v9964_v38  ;;  %v11885_v60 = vor.u32 %v11883_v62, %v11882_v61  ;;  %v13981_v57 = vrot.slane %v11875_v29, 11 }
 0x545   :  { %v10707_v11 = vpop.permute.xlu1 %10706  ;;  %12358 = vst.msk [vmem:[#allocation4] sm:$0xff] %vm1808_vm2, %v12326_v6  ;;  %v12327_v7 = vadd.f32 %v12295_v30, %v12170_v1  ;;  %v10317_v30 = vld [vmem:[#allocation4 + $0x50] sm:$0xff] }
 0x546   :  { %12361 = vst.msk [vmem:[#allocation4 + $0x18] sm:$0xff] %vm1808_vm2, %v12329_v36  ;;  %14484 = vmatmul.mubr.msk.bf16.gmra.mrb[136].mxu1 %vm1808_vm2, %v13776_v19  ;;  %v11886_v31 = vsel %vm18814_vm7, %v13981_v57, %v11885_v60 }
 0x547   :  { %12359 = vst.msk [vmem:[#allocation4 + $0x8] sm:$0xff] %vm1808_vm2, %v12327_v7 }
 0x548   :  { %v20493_v24 = vpop.permute.xlu0 %9085 }
 0x549   :  { %v11059_v37 = vpop.permute.xlu1 %11058 }
 0x54a   :  { %v11339_v23 = vsel %vm7356_vm4, %v10707_v11, %v11059_v37  ;;  %v9367_v11 = vsel %vm7356_vm4, %v20470_v43, %v20474_v2 }
 0x54b   :  { %v20516_v0 = vld [vmem:[#allocation4 + $0x10] sm:$0xff] }
 0x54c   :  { %v20501_v5 = vpop.permute.xlu0 %9273  ;;  %v20504_v9 = vld [vmem:[#allocation4] sm:$0xff] }
 0x54d   :  { %v11247_v41 = vpop.permute.xlu1 %11246  ;;  %12454 = vrot.lane.b32.xlu0 %v20504_v9, %s15189_s0  ;;  %v20521_v40 = vld [vmem:[#allocation4 + $0x18] sm:$0xff]  ;;  %v9434_v37 = vsel %vm1422_vm1, %v9367_v11, %v20501_v5 }
 0x54e   :  { %v11407_v16 = vsel %vm1422_vm1, %v11333_v25, %v11247_v41  ;;  %v20509_v10 = vld [vmem:[#allocation4 + $0x8] sm:$0xff]  ;;  %v10318_v25 = vld [vmem:[#allocation4 + $0x58] sm:$0xff]  ;;  %v13716_v17 = vcombine.high %v9434_v37, %v9434_v37 }
 0x54f   :  { %v13937_v21 = vcombine.low %v11407_v16, %v11407_v16  ;;  %v13938_v3 = vcombine.high %v11407_v16, %v11407_v16  ;;  %12456 = vrot.lane.b32.xlu1 %v20509_v10, %s15189_s0  ;;  %v10316_v41 = vld [vmem:[#allocation4 + $0x48] sm:$0xff] }
 0x550   :  { %v20511_v47 = vpop.permute.xlu0 %9277  ;;  %v9971_v15 = vshrl.u32 %v13716_v17, 16 }
 0x551   :  { %v11251_v20 = vpop.permute.xlu1 %11250  ;;  %v11862_v53 = vshrl.u32 %v13937_v21, 16  ;;  %v11867_v52 = vshrl.u32 %v13938_v3, 16  ;;  %12458 = vrot.lane.b32.xlu0 %v20516_v0, %s15189_s0  ;;  %v11870_v49 = vshll.u32 %v13938_v3, 16  ;;  %v9373_v3 = vsel %vm7356_vm4, %v20482_v58, %v20493_v24 }
 0x552   :  { %v11411_v12 = vsel %vm1422_vm1, %v11339_v23, %v11251_v20  ;;  %v9438_v35 = vsel %vm1422_vm1, %v9373_v3, %v20511_v47 }
 0x553   :  { %v13941_v13 = vcombine.low %v11411_v12, %v11411_v12  ;;  %v11869_v54 = vrot.slane %v11867_v52, 7  ;;  %v13942_v46 = vcombine.high %v11411_v12, %v11411_v12  ;;  %12460 = vrot.lane.b32.xlu1 %v20521_v40, %s15189_s0  ;;  %v13980_v45 = vrot.slane %v11862_v53, 11 }
 0x554   :  { %v20523_v4 = vpop.permute.xlu0 %10708  ;;  %v13720_v20 = vcombine.high %v9438_v35, %v9438_v35  ;;  %v13715_v53 = vcombine.low %v9434_v37, %v9434_v37  ;;  %v13719_v18 = vcombine.low %v9438_v35, %v9438_v35 }
 0x555   :  { %v8732_v48 = vpop.permute.xlu1 %8731  ;;  %v11872_v8 = vor.u32 %v11870_v49, %v11869_v54  ;;  %v11888_v51 = vshrl.u32 %v13941_v13, 16  ;;  %v11893_v39 = vshrl.u32 %v13942_v46, 16  ;;  %v11896_v55 = vshll.u32 %v13942_v46, 16 }
 0x556   :  { %v9973_v13 = vrot.slane %v9971_v15, 7  ;;  %v9997_v54 = vshrl.u32 %v13720_v20, 16  ;;  %v9966_v24 = vshrl.u32 %v13715_v53, 16  ;;  %v9974_v46 = vshll.u32 %v13716_v17, 16  ;;  %v12301_v53 = vld [vmem:[#allocation4 + $0x38] sm:$0xff] }
 0x557   :  { %v11873_v32 = vsel %vm18814_vm7, %v13980_v45, %v11872_v8  ;;  %v11895_v59 = vrot.slane %v11893_v39, 7  ;;  %v13982_v50 = vrot.slane %v11888_v51, 11 }
 0x558   :  { %v20529_v26 = vpop.permute.xlu0 %11060  ;;  %v14009_v6 = vcombine.low %v11860_v14, %v11873_v32  ;;  %v9976_v51 = vor.u32 %v9974_v46, %v9973_v13  ;;  %v9999_v39 = vrot.slane %v9997_v54, 7 }
 0x559   :  { %v9084_v38 = vpop.permute.xlu1 %9083  ;;  %v11898_v36 = vor.u32 %v11896_v55, %v11895_v59  ;;  %v14469_v1 = vpop.f32.mrb[120].mxu1  ;;  %v13751_v59 = vrot.slane %v9966_v24, 11  ;;  %v9992_v55 = vshrl.u32 %v13719_v18, 16 }
 0x55a   :  { %v10349_v19 = vadd.f32 %v14469_v1, %v10317_v30  ;;  %v10212_v7 = vpop.f32.mrb[121].mxu1  ;;  %14519 = vmatprep.mubr.msk.bf16.mxu0 %vm1808_vm2, %v14009_v6  ;;  %v9370_v52 = vsel %vm7356_vm4, %v8732_v48, %v9084_v38  ;;  %v10000_v38 = vshll.u32 %v13720_v20, 16 }
 0x55b   :  { %v11899_v44 = vsel %vm18814_vm7, %v13982_v50, %v11898_v36  ;;  %v10347_v63 = vadd.f32 %v10315_v27, %v10212_v7  ;;  %v14470_v22 = vpop.f32.mrb[122].mxu1  ;;  %v9977_v11 = vsel %vm18814_vm7, %v13751_v59, %v9976_v51 }
 0x55c   :  { %v20537_v56 = vpop.permute.xlu0 %10712  ;;  %10381 = vst.msk [vmem:[#allocation4 + $0x50] sm:$0xff] %vm1808_vm2, %v10349_v19  ;;  %v10350_v43 = vadd.f32 %v14470_v22, %v10318_v25  ;;  %v10215_v2 = vpop.f32.mrb[123].mxu1  ;;  %v14010_v28 = vcombine.low %v11886_v31, %v11899_v44  ;;  %v10002_v19 = vor.u32 %v10000_v38, %v9999_v39 }
 0x55d   :  { %v8736_v16 = vpop.permute.xlu1 %8735  ;;  %10379 = vst.msk [vmem:[#allocation4 + $0x40] sm:$0xff] %vm1808_vm2, %v10347_v63  ;;  %v10348_v21 = vadd.f32 %v10316_v41, %v10215_v2  ;;  %v13753_v63 = vrot.slane %v9992_v55, 11  ;;  %v12300_v2 = vld [vmem:[#allocation4 + $0x30] sm:$0xff]  ;;  %v11342_v41 = vsel %vm7356_vm4, %v20523_v4, %v20529_v26 }
 0x55e   :  { %10382 = vst.msk [vmem:[#allocation4 + $0x58] sm:$0xff] %vm1808_vm2, %v10350_v43  ;;  %14520 = vmatmul.mubr.msk.bf16.gmra.mrb[132].mxu0 %vm1808_vm2, %v14010_v28 }
 0x55f   :  { %10380 = vst.msk [vmem:[#allocation4 + $0x48] sm:$0xff] %vm1808_vm2, %v10348_v21  ;;  %v12298_v21 = vld [vmem:[#allocation4 + $0x20] sm:$0xff]  ;;  %v10003_v17 = vsel %vm18814_vm7, %v13753_v63, %v10002_v19 }
 0x560   :  { %v20549_v5 = vpop.permute.xlu0 %11064 }
 0x561   :  { %v9088_v34 = vpop.permute.xlu1 %9087 }
 0x562   :  { %v9376_v47 = vsel %vm7356_vm4, %v8736_v16, %v9088_v34 }
 0x564   :  { %v11253_v23 = vpop.permute.xlu0 %11252 }
 0x565   :  { %v9276_v12 = vpop.permute.xlu1 %9275  ;;  %v11413_v3 = vsel %vm1422_vm1, %v11342_v41, %v11253_v23  ;;  %v11348_v23 = vsel %vm7356_vm4, %v20537_v56, %v20549_v5 }
 0x566   :  { %v9436_v33 = vsel %vm1422_vm1, %v9370_v52, %v9276_v12  ;;  %v12299_v52 = vld [vmem:[#allocation4 + $0x28] sm:$0xff] }
 0x567   :  { %v13717_v61 = vcombine.low %v9436_v33, %v9436_v33  ;;  %v13718_v49 = vcombine.high %v9436_v33, %v9436_v33 }
 0x568   :  { %v11257_v58 = vpop.permute.xlu0 %11256 }
 0x569   :  { %v9280_v29 = vpop.permute.xlu1 %9279  ;;  %v9979_v62 = vshrl.u32 %v13717_v61, 16  ;;  %v9984_v45 = vshrl.u32 %v13718_v49, 16  ;;  %v9987_v60 = vshll.u32 %v13718_v49, 16  ;;  %v13944_v61 = vcombine.high %v11413_v3, %v11413_v3 }
 0x56a   :  { %v9440_v8 = vsel %vm1422_vm1, %v9376_v47, %v9280_v29  ;;  %v11417_v54 = vsel %vm1422_vm1, %v11348_v23, %v11257_v58  ;;  %v13943_v47 = vcombine.low %v11413_v3, %v11413_v3 }
 0x56b   :  { %v13721_v48 = vcombine.low %v9440_v8, %v9440_v8  ;;  %v9986_v14 = vrot.slane %v9984_v45, 7  ;;  %v13722_v32 = vcombine.high %v9440_v8, %v9440_v8  ;;  %v13752_v57 = vrot.slane %v9979_v62, 11 }
 0x56c   :  { %v20561_v30 = vpop.permute.xlu0 %10716  ;;  %v11906_v46 = vshrl.u32 %v13944_v61, 16  ;;  %v13948_v18 = vcombine.high %v11417_v54, %v11417_v54 }
 0x56d   :  { %v10711_v6 = vpop.permute.xlu1 %10710  ;;  %v9989_v50 = vor.u32 %v9987_v60, %v9986_v14  ;;  %v10005_v36 = vshrl.u32 %v13721_v48, 16  ;;  %v10010_v1 = vshrl.u32 %v13722_v32, 16  ;;  %v10013_v31 = vshll.u32 %v13722_v32, 16 }
 0x56e   :  { %v11908_v56 = vrot.slane %v11906_v46, 7  ;;  %v11932_v58 = vshrl.u32 %v13948_v18, 16  ;;  %v11901_v14 = vshrl.u32 %v13943_v47, 16  ;;  %v11909_v60 = vshll.u32 %v13944_v61, 16 }
 0x56f   :  { %v9990_v7 = vsel %vm18814_vm7, %v13752_v57, %v9989_v50  ;;  %v10012_v27 = vrot.slane %v10010_v1, 7  ;;  %v13754_v22 = vrot.slane %v10005_v36, 11  ;;  %v13947_v32 = vcombine.low %v11417_v54, %v11417_v54  ;;  %v10319_v54 = vld [vmem:[#allocation4 + $0x60] sm:$0xff] }
 0x570   :  { %v13777_v44 = vcombine.low %v9977_v11, %v9990_v7  ;;  %v20576_v34 = vpop.permute.xlu0 %11068  ;;  %v11911_v36 = vor.u32 %v11909_v60, %v11908_v56  ;;  %v11934_v19 = vrot.slane %v11932_v58, 7  ;;  %v11935_v63 = vshll.u32 %v13948_v18, 16 }
 0x571   :  { %v11063_v37 = vpop.permute.xlu1 %11062  ;;  %v10015_v25 = vor.u32 %v10013_v31, %v10012_v27  ;;  %v14505_v43 = vpop.f32.mrb[116].mxu0 }
 0x572   :  { %v12332_v16 = vadd.f32 %v14505_v43, %v12300_v2  ;;  %14487 = vmatprep.mubr.msk.bf16.mxu1 %vm1808_vm2, %v13777_v44  ;;  %v12183_v28 = vpop.f32.mrb[117].mxu0  ;;  %v11345_v29 = vsel %vm7356_vm4, %v10711_v6, %v11063_v37  ;;  %v13983_v37 = vrot.slane %v11901_v14, 11  ;;  %v11927_v44 = vshrl.u32 %v13947_v32, 16 }
 0x573   :  { %v10016_v35 = vsel %vm18814_vm7, %v13754_v22, %v10015_v25  ;;  %v12330_v15 = vadd.f32 %v12298_v21, %v12183_v28  ;;  %v14506_v20 = vpop.f32.mrb[118].mxu0  ;;  %v11937_v21 = vor.u32 %v11935_v63, %v11934_v19 }
 0x574   :  { %12364 = vst.msk [vmem:[#allocation4 + $0x30] sm:$0xff] %vm1808_vm2, %v12332_v16  ;;  %v12333_v4 = vadd.f32 %v14506_v20, %v12301_v53  ;;  %v12186_v26 = vpop.f32.mrb[119].mxu0  ;;  %v13778_v33 = vcombine.low %v10003_v17, %v10016_v35  ;;  %v20587_v24 = vpop.permute.xlu0 %10720  ;;  %v11912_v28 = vsel %vm18814_vm7, %v13983_v37, %v11911_v36  ;;  %v13985_v53 = vrot.slane %v11927_v44, 11 }
 0x575   :  { %v10715_v12 = vpop.permute.xlu1 %10714  ;;  %12362 = vst.msk [vmem:[#allocation4 + $0x20] sm:$0xff] %vm1808_vm2, %v12330_v15  ;;  %v12331_v13 = vadd.f32 %v12299_v52, %v12186_v26 }
 0x576   :  { %12365 = vst.msk [vmem:[#allocation4 + $0x38] sm:$0xff] %vm1808_vm2, %v12333_v4  ;;  %14488 = vmatmul.mubr.msk.bf16.gmra.mrb[140].mxu1 %vm1808_vm2, %v13778_v33  ;;  %v11354_v4 = vsel %vm7356_vm4, %v20561_v30, %v20576_v34  ;;  %v10321_v33 = vld [vmem:[#allocation4 + $0x70] sm:$0xff]  ;;  %v10322_v34 = vld [vmem:[#allocation4 + $0x78] sm:$0xff] }
 0x577   :  { %12363 = vst.msk [vmem:[#allocation4 + $0x28] sm:$0xff] %vm1808_vm2, %v12331_v13 }
 0x578   :  { %v11073_v48 = vpop.permute.xlu0 %11072 }
 0x579   :  { %v11067_v49 = vpop.permute.xlu1 %11066  ;;  %v11360_v58 = vsel %vm7356_vm4, %v20587_v24, %v11073_v48 }
 0x57a   :  { %v11351_v59 = vsel %vm7356_vm4, %v10715_v12, %v11067_v49  ;;  %v11938_v49 = vsel %vm18814_vm7, %v13985_v53, %v11937_v21 }
 0x57b   :  { %v20600_v38 = vld [vmem:[#allocation4 + $0x30] sm:$0xff] }
 0x57c   :  { %v20590_v45 = vld [vmem:[#allocation4 + $0x20] sm:$0xff]  ;;  %v11261_v25 = vpop.permute.xlu0 %11260 }
 0x57d   :  { %v11255_v62 = vpop.permute.xlu1 %11254  ;;  %12462 = vrot.lane.b32.xlu0 %v20590_v45, %s15189_s0  ;;  %v20605_v11 = vld [vmem:[#allocation4 + $0x38] sm:$0xff]  ;;  %v11421_v13 = vsel %vm1422_vm1, %v11354_v4, %v11261_v25 }
 0x57e   :  { %v11415_v8 = vsel %vm1422_vm1, %v11345_v29, %v11255_v62  ;;  %v20595_v51 = vld [vmem:[#allocation4 + $0x28] sm:$0xff] }
 0x57f   :  { %v13945_v5 = vcombine.low %v11415_v8, %v11415_v8  ;;  %v13946_v39 = vcombine.high %v11415_v8, %v11415_v8  ;;  %12464 = vrot.lane.b32.xlu1 %v20595_v51, %s15189_s0  ;;  %v10320_v8 = vld [vmem:[#allocation4 + $0x68] sm:$0xff] }
 0x580   :  { %v11265_v46 = vpop.permute.xlu0 %11264 }
 0x581   :  { %v11259_v55 = vpop.permute.xlu1 %11258  ;;  %v11914_v6 = vshrl.u32 %v13945_v5, 16  ;;  %v11919_v57 = vshrl.u32 %v13946_v39, 16  ;;  %12466 = vrot.lane.b32.xlu0 %v20600_v38, %s15189_s0  ;;  %v11922_v27 = vshll.u32 %v13946_v39, 16  ;;  %v13952_v39 = vcombine.high %v11421_v13, %v11421_v13 }
 0x582   :  { %v11419_v50 = vsel %vm1422_vm1, %v11351_v59, %v11259_v55  ;;  %v11425_v60 = vsel %vm1422_vm1, %v11360_v58, %v11265_v46 }
 0x583   :  { %v13949_v1 = vcombine.low %v11419_v50, %v11419_v50  ;;  %v11921_v7 = vrot.slane %v11919_v57, 7  ;;  %v13950_v31 = vcombine.high %v11419_v50, %v11419_v50  ;;  %12468 = vrot.lane.b32.xlu1 %v20605_v11, %s15189_s0  ;;  %v13984_v43 = vrot.slane %v11914_v6, 11 }
 0x584   :  { %v11958_v59 = vshrl.u32 %v13952_v39, 16  ;;  %v13956_v55 = vcombine.high %v11425_v60, %v11425_v60  ;;  %v13951_v6 = vcombine.low %v11421_v13, %v11421_v13 }
 0x585   :  { %v10719_v22 = vpop.permute.xlu1 %10718  ;;  %v11924_v2 = vor.u32 %v11922_v27, %v11921_v7  ;;  %v11940_v41 = vshrl.u32 %v13949_v1, 16  ;;  %v11945_v16 = vshrl.u32 %v13950_v31, 16  ;;  %v11948_v35 = vshll.u32 %v13950_v31, 16 }
 0x586   :  { %v11960_v24 = vrot.slane %v11958_v59, 7  ;;  %v11984_v48 = vshrl.u32 %v13956_v55, 16  ;;  %v11953_v7 = vshrl.u32 %v13951_v6, 16  ;;  %v11961_v27 = vshll.u32 %v13952_v39, 16 }
 0x587   :  { %v11925_v17 = vsel %vm18814_vm7, %v13984_v43, %v11924_v2  ;;  %v11947_v3 = vrot.slane %v11945_v16, 7  ;;  %v13986_v26 = vrot.slane %v11940_v41, 11  ;;  %v13955_v31 = vcombine.low %v11425_v60, %v11425_v60  ;;  %v12303_v60 = vld [vmem:[#allocation4 + $0x48] sm:$0xff] }
 0x588   :  { %v14011_v20 = vcombine.low %v11912_v28, %v11925_v17  ;;  %v11963_v43 = vor.u32 %v11961_v27, %v11960_v24  ;;  %v11986_v2 = vrot.slane %v11984_v48, 7  ;;  %v13987_v17 = vrot.slane %v11953_v7, 11  ;;  %v10326_v7 = vld [vmem:[#allocation4 + $0x98] sm:$0xff] }
 0x589   :  { %v11071_v15 = vpop.permute.xlu1 %11070  ;;  %v11950_v52 = vor.u32 %v11948_v35, %v11947_v3  ;;  %v14473_v12 = vpop.f32.mrb[124].mxu1  ;;  %v11979_v3 = vshrl.u32 %v13955_v31, 16  ;;  %v11987_v35 = vshll.u32 %v13956_v55, 16 }
 0x58a   :  { %v10353_v61 = vadd.f32 %v14473_v12, %v10321_v33  ;;  %v10228_v23 = vpop.f32.mrb[125].mxu1  ;;  %14523 = vmatprep.mubr.msk.bf16.mxu0 %vm1808_vm2, %v14011_v20  ;;  %v11357_v57 = vsel %vm7356_vm4, %v10719_v22, %v11071_v15 }
 0x58b   :  { %v11951_v18 = vsel %vm18814_vm7, %v13986_v26, %v11950_v52  ;;  %v10351_v47 = vadd.f32 %v10319_v54, %v10228_v23  ;;  %v14474_v30 = vpop.f32.mrb[126].mxu1  ;;  %v11964_v26 = vsel %vm18814_vm7, %v13987_v17, %v11963_v43  ;;  %v11989_v52 = vor.u32 %v11987_v35, %v11986_v2 }
 0x58c   :  { %10385 = vst.msk [vmem:[#allocation4 + $0x70] sm:$0xff] %vm1808_vm2, %v10353_v61  ;;  %v10354_v29 = vadd.f32 %v14474_v30, %v10322_v34  ;;  %v10231_v62 = vpop.f32.mrb[127].mxu1  ;;  %v14012_v5 = vcombine.low %v11938_v49, %v11951_v18  ;;  %v13989_v23 = vrot.slane %v11979_v3, 11  ;;  %v12304_v18 = vld [vmem:[#allocation4 + $0x50] sm:$0xff] }
 0x58d   :  { %v10723_v56 = vpop.permute.xlu1 %10722  ;;  %10383 = vst.msk [vmem:[#allocation4 + $0x60] sm:$0xff] %vm1808_vm2, %v10351_v47  ;;  %v10352_v14 = vadd.f32 %v10320_v8, %v10231_v62  ;;  %v12302_v62 = vld [vmem:[#allocation4 + $0x40] sm:$0xff] }
 0x58e   :  { %10386 = vst.msk [vmem:[#allocation4 + $0x78] sm:$0xff] %vm1808_vm2, %v10354_v29  ;;  %14524 = vmatmul.mubr.msk.bf16.gmra.mrb[136].mxu0 %vm1808_vm2, %v14012_v5  ;;  %v11990_v47 = vsel %vm18814_vm7, %v13989_v23, %v11989_v52  ;;  %v12305_v5 = vld [vmem:[#allocation4 + $0x58] sm:$0xff] }
 0x58f   :  { %10384 = vst.msk [vmem:[#allocation4 + $0x68] sm:$0xff] %vm1808_vm2, %v10352_v14 }
 0x591   :  { %v11075_v32 = vpop.permute.xlu1 %11074 }
 0x592   :  { %v11363_v37 = vsel %vm7356_vm4, %v10723_v56, %v11075_v32 }
 0x594   :  { %v12306_v52 = vld [vmem:[#allocation4 + $0x60] sm:$0xff] }
 0x595   :  { %v11263_v50 = vpop.permute.xlu1 %11262 }
 0x596   :  { %v11423_v36 = vsel %vm1422_vm1, %v11357_v57, %v11263_v50  ;;  %v10325_v50 = vld [vmem:[#allocation4 + $0x90] sm:$0xff] }
 0x597   :  { %v13953_v1 = vcombine.low %v11423_v36, %v11423_v36  ;;  %v13954_v19 = vcombine.high %v11423_v36, %v11423_v36  ;;  %v10323_v36 = vld [vmem:[#allocation4 + $0x80] sm:$0xff] }
 0x599   :  { %v11966_v44 = vshrl.u32 %v13953_v1, 16  ;;  %v11971_v63 = vshrl.u32 %v13954_v19, 16  ;;  %v11267_v25 = vpop.permute.xlu1 %11266  ;;  %v11974_v16 = vshll.u32 %v13954_v19, 16 }
 0x59a   :  { %v11427_v41 = vsel %vm1422_vm1, %v11363_v37, %v11267_v25  ;;  %v10324_v37 = vld [vmem:[#allocation4 + $0x88] sm:$0xff] }
 0x59b   :  { %v11973_v22 = vrot.slane %v11971_v63, 7  ;;  %v13957_v28 = vcombine.low %v11427_v41, %v11427_v41  ;;  %v13958_v21 = vcombine.high %v11427_v41, %v11427_v41  ;;  %v13988_v15 = vrot.slane %v11966_v44, 11  ;;  %v20673_v41 = vld [vmem:[%s20889_s4] ss:$0 sm:$0xff] }
 0x59d   :  { %v11976_v20 = vor.u32 %v11974_v16, %v11973_v22  ;;  %v11992_v53 = vshrl.u32 %v13957_v28, 16  ;;  %v11997_v4 = vshrl.u32 %v13958_v21, 16  ;;  %v12000_v13 = vshll.u32 %v13958_v21, 16 }
 0x59f   :  { %v11977_v12 = vsel %vm18814_vm7, %v13988_v15, %v11976_v20  ;;  %v11999_v33 = vrot.slane %v11997_v4, 7  ;;  %v13990_v54 = vrot.slane %v11992_v53, 11  ;;  %v12308_v4 = vld [vmem:[#allocation4 + $0x70] sm:$0xff] }
 0x5a0   :  { %v14013_v61 = vcombine.low %v11964_v26, %v11977_v12 }
 0x5a1   :  { %v12002_v49 = vor.u32 %v12000_v13, %v11999_v33  ;;  %v14509_v46 = vpop.f32.mrb[120].mxu0  ;;  %v12309_v13 = vld [vmem:[#allocation4 + $0x78] sm:$0xff] }
 0x5a2   :  { %14527 = vmatprep.mubr.msk.bf16.mxu0 %vm1808_vm2, %v14013_v61  ;;  %v12336_v34 = vadd.f32 %v14509_v46, %v12304_v18  ;;  %v12199_v29 = vpop.f32.mrb[121].mxu0 }
 0x5a3   :  { %v12003_v30 = vsel %vm18814_vm7, %v13990_v54, %v12002_v49  ;;  %v12334_v8 = vadd.f32 %v12302_v62, %v12199_v29  ;;  %v14510_v56 = vpop.f32.mrb[122].mxu0  ;;  %v12307_v54 = vld [vmem:[#allocation4 + $0x68] sm:$0xff]  ;;  %v10329_v29 = vld [vmem:[#allocation4 + $0xb0] sm:$0xff] }
 0x5a4   :  { %v14014_v58 = vcombine.low %v11990_v47, %v12003_v30  ;;  %12368 = vst.msk [vmem:[#allocation4 + $0x50] sm:$0xff] %vm1808_vm2, %v12336_v34  ;;  %v12337_v39 = vadd.f32 %v14510_v56, %v12305_v5  ;;  %v12202_v14 = vpop.f32.mrb[123].mxu0  ;;  %v10327_v56 = vld [vmem:[#allocation4 + $0xa0] sm:$0xff] }
 0x5a5   :  { %12366 = vst.msk [vmem:[#allocation4 + $0x40] sm:$0xff] %vm1808_vm2, %v12334_v8  ;;  %v12335_v32 = vadd.f32 %v12303_v60, %v12202_v14 }
 0x5a6   :  { %14528 = vmatmul.mubr.msk.bf16.gmra.mrb[140].mxu0 %vm1808_vm2, %v14014_v58  ;;  %12369 = vst.msk [vmem:[#allocation4 + $0x58] sm:$0xff] %vm1808_vm2, %v12337_v39  ;;  %v10330_v39 = vld [vmem:[#allocation4 + $0xb8] sm:$0xff] }
 0x5a7   :  { %12367 = vst.msk [vmem:[#allocation4 + $0x48] sm:$0xff] %vm1808_vm2, %v12335_v32  ;;  %v10328_v32 = vld [vmem:[#allocation4 + $0xa8] sm:$0xff] }
 0x5ab   :  { %v20656_v55 = vld [vmem:[#allocation4 + $0x50] sm:$0xff] }
 0x5ac   :  { %v20648_v42 = vld [vmem:[#allocation4 + $0x40] sm:$0xff] }
 0x5ad   :  { %12470 = vrot.lane.b32.xlu0 %v20648_v42, %s15189_s0  ;;  %v20660_v6 = vld [vmem:[#allocation4 + $0x58] sm:$0xff] }
 0x5ae   :  { %v20652_v59 = vld [vmem:[#allocation4 + $0x48] sm:$0xff] }
 0x5af   :  { %12472 = vrot.lane.b32.xlu1 %v20652_v59, %s15189_s0 }
 0x5b1   :  { %12474 = vrot.lane.b32.xlu0 %v20656_v55, %s15189_s0 }
 0x5b3   :  { %12476 = vrot.lane.b32.xlu1 %v20660_v6, %s15189_s0 }
 0x5b9   :  { %v14477_v57 = vpop.f32.mrb[128].mxu1 }
 0x5ba   :  { %v10357_v24 = vadd.f32 %v14477_v57, %v10325_v50  ;;  %v10244_v48 = vpop.f32.mrb[129].mxu1 }
 0x5bb   :  { %v10355_v1 = vadd.f32 %v10323_v36, %v10244_v48  ;;  %v14478_v19 = vpop.f32.mrb[130].mxu1 }
 0x5bc   :  { %10389 = vst.msk [vmem:[#allocation4 + $0x90] sm:$0xff] %vm1808_vm2, %v10357_v24  ;;  %v10358_v27 = vadd.f32 %v14478_v19, %v10326_v7  ;;  %v10247_v31 = vpop.f32.mrb[131].mxu1 }
 0x5bd   :  { %10387 = vst.msk [vmem:[#allocation4 + $0x80] sm:$0xff] %vm1808_vm2, %v10355_v1  ;;  %v10356_v44 = vadd.f32 %v10324_v37, %v10247_v31 }
 0x5be   :  { %10390 = vst.msk [vmem:[#allocation4 + $0x98] sm:$0xff] %vm1808_vm2, %v10358_v27 }
 0x5bf   :  { %10388 = vst.msk [vmem:[#allocation4 + $0x88] sm:$0xff] %vm1808_vm2, %v10356_v44  ;;  %v12455_v63 = vpop.permute.xlu0 %12454 }
 0x5c0   :  { %v12550_v43 = vmax.f32 %v20504_v9, %v12455_v63 }
 0x5c1   :  { %v12457_v25 = vpop.permute.xlu1 %12456 }
 0x5c2   :  { %v12551_v2 = vmax.f32 %v20509_v10, %v12457_v25 }
 0x5c3   :  { %v12459_v22 = vpop.permute.xlu0 %12458 }
 0x5c4   :  { %v12582_v16 = vmax.f32 %v12550_v43, %v12551_v2  ;;  %v12552_v17 = vmax.f32 %v20516_v0, %v12459_v22  ;;  %v12312_v2 = vld [vmem:[#allocation4 + $0x90] sm:$0xff] }
 0x5c5   :  { %v12461_v28 = vpop.permute.xlu1 %12460 }
 0x5c6   :  { %v12605_v21 = vadd.f32 %v20673_v41, %v12582_v16  ;;  %v12553_v3 = vmax.f32 %v20521_v40, %v12461_v28  ;;  %v12310_v16 = vld [vmem:[#allocation4 + $0x80] sm:$0xff] }
 0x5c8   :  { %v12621_v35 = vmax.f32 %v12605_v21, 0.0  ;;  %v12583_v15 = vmax.f32 %v12552_v17, %v12553_v3  ;;  %v12313_v17 = vld [vmem:[#allocation4 + $0x98] sm:$0xff] }
 0x5ca   :  { %v12637_v20 = vpack.c.bf16 %v12621_v35, %v12621_v35  ;;  %v12606_v9 = vadd.f32 %v20673_v41, %v12583_v15  ;;  %v12311_v15 = vld [vmem:[#allocation4 + $0x88] sm:$0xff] }
 0x5cc   :  { %12653 = vst.msk [vmem:[%s20890_s5] sm:$0xf] %vm6350_vm3, %v12637_v20  ;;  %v12622_v10 = vmax.f32 %v12606_v9, 0.0 }
 0x5ce   :  { %v12638_v53 = vpack.c.bf16 %v12622_v10, %v12622_v10 }
 0x5d0   :  { %12654 = vst.msk [vmem:[%s20890_s5 + $0x4] sm:$0xf] %vm6350_vm3, %v12638_v53 }
 0x5d1   :  { %v14513_v0 = vpop.f32.mrb[124].mxu0 }
 0x5d2   :  { %v12340_v40 = vadd.f32 %v14513_v0, %v12308_v4  ;;  %v12215_v26 = vpop.f32.mrb[125].mxu0 }
 0x5d3   :  { %v12338_v12 = vadd.f32 %v12306_v52, %v12215_v26  ;;  %v14514_v33 = vpop.f32.mrb[126].mxu0 }
 0x5d4   :  { %12372 = vst.msk [vmem:[#allocation4 + $0x70] sm:$0xff] %vm1808_vm2, %v12340_v40  ;;  %v12341_v61 = vadd.f32 %v14514_v33, %v12309_v13  ;;  %v12218_v23 = vpop.f32.mrb[127].mxu0  ;;  %v10333_v40 = vld [vmem:[#allocation4 + $0xd0] sm:$0xff] }
 0x5d5   :  { %12370 = vst.msk [vmem:[#allocation4 + $0x60] sm:$0xff] %vm1808_vm2, %v12338_v12  ;;  %v12339_v49 = vadd.f32 %v12307_v54, %v12218_v23  ;;  %v10331_v12 = vld [vmem:[#allocation4 + $0xc0] sm:$0xff] }
 0x5d6   :  { %12373 = vst.msk [vmem:[#allocation4 + $0x78] sm:$0xff] %vm1808_vm2, %v12341_v61  ;;  %v10334_v61 = vld [vmem:[#allocation4 + $0xd8] sm:$0xff] }
 0x5d7   :  { %12371 = vst.msk [vmem:[#allocation4 + $0x68] sm:$0xff] %vm1808_vm2, %v12339_v49  ;;  %v10332_v49 = vld [vmem:[#allocation4 + $0xc8] sm:$0xff] }
 0x5db   :  { %v20699_v47 = vld [vmem:[#allocation4 + $0x70] sm:$0xff] }
 0x5dc   :  { %v20691_v46 = vld [vmem:[#allocation4 + $0x60] sm:$0xff] }
 0x5dd   :  { %12478 = vrot.lane.b32.xlu0 %v20691_v46, %s15189_s0  ;;  %v20703_v30 = vld [vmem:[#allocation4 + $0x78] sm:$0xff] }
 0x5de   :  { %v20695_v18 = vld [vmem:[#allocation4 + $0x68] sm:$0xff] }
 0x5df   :  { %12480 = vrot.lane.b32.xlu1 %v20695_v18, %s15189_s0 }
 0x5e1   :  { %12482 = vrot.lane.b32.xlu0 %v20699_v47, %s15189_s0 }
 0x5e3   :  { %12484 = vrot.lane.b32.xlu1 %v20703_v30, %s15189_s0 }
 0x5e9   :  { %v14481_v34 = vpop.f32.mrb[132].mxu1 }
 0x5ea   :  { %v10361_v62 = vadd.f32 %v14481_v34, %v10329_v29  ;;  %v10260_v8 = vpop.f32.mrb[133].mxu1 }
 0x5eb   :  { %v10359_v5 = vadd.f32 %v10327_v56, %v10260_v8  ;;  %v14482_v58 = vpop.f32.mrb[134].mxu1 }
 0x5ec   :  { %10393 = vst.msk [vmem:[#allocation4 + $0xb0] sm:$0xff] %vm1808_vm2, %v10361_v62  ;;  %v10362_v14 = vadd.f32 %v14482_v58, %v10330_v39  ;;  %v10263_v60 = vpop.f32.mrb[135].mxu1 }
 0x5ed   :  { %10391 = vst.msk [vmem:[#allocation4 + $0xa0] sm:$0xff] %vm1808_vm2, %v10359_v5  ;;  %v10360_v57 = vadd.f32 %v10328_v32, %v10263_v60 }
 0x5ee   :  { %10394 = vst.msk [vmem:[#allocation4 + $0xb8] sm:$0xff] %vm1808_vm2, %v10362_v14 }
 0x5ef   :  { %10392 = vst.msk [vmem:[#allocation4 + $0xa8] sm:$0xff] %vm1808_vm2, %v10360_v57  ;;  %v12463_v50 = vpop.permute.xlu0 %12462 }
 0x5f0   :  { %v12554_v48 = vmax.f32 %v20590_v45, %v12463_v50 }
 0x5f1   :  { %v12465_v24 = vpop.permute.xlu1 %12464 }
 0x5f2   :  { %v12555_v36 = vmax.f32 %v20595_v51, %v12465_v24 }
 0x5f3   :  { %v12467_v1 = vpop.permute.xlu0 %12466 }
 0x5f4   :  { %v12584_v19 = vmax.f32 %v12554_v48, %v12555_v36  ;;  %v12556_v31 = vmax.f32 %v20600_v38, %v12467_v1  ;;  %v12316_v36 = vld [vmem:[#allocation4 + $0xb0] sm:$0xff] }
 0x5f5   :  { %v12469_v7 = vpop.permute.xlu1 %12468 }
 0x5f6   :  { %v12607_v27 = vadd.f32 %v20673_v41, %v12584_v19  ;;  %v12557_v37 = vmax.f32 %v20605_v11, %v12469_v7  ;;  %v12314_v19 = vld [vmem:[#allocation4 + $0xa0] sm:$0xff] }
 0x5f8   :  { %v12623_v44 = vmax.f32 %v12607_v27, 0.0  ;;  %v12585_v63 = vmax.f32 %v12556_v31, %v12557_v37  ;;  %v12317_v31 = vld [vmem:[#allocation4 + $0xb8] sm:$0xff] }
 0x5fa   :  { %v12639_v25 = vpack.c.bf16 %v12623_v44, %v12623_v44  ;;  %v12608_v43 = vadd.f32 %v20673_v41, %v12585_v63  ;;  %v12315_v63 = vld [vmem:[#allocation4 + $0xa8] sm:$0xff] }
 0x5fc   :  { %12655 = vst.msk [vmem:[%s20890_s5 + $0x8] sm:$0xf] %vm6350_vm3, %v12639_v25  ;;  %v12624_v45 = vmax.f32 %v12608_v43, 0.0 }
 0x5fe   :  { %v12640_v51 = vpack.c.bf16 %v12624_v45, %v12624_v45 }
 0x600   :  { %12656 = vst.msk [vmem:[%s20890_s5 + $0xc] sm:$0xf] %vm6350_vm3, %v12640_v51 }
 0x601   :  { %v14517_v38 = vpop.f32.mrb[128].mxu0 }
 0x602   :  { %v12344_v11 = vadd.f32 %v14517_v38, %v12312_v2  ;;  %v12231_v22 = vpop.f32.mrb[129].mxu0 }
 0x603   :  { %v12342_v28 = vadd.f32 %v12310_v16, %v12231_v22  ;;  %v14518_v21 = vpop.f32.mrb[130].mxu0 }
 0x604   :  { %12376 = vst.msk [vmem:[#allocation4 + $0x90] sm:$0xff] %vm1808_vm2, %v12344_v11  ;;  %v12345_v3 = vadd.f32 %v14518_v21, %v12313_v17  ;;  %v12234_v35 = vpop.f32.mrb[131].mxu0  ;;  %v10337_v11 = vld [vmem:[#allocation4 + $0xf0] sm:$0xff] }
 0x605   :  { %12374 = vst.msk [vmem:[#allocation4 + $0x80] sm:$0xff] %vm1808_vm2, %v12342_v28  ;;  %v12343_v20 = vadd.f32 %v12311_v15, %v12234_v35  ;;  %v10335_v28 = vld [vmem:[#allocation4 + $0xe0] sm:$0xff] }
 0x606   :  { %12377 = vst.msk [vmem:[#allocation4 + $0x98] sm:$0xff] %vm1808_vm2, %v12345_v3  ;;  %v10338_v3 = vld [vmem:[#allocation4 + $0xf8] sm:$0xff] }
 0x607   :  { %12375 = vst.msk [vmem:[#allocation4 + $0x88] sm:$0xff] %vm1808_vm2, %v12343_v20  ;;  %v10336_v20 = vld [vmem:[#allocation4 + $0xe8] sm:$0xff] }
 0x60b   :  { %v20737_v53 = vld [vmem:[#allocation4 + $0x90] sm:$0xff] }
 0x60c   :  { %v20729_v9 = vld [vmem:[#allocation4 + $0x80] sm:$0xff] }
 0x60d   :  { %12486 = vrot.lane.b32.xlu0 %v20729_v9, %s15189_s0  ;;  %v20741_v0 = vld [vmem:[#allocation4 + $0x98] sm:$0xff] }
 0x60e   :  { %v20733_v10 = vld [vmem:[#allocation4 + $0x88] sm:$0xff] }
 0x60f   :  { %12488 = vrot.lane.b32.xlu1 %v20733_v10, %s15189_s0 }
 0x611   :  { %12490 = vrot.lane.b32.xlu0 %v20737_v53, %s15189_s0 }
 0x613   :  { %12492 = vrot.lane.b32.xlu1 %v20741_v0, %s15189_s0 }
 0x619   :  { %v14485_v4 = vpop.f32.mrb[136].mxu1 }
 0x61a   :  { %v10365_v26 = vadd.f32 %v14485_v4, %v10333_v40  ;;  %v10276_v52 = vpop.f32.mrb[137].mxu1 }
 0x61b   :  { %v10363_v33 = vadd.f32 %v10331_v12, %v10276_v52  ;;  %v14486_v13 = vpop.f32.mrb[138].mxu1 }
 0x61c   :  { %10397 = vst.msk [vmem:[#allocation4 + $0xd0] sm:$0xff] %vm1808_vm2, %v10365_v26  ;;  %v10366_v23 = vadd.f32 %v14486_v13, %v10334_v61  ;;  %v10279_v54 = vpop.f32.mrb[139].mxu1 }
 0x61d   :  { %10395 = vst.msk [vmem:[#allocation4 + $0xc0] sm:$0xff] %vm1808_vm2, %v10363_v33  ;;  %v10364_v34 = vadd.f32 %v10332_v49, %v10279_v54 }
 0x61e   :  { %10398 = vst.msk [vmem:[#allocation4 + $0xd8] sm:$0xff] %vm1808_vm2, %v10366_v23 }
 0x61f   :  { %10396 = vst.msk [vmem:[#allocation4 + $0xc8] sm:$0xff] %vm1808_vm2, %v10364_v34  ;;  %v12471_v29 = vpop.permute.xlu0 %12470 }
 0x620   :  { %v12558_v8 = vmax.f32 %v20648_v42, %v12471_v29 }
 0x621   :  { %v12473_v62 = vpop.permute.xlu1 %12472 }
 0x622   :  { %v12559_v56 = vmax.f32 %v20652_v59, %v12473_v62 }
 0x623   :  { %v12475_v5 = vpop.permute.xlu0 %12474 }
 0x624   :  { %v12586_v58 = vmax.f32 %v12558_v8, %v12559_v56  ;;  %v12560_v60 = vmax.f32 %v20656_v55, %v12475_v5  ;;  %v12320_v56 = vld [vmem:[#allocation4 + $0xd0] sm:$0xff] }
 0x625   :  { %v12477_v39 = vpop.permute.xlu1 %12476 }
 0x626   :  { %v12609_v14 = vadd.f32 %v20673_v41, %v12586_v58  ;;  %v12561_v32 = vmax.f32 %v20660_v6, %v12477_v39  ;;  %v12318_v58 = vld [vmem:[#allocation4 + $0xc0] sm:$0xff] }
 0x628   :  { %v12625_v57 = vmax.f32 %v12609_v14, 0.0  ;;  %v12587_v50 = vmax.f32 %v12560_v60, %v12561_v32  ;;  %v12321_v60 = vld [vmem:[#allocation4 + $0xd8] sm:$0xff] }
 0x62a   :  { %v12641_v24 = vpack.c.bf16 %v12625_v57, %v12625_v57  ;;  %v12610_v48 = vadd.f32 %v20673_v41, %v12587_v50  ;;  %v12319_v50 = vld [vmem:[#allocation4 + $0xc8] sm:$0xff] }
 0x62c   :  { %12657 = vst.msk [vmem:[%s20890_s5 + $0x10] sm:$0xf] %vm6350_vm3, %v12641_v24  ;;  %v12626_v42 = vmax.f32 %v12610_v48, 0.0 }
 0x62e   :  { %v12642_v59 = vpack.c.bf16 %v12626_v42, %v12626_v42 }
 0x630   :  { %12658 = vst.msk [vmem:[%s20890_s5 + $0x14] sm:$0xf] %vm6350_vm3, %v12642_v59 }
 0x631   :  { %v14521_v55 = vpop.f32.mrb[132].mxu0 }
 0x632   :  { %v12348_v6 = vadd.f32 %v14521_v55, %v12316_v36  ;;  %v12247_v1 = vpop.f32.mrb[133].mxu0 }
 0x633   :  { %v12346_v7 = vadd.f32 %v12314_v19, %v12247_v1  ;;  %v14522_v27 = vpop.f32.mrb[134].mxu0 }
 0x634   :  { %12380 = vst.msk [vmem:[#allocation4 + $0xb0] sm:$0xff] %vm1808_vm2, %v12348_v6  ;;  %v12349_v37 = vadd.f32 %v14522_v27, %v12317_v31  ;;  %v12250_v44 = vpop.f32.mrb[135].mxu0 }
 0x635   :  { %12378 = vst.msk [vmem:[#allocation4 + $0xa0] sm:$0xff] %vm1808_vm2, %v12346_v7  ;;  %v12347_v25 = vadd.f32 %v12315_v63, %v12250_v44 }
 0x636   :  { %12381 = vst.msk [vmem:[#allocation4 + $0xb8] sm:$0xff] %vm1808_vm2, %v12349_v37 }
 0x637   :  { %12379 = vst.msk [vmem:[#allocation4 + $0xa8] sm:$0xff] %vm1808_vm2, %v12347_v25 }
 0x63b   :  { %v20775_v51 = vld [vmem:[#allocation4 + $0xb0] sm:$0xff] }
 0x63c   :  { %v20767_v43 = vld [vmem:[#allocation4 + $0xa0] sm:$0xff] }
 0x63d   :  { %12494 = vrot.lane.b32.xlu0 %v20767_v43, %s15189_s0  ;;  %v20779_v38 = vld [vmem:[#allocation4 + $0xb8] sm:$0xff] }
 0x63e   :  { %v20771_v45 = vld [vmem:[#allocation4 + $0xa8] sm:$0xff] }
 0x63f   :  { %12496 = vrot.lane.b32.xlu1 %v20771_v45, %s15189_s0 }
 0x641   :  { %12498 = vrot.lane.b32.xlu0 %v20775_v51, %s15189_s0 }
 0x643   :  { %12500 = vrot.lane.b32.xlu1 %v20779_v38, %s15189_s0 }
 0x649   :  { %v14489_v2 = vpop.f32.mrb[140].mxu1 }
 0x64a   :  { %v10369_v22 = vadd.f32 %v14489_v2, %v10337_v11  ;;  %v10292_v16 = vpop.f32.mrb[141].mxu1 }
 0x64b   :  { %v10367_v21 = vadd.f32 %v10335_v28, %v10292_v16  ;;  %v14490_v17 = vpop.f32.mrb[142].mxu1 }
 0x64c   :  { %10401 = vst.msk [vmem:[#allocation4 + $0xf0] sm:$0xff] %vm1808_vm2, %v10369_v22  ;;  %v10370_v35 = vadd.f32 %v14490_v17, %v10338_v3  ;;  %v10295_v15 = vpop.f32.mrb[143].mxu1 }
 0x64d   :  { %10399 = vst.msk [vmem:[#allocation4 + $0xe0] sm:$0xff] %vm1808_vm2, %v10367_v21  ;;  %v10368_v4 = vadd.f32 %v10336_v20, %v10295_v15 }
 0x64e   :  { %10402 = vst.msk [vmem:[#allocation4 + $0xf8] sm:$0xff] %vm1808_vm2, %v10370_v35 }
 0x64f   :  { %10400 = vst.msk [vmem:[#allocation4 + $0xe8] sm:$0xff] %vm1808_vm2, %v10368_v4  ;;  %v12479_v40 = vpop.permute.xlu0 %12478 }
 0x650   :  { %v12562_v52 = vmax.f32 %v20691_v46, %v12479_v40 }
 0x651   :  { %v12481_v26 = vpop.permute.xlu1 %12480 }
 0x652   :  { %v12563_v12 = vmax.f32 %v20695_v18, %v12481_v26 }
 0x653   :  { %v12483_v33 = vpop.permute.xlu0 %12482  ;;  %v12324_v6 = vld [vmem:[#allocation4 + $0xf0] sm:$0xff] }
 0x654   :  { %v12588_v13 = vmax.f32 %v12562_v52, %v12563_v12  ;;  %v12564_v54 = vmax.f32 %v20699_v47, %v12483_v33  ;;  %v12322_v7 = vld [vmem:[#allocation4 + $0xe0] sm:$0xff] }
 0x655   :  { %v12485_v61 = vpop.permute.xlu1 %12484  ;;  %v12325_v37 = vld [vmem:[#allocation4 + $0xf8] sm:$0xff] }
 0x656   :  { %v12611_v23 = vadd.f32 %v20673_v41, %v12588_v13  ;;  %v12565_v49 = vmax.f32 %v20703_v30, %v12485_v61  ;;  %v12323_v25 = vld [vmem:[#allocation4 + $0xe8] sm:$0xff] }
 0x658   :  { %v12627_v34 = vmax.f32 %v12611_v23, 0.0  ;;  %v12589_v29 = vmax.f32 %v12564_v54, %v12565_v49 }
 0x65a   :  { %v12643_v62 = vpack.c.bf16 %v12627_v34, %v12627_v34  ;;  %v12612_v8 = vadd.f32 %v20673_v41, %v12589_v29 }
 0x65c   :  { %12659 = vst.msk [vmem:[%s20890_s5 + $0x18] sm:$0xf] %vm6350_vm3, %v12643_v62  ;;  %v12628_v46 = vmax.f32 %v12612_v8, 0.0 }
 0x65e   :  { %v12644_v18 = vpack.c.bf16 %v12628_v46, %v12628_v46 }
 0x660   :  { %12660 = vst.msk [vmem:[%s20890_s5 + $0x1c] sm:$0xf] %vm6350_vm3, %v12644_v18 }
 0x661   :  { %v14525_v47 = vpop.f32.mrb[136].mxu0 }
 0x662   :  { %v12352_v30 = vadd.f32 %v14525_v47, %v12320_v56  ;;  %v12263_v5 = vpop.f32.mrb[137].mxu0 }
 0x663   :  { %v12350_v39 = vadd.f32 %v12318_v58, %v12263_v5  ;;  %v14526_v14 = vpop.f32.mrb[138].mxu0 }
 0x664   :  { %12384 = vst.msk [vmem:[#allocation4 + $0xd0] sm:$0xff] %vm1808_vm2, %v12352_v30  ;;  %v12353_v32 = vadd.f32 %v14526_v14, %v12321_v60  ;;  %v12266_v57 = vpop.f32.mrb[139].mxu0 }
 0x665   :  { %12382 = vst.msk [vmem:[#allocation4 + $0xc0] sm:$0xff] %vm1808_vm2, %v12350_v39  ;;  %v12351_v24 = vadd.f32 %v12319_v50, %v12266_v57 }
 0x666   :  { %12385 = vst.msk [vmem:[#allocation4 + $0xd8] sm:$0xff] %vm1808_vm2, %v12353_v32 }
 0x667   :  { %12383 = vst.msk [vmem:[#allocation4 + $0xc8] sm:$0xff] %vm1808_vm2, %v12351_v24 }
 0x66b   :  { %v20813_v59 = vld [vmem:[#allocation4 + $0xd0] sm:$0xff] }
 0x66c   :  { %v20805_v48 = vld [vmem:[#allocation4 + $0xc0] sm:$0xff] }
 0x66d   :  { %12502 = vrot.lane.b32.xlu0 %v20805_v48, %s15189_s0  ;;  %v20817_v55 = vld [vmem:[#allocation4 + $0xd8] sm:$0xff] }
 0x66e   :  { %v20809_v42 = vld [vmem:[#allocation4 + $0xc8] sm:$0xff] }
 0x66f   :  { %12504 = vrot.lane.b32.xlu1 %v20809_v42, %s15189_s0 }
 0x671   :  { %12506 = vrot.lane.b32.xlu0 %v20813_v59, %s15189_s0 }
 0x673   :  { %12508 = vrot.lane.b32.xlu1 %v20817_v55, %s15189_s0 }
 0x679   :  { %v14529_v36 = vpop.f32.mrb[140].mxu0 }
 0x67a   :  { %v12356_v1 = vadd.f32 %v14529_v36, %v12324_v6  ;;  %v12279_v19 = vpop.f32.mrb[141].mxu0 }
 0x67b   :  { %v12354_v27 = vadd.f32 %v12322_v7, %v12279_v19  ;;  %v14530_v31 = vpop.f32.mrb[142].mxu0 }
 0x67c   :  { %12388 = vst.msk [vmem:[#allocation4 + $0xf0] sm:$0xff] %vm1808_vm2, %v12356_v1  ;;  %v12357_v44 = vadd.f32 %v14530_v31, %v12325_v37  ;;  %v12282_v63 = vpop.f32.mrb[143].mxu0 }
 0x67d   :  { %12386 = vst.msk [vmem:[#allocation4 + $0xe0] sm:$0xff] %vm1808_vm2, %v12354_v27  ;;  %v12355_v2 = vadd.f32 %v12323_v25, %v12282_v63 }
 0x67e   :  { %12389 = vst.msk [vmem:[#allocation4 + $0xf8] sm:$0xff] %vm1808_vm2, %v12357_v44 }
 0x67f   :  { %12387 = vst.msk [vmem:[#allocation4 + $0xe8] sm:$0xff] %vm1808_vm2, %v12355_v2  ;;  %v12487_v11 = vpop.permute.xlu0 %12486 }
 0x680   :  { %v12566_v16 = vmax.f32 %v20729_v9, %v12487_v11 }
 0x681   :  { %v12489_v22 = vpop.permute.xlu1 %12488 }
 0x682   :  { %v12567_v28 = vmax.f32 %v20733_v10, %v12489_v22 }
 0x683   :  { %v12491_v21 = vpop.permute.xlu0 %12490  ;;  %v12420_v9 = vld [vmem:[#allocation4 + $0xf0] sm:$0xff] }
 0x684   :  { %v20827_v17 = vld [vmem:[#allocation4 + $0xe0] sm:$0xff]  ;;  %v12590_v3 = vmax.f32 %v12566_v16, %v12567_v28  ;;  %v12568_v4 = vmax.f32 %v20737_v53, %v12491_v21 }
 0x685   :  { %12510 = vrot.lane.b32.xlu0 %v20827_v17, %s15189_s0  ;;  %v12493_v35 = vpop.permute.xlu1 %12492  ;;  %v12421_v52 = vld [vmem:[#allocation4 + $0xf8] sm:$0xff] }
 0x686   :  { %v12419_v15 = vld [vmem:[#allocation4 + $0xe8] sm:$0xff]  ;;  %v12613_v20 = vadd.f32 %v20673_v41, %v12590_v3  ;;  %v12569_v40 = vmax.f32 %v20741_v0, %v12493_v35 }
 0x687   :  { %12512 = vrot.lane.b32.xlu1 %v12419_v15, %s15189_s0 }
 0x688   :  { %v12629_v26 = vmax.f32 %v12613_v20, 0.0  ;;  %v12591_v10 = vmax.f32 %v12568_v4, %v12569_v40 }
 0x689   :  { %12514 = vrot.lane.b32.xlu0 %v12420_v9, %s15189_s0 }
 0x68a   :  { %v12645_v12 = vpack.c.bf16 %v12629_v26, %v12629_v26  ;;  %v12614_v33 = vadd.f32 %v20673_v41, %v12591_v10 }
 0x68b   :  { %12516 = vrot.lane.b32.xlu1 %v12421_v52, %s15189_s0 }
 0x68c   :  { %12661 = vst.msk [vmem:[%s20890_s5 + $0x20] sm:$0xf] %vm6350_vm3, %v12645_v12  ;;  %v12630_v53 = vmax.f32 %v12614_v33, 0.0 }
 0x68e   :  { %v12646_v0 = vpack.c.bf16 %v12630_v53, %v12630_v53 }
 0x690   :  { %12662 = vst.msk [vmem:[%s20890_s5 + $0x24] sm:$0xf] %vm6350_vm3, %v12646_v0 }
 0x6af   :  { %v12495_v13 = vpop.permute.xlu0 %12494 }
 0x6b0   :  { %v12570_v23 = vmax.f32 %v20767_v43, %v12495_v13 }
 0x6b1   :  { %v12497_v61 = vpop.permute.xlu1 %12496 }
 0x6b2   :  { %v12571_v54 = vmax.f32 %v20771_v45, %v12497_v61 }
 0x6b3   :  { %v12499_v49 = vpop.permute.xlu0 %12498 }
 0x6b4   :  { %v12592_v34 = vmax.f32 %v12570_v23, %v12571_v54  ;;  %v12572_v8 = vmax.f32 %v20775_v51, %v12499_v49 }
 0x6b5   :  { %v12501_v29 = vpop.permute.xlu1 %12500 }
 0x6b6   :  { %v12615_v62 = vadd.f32 %v20673_v41, %v12592_v34  ;;  %v12573_v46 = vmax.f32 %v20779_v38, %v12501_v29 }
 0x6b8   :  { %v12631_v18 = vmax.f32 %v12615_v62, 0.0  ;;  %v12593_v47 = vmax.f32 %v12572_v8, %v12573_v46 }
 0x6ba   :  { %v12647_v56 = vpack.c.bf16 %v12631_v18, %v12631_v18  ;;  %v12616_v30 = vadd.f32 %v20673_v41, %v12593_v47 }
 0x6bc   :  { %12663 = vst.msk [vmem:[%s20890_s5 + $0x28] sm:$0xf] %vm6350_vm3, %v12647_v56  ;;  %v12632_v43 = vmax.f32 %v12616_v30, 0.0 }
 0x6be   :  { %v12648_v45 = vpack.c.bf16 %v12632_v43, %v12632_v43 }
 0x6c0   :  { %12664 = vst.msk [vmem:[%s20890_s5 + $0x2c] sm:$0xf] %vm6350_vm3, %v12648_v45 }
 0x6df   :  { %v12503_v51 = vpop.permute.xlu0 %12502 }
 0x6e0   :  { %v12574_v38 = vmax.f32 %v20805_v48, %v12503_v51 }
 0x6e1   :  { %v12505_v5 = vpop.permute.xlu1 %12504 }
 0x6e2   :  { %v12575_v58 = vmax.f32 %v20809_v42, %v12505_v5 }
 0x6e3   :  { %v12507_v39 = vpop.permute.xlu0 %12506 }
 0x6e4   :  { %v12594_v14 = vmax.f32 %v12574_v38, %v12575_v58  ;;  %v12576_v57 = vmax.f32 %v20813_v59, %v12507_v39 }
 0x6e5   :  { %v12509_v60 = vpop.permute.xlu1 %12508 }
 0x6e6   :  { %v12617_v32 = vadd.f32 %v20673_v41, %v12594_v14  ;;  %v12577_v50 = vmax.f32 %v20817_v55, %v12509_v60 }
 0x6e8   :  { %v12633_v24 = vmax.f32 %v12617_v32, 0.0  ;;  %v12595_v36 = vmax.f32 %v12576_v57, %v12577_v50 }
 0x6ea   :  { %v12649_v6 = vpack.c.bf16 %v12633_v24, %v12633_v24  ;;  %v12618_v1 = vadd.f32 %v20673_v41, %v12595_v36 }
 0x6ec   :  { %12665 = vst.msk [vmem:[%s20890_s5 + $0x30] sm:$0xf] %vm6350_vm3, %v12649_v6  ;;  %v12634_v48 = vmax.f32 %v12618_v1, 0.0 }
 0x6ee   :  { %v12650_v42 = vpack.c.bf16 %v12634_v48, %v12634_v48 }
 0x6f0   :  { %12666 = vst.msk [vmem:[%s20890_s5 + $0x34] sm:$0xf] %vm6350_vm3, %v12650_v42 }
 0x6f7   :  { %v12511_v59 = vpop.permute.xlu0 %12510 }
 0x6f8   :  { %v12578_v55 = vmax.f32 %v20827_v17, %v12511_v59 }
 0x6f9   :  { %v12513_v19 = vpop.permute.xlu1 %12512 }
 0x6fa   :  { %v12579_v7 = vmax.f32 %v12419_v15, %v12513_v19 }
 0x6fb   :  { %v12515_v27 = vpop.permute.xlu0 %12514 }
 0x6fc   :  { %v12596_v31 = vmax.f32 %v12578_v55, %v12579_v7  ;;  %v12580_v63 = vmax.f32 %v12420_v9, %v12515_v27 }
 0x6fd   :  { %v12517_v37 = vpop.permute.xlu1 %12516 }
 0x6fe   :  { %v12619_v44 = vadd.f32 %v20673_v41, %v12596_v31  ;;  %v12581_v25 = vmax.f32 %v12421_v52, %v12517_v37 }
 0x700   :  { %v12635_v2 = vmax.f32 %v12619_v44, 0.0  ;;  %v12597_v11 = vmax.f32 %v12580_v63, %v12581_v25 }
 0x702   :  { %v12651_v22 = vpack.c.bf16 %v12635_v2, %v12635_v2  ;;  %v12620_v16 = vadd.f32 %v20673_v41, %v12597_v11 }
 0x704   :  { %12667 = vst.msk [vmem:[%s20890_s5 + $0x38] sm:$0xf] %vm6350_vm3, %v12651_v22  ;;  %v12636_v28 = vmax.f32 %v12620_v16, 0.0 }
 0x706   :  { %v12652_v21 = vpack.c.bf16 %v12636_v28, %v12636_v28 }
 0x708   :  { %12668 = vst.msk [vmem:[%s20890_s5 + $0x3c] sm:$0xf] %vm6350_vm3, %v12652_v21 }

</bundles_post_ra>
